<compile_context>
chip_gen: v7x
topology: tpu7x:2x2x1
jax: 0.10.0
libtpu: 0.0.40
codegen_flags: <defaults>
</compile_context>

<pallas_src>
import math

import numpy as np
import jax
import jax.numpy as jnp
from jax import lax
from jax.experimental import pallas as pl
from jax.experimental.pallas import tpu as pltpu

# ----------------------------- config (ddsp / preprocess) -----------------------------
HIDDEN = 32            # ddsp.hidden_size
NPART = 8              # ddsp.n_partial
FILTER = 8             # ddsp.filter_size
CONV_HIDDEN = 16       # ddsp.conv_hidden_size
CONV_OUT = 8           # ddsp.conv_out_size
KSIZE = 5              # ddsp.conv_kernel_size
STRIDES = (2, 2, 4)    # ddsp.strides
BLOCK = 16             # preprocess.block_size (= prod(strides))
SEQ = 8                # preprocess.sequence_size
SAMPLERATE = 16000.0   # preprocess.samplerate
LOG10 = math.log(10.0)

F2 = FILTER // 2 + 1   # 5
B2 = BLOCK // 2 + 1    # 9


def SDS(shape):
    return jax.ShapeDtypeStruct(shape, jnp.float32)


def _mod_sigmoid(v):
    # 2 * sigmoid(v) ** ln(10) + 1e-7  ==  2 * exp(ln(10) * log_sigmoid(v)) + 1e-7
    ls = jnp.where(v >= 0.0, -jnp.log1p(jnp.exp(-v)), v - jnp.log1p(jnp.exp(v)))
    return 2.0 * jnp.exp(LOG10 * ls) + 1e-7


# ----------------------------------- fused kernel --------------------------------------
def fused_kernel(
        # data
        x_ref, f0col_ref, locol_ref, f0bt_ref, eps_ref, noise_ref,
        # encoder (banded conv matrices, bf16) + biases
        a1, c1, a2, c2, a3, c3,
        # z extraction constants
        repz, rowmask, colsel,
        # parallel (z|f0|lo) MLPs (block-diagonal 96-wide)
        wz0, wf0, wlo, wp12, pb, pg, pe, mseg,
        # GRU (input projection hoisted) + batch<->time permutations
        wgx, bgx, wgh, bgh, pmat, pmatT,
        # fi MLP
        wfi, bfi, gfi, efi,
        # heads: [amp | alpha | filter | reverb]
        whd, bhd,
        # filtered-noise DFT matrices
        mre, mim, nre, nim,
        # synth constants
        umat, lcum, kcol, repp, summat, tmat,
        # outputs
        enc_ref, y_ref, ampup_ref, alphaup_ref, sre_ref, sim_ref,
        # scratch
        hs_ref):
    f32 = jnp.float32
    bf16 = jnp.bfloat16
    B, T = f0bt_ref.shape
    H = HIDDEN
    C = CONV_OUT
    P = NPART

    # ---- encoder: 3 strided Conv1d layers as banded bf16 matmuls (relu, relu, linear) ----
    xb = x_ref[...].astype(bf16)
    h1 = jnp.maximum(jnp.dot(xb, a1[...], preferred_element_type=f32) + c1[...], 0.0)
    h2 = jnp.maximum(jnp.dot(h1.astype(bf16), a2[...],
                             preferred_element_type=f32) + c2[...], 0.0)
    enc = jnp.dot(h2.astype(bf16), a3[...], preferred_element_type=f32) + c3[...]  # (B, T*2C)
    enc_ref[...] = enc

    # ---- reparameterization, rows in batch-major order b*T+t (no in-kernel reshape) ----
    rep = jnp.dot(repz[...], enc, preferred_element_type=f32)                      # (BT, T*2C)
    zz = jnp.dot(rep * rowmask[...], colsel[...], preferred_element_type=f32)      # (BT, 2C)
    z_mean = zz[:, :C]
    z_var = zz[:, C:]
    z = jnp.exp(z_var) * eps_ref[...] + z_mean                                     # (BT, C)

    # ---- three parallel MLPs as 96-wide block-diagonal layers, segmented LayerNorm ----
    mseg_v = mseg[...]

    def block_ln_relu(h, g, e):
        mu = jnp.dot(h, mseg_v, preferred_element_type=f32)          # per-32-block mean
        d = h - mu
        var = jnp.dot(d * d, mseg_v, preferred_element_type=f32)     # per-32-block var
        return jnp.maximum(d * lax.rsqrt(var + 1e-5) * g + e, 0.0)

    h = (jnp.dot(z, wz0[...], preferred_element_type=f32)
         + f0col_ref[...] * wf0[...] + locol_ref[...] * wlo[...] + pb[0])
    h = block_ln_relu(h, pg[0], pe[0])
    h = jnp.dot(h, wp12[0], preferred_element_type=f32) + pb[1]
    h = block_ln_relu(h, pg[1], pe[1])
    h = jnp.dot(h, wp12[1], preferred_element_type=f32) + pb[2]
    gru_in = block_ln_relu(h, pg[2], pe[2])                           # (BT, 96) = [z|f0|lo]

    # ---- GRU: input projection hoisted, time-major contiguous steps, VMEM hs scratch ----
    xp_bm = jnp.dot(gru_in, wgx[...], preferred_element_type=f32) + bgx[...]
    xp = jnp.dot(pmat[...], xp_bm, preferred_element_type=f32)        # rows t*B+b
    whh = wgh[...]
    bhh = bgh[...]
    # TODO(synk): on v6e the (32,96) whh could stay MXU-resident via pltpu.matmul_push_rhs.
    h_t = jnp.zeros((B, H), f32)
    for t in range(T):
        x_t = xp[t * B:(t + 1) * B, :]
        hp = jnp.dot(h_t, whh, preferred_element_type=f32) + bhh
        r = jax.nn.sigmoid(x_t[:, :H] + hp[:, :H])
        u = jax.nn.sigmoid(x_t[:, H:2 * H] + hp[:, H:2 * H])
        n = jnp.tanh(x_t[:, 2 * H:] + r * hp[:, 2 * H:])
        h_t = (1.0 - u) * n + u * h_t
        hs_ref[pl.ds(t * B, B), :] = h_t
    y2 = jnp.dot(pmatT[...], hs_ref[...], preferred_element_type=f32)  # back to batch-major

    # ---- fi MLP (3x Linear + LayerNorm + ReLU) ----
    for i in range(3):
        y2 = jnp.dot(y2, wfi[i], preferred_element_type=f32) + bfi[i]
        mu = jnp.mean(y2, axis=-1, keepdims=True)
        var = jnp.mean(jnp.square(y2 - mu), axis=-1, keepdims=True)
        y2 = jnp.maximum((y2 - mu) * lax.rsqrt(var + 1e-5) * gfi[i] + efi[i], 0.0)

    # ---- heads: one fused (32,16) matmul; cols = [amp | alpha(8) | filt(5) | rev(2)] ----
    hd = jnp.dot(y2, whd[...], preferred_element_type=f32) + bhd[...]  # (BT, 16)
    amp = _mod_sigmoid(hd[:, 0:1])
    alpha = _mod_sigmoid(hd[:, 1:1 + P])
    alpha = alpha / jnp.sum(alpha, axis=-1, keepdims=True)
    filt = _mod_sigmoid(hd[:, 1 + P:1 + P + F2])
    # reverb head columns (14:16) are dead for conv_pass=False (IR parameters are fixed).

    # ---- filtered-noise spectrum: irfft/Hann/rfft folded into real-DFT matmuls ----
    h_re = jnp.dot(filt, mre[...], preferred_element_type=f32)         # (BT, 9)
    h_im = jnp.dot(filt, mim[...], preferred_element_type=f32)
    s_re = jnp.dot(noise_ref[...], nre[...], preferred_element_type=f32)
    s_im = jnp.dot(noise_ref[...], nim[...], preferred_element_type=f32)
    sre_ref[...] = h_re * s_re - h_im * s_im
    sim_ref[...] = h_re * s_im + h_im * s_re

    # ---- upsample (matmul vs U), phase accumulation (prefix-sum matmul), harmonics ----
    umat_v = umat[...]
    dn = (((0,), (0,)), ((), ()))                                      # contract over rows
    f0_up = jnp.dot(f0bt_ref[...], umat_v,
                    preferred_element_type=f32) * (1.0 / SAMPLERATE)   # (B, N)
    phi = (2.0 * math.pi) * jnp.dot(f0_up, lcum[...], preferred_element_type=f32)

    amp_ups = []
    alpha_ups = []
    for b in range(B):
        amp_ups.append(lax.dot_general(amp[b * T:(b + 1) * T, :], umat_v, dn,
                                       preferred_element_type=f32))    # (1, N)
        alpha_ups.append(lax.dot_general(alpha[b * T:(b + 1) * T, :], umat_v, dn,
                                         preferred_element_type=f32))  # (P, N)
    amp_up = jnp.concatenate(amp_ups, axis=0)                          # (B, N)
    alpha_up = jnp.concatenate(alpha_ups, axis=0)                      # (B*P, N)

    f0_bp = jnp.dot(repp[...], f0_up, preferred_element_type=f32)      # (B*P, N)
    phi_bp = jnp.dot(repp[...], phi, preferred_element_type=f32)
    kv = kcol[...]                                                     # (B*P, 1)
    contrib = (kv * f0_bp < 0.5).astype(f32) * alpha_up * jnp.sin(kv * phi_bp)
    harm = jnp.dot(summat[...], contrib, preferred_element_type=f32)   # (B, N)
    y_dry = amp_up * harm
    # IR reverb (conv_pass=False): exact causal Toeplitz convolution with the fixed IR.
    y_ref[...] = jnp.dot(y_dry, tmat[...], preferred_element_type=f32)
    ampup_ref[...] = amp_up
    alphaup_ref[...] = alpha_up


# --------------------------------- parameter init --------------------------------------
def init_params(key):
    keys = iter(jax.random.split(key, 64))

    def nrm(shape, scale=0.2):
        return scale * jax.random.normal(next(keys), shape, jnp.float32)

    p = {}
    cins = [1, CONV_HIDDEN, CONV_HIDDEN]
    couts = [CONV_HIDDEN, CONV_HIDDEN, 2 * CONV_OUT]
    p['convs'] = [(nrm((co, ci, KSIZE)), jnp.zeros((co,), jnp.float32))
                  for ci, co in zip(cins, couts)]

    def mlp(in_size):
        sizes = [(in_size, HIDDEN), (HIDDEN, HIDDEN), (HIDDEN, HIDDEN)]
        return [(nrm((i, o)),
                 jnp.zeros((1, o), jnp.float32),
                 jnp.ones((1, o), jnp.float32),
                 jnp.zeros((1, o), jnp.float32)) for (i, o) in sizes]

    p['f0_mlp'] = mlp(1)
    p['lo_mlp'] = mlp(1)
    p['z_mlp'] = mlp(CONV_OUT)
    p['fi_mlp'] = mlp(HIDDEN)

    gin = 3 * HIDDEN
    p['gru'] = tuple(
        [nrm((gin, HIDDEN)) for _ in range(3)] +
        [nrm((HIDDEN, HIDDEN)) for _ in range(3)] +
        [jnp.zeros((1, HIDDEN), jnp.float32) for _ in range(6)])

    p['heads'] = (nrm((HIDDEN, 1)), jnp.zeros((1, 1), jnp.float32),
                  nrm((HIDDEN, NPART)), jnp.zeros((1, NPART), jnp.float32),
                  nrm((HIDDEN, F2)), jnp.zeros((1, F2), jnp.float32),
                  nrm((HIDDEN, 2)), jnp.zeros((1, 2), jnp.float32))

    size = SEQ * BLOCK
    imp = jax.random.uniform(next(keys), (1, size)) * 2.0 - 1.0
    p['reverb_impulse'] = imp.at[0, 0].set(0.0)
    p['reverb_identity'] = jnp.zeros((1, size), jnp.float32).at[0, 0].set(1.0)
    return p


# -------------------------- one-time fusion / precompute step ---------------------------
def precompute(params, batch_size):
    B = batch_size
    T, C, H, P = SEQ, CONV_OUT, HIDDEN, NPART
    N = SEQ * BLOCK
    BT, BP = B * T, B * P
    f32 = np.float32

    # ---- encoder: fold each strided Conv1d into a banded (Lin*Cin, Tout*Cout) matmul ----
    enc_args = []
    lin = SEQ * BLOCK
    for (W, bias), s in zip(params['convs'], STRIDES):
        W = np.asarray(W, f32)
        bias = np.asarray(bias, f32)
        cout, cin, ksz = W.shape
        pad = ksz // 2
        t_out = (lin + 2 * pad - ksz) // s + 1
        A = np.zeros((lin, cin, t_out, cout), f32)
        for k in range(ksz):
            for t in range(t_out):
                tau = t * s + k - pad
                if 0 <= tau < lin:
                    A[tau, :, t, :] += W[:, :, k].T
        enc_args.append(jnp.asarray(A.reshape(lin * cin, t_out * cout), jnp.bfloat16))
        enc_args.append(jnp.asarray(np.tile(bias, t_out).reshape(1, t_out * cout), f32))
        lin = t_out
    # TODO(synk): exploit the band structure directly (smaller weights, 64-128 LHS rows)
    # instead of densified banded matrices; bf16 cast is taken as the cheaper mitigation.

    # ---- z extraction constants (batch-major rows b*T+t) ----
    repz = np.zeros((BT, B), f32)
    repz[np.arange(BT), np.arange(BT) // T] = 1.0
    rowmask = np.zeros((BT, T * 2 * C), f32)
    for b in range(B):
        for t in range(T):
            rowmask[b * T + t, t * 2 * C:(t + 1) * 2 * C] = 1.0
    colsel = np.zeros((T * 2 * C, 2 * C), f32)
    colsel[np.arange(T * 2 * C), np.arange(T * 2 * C) % (2 * C)] = 1.0

    # ---- parallel (z | f0 | lo) MLPs as block-diagonal 96-wide layers ----
    mlps = [params['z_mlp'], params['f0_mlp'], params['lo_mlp']]

    def cat(li, idx):
        return np.concatenate([np.asarray(m[li][idx], f32) for m in mlps], axis=1)

    wz0 = np.zeros((C, 3 * H), f32)
    wz0[:, 0:H] = np.asarray(mlps[0][0][0], f32)
    wf0 = np.zeros((1, 3 * H), f32)
    wf0[:, H:2 * H] = np.asarray(mlps[1][0][0], f32)
    wlo = np.zeros((1, 3 * H), f32)
    wlo[:, 2 * H:3 * H] = np.asarray(mlps[2][0][0], f32)
    wp12 = np.zeros((2, 3 * H, 3 * H), f32)
    for li in (1, 2):
        for j, m in enumerate(mlps):
            wp12[li - 1, j * H:(j + 1) * H, j * H:(j + 1) * H] = np.asarray(m[li][0], f32)
    pb = np.stack([cat(li, 1) for li in range(3)])       # (3, 1, 96)
    pg = np.stack([cat(li, 2) for li in range(3)])
    pe = np.stack([cat(li, 3) for li in range(3)])
    mseg = np.zeros((3 * H, 3 * H), f32)
    for j in range(3):
        mseg[j * H:(j + 1) * H, j * H:(j + 1) * H] = 1.0 / H

    # ---- GRU gate weights concatenated ([r|z|n]) + batch<->time permutations ----
    wir, wiz, win_, whr, whz, whn, bir, biz, bin_, bhr, bhz, bhn = params['gru']
    wgx = np.concatenate([np.asarray(a, f32) for a in (wir, wiz, win_)], axis=1)
    bgx = np.concatenate([np.asarray(a, f32) for a in (bir, biz, bin_)], axis=1)
    wgh = np.concatenate([np.asarray(a, f32) for a in (whr, whz, whn)], axis=1)
    bgh = np.concatenate([np.asarray(a, f32) for a in (bhr, bhz, bhn)], axis=1)
    pmat = np.zeros((BT, BT), f32)
    for b in range(B):
        for t in range(T):
            pmat[t * B + b, b * T + t] = 1.0
    pmatT = pmat.T.copy()

    # ---- fi MLP stacked ----
    wfi = np.stack([np.asarray(l[0], f32) for l in params['fi_mlp']])
    bfi = np.stack([np.asarray(l[1], f32) for l in params['fi_mlp']])
    gfi = np.stack([np.asarray(l[2], f32) for l in params['fi_mlp']])
    efi = np.stack([np.asarray(l[3], f32) for l in params['fi_mlp']])

    # ---- heads concatenated: [amp | alpha | filter | reverb] ----
    wa, ba, wal, bal, wf, bf_, wr, br = params['heads']
    whd = np.concatenate([np.asarray(a, f32) for a in (wa, wal, wf, wr)], axis=1)
    bhd = np.concatenate([np.asarray(a, f32) for a in (ba, bal, bf_, br)], axis=1)

    # ---- filtered-noise DFT matrices: irfft(5->8, zero imag) * Hann, then rfft(16->9) ----
    m_i = np.arange(F2)
    n_i = np.arange(FILTER)
    w_m = np.where((m_i == 0) | (m_i == FILTER // 2), 1.0, 2.0)
    dirfft = (w_m[:, None] / FILTER) * np.cos(2 * np.pi * np.outer(m_i, n_i) / FILTER)
    window = np.roll(0.5 - 0.5 * np.cos(2 * np.pi * np.arange(FILTER) / FILTER), FILTER // 2)
    dw = dirfft * window[None, :]
    m_o = np.arange(B2)
    cr = np.cos(2 * np.pi * np.outer(n_i, m_o) / BLOCK)
    ci = -np.sin(2 * np.pi * np.outer(n_i, m_o) / BLOCK)
    mre = (dw @ cr).astype(f32)                                        # (5, 9)
    mim = (dw @ ci).astype(f32)
    n_b = np.arange(BLOCK)
    nre = np.cos(2 * np.pi * np.outer(n_b, m_o) / BLOCK).astype(f32)   # (16, 9)
    nim = (-np.sin(2 * np.pi * np.outer(n_b, m_o) / BLOCK)).astype(f32)

    # ---- linear upsample (align_corners=False), phase prefix-sum, harmonic helpers ----
    pos = np.clip((np.arange(N) + 0.5) / BLOCK - 0.5, 0.0, SEQ - 1)
    lo_i = np.floor(pos).astype(np.int64)
    hi_i = np.minimum(lo_i + 1, SEQ - 1)
    w = (pos - lo_i).astype(f32)
    umat = np.zeros((SEQ, N), f32)
    umat[lo_i, np.arange(N)] += (1.0 - w)
    umat[hi_i, np.arange(N)] += w
    jj = np.arange(N)[:, None]
    nn2 = np.arange(N)[None, :]
    lcum = ((jj >= 1) & (jj <= nn2)).astype(f32)       # phi[0]=0, matches torch loop
    kcol = np.tile(np.arange(1, P + 1, dtype=f32), B).reshape(BP, 1)
    repp = np.zeros((BP, B), f32)
    repp[np.arange(BP), np.arange(BP) // P] = 1.0
    summat = repp.T.copy()

    # ---- reverb as causal Toeplitz convolution (conv_pass=False: wetdry=2, decay=4) ----
    wetdry, decay = 2.0, 4.0
    dcy = np.exp(-(np.exp(decay) + 2.0) * np.linspace(0.0, 1.0, N))
    sig = lambda v: 1.0 / (1.0 + np.exp(-v))
    impulse = (sig(wetdry) * np.asarray(params['reverb_identity'], f32)[0]
               + sig(1.0 - wetdry) * np.asarray(params['reverb_impulse'], f32)[0] * dcy)
    tmat = np.zeros((N, N), f32)
    for m in range(N):
        tmat[m, m:] = impulse[:N - m]

    consts = enc_args + [
        repz, rowmask, colsel,
        wz0, wf0, wlo, wp12, pb, pg, pe, mseg,
        wgx, bgx, wgh, bgh, pmat, pmatT,
        wfi, bfi, gfi, efi,
        whd, bhd,
        mre, mim, nre, nim,
        umat, lcum, kcol, repp, summat, tmat,
    ]
    return {'consts': tuple(jnp.asarray(c) for c in consts)}


# ------------------------------------ forward ------------------------------------------
def neural_synth_forward(pre, x, f0, lo, rng):
    assert f0.ndim == 3 and lo.ndim == 3
    B, T = f0.shape[0], f0.shape[1]
    assert T == SEQ
    BT = B * T
    N = T * BLOCK
    k_z, k_noise = jax.random.split(rng, 2)
    eps = jax.random.normal(k_z, (BT, CONV_OUT), jnp.float32)
    noise = (jax.random.uniform(k_noise, (BT, BLOCK)) * 2.0 - 1.0) / 100.0

    x2d = x.reshape(B, SEQ * BLOCK)
    f0col = f0.reshape(BT, 1)
    locol = lo.reshape(BT, 1)
    f0bt = f0.reshape(B, T)

    consts = pre['consts']
    vmem = pl.BlockSpec(memory_space=pltpu.MemorySpace.VMEM)
    n_in = 6 + len(consts)
    # TODO(synk): on v7x a grid=(B,) with "parallel" semantics would use both TensorCores.
    enc, y, amp_up, alpha_up, s_re, s_im = pl.pallas_call(
        fused_kernel,
        out_shape=(SDS((B, T * 2 * CONV_OUT)), SDS((B, N)), SDS((B, N)),
                   SDS((B * NPART, N)), SDS((BT, B2)), SDS((BT, B2))),
        in_specs=[vmem] * n_in,
        out_specs=(vmem,) * 6,
        scratch_shapes=[pltpu.VMEM((BT, HIDDEN), jnp.float32)],
    )(x2d, f0col, locol, f0bt, eps, noise, *consts)

    enc3 = enc.reshape(B, T, 2 * CONV_OUT)
    z_mean, z_var = enc3[..., :CONV_OUT], enc3[..., CONV_OUT:]
    alpha_out = jnp.transpose(alpha_up.reshape(B, NPART, N), (0, 2, 1))   # (B, N, P)
    s_filt = jnp.stack([s_re, s_im], axis=-1).reshape(B, T, B2, 2)
    return (z_mean, z_var), y, amp_up, alpha_out, s_filt


# -------------------------------------- main --------------------------------------------
if __name__ == "__main__":
    key = jax.random.PRNGKey(0)
    kx, kf, kl, krun = jax.random.split(key, 4)
    B = 2
    x = jax.random.normal(kx, (B, 1, SEQ * BLOCK), jnp.float32)          # raw audio (NCW)
    f0 = jax.random.uniform(kf, (B, SEQ, 1), minval=50.0, maxval=500.0)  # pitch (Hz)
    lo = jax.random.uniform(kl, (B, SEQ, 1), minval=-6.0, maxval=0.0)    # loudness

    params = init_params(jax.random.PRNGKey(42))
    pre = precompute(params, batch_size=B)                # one-time weight fusion

    fwd = jax.jit(neural_synth_forward)
    outs = fwd(pre, x, f0, lo, krun)
    jax.block_until_ready(outs)

    # TODO(synk): multiScaleFFT (STFT loss helper) is not part of forward() and is omitted.
    print("KERNEL_OK")
</pallas_src>

<mosaic_0001>
module attributes {stable_mosaic.version = 11 : i64} {
  func.func @fused_kernel(%arg0: memref<2x128xf32, #tpu.memory_space<vmem>>, %arg1: memref<16x1xf32, #tpu.memory_space<vmem>>, %arg2: memref<16x1xf32, #tpu.memory_space<vmem>>, %arg3: memref<2x8xf32, #tpu.memory_space<vmem>>, %arg4: memref<16x8xf32, #tpu.memory_space<vmem>>, %arg5: memref<16x16xf32, #tpu.memory_space<vmem>>, %arg6: memref<128x1024xbf16, #tpu.memory_space<vmem>>, %arg7: memref<1x1024xf32, #tpu.memory_space<vmem>>, %arg8: memref<1024x512xbf16, #tpu.memory_space<vmem>>, %arg9: memref<1x512xf32, #tpu.memory_space<vmem>>, %arg10: memref<512x128xbf16, #tpu.memory_space<vmem>>, %arg11: memref<1x128xf32, #tpu.memory_space<vmem>>, %arg12: memref<16x2xf32, #tpu.memory_space<vmem>>, %arg13: memref<16x128xf32, #tpu.memory_space<vmem>>, %arg14: memref<128x16xf32, #tpu.memory_space<vmem>>, %arg15: memref<8x96xf32, #tpu.memory_space<vmem>>, %arg16: memref<1x96xf32, #tpu.memory_space<vmem>>, %arg17: memref<1x96xf32, #tpu.memory_space<vmem>>, %arg18: memref<2x96x96xf32, #tpu.memory_space<vmem>>, %arg19: memref<3x1x96xf32, #tpu.memory_space<vmem>>, %arg20: memref<3x1x96xf32, #tpu.memory_space<vmem>>, %arg21: memref<3x1x96xf32, #tpu.memory_space<vmem>>, %arg22: memref<96x96xf32, #tpu.memory_space<vmem>>, %arg23: memref<96x96xf32, #tpu.memory_space<vmem>>, %arg24: memref<1x96xf32, #tpu.memory_space<vmem>>, %arg25: memref<32x96xf32, #tpu.memory_space<vmem>>, %arg26: memref<1x96xf32, #tpu.memory_space<vmem>>, %arg27: memref<16x16xf32, #tpu.memory_space<vmem>>, %arg28: memref<16x16xf32, #tpu.memory_space<vmem>>, %arg29: memref<3x32x32xf32, #tpu.memory_space<vmem>>, %arg30: memref<3x1x32xf32, #tpu.memory_space<vmem>>, %arg31: memref<3x1x32xf32, #tpu.memory_space<vmem>>, %arg32: memref<3x1x32xf32, #tpu.memory_space<vmem>>, %arg33: memref<32x16xf32, #tpu.memory_space<vmem>>, %arg34: memref<1x16xf32, #tpu.memory_space<vmem>>, %arg35: memref<5x9xf32, #tpu.memory_space<vmem>>, %arg36: memref<5x9xf32, #tpu.memory_space<vmem>>, %arg37: memref<16x9xf32, #tpu.memory_space<vmem>>, %arg38: memref<16x9xf32, #tpu.memory_space<vmem>>, %arg39: memref<8x128xf32, #tpu.memory_space<vmem>>, %arg40: memref<128x128xf32, #tpu.memory_space<vmem>>, %arg41: memref<16x1xf32, #tpu.memory_space<vmem>>, %arg42: memref<16x2xf32, #tpu.memory_space<vmem>>, %arg43: memref<2x16xf32, #tpu.memory_space<vmem>>, %arg44: memref<128x128xf32, #tpu.memory_space<vmem>>, %arg45: memref<2x128xf32, #tpu.memory_space<vmem>>, %arg46: memref<2x128xf32, #tpu.memory_space<vmem>>, %arg47: memref<2x128xf32, #tpu.memory_space<vmem>>, %arg48: memref<16x128xf32, #tpu.memory_space<vmem>>, %arg49: memref<16x9xf32, #tpu.memory_space<vmem>>, %arg50: memref<16x9xf32, #tpu.memory_space<vmem>>, %arg51: memref<16x32xf32, #tpu.memory_space<vmem>>) attributes {dimension_semantics = [], scalar_prefetch = 0 : i64, scratch_operands = 1 : i64, tpu.core_type = #tpu.core_type<tc>} {
    %c0 = arith.constant 0 : index
    %c0_0 = arith.constant 0 : index
    %0 = vector.load %arg0[%c0, %c0_0] : memref<2x128xf32, #tpu.memory_space<vmem>>, vector<2x128xf32>
    %1 = arith.truncf %0 : vector<2x128xf32> to vector<2x128xbf16>
    %c0_1 = arith.constant 0 : index
    %c0_2 = arith.constant 0 : index
    %2 = vector.load %arg6[%c0_1, %c0_2] : memref<128x1024xbf16, #tpu.memory_space<vmem>>, vector<128x1024xbf16>
    %cst = arith.constant dense<0.000000e+00> : vector<2x1024xf32>
    %3 = tpu.matmul %1, %2, %cst {dimension_numbers = #tpu.dot_dimension_numbers<[1], [0], [0], [1], [0, 0, 1, 1], [], []>} : vector<2x128xbf16>, vector<128x1024xbf16>, vector<2x1024xf32> -> vector<2x1024xf32>
    %c0_3 = arith.constant 0 : index
    %c0_4 = arith.constant 0 : index
    %4 = vector.load %arg7[%c0_3, %c0_4] : memref<1x1024xf32, #tpu.memory_space<vmem>>, vector<1x1024xf32>
    %5 = vector.broadcast %4 : vector<1x1024xf32> to vector<2x1024xf32>
    %6 = arith.addf %3, %5 : vector<2x1024xf32>
    %cst_5 = arith.constant 0.000000e+00 : f32
    %7 = vector.broadcast %cst_5 : f32 to vector<2x1024xf32>
    %8 = arith.maximumf %6, %7 : vector<2x1024xf32>
    %9 = arith.truncf %8 : vector<2x1024xf32> to vector<2x1024xbf16>
    %c0_6 = arith.constant 0 : index
    %c0_7 = arith.constant 0 : index
    %10 = vector.load %arg8[%c0_6, %c0_7] : memref<1024x512xbf16, #tpu.memory_space<vmem>>, vector<1024x512xbf16>
    %cst_8 = arith.constant dense<0.000000e+00> : vector<2x512xf32>
    %11 = tpu.matmul %9, %10, %cst_8 {dimension_numbers = #tpu.dot_dimension_numbers<[1], [0], [0], [1], [0, 0, 1, 1], [], []>} : vector<2x1024xbf16>, vector<1024x512xbf16>, vector<2x512xf32> -> vector<2x512xf32>
    %c0_9 = arith.constant 0 : index
    %c0_10 = arith.constant 0 : index
    %12 = vector.load %arg9[%c0_9, %c0_10] : memref<1x512xf32, #tpu.memory_space<vmem>>, vector<1x512xf32>
    %13 = vector.broadcast %12 : vector<1x512xf32> to vector<2x512xf32>
    %14 = arith.addf %11, %13 : vector<2x512xf32>
    %cst_11 = arith.constant 0.000000e+00 : f32
    %15 = vector.broadcast %cst_11 : f32 to vector<2x512xf32>
    %16 = arith.maximumf %14, %15 : vector<2x512xf32>
    %17 = arith.truncf %16 : vector<2x512xf32> to vector<2x512xbf16>
    %c0_12 = arith.constant 0 : index
    %c0_13 = arith.constant 0 : index
    %18 = vector.load %arg10[%c0_12, %c0_13] : memref<512x128xbf16, #tpu.memory_space<vmem>>, vector<512x128xbf16>
    %cst_14 = arith.constant dense<0.000000e+00> : vector<2x128xf32>
    %19 = tpu.matmul %17, %18, %cst_14 {dimension_numbers = #tpu.dot_dimension_numbers<[1], [0], [0], [1], [0, 0, 1, 1], [], []>} : vector<2x512xbf16>, vector<512x128xbf16>, vector<2x128xf32> -> vector<2x128xf32>
    %c0_15 = arith.constant 0 : index
    %c0_16 = arith.constant 0 : index
    %20 = vector.load %arg11[%c0_15, %c0_16] : memref<1x128xf32, #tpu.memory_space<vmem>>, vector<1x128xf32>
    %21 = vector.broadcast %20 : vector<1x128xf32> to vector<2x128xf32>
    %22 = arith.addf %19, %21 : vector<2x128xf32>
    %c0_17 = arith.constant 0 : index
    %c0_18 = arith.constant 0 : index
    %23 = vector.load %arg45[%c0_17, %c0_18] : memref<2x128xf32, #tpu.memory_space<vmem>>, vector<2x128xf32>
    tpu.vector_store %arg45[%c0_17, %c0_18], %22 {strides = array<i32>} : memref<2x128xf32, #tpu.memory_space<vmem>>, vector<2x128xf32>,
    %c0_19 = arith.constant 0 : index
    %c0_20 = arith.constant 0 : index
    %24 = vector.load %arg12[%c0_19, %c0_20] : memref<16x2xf32, #tpu.memory_space<vmem>>, vector<16x2xf32>
    %cst_21 = arith.constant dense<0.000000e+00> : vector<16x128xf32>
    %25 = tpu.matmul %24, %22, %cst_21 {dimension_numbers = #tpu.dot_dimension_numbers<[1], [0], [0], [1], [0, 0, 1, 1], [], []>} : vector<16x2xf32>, vector<2x128xf32>, vector<16x128xf32> -> vector<16x128xf32>
    %c0_22 = arith.constant 0 : index
    %c0_23 = arith.constant 0 : index
    %26 = vector.load %arg13[%c0_22, %c0_23] : memref<16x128xf32, #tpu.memory_space<vmem>>, vector<16x128xf32>
    %27 = arith.mulf %25, %26 : vector<16x128xf32>
    %c0_24 = arith.constant 0 : index
    %c0_25 = arith.constant 0 : index
    %28 = vector.load %arg14[%c0_24, %c0_25] : memref<128x16xf32, #tpu.memory_space<vmem>>, vector<128x16xf32>
    %cst_26 = arith.constant dense<0.000000e+00> : vector<16x16xf32>
    %29 = tpu.matmul %27, %28, %cst_26 {dimension_numbers = #tpu.dot_dimension_numbers<[1], [0], [0], [1], [0, 0, 1, 1], [], []>} : vector<16x128xf32>, vector<128x16xf32>, vector<16x16xf32> -> vector<16x16xf32>
    %30 = vector.extract_strided_slice %29 {offsets = [0, 0], sizes = [16, 8], strides = [1, 1]} : vector<16x16xf32> to vector<16x8xf32>
    %31 = vector.extract_strided_slice %29 {offsets = [0, 8], sizes = [16, 8], strides = [1, 1]} : vector<16x16xf32> to vector<16x8xf32>
    %32 = math.exp %31 : vector<16x8xf32>
    %c0_27 = arith.constant 0 : index
    %c0_28 = arith.constant 0 : index
    %33 = vector.load %arg4[%c0_27, %c0_28] : memref<16x8xf32, #tpu.memory_space<vmem>>, vector<16x8xf32>
    %34 = arith.mulf %32, %33 : vector<16x8xf32>
    %35 = arith.addf %34, %30 : vector<16x8xf32>
    %c0_29 = arith.constant 0 : index
    %c0_30 = arith.constant 0 : index
    %36 = vector.load %arg22[%c0_29, %c0_30] : memref<96x96xf32, #tpu.memory_space<vmem>>, vector<96x96xf32>
    %c0_31 = arith.constant 0 : index
    %c0_32 = arith.constant 0 : index
    %37 = vector.load %arg15[%c0_31, %c0_32] : memref<8x96xf32, #tpu.memory_space<vmem>>, vector<8x96xf32>
    %cst_33 = arith.constant dense<0.000000e+00> : vector<16x96xf32>
    %38 = tpu.matmul %35, %37, %cst_33 {dimension_numbers = #tpu.dot_dimension_numbers<[1], [0], [0], [1], [0, 0, 1, 1], [], []>} : vector<16x8xf32>, vector<8x96xf32>, vector<16x96xf32> -> vector<16x96xf32>
    %c0_34 = arith.constant 0 : index
    %c0_35 = arith.constant 0 : index
    %39 = vector.load %arg1[%c0_34, %c0_35] : memref<16x1xf32, #tpu.memory_space<vmem>>, vector<16x1xf32>
    %c0_36 = arith.constant 0 : index
    %c0_37 = arith.constant 0 : index
    %40 = vector.load %arg16[%c0_36, %c0_37] : memref<1x96xf32, #tpu.memory_space<vmem>>, vector<1x96xf32>
    %41 = vector.broadcast %39 : vector<16x1xf32> to vector<16x96xf32>
    %42 = vector.broadcast %40 : vector<1x96xf32> to vector<16x96xf32>
    %43 = arith.mulf %41, %42 : vector<16x96xf32>
    %44 = arith.addf %38, %43 : vector<16x96xf32>
    %c0_38 = arith.constant 0 : index
    %c0_39 = arith.constant 0 : index
    %45 = vector.load %arg2[%c0_38, %c0_39] : memref<16x1xf32, #tpu.memory_space<vmem>>, vector<16x1xf32>
    %c0_40 = arith.constant 0 : index
    %c0_41 = arith.constant 0 : index
    %46 = vector.load %arg17[%c0_40, %c0_41] : memref<1x96xf32, #tpu.memory_space<vmem>>, vector<1x96xf32>
    %47 = vector.broadcast %45 : vector<16x1xf32> to vector<16x96xf32>
    %48 = vector.broadcast %46 : vector<1x96xf32> to vector<16x96xf32>
    %49 = arith.mulf %47, %48 : vector<16x96xf32>
    %50 = arith.addf %44, %49 : vector<16x96xf32>
    %c0_42 = arith.constant 0 : index
    %c0_43 = arith.constant 0 : index
    %c0_44 = arith.constant 0 : index
    %51 = vector.load %arg19[%c0_42, %c0_43, %c0_44] : memref<3x1x96xf32, #tpu.memory_space<vmem>>, vector<1x1x96xf32>
    %52 = vector.shape_cast %51 : vector<1x1x96xf32> to vector<1x96xf32>
    %53 = vector.broadcast %52 : vector<1x96xf32> to vector<16x96xf32>
    %54 = arith.addf %50, %53 : vector<16x96xf32>
    %c0_45 = arith.constant 0 : index
    %c0_46 = arith.constant 0 : index
    %c0_47 = arith.constant 0 : index
    %55 = vector.load %arg20[%c0_45, %c0_46, %c0_47] : memref<3x1x96xf32, #tpu.memory_space<vmem>>, vector<1x1x96xf32>
    %56 = vector.shape_cast %55 : vector<1x1x96xf32> to vector<1x96xf32>
    %c0_48 = arith.constant 0 : index
    %c0_49 = arith.constant 0 : index
    %c0_50 = arith.constant 0 : index
    %57 = vector.load %arg21[%c0_48, %c0_49, %c0_50] : memref<3x1x96xf32, #tpu.memory_space<vmem>>, vector<1x1x96xf32>
    %58 = vector.shape_cast %57 : vector<1x1x96xf32> to vector<1x96xf32>
    %cst_51 = arith.constant dense<0.000000e+00> : vector<16x96xf32>
    %59 = tpu.matmul %54, %36, %cst_51 {dimension_numbers = #tpu.dot_dimension_numbers<[1], [0], [0], [1], [0, 0, 1, 1], [], []>} : vector<16x96xf32>, vector<96x96xf32>, vector<16x96xf32> -> vector<16x96xf32>
    %60 = arith.subf %54, %59 : vector<16x96xf32>
    %61 = arith.mulf %60, %60 : vector<16x96xf32>
    %cst_52 = arith.constant dense<0.000000e+00> : vector<16x96xf32>
    %62 = tpu.matmul %61, %36, %cst_52 {dimension_numbers = #tpu.dot_dimension_numbers<[1], [0], [0], [1], [0, 0, 1, 1], [], []>} : vector<16x96xf32>, vector<96x96xf32>, vector<16x96xf32> -> vector<16x96xf32>
    %cst_53 = arith.constant 9.99999974E-6 : f32
    %63 = vector.broadcast %cst_53 : f32 to vector<16x96xf32>
    %64 = arith.addf %62, %63 : vector<16x96xf32>
    %65 = math.rsqrt %64 : vector<16x96xf32>
    %66 = arith.mulf %60, %65 : vector<16x96xf32>
    %67 = vector.broadcast %56 : vector<1x96xf32> to vector<16x96xf32>
    %68 = arith.mulf %66, %67 : vector<16x96xf32>
    %69 = vector.broadcast %58 : vector<1x96xf32> to vector<16x96xf32>
    %70 = arith.addf %68, %69 : vector<16x96xf32>
    %cst_54 = arith.constant 0.000000e+00 : f32
    %71 = vector.broadcast %cst_54 : f32 to vector<16x96xf32>
    %72 = arith.maximumf %70, %71 : vector<16x96xf32>
    %c0_55 = arith.constant 0 : index
    %c0_56 = arith.constant 0 : index
    %c0_57 = arith.constant 0 : index
    %73 = vector.load %arg18[%c0_55, %c0_56, %c0_57] : memref<2x96x96xf32, #tpu.memory_space<vmem>>, vector<1x96x96xf32>
    %74 = vector.shape_cast %73 : vector<1x96x96xf32> to vector<96x96xf32>
    %cst_58 = arith.constant dense<0.000000e+00> : vector<16x96xf32>
    %75 = tpu.matmul %72, %74, %cst_58 {dimension_numbers = #tpu.dot_dimension_numbers<[1], [0], [0], [1], [0, 0, 1, 1], [], []>} : vector<16x96xf32>, vector<96x96xf32>, vector<16x96xf32> -> vector<16x96xf32>
    %c1 = arith.constant 1 : index
    %c0_59 = arith.constant 0 : index
    %c0_60 = arith.constant 0 : index
    %76 = vector.load %arg19[%c1, %c0_59, %c0_60] : memref<3x1x96xf32, #tpu.memory_space<vmem>>, vector<1x1x96xf32>
    %77 = vector.shape_cast %76 : vector<1x1x96xf32> to vector<1x96xf32>
    %78 = vector.broadcast %77 : vector<1x96xf32> to vector<16x96xf32>
    %79 = arith.addf %75, %78 : vector<16x96xf32>
    %c1_61 = arith.constant 1 : index
    %c0_62 = arith.constant 0 : index
    %c0_63 = arith.constant 0 : index
    %80 = vector.load %arg20[%c1_61, %c0_62, %c0_63] : memref<3x1x96xf32, #tpu.memory_space<vmem>>, vector<1x1x96xf32>
    %81 = vector.shape_cast %80 : vector<1x1x96xf32> to vector<1x96xf32>
    %c1_64 = arith.constant 1 : index
    %c0_65 = arith.constant 0 : index
    %c0_66 = arith.constant 0 : index
    %82 = vector.load %arg21[%c1_64, %c0_65, %c0_66] : memref<3x1x96xf32, #tpu.memory_space<vmem>>, vector<1x1x96xf32>
    %83 = vector.shape_cast %82 : vector<1x1x96xf32> to vector<1x96xf32>
    %cst_67 = arith.constant dense<0.000000e+00> : vector<16x96xf32>
    %84 = tpu.matmul %79, %36, %cst_67 {dimension_numbers = #tpu.dot_dimension_numbers<[1], [0], [0], [1], [0, 0, 1, 1], [], []>} : vector<16x96xf32>, vector<96x96xf32>, vector<16x96xf32> -> vector<16x96xf32>
    %85 = arith.subf %79, %84 : vector<16x96xf32>
    %86 = arith.mulf %85, %85 : vector<16x96xf32>
    %cst_68 = arith.constant dense<0.000000e+00> : vector<16x96xf32>
    %87 = tpu.matmul %86, %36, %cst_68 {dimension_numbers = #tpu.dot_dimension_numbers<[1], [0], [0], [1], [0, 0, 1, 1], [], []>} : vector<16x96xf32>, vector<96x96xf32>, vector<16x96xf32> -> vector<16x96xf32>
    %cst_69 = arith.constant 9.99999974E-6 : f32
    %88 = vector.broadcast %cst_69 : f32 to vector<16x96xf32>
    %89 = arith.addf %87, %88 : vector<16x96xf32>
    %90 = math.rsqrt %89 : vector<16x96xf32>
    %91 = arith.mulf %85, %90 : vector<16x96xf32>
    %92 = vector.broadcast %81 : vector<1x96xf32> to vector<16x96xf32>
    %93 = arith.mulf %91, %92 : vector<16x96xf32>
    %94 = vector.broadcast %83 : vector<1x96xf32> to vector<16x96xf32>
    %95 = arith.addf %93, %94 : vector<16x96xf32>
    %cst_70 = arith.constant 0.000000e+00 : f32
    %96 = vector.broadcast %cst_70 : f32 to vector<16x96xf32>
    %97 = arith.maximumf %95, %96 : vector<16x96xf32>
    %c1_71 = arith.constant 1 : index
    %c0_72 = arith.constant 0 : index
    %c0_73 = arith.constant 0 : index
    %98 = vector.load %arg18[%c1_71, %c0_72, %c0_73] : memref<2x96x96xf32, #tpu.memory_space<vmem>>, vector<1x96x96xf32>
    %99 = vector.shape_cast %98 : vector<1x96x96xf32> to vector<96x96xf32>
    %cst_74 = arith.constant dense<0.000000e+00> : vector<16x96xf32>
    %100 = tpu.matmul %97, %99, %cst_74 {dimension_numbers = #tpu.dot_dimension_numbers<[1], [0], [0], [1], [0, 0, 1, 1], [], []>} : vector<16x96xf32>, vector<96x96xf32>, vector<16x96xf32> -> vector<16x96xf32>
    %c2 = arith.constant 2 : index
    %c0_75 = arith.constant 0 : index
    %c0_76 = arith.constant 0 : index
    %101 = vector.load %arg19[%c2, %c0_75, %c0_76] : memref<3x1x96xf32, #tpu.memory_space<vmem>>, vector<1x1x96xf32>
    %102 = vector.shape_cast %101 : vector<1x1x96xf32> to vector<1x96xf32>
    %103 = vector.broadcast %102 : vector<1x96xf32> to vector<16x96xf32>
    %104 = arith.addf %100, %103 : vector<16x96xf32>
    %c2_77 = arith.constant 2 : index
    %c0_78 = arith.constant 0 : index
    %c0_79 = arith.constant 0 : index
    %105 = vector.load %arg20[%c2_77, %c0_78, %c0_79] : memref<3x1x96xf32, #tpu.memory_space<vmem>>, vector<1x1x96xf32>
    %106 = vector.shape_cast %105 : vector<1x1x96xf32> to vector<1x96xf32>
    %c2_80 = arith.constant 2 : index
    %c0_81 = arith.constant 0 : index
    %c0_82 = arith.constant 0 : index
    %107 = vector.load %arg21[%c2_80, %c0_81, %c0_82] : memref<3x1x96xf32, #tpu.memory_space<vmem>>, vector<1x1x96xf32>
    %108 = vector.shape_cast %107 : vector<1x1x96xf32> to vector<1x96xf32>
    %cst_83 = arith.constant dense<0.000000e+00> : vector<16x96xf32>
    %109 = tpu.matmul %104, %36, %cst_83 {dimension_numbers = #tpu.dot_dimension_numbers<[1], [0], [0], [1], [0, 0, 1, 1], [], []>} : vector<16x96xf32>, vector<96x96xf32>, vector<16x96xf32> -> vector<16x96xf32>
    %110 = arith.subf %104, %109 : vector<16x96xf32>
    %111 = arith.mulf %110, %110 : vector<16x96xf32>
    %cst_84 = arith.constant dense<0.000000e+00> : vector<16x96xf32>
    %112 = tpu.matmul %111, %36, %cst_84 {dimension_numbers = #tpu.dot_dimension_numbers<[1], [0], [0], [1], [0, 0, 1, 1], [], []>} : vector<16x96xf32>, vector<96x96xf32>, vector<16x96xf32> -> vector<16x96xf32>
    %cst_85 = arith.constant 9.99999974E-6 : f32
    %113 = vector.broadcast %cst_85 : f32 to vector<16x96xf32>
    %114 = arith.addf %112, %113 : vector<16x96xf32>
    %115 = math.rsqrt %114 : vector<16x96xf32>
    %116 = arith.mulf %110, %115 : vector<16x96xf32>
    %117 = vector.broadcast %106 : vector<1x96xf32> to vector<16x96xf32>
    %118 = arith.mulf %116, %117 : vector<16x96xf32>
    %119 = vector.broadcast %108 : vector<1x96xf32> to vector<16x96xf32>
    %120 = arith.addf %118, %119 : vector<16x96xf32>
    %cst_86 = arith.constant 0.000000e+00 : f32
    %121 = vector.broadcast %cst_86 : f32 to vector<16x96xf32>
    %122 = arith.maximumf %120, %121 : vector<16x96xf32>
    %c0_87 = arith.constant 0 : index
    %c0_88 = arith.constant 0 : index
    %123 = vector.load %arg23[%c0_87, %c0_88] : memref<96x96xf32, #tpu.memory_space<vmem>>, vector<96x96xf32>
    %cst_89 = arith.constant dense<0.000000e+00> : vector<16x96xf32>
    %124 = tpu.matmul %122, %123, %cst_89 {dimension_numbers = #tpu.dot_dimension_numbers<[1], [0], [0], [1], [0, 0, 1, 1], [], []>} : vector<16x96xf32>, vector<96x96xf32>, vector<16x96xf32> -> vector<16x96xf32>
    %c0_90 = arith.constant 0 : index
    %c0_91 = arith.constant 0 : index
    %125 = vector.load %arg24[%c0_90, %c0_91] : memref<1x96xf32, #tpu.memory_space<vmem>>, vector<1x96xf32>
    %126 = vector.broadcast %125 : vector<1x96xf32> to vector<16x96xf32>
    %127 = arith.addf %124, %126 : vector<16x96xf32>
    %c0_92 = arith.constant 0 : index
    %c0_93 = arith.constant 0 : index
    %128 = vector.load %arg27[%c0_92, %c0_93] : memref<16x16xf32, #tpu.memory_space<vmem>>, vector<16x16xf32>
    %cst_94 = arith.constant dense<0.000000e+00> : vector<16x96xf32>
    %129 = tpu.matmul %128, %127, %cst_94 {dimension_numbers = #tpu.dot_dimension_numbers<[1], [0], [0], [1], [0, 0, 1, 1], [], []>} : vector<16x16xf32>, vector<16x96xf32>, vector<16x96xf32> -> vector<16x96xf32>
    %c0_95 = arith.constant 0 : index
    %c0_96 = arith.constant 0 : index
    %130 = vector.load %arg25[%c0_95, %c0_96] : memref<32x96xf32, #tpu.memory_space<vmem>>, vector<32x96xf32>
    %c0_97 = arith.constant 0 : index
    %c0_98 = arith.constant 0 : index
    %131 = vector.load %arg26[%c0_97, %c0_98] : memref<1x96xf32, #tpu.memory_space<vmem>>, vector<1x96xf32>
    %cst_99 = arith.constant 0.000000e+00 : f32
    %132 = vector.broadcast %cst_99 : f32 to vector<2x32xf32>
    %133 = vector.extract_strided_slice %129 {offsets = [0, 0], sizes = [2, 96], strides = [1, 1]} : vector<16x96xf32> to vector<2x96xf32>
    %cst_100 = arith.constant dense<0.000000e+00> : vector<2x96xf32>
    %134 = tpu.matmul %132, %130, %cst_100 {dimension_numbers = #tpu.dot_dimension_numbers<[1], [0], [0], [1], [0, 0, 1, 1], [], []>} : vector<2x32xf32>, vector<32x96xf32>, vector<2x96xf32> -> vector<2x96xf32>
    %135 = vector.broadcast %131 : vector<1x96xf32> to vector<2x96xf32>
    %136 = arith.addf %134, %135 : vector<2x96xf32>
    %137 = vector.extract_strided_slice %133 {offsets = [0, 0], sizes = [2, 32], strides = [1, 1]} : vector<2x96xf32> to vector<2x32xf32>
    %138 = vector.extract_strided_slice %136 {offsets = [0, 0], sizes = [2, 32], strides = [1, 1]} : vector<2x96xf32> to vector<2x32xf32>
    %139 = arith.addf %137, %138 : vector<2x32xf32>
    %140 = arith.negf %139 : vector<2x32xf32>
    %141 = math.exp %140 : vector<2x32xf32>
    %cst_101 = arith.constant 1.000000e+00 : f32
    %142 = vector.broadcast %cst_101 : f32 to vector<2x32xf32>
    %143 = arith.addf %142, %141 : vector<2x32xf32>
    %144 = arith.divf %142, %143 : vector<2x32xf32>
    %145 = vector.extract_strided_slice %133 {offsets = [0, 32], sizes = [2, 32], strides = [1, 1]} : vector<2x96xf32> to vector<2x32xf32>
    %146 = vector.extract_strided_slice %136 {offsets = [0, 32], sizes = [2, 32], strides = [1, 1]} : vector<2x96xf32> to vector<2x32xf32>
    %147 = arith.addf %145, %146 : vector<2x32xf32>
    %148 = arith.negf %147 : vector<2x32xf32>
    %149 = math.exp %148 : vector<2x32xf32>
    %cst_102 = arith.constant 1.000000e+00 : f32
    %150 = vector.broadcast %cst_102 : f32 to vector<2x32xf32>
    %151 = arith.addf %150, %149 : vector<2x32xf32>
    %152 = arith.divf %150, %151 : vector<2x32xf32>
    %153 = vector.extract_strided_slice %133 {offsets = [0, 64], sizes = [2, 32], strides = [1, 1]} : vector<2x96xf32> to vector<2x32xf32>
    %154 = vector.extract_strided_slice %136 {offsets = [0, 64], sizes = [2, 32], strides = [1, 1]} : vector<2x96xf32> to vector<2x32xf32>
    %155 = arith.mulf %144, %154 : vector<2x32xf32>
    %156 = arith.addf %153, %155 : vector<2x32xf32>
    %157 = math.tanh %156 : vector<2x32xf32>
    %cst_103 = arith.constant 1.000000e+00 : f32
    %158 = vector.broadcast %cst_103 : f32 to vector<2x32xf32>
    %159 = arith.subf %158, %152 : vector<2x32xf32>
    %160 = arith.mulf %159, %157 : vector<2x32xf32>
    %161 = arith.mulf %152, %132 : vector<2x32xf32>
    %162 = arith.addf %160, %161 : vector<2x32xf32>
    %c0_104 = arith.constant 0 : index
    %c0_105 = arith.constant 0 : index
    %163 = vector.load %arg51[%c0_104, %c0_105] : memref<16x32xf32, #tpu.memory_space<vmem>>, vector<2x32xf32>
    tpu.vector_store %arg51[%c0_104, %c0_105], %162 {strides = array<i32>} : memref<16x32xf32, #tpu.memory_space<vmem>>, vector<2x32xf32>,
    %164 = vector.extract_strided_slice %129 {offsets = [2, 0], sizes = [2, 96], strides = [1, 1]} : vector<16x96xf32> to vector<2x96xf32>
    %cst_106 = arith.constant dense<0.000000e+00> : vector<2x96xf32>
    %165 = tpu.matmul %162, %130, %cst_106 {dimension_numbers = #tpu.dot_dimension_numbers<[1], [0], [0], [1], [0, 0, 1, 1], [], []>} : vector<2x32xf32>, vector<32x96xf32>, vector<2x96xf32> -> vector<2x96xf32>
    %166 = vector.broadcast %131 : vector<1x96xf32> to vector<2x96xf32>
    %167 = arith.addf %165, %166 : vector<2x96xf32>
    %168 = vector.extract_strided_slice %164 {offsets = [0, 0], sizes = [2, 32], strides = [1, 1]} : vector<2x96xf32> to vector<2x32xf32>
    %169 = vector.extract_strided_slice %167 {offsets = [0, 0], sizes = [2, 32], strides = [1, 1]} : vector<2x96xf32> to vector<2x32xf32>
    %170 = arith.addf %168, %169 : vector<2x32xf32>
    %171 = arith.negf %170 : vector<2x32xf32>
    %172 = math.exp %171 : vector<2x32xf32>
    %cst_107 = arith.constant 1.000000e+00 : f32
    %173 = vector.broadcast %cst_107 : f32 to vector<2x32xf32>
    %174 = arith.addf %173, %172 : vector<2x32xf32>
    %175 = arith.divf %173, %174 : vector<2x32xf32>
    %176 = vector.extract_strided_slice %164 {offsets = [0, 32], sizes = [2, 32], strides = [1, 1]} : vector<2x96xf32> to vector<2x32xf32>
    %177 = vector.extract_strided_slice %167 {offsets = [0, 32], sizes = [2, 32], strides = [1, 1]} : vector<2x96xf32> to vector<2x32xf32>
    %178 = arith.addf %176, %177 : vector<2x32xf32>
    %179 = arith.negf %178 : vector<2x32xf32>
    %180 = math.exp %179 : vector<2x32xf32>
    %cst_108 = arith.constant 1.000000e+00 : f32
    %181 = vector.broadcast %cst_108 : f32 to vector<2x32xf32>
    %182 = arith.addf %181, %180 : vector<2x32xf32>
    %183 = arith.divf %181, %182 : vector<2x32xf32>
    %184 = vector.extract_strided_slice %164 {offsets = [0, 64], sizes = [2, 32], strides = [1, 1]} : vector<2x96xf32> to vector<2x32xf32>
    %185 = vector.extract_strided_slice %167 {offsets = [0, 64], sizes = [2, 32], strides = [1, 1]} : vector<2x96xf32> to vector<2x32xf32>
    %186 = arith.mulf %175, %185 : vector<2x32xf32>
    %187 = arith.addf %184, %186 : vector<2x32xf32>
    %188 = math.tanh %187 : vector<2x32xf32>
    %cst_109 = arith.constant 1.000000e+00 : f32
    %189 = vector.broadcast %cst_109 : f32 to vector<2x32xf32>
    %190 = arith.subf %189, %183 : vector<2x32xf32>
    %191 = arith.mulf %190, %188 : vector<2x32xf32>
    %192 = arith.mulf %183, %162 : vector<2x32xf32>
    %193 = arith.addf %191, %192 : vector<2x32xf32>
    %c2_110 = arith.constant 2 : index
    %c0_111 = arith.constant 0 : index
    %194 = vector.load %arg51[%c2_110, %c0_111] : memref<16x32xf32, #tpu.memory_space<vmem>>, vector<2x32xf32>
    tpu.vector_store %arg51[%c2_110, %c0_111], %193 {strides = array<i32>} : memref<16x32xf32, #tpu.memory_space<vmem>>, vector<2x32xf32>,
    %195 = vector.extract_strided_slice %129 {offsets = [4, 0], sizes = [2, 96], strides = [1, 1]} : vector<16x96xf32> to vector<2x96xf32>
    %cst_112 = arith.constant dense<0.000000e+00> : vector<2x96xf32>
    %196 = tpu.matmul %193, %130, %cst_112 {dimension_numbers = #tpu.dot_dimension_numbers<[1], [0], [0], [1], [0, 0, 1, 1], [], []>} : vector<2x32xf32>, vector<32x96xf32>, vector<2x96xf32> -> vector<2x96xf32>
    %197 = vector.broadcast %131 : vector<1x96xf32> to vector<2x96xf32>
    %198 = arith.addf %196, %197 : vector<2x96xf32>
    %199 = vector.extract_strided_slice %195 {offsets = [0, 0], sizes = [2, 32], strides = [1, 1]} : vector<2x96xf32> to vector<2x32xf32>
    %200 = vector.extract_strided_slice %198 {offsets = [0, 0], sizes = [2, 32], strides = [1, 1]} : vector<2x96xf32> to vector<2x32xf32>
    %201 = arith.addf %199, %200 : vector<2x32xf32>
    %202 = arith.negf %201 : vector<2x32xf32>
    %203 = math.exp %202 : vector<2x32xf32>
    %cst_113 = arith.constant 1.000000e+00 : f32
    %204 = vector.broadcast %cst_113 : f32 to vector<2x32xf32>
    %205 = arith.addf %204, %203 : vector<2x32xf32>
    %206 = arith.divf %204, %205 : vector<2x32xf32>
    %207 = vector.extract_strided_slice %195 {offsets = [0, 32], sizes = [2, 32], strides = [1, 1]} : vector<2x96xf32> to vector<2x32xf32>
    %208 = vector.extract_strided_slice %198 {offsets = [0, 32], sizes = [2, 32], strides = [1, 1]} : vector<2x96xf32> to vector<2x32xf32>
    %209 = arith.addf %207, %208 : vector<2x32xf32>
    %210 = arith.negf %209 : vector<2x32xf32>
    %211 = math.exp %210 : vector<2x32xf32>
    %cst_114 = arith.constant 1.000000e+00 : f32
    %212 = vector.broadcast %cst_114 : f32 to vector<2x32xf32>
    %213 = arith.addf %212, %211 : vector<2x32xf32>
    %214 = arith.divf %212, %213 : vector<2x32xf32>
    %215 = vector.extract_strided_slice %195 {offsets = [0, 64], sizes = [2, 32], strides = [1, 1]} : vector<2x96xf32> to vector<2x32xf32>
    %216 = vector.extract_strided_slice %198 {offsets = [0, 64], sizes = [2, 32], strides = [1, 1]} : vector<2x96xf32> to vector<2x32xf32>
    %217 = arith.mulf %206, %216 : vector<2x32xf32>
    %218 = arith.addf %215, %217 : vector<2x32xf32>
    %219 = math.tanh %218 : vector<2x32xf32>
    %cst_115 = arith.constant 1.000000e+00 : f32
    %220 = vector.broadcast %cst_115 : f32 to vector<2x32xf32>
    %221 = arith.subf %220, %214 : vector<2x32xf32>
    %222 = arith.mulf %221, %219 : vector<2x32xf32>
    %223 = arith.mulf %214, %193 : vector<2x32xf32>
    %224 = arith.addf %222, %223 : vector<2x32xf32>
    %c4 = arith.constant 4 : index
    %c0_116 = arith.constant 0 : index
    %225 = vector.load %arg51[%c4, %c0_116] : memref<16x32xf32, #tpu.memory_space<vmem>>, vector<2x32xf32>
    tpu.vector_store %arg51[%c4, %c0_116], %224 {strides = array<i32>} : memref<16x32xf32, #tpu.memory_space<vmem>>, vector<2x32xf32>,
    %226 = vector.extract_strided_slice %129 {offsets = [6, 0], sizes = [2, 96], strides = [1, 1]} : vector<16x96xf32> to vector<2x96xf32>
    %cst_117 = arith.constant dense<0.000000e+00> : vector<2x96xf32>
    %227 = tpu.matmul %224, %130, %cst_117 {dimension_numbers = #tpu.dot_dimension_numbers<[1], [0], [0], [1], [0, 0, 1, 1], [], []>} : vector<2x32xf32>, vector<32x96xf32>, vector<2x96xf32> -> vector<2x96xf32>
    %228 = vector.broadcast %131 : vector<1x96xf32> to vector<2x96xf32>
    %229 = arith.addf %227, %228 : vector<2x96xf32>
    %230 = vector.extract_strided_slice %226 {offsets = [0, 0], sizes = [2, 32], strides = [1, 1]} : vector<2x96xf32> to vector<2x32xf32>
    %231 = vector.extract_strided_slice %229 {offsets = [0, 0], sizes = [2, 32], strides = [1, 1]} : vector<2x96xf32> to vector<2x32xf32>
    %232 = arith.addf %230, %231 : vector<2x32xf32>
    %233 = arith.negf %232 : vector<2x32xf32>
    %234 = math.exp %233 : vector<2x32xf32>
    %cst_118 = arith.constant 1.000000e+00 : f32
    %235 = vector.broadcast %cst_118 : f32 to vector<2x32xf32>
    %236 = arith.addf %235, %234 : vector<2x32xf32>
    %237 = arith.divf %235, %236 : vector<2x32xf32>
    %238 = vector.extract_strided_slice %226 {offsets = [0, 32], sizes = [2, 32], strides = [1, 1]} : vector<2x96xf32> to vector<2x32xf32>
    %239 = vector.extract_strided_slice %229 {offsets = [0, 32], sizes = [2, 32], strides = [1, 1]} : vector<2x96xf32> to vector<2x32xf32>
    %240 = arith.addf %238, %239 : vector<2x32xf32>
    %241 = arith.negf %240 : vector<2x32xf32>
    %242 = math.exp %241 : vector<2x32xf32>
    %cst_119 = arith.constant 1.000000e+00 : f32
    %243 = vector.broadcast %cst_119 : f32 to vector<2x32xf32>
    %244 = arith.addf %243, %242 : vector<2x32xf32>
    %245 = arith.divf %243, %244 : vector<2x32xf32>
    %246 = vector.extract_strided_slice %226 {offsets = [0, 64], sizes = [2, 32], strides = [1, 1]} : vector<2x96xf32> to vector<2x32xf32>
    %247 = vector.extract_strided_slice %229 {offsets = [0, 64], sizes = [2, 32], strides = [1, 1]} : vector<2x96xf32> to vector<2x32xf32>
    %248 = arith.mulf %237, %247 : vector<2x32xf32>
    %249 = arith.addf %246, %248 : vector<2x32xf32>
    %250 = math.tanh %249 : vector<2x32xf32>
    %cst_120 = arith.constant 1.000000e+00 : f32
    %251 = vector.broadcast %cst_120 : f32 to vector<2x32xf32>
    %252 = arith.subf %251, %245 : vector<2x32xf32>
    %253 = arith.mulf %252, %250 : vector<2x32xf32>
    %254 = arith.mulf %245, %224 : vector<2x32xf32>
    %255 = arith.addf %253, %254 : vector<2x32xf32>
    %c6 = arith.constant 6 : index
    %c0_121 = arith.constant 0 : index
    %256 = vector.load %arg51[%c6, %c0_121] : memref<16x32xf32, #tpu.memory_space<vmem>>, vector<2x32xf32>
    tpu.vector_store %arg51[%c6, %c0_121], %255 {strides = array<i32>} : memref<16x32xf32, #tpu.memory_space<vmem>>, vector<2x32xf32>,
    %257 = vector.extract_strided_slice %129 {offsets = [8, 0], sizes = [2, 96], strides = [1, 1]} : vector<16x96xf32> to vector<2x96xf32>
    %cst_122 = arith.constant dense<0.000000e+00> : vector<2x96xf32>
    %258 = tpu.matmul %255, %130, %cst_122 {dimension_numbers = #tpu.dot_dimension_numbers<[1], [0], [0], [1], [0, 0, 1, 1], [], []>} : vector<2x32xf32>, vector<32x96xf32>, vector<2x96xf32> -> vector<2x96xf32>
    %259 = vector.broadcast %131 : vector<1x96xf32> to vector<2x96xf32>
    %260 = arith.addf %258, %259 : vector<2x96xf32>
    %261 = vector.extract_strided_slice %257 {offsets = [0, 0], sizes = [2, 32], strides = [1, 1]} : vector<2x96xf32> to vector<2x32xf32>
    %262 = vector.extract_strided_slice %260 {offsets = [0, 0], sizes = [2, 32], strides = [1, 1]} : vector<2x96xf32> to vector<2x32xf32>
    %263 = arith.addf %261, %262 : vector<2x32xf32>
    %264 = arith.negf %263 : vector<2x32xf32>
    %265 = math.exp %264 : vector<2x32xf32>
    %cst_123 = arith.constant 1.000000e+00 : f32
    %266 = vector.broadcast %cst_123 : f32 to vector<2x32xf32>
    %267 = arith.addf %266, %265 : vector<2x32xf32>
    %268 = arith.divf %266, %267 : vector<2x32xf32>
    %269 = vector.extract_strided_slice %257 {offsets = [0, 32], sizes = [2, 32], strides = [1, 1]} : vector<2x96xf32> to vector<2x32xf32>
    %270 = vector.extract_strided_slice %260 {offsets = [0, 32], sizes = [2, 32], strides = [1, 1]} : vector<2x96xf32> to vector<2x32xf32>
    %271 = arith.addf %269, %270 : vector<2x32xf32>
    %272 = arith.negf %271 : vector<2x32xf32>
    %273 = math.exp %272 : vector<2x32xf32>
    %cst_124 = arith.constant 1.000000e+00 : f32
    %274 = vector.broadcast %cst_124 : f32 to vector<2x32xf32>
    %275 = arith.addf %274, %273 : vector<2x32xf32>
    %276 = arith.divf %274, %275 : vector<2x32xf32>
    %277 = vector.extract_strided_slice %257 {offsets = [0, 64], sizes = [2, 32], strides = [1, 1]} : vector<2x96xf32> to vector<2x32xf32>
    %278 = vector.extract_strided_slice %260 {offsets = [0, 64], sizes = [2, 32], strides = [1, 1]} : vector<2x96xf32> to vector<2x32xf32>
    %279 = arith.mulf %268, %278 : vector<2x32xf32>
    %280 = arith.addf %277, %279 : vector<2x32xf32>
    %281 = math.tanh %280 : vector<2x32xf32>
    %cst_125 = arith.constant 1.000000e+00 : f32
    %282 = vector.broadcast %cst_125 : f32 to vector<2x32xf32>
    %283 = arith.subf %282, %276 : vector<2x32xf32>
    %284 = arith.mulf %283, %281 : vector<2x32xf32>
    %285 = arith.mulf %276, %255 : vector<2x32xf32>
    %286 = arith.addf %284, %285 : vector<2x32xf32>
    %c8 = arith.constant 8 : index
    %c0_126 = arith.constant 0 : index
    %287 = vector.load %arg51[%c8, %c0_126] : memref<16x32xf32, #tpu.memory_space<vmem>>, vector<2x32xf32>
    tpu.vector_store %arg51[%c8, %c0_126], %286 {strides = array<i32>} : memref<16x32xf32, #tpu.memory_space<vmem>>, vector<2x32xf32>,
    %288 = vector.extract_strided_slice %129 {offsets = [10, 0], sizes = [2, 96], strides = [1, 1]} : vector<16x96xf32> to vector<2x96xf32>
    %cst_127 = arith.constant dense<0.000000e+00> : vector<2x96xf32>
    %289 = tpu.matmul %286, %130, %cst_127 {dimension_numbers = #tpu.dot_dimension_numbers<[1], [0], [0], [1], [0, 0, 1, 1], [], []>} : vector<2x32xf32>, vector<32x96xf32>, vector<2x96xf32> -> vector<2x96xf32>
    %290 = vector.broadcast %131 : vector<1x96xf32> to vector<2x96xf32>
    %291 = arith.addf %289, %290 : vector<2x96xf32>
    %292 = vector.extract_strided_slice %288 {offsets = [0, 0], sizes = [2, 32], strides = [1, 1]} : vector<2x96xf32> to vector<2x32xf32>
    %293 = vector.extract_strided_slice %291 {offsets = [0, 0], sizes = [2, 32], strides = [1, 1]} : vector<2x96xf32> to vector<2x32xf32>
    %294 = arith.addf %292, %293 : vector<2x32xf32>
    %295 = arith.negf %294 : vector<2x32xf32>
    %296 = math.exp %295 : vector<2x32xf32>
    %cst_128 = arith.constant 1.000000e+00 : f32
    %297 = vector.broadcast %cst_128 : f32 to vector<2x32xf32>
    %298 = arith.addf %297, %296 : vector<2x32xf32>
    %299 = arith.divf %297, %298 : vector<2x32xf32>
    %300 = vector.extract_strided_slice %288 {offsets = [0, 32], sizes = [2, 32], strides = [1, 1]} : vector<2x96xf32> to vector<2x32xf32>
    %301 = vector.extract_strided_slice %291 {offsets = [0, 32], sizes = [2, 32], strides = [1, 1]} : vector<2x96xf32> to vector<2x32xf32>
    %302 = arith.addf %300, %301 : vector<2x32xf32>
    %303 = arith.negf %302 : vector<2x32xf32>
    %304 = math.exp %303 : vector<2x32xf32>
    %cst_129 = arith.constant 1.000000e+00 : f32
    %305 = vector.broadcast %cst_129 : f32 to vector<2x32xf32>
    %306 = arith.addf %305, %304 : vector<2x32xf32>
    %307 = arith.divf %305, %306 : vector<2x32xf32>
    %308 = vector.extract_strided_slice %288 {offsets = [0, 64], sizes = [2, 32], strides = [1, 1]} : vector<2x96xf32> to vector<2x32xf32>
    %309 = vector.extract_strided_slice %291 {offsets = [0, 64], sizes = [2, 32], strides = [1, 1]} : vector<2x96xf32> to vector<2x32xf32>
    %310 = arith.mulf %299, %309 : vector<2x32xf32>
    %311 = arith.addf %308, %310 : vector<2x32xf32>
    %312 = math.tanh %311 : vector<2x32xf32>
    %cst_130 = arith.constant 1.000000e+00 : f32
    %313 = vector.broadcast %cst_130 : f32 to vector<2x32xf32>
    %314 = arith.subf %313, %307 : vector<2x32xf32>
    %315 = arith.mulf %314, %312 : vector<2x32xf32>
    %316 = arith.mulf %307, %286 : vector<2x32xf32>
    %317 = arith.addf %315, %316 : vector<2x32xf32>
    %c10 = arith.constant 10 : index
    %c0_131 = arith.constant 0 : index
    %318 = vector.load %arg51[%c10, %c0_131] : memref<16x32xf32, #tpu.memory_space<vmem>>, vector<2x32xf32>
    tpu.vector_store %arg51[%c10, %c0_131], %317 {strides = array<i32>} : memref<16x32xf32, #tpu.memory_space<vmem>>, vector<2x32xf32>,
    %319 = vector.extract_strided_slice %129 {offsets = [12, 0], sizes = [2, 96], strides = [1, 1]} : vector<16x96xf32> to vector<2x96xf32>
    %cst_132 = arith.constant dense<0.000000e+00> : vector<2x96xf32>
    %320 = tpu.matmul %317, %130, %cst_132 {dimension_numbers = #tpu.dot_dimension_numbers<[1], [0], [0], [1], [0, 0, 1, 1], [], []>} : vector<2x32xf32>, vector<32x96xf32>, vector<2x96xf32> -> vector<2x96xf32>
    %321 = vector.broadcast %131 : vector<1x96xf32> to vector<2x96xf32>
    %322 = arith.addf %320, %321 : vector<2x96xf32>
    %323 = vector.extract_strided_slice %319 {offsets = [0, 0], sizes = [2, 32], strides = [1, 1]} : vector<2x96xf32> to vector<2x32xf32>
    %324 = vector.extract_strided_slice %322 {offsets = [0, 0], sizes = [2, 32], strides = [1, 1]} : vector<2x96xf32> to vector<2x32xf32>
    %325 = arith.addf %323, %324 : vector<2x32xf32>
    %326 = arith.negf %325 : vector<2x32xf32>
    %327 = math.exp %326 : vector<2x32xf32>
    %cst_133 = arith.constant 1.000000e+00 : f32
    %328 = vector.broadcast %cst_133 : f32 to vector<2x32xf32>
    %329 = arith.addf %328, %327 : vector<2x32xf32>
    %330 = arith.divf %328, %329 : vector<2x32xf32>
    %331 = vector.extract_strided_slice %319 {offsets = [0, 32], sizes = [2, 32], strides = [1, 1]} : vector<2x96xf32> to vector<2x32xf32>
    %332 = vector.extract_strided_slice %322 {offsets = [0, 32], sizes = [2, 32], strides = [1, 1]} : vector<2x96xf32> to vector<2x32xf32>
    %333 = arith.addf %331, %332 : vector<2x32xf32>
    %334 = arith.negf %333 : vector<2x32xf32>
    %335 = math.exp %334 : vector<2x32xf32>
    %cst_134 = arith.constant 1.000000e+00 : f32
    %336 = vector.broadcast %cst_134 : f32 to vector<2x32xf32>
    %337 = arith.addf %336, %335 : vector<2x32xf32>
    %338 = arith.divf %336, %337 : vector<2x32xf32>
    %339 = vector.extract_strided_slice %319 {offsets = [0, 64], sizes = [2, 32], strides = [1, 1]} : vector<2x96xf32> to vector<2x32xf32>
    %340 = vector.extract_strided_slice %322 {offsets = [0, 64], sizes = [2, 32], strides = [1, 1]} : vector<2x96xf32> to vector<2x32xf32>
    %341 = arith.mulf %330, %340 : vector<2x32xf32>
    %342 = arith.addf %339, %341 : vector<2x32xf32>
    %343 = math.tanh %342 : vector<2x32xf32>
    %cst_135 = arith.constant 1.000000e+00 : f32
    %344 = vector.broadcast %cst_135 : f32 to vector<2x32xf32>
    %345 = arith.subf %344, %338 : vector<2x32xf32>
    %346 = arith.mulf %345, %343 : vector<2x32xf32>
    %347 = arith.mulf %338, %317 : vector<2x32xf32>
    %348 = arith.addf %346, %347 : vector<2x32xf32>
    %c12 = arith.constant 12 : index
    %c0_136 = arith.constant 0 : index
    %349 = vector.load %arg51[%c12, %c0_136] : memref<16x32xf32, #tpu.memory_space<vmem>>, vector<2x32xf32>
    tpu.vector_store %arg51[%c12, %c0_136], %348 {strides = array<i32>} : memref<16x32xf32, #tpu.memory_space<vmem>>, vector<2x32xf32>,
    %350 = vector.extract_strided_slice %129 {offsets = [14, 0], sizes = [2, 96], strides = [1, 1]} : vector<16x96xf32> to vector<2x96xf32>
    %cst_137 = arith.constant dense<0.000000e+00> : vector<2x96xf32>
    %351 = tpu.matmul %348, %130, %cst_137 {dimension_numbers = #tpu.dot_dimension_numbers<[1], [0], [0], [1], [0, 0, 1, 1], [], []>} : vector<2x32xf32>, vector<32x96xf32>, vector<2x96xf32> -> vector<2x96xf32>
    %352 = vector.broadcast %131 : vector<1x96xf32> to vector<2x96xf32>
    %353 = arith.addf %351, %352 : vector<2x96xf32>
    %354 = vector.extract_strided_slice %350 {offsets = [0, 0], sizes = [2, 32], strides = [1, 1]} : vector<2x96xf32> to vector<2x32xf32>
    %355 = vector.extract_strided_slice %353 {offsets = [0, 0], sizes = [2, 32], strides = [1, 1]} : vector<2x96xf32> to vector<2x32xf32>
    %356 = arith.addf %354, %355 : vector<2x32xf32>
    %357 = arith.negf %356 : vector<2x32xf32>
    %358 = math.exp %357 : vector<2x32xf32>
    %cst_138 = arith.constant 1.000000e+00 : f32
    %359 = vector.broadcast %cst_138 : f32 to vector<2x32xf32>
    %360 = arith.addf %359, %358 : vector<2x32xf32>
    %361 = arith.divf %359, %360 : vector<2x32xf32>
    %362 = vector.extract_strided_slice %350 {offsets = [0, 32], sizes = [2, 32], strides = [1, 1]} : vector<2x96xf32> to vector<2x32xf32>
    %363 = vector.extract_strided_slice %353 {offsets = [0, 32], sizes = [2, 32], strides = [1, 1]} : vector<2x96xf32> to vector<2x32xf32>
    %364 = arith.addf %362, %363 : vector<2x32xf32>
    %365 = arith.negf %364 : vector<2x32xf32>
    %366 = math.exp %365 : vector<2x32xf32>
    %cst_139 = arith.constant 1.000000e+00 : f32
    %367 = vector.broadcast %cst_139 : f32 to vector<2x32xf32>
    %368 = arith.addf %367, %366 : vector<2x32xf32>
    %369 = arith.divf %367, %368 : vector<2x32xf32>
    %370 = vector.extract_strided_slice %350 {offsets = [0, 64], sizes = [2, 32], strides = [1, 1]} : vector<2x96xf32> to vector<2x32xf32>
    %371 = vector.extract_strided_slice %353 {offsets = [0, 64], sizes = [2, 32], strides = [1, 1]} : vector<2x96xf32> to vector<2x32xf32>
    %372 = arith.mulf %361, %371 : vector<2x32xf32>
    %373 = arith.addf %370, %372 : vector<2x32xf32>
    %374 = math.tanh %373 : vector<2x32xf32>
    %cst_140 = arith.constant 1.000000e+00 : f32
    %375 = vector.broadcast %cst_140 : f32 to vector<2x32xf32>
    %376 = arith.subf %375, %369 : vector<2x32xf32>
    %377 = arith.mulf %376, %374 : vector<2x32xf32>
    %378 = arith.mulf %369, %348 : vector<2x32xf32>
    %379 = arith.addf %377, %378 : vector<2x32xf32>
    %c14 = arith.constant 14 : index
    %c0_141 = arith.constant 0 : index
    %380 = vector.load %arg51[%c14, %c0_141] : memref<16x32xf32, #tpu.memory_space<vmem>>, vector<2x32xf32>
    tpu.vector_store %arg51[%c14, %c0_141], %379 {strides = array<i32>} : memref<16x32xf32, #tpu.memory_space<vmem>>, vector<2x32xf32>,
    %c0_142 = arith.constant 0 : index
    %c0_143 = arith.constant 0 : index
    %381 = vector.load %arg28[%c0_142, %c0_143] : memref<16x16xf32, #tpu.memory_space<vmem>>, vector<16x16xf32>
    %c0_144 = arith.constant 0 : index
    %c0_145 = arith.constant 0 : index
    %382 = vector.load %arg51[%c0_144, %c0_145] : memref<16x32xf32, #tpu.memory_space<vmem>>, vector<16x32xf32>
    %cst_146 = arith.constant dense<0.000000e+00> : vector<16x32xf32>
    %383 = tpu.matmul %381, %382, %cst_146 {dimension_numbers = #tpu.dot_dimension_numbers<[1], [0], [0], [1], [0, 0, 1, 1], [], []>} : vector<16x16xf32>, vector<16x32xf32>, vector<16x32xf32> -> vector<16x32xf32>
    %c0_147 = arith.constant 0 : index
    %c0_148 = arith.constant 0 : index
    %c0_149 = arith.constant 0 : index
    %384 = vector.load %arg29[%c0_147, %c0_148, %c0_149] : memref<3x32x32xf32, #tpu.memory_space<vmem>>, vector<1x32x32xf32>
    %385 = vector.shape_cast %384 : vector<1x32x32xf32> to vector<32x32xf32>
    %cst_150 = arith.constant dense<0.000000e+00> : vector<16x32xf32>
    %386 = tpu.matmul %383, %385, %cst_150 {dimension_numbers = #tpu.dot_dimension_numbers<[1], [0], [0], [1], [0, 0, 1, 1], [], []>} : vector<16x32xf32>, vector<32x32xf32>, vector<16x32xf32> -> vector<16x32xf32>
    %c0_151 = arith.constant 0 : index
    %c0_152 = arith.constant 0 : index
    %c0_153 = arith.constant 0 : index
    %387 = vector.load %arg30[%c0_151, %c0_152, %c0_153] : memref<3x1x32xf32, #tpu.memory_space<vmem>>, vector<1x1x32xf32>
    %388 = vector.shape_cast %387 : vector<1x1x32xf32> to vector<1x32xf32>
    %389 = vector.broadcast %388 : vector<1x32xf32> to vector<16x32xf32>
    %390 = arith.addf %386, %389 : vector<16x32xf32>
    %cst_154 = arith.constant dense<0.000000e+00> : vector<16xf32>
    %391 = vector.multi_reduction <add>, %390, %cst_154 [1] : vector<16x32xf32> to vector<16xf32>
    %392 = vector.shape_cast %391 : vector<16xf32> to vector<16x1xf32>
    %cst_155 = arith.constant 3.200000e+01 : f32
    %393 = vector.broadcast %cst_155 : f32 to vector<16x1xf32>
    %394 = arith.divf %392, %393 : vector<16x1xf32>
    %395 = vector.broadcast %394 : vector<16x1xf32> to vector<16x32xf32>
    %396 = arith.subf %390, %395 : vector<16x32xf32>
    %397 = arith.mulf %396, %396 : vector<16x32xf32>
    %cst_156 = arith.constant dense<0.000000e+00> : vector<16xf32>
    %398 = vector.multi_reduction <add>, %397, %cst_156 [1] : vector<16x32xf32> to vector<16xf32>
    %399 = vector.shape_cast %398 : vector<16xf32> to vector<16x1xf32>
    %cst_157 = arith.constant 3.200000e+01 : f32
    %400 = vector.broadcast %cst_157 : f32 to vector<16x1xf32>
    %401 = arith.divf %399, %400 : vector<16x1xf32>
    %402 = vector.broadcast %394 : vector<16x1xf32> to vector<16x32xf32>
    %403 = arith.subf %390, %402 : vector<16x32xf32>
    %cst_158 = arith.constant 9.99999974E-6 : f32
    %404 = vector.broadcast %cst_158 : f32 to vector<16x1xf32>
    %405 = arith.addf %401, %404 : vector<16x1xf32>
    %406 = math.rsqrt %405 : vector<16x1xf32>
    %407 = vector.broadcast %406 : vector<16x1xf32> to vector<16x32xf32>
    %408 = arith.mulf %403, %407 : vector<16x32xf32>
    %c0_159 = arith.constant 0 : index
    %c0_160 = arith.constant 0 : index
    %c0_161 = arith.constant 0 : index
    %409 = vector.load %arg31[%c0_159, %c0_160, %c0_161] : memref<3x1x32xf32, #tpu.memory_space<vmem>>, vector<1x1x32xf32>
    %410 = vector.shape_cast %409 : vector<1x1x32xf32> to vector<1x32xf32>
    %411 = vector.broadcast %410 : vector<1x32xf32> to vector<16x32xf32>
    %412 = arith.mulf %408, %411 : vector<16x32xf32>
    %c0_162 = arith.constant 0 : index
    %c0_163 = arith.constant 0 : index
    %c0_164 = arith.constant 0 : index
    %413 = vector.load %arg32[%c0_162, %c0_163, %c0_164] : memref<3x1x32xf32, #tpu.memory_space<vmem>>, vector<1x1x32xf32>
    %414 = vector.shape_cast %413 : vector<1x1x32xf32> to vector<1x32xf32>
    %415 = vector.broadcast %414 : vector<1x32xf32> to vector<16x32xf32>
    %416 = arith.addf %412, %415 : vector<16x32xf32>
    %cst_165 = arith.constant 0.000000e+00 : f32
    %417 = vector.broadcast %cst_165 : f32 to vector<16x32xf32>
    %418 = arith.maximumf %416, %417 : vector<16x32xf32>
    %c1_166 = arith.constant 1 : index
    %c0_167 = arith.constant 0 : index
    %c0_168 = arith.constant 0 : index
    %419 = vector.load %arg29[%c1_166, %c0_167, %c0_168] : memref<3x32x32xf32, #tpu.memory_space<vmem>>, vector<1x32x32xf32>
    %420 = vector.shape_cast %419 : vector<1x32x32xf32> to vector<32x32xf32>
    %cst_169 = arith.constant dense<0.000000e+00> : vector<16x32xf32>
    %421 = tpu.matmul %418, %420, %cst_169 {dimension_numbers = #tpu.dot_dimension_numbers<[1], [0], [0], [1], [0, 0, 1, 1], [], []>} : vector<16x32xf32>, vector<32x32xf32>, vector<16x32xf32> -> vector<16x32xf32>
    %c1_170 = arith.constant 1 : index
    %c0_171 = arith.constant 0 : index
    %c0_172 = arith.constant 0 : index
    %422 = vector.load %arg30[%c1_170, %c0_171, %c0_172] : memref<3x1x32xf32, #tpu.memory_space<vmem>>, vector<1x1x32xf32>
    %423 = vector.shape_cast %422 : vector<1x1x32xf32> to vector<1x32xf32>
    %424 = vector.broadcast %423 : vector<1x32xf32> to vector<16x32xf32>
    %425 = arith.addf %421, %424 : vector<16x32xf32>
    %cst_173 = arith.constant dense<0.000000e+00> : vector<16xf32>
    %426 = vector.multi_reduction <add>, %425, %cst_173 [1] : vector<16x32xf32> to vector<16xf32>
    %427 = vector.shape_cast %426 : vector<16xf32> to vector<16x1xf32>
    %cst_174 = arith.constant 3.200000e+01 : f32
    %428 = vector.broadcast %cst_174 : f32 to vector<16x1xf32>
    %429 = arith.divf %427, %428 : vector<16x1xf32>
    %430 = vector.broadcast %429 : vector<16x1xf32> to vector<16x32xf32>
    %431 = arith.subf %425, %430 : vector<16x32xf32>
    %432 = arith.mulf %431, %431 : vector<16x32xf32>
    %cst_175 = arith.constant dense<0.000000e+00> : vector<16xf32>
    %433 = vector.multi_reduction <add>, %432, %cst_175 [1] : vector<16x32xf32> to vector<16xf32>
    %434 = vector.shape_cast %433 : vector<16xf32> to vector<16x1xf32>
    %cst_176 = arith.constant 3.200000e+01 : f32
    %435 = vector.broadcast %cst_176 : f32 to vector<16x1xf32>
    %436 = arith.divf %434, %435 : vector<16x1xf32>
    %437 = vector.broadcast %429 : vector<16x1xf32> to vector<16x32xf32>
    %438 = arith.subf %425, %437 : vector<16x32xf32>
    %cst_177 = arith.constant 9.99999974E-6 : f32
    %439 = vector.broadcast %cst_177 : f32 to vector<16x1xf32>
    %440 = arith.addf %436, %439 : vector<16x1xf32>
    %441 = math.rsqrt %440 : vector<16x1xf32>
    %442 = vector.broadcast %441 : vector<16x1xf32> to vector<16x32xf32>
    %443 = arith.mulf %438, %442 : vector<16x32xf32>
    %c1_178 = arith.constant 1 : index
    %c0_179 = arith.constant 0 : index
    %c0_180 = arith.constant 0 : index
    %444 = vector.load %arg31[%c1_178, %c0_179, %c0_180] : memref<3x1x32xf32, #tpu.memory_space<vmem>>, vector<1x1x32xf32>
    %445 = vector.shape_cast %444 : vector<1x1x32xf32> to vector<1x32xf32>
    %446 = vector.broadcast %445 : vector<1x32xf32> to vector<16x32xf32>
    %447 = arith.mulf %443, %446 : vector<16x32xf32>
    %c1_181 = arith.constant 1 : index
    %c0_182 = arith.constant 0 : index
    %c0_183 = arith.constant 0 : index
    %448 = vector.load %arg32[%c1_181, %c0_182, %c0_183] : memref<3x1x32xf32, #tpu.memory_space<vmem>>, vector<1x1x32xf32>
    %449 = vector.shape_cast %448 : vector<1x1x32xf32> to vector<1x32xf32>
    %450 = vector.broadcast %449 : vector<1x32xf32> to vector<16x32xf32>
    %451 = arith.addf %447, %450 : vector<16x32xf32>
    %cst_184 = arith.constant 0.000000e+00 : f32
    %452 = vector.broadcast %cst_184 : f32 to vector<16x32xf32>
    %453 = arith.maximumf %451, %452 : vector<16x32xf32>
    %c2_185 = arith.constant 2 : index
    %c0_186 = arith.constant 0 : index
    %c0_187 = arith.constant 0 : index
    %454 = vector.load %arg29[%c2_185, %c0_186, %c0_187] : memref<3x32x32xf32, #tpu.memory_space<vmem>>, vector<1x32x32xf32>
    %455 = vector.shape_cast %454 : vector<1x32x32xf32> to vector<32x32xf32>
    %cst_188 = arith.constant dense<0.000000e+00> : vector<16x32xf32>
    %456 = tpu.matmul %453, %455, %cst_188 {dimension_numbers = #tpu.dot_dimension_numbers<[1], [0], [0], [1], [0, 0, 1, 1], [], []>} : vector<16x32xf32>, vector<32x32xf32>, vector<16x32xf32> -> vector<16x32xf32>
    %c2_189 = arith.constant 2 : index
    %c0_190 = arith.constant 0 : index
    %c0_191 = arith.constant 0 : index
    %457 = vector.load %arg30[%c2_189, %c0_190, %c0_191] : memref<3x1x32xf32, #tpu.memory_space<vmem>>, vector<1x1x32xf32>
    %458 = vector.shape_cast %457 : vector<1x1x32xf32> to vector<1x32xf32>
    %459 = vector.broadcast %458 : vector<1x32xf32> to vector<16x32xf32>
    %460 = arith.addf %456, %459 : vector<16x32xf32>
    %cst_192 = arith.constant dense<0.000000e+00> : vector<16xf32>
    %461 = vector.multi_reduction <add>, %460, %cst_192 [1] : vector<16x32xf32> to vector<16xf32>
    %462 = vector.shape_cast %461 : vector<16xf32> to vector<16x1xf32>
    %cst_193 = arith.constant 3.200000e+01 : f32
    %463 = vector.broadcast %cst_193 : f32 to vector<16x1xf32>
    %464 = arith.divf %462, %463 : vector<16x1xf32>
    %465 = vector.broadcast %464 : vector<16x1xf32> to vector<16x32xf32>
    %466 = arith.subf %460, %465 : vector<16x32xf32>
    %467 = arith.mulf %466, %466 : vector<16x32xf32>
    %cst_194 = arith.constant dense<0.000000e+00> : vector<16xf32>
    %468 = vector.multi_reduction <add>, %467, %cst_194 [1] : vector<16x32xf32> to vector<16xf32>
    %469 = vector.shape_cast %468 : vector<16xf32> to vector<16x1xf32>
    %cst_195 = arith.constant 3.200000e+01 : f32
    %470 = vector.broadcast %cst_195 : f32 to vector<16x1xf32>
    %471 = arith.divf %469, %470 : vector<16x1xf32>
    %472 = vector.broadcast %464 : vector<16x1xf32> to vector<16x32xf32>
    %473 = arith.subf %460, %472 : vector<16x32xf32>
    %cst_196 = arith.constant 9.99999974E-6 : f32
    %474 = vector.broadcast %cst_196 : f32 to vector<16x1xf32>
    %475 = arith.addf %471, %474 : vector<16x1xf32>
    %476 = math.rsqrt %475 : vector<16x1xf32>
    %477 = vector.broadcast %476 : vector<16x1xf32> to vector<16x32xf32>
    %478 = arith.mulf %473, %477 : vector<16x32xf32>
    %c2_197 = arith.constant 2 : index
    %c0_198 = arith.constant 0 : index
    %c0_199 = arith.constant 0 : index
    %479 = vector.load %arg31[%c2_197, %c0_198, %c0_199] : memref<3x1x32xf32, #tpu.memory_space<vmem>>, vector<1x1x32xf32>
    %480 = vector.shape_cast %479 : vector<1x1x32xf32> to vector<1x32xf32>
    %481 = vector.broadcast %480 : vector<1x32xf32> to vector<16x32xf32>
    %482 = arith.mulf %478, %481 : vector<16x32xf32>
    %c2_200 = arith.constant 2 : index
    %c0_201 = arith.constant 0 : index
    %c0_202 = arith.constant 0 : index
    %483 = vector.load %arg32[%c2_200, %c0_201, %c0_202] : memref<3x1x32xf32, #tpu.memory_space<vmem>>, vector<1x1x32xf32>
    %484 = vector.shape_cast %483 : vector<1x1x32xf32> to vector<1x32xf32>
    %485 = vector.broadcast %484 : vector<1x32xf32> to vector<16x32xf32>
    %486 = arith.addf %482, %485 : vector<16x32xf32>
    %cst_203 = arith.constant 0.000000e+00 : f32
    %487 = vector.broadcast %cst_203 : f32 to vector<16x32xf32>
    %488 = arith.maximumf %486, %487 : vector<16x32xf32>
    %c0_204 = arith.constant 0 : index
    %c0_205 = arith.constant 0 : index
    %489 = vector.load %arg33[%c0_204, %c0_205] : memref<32x16xf32, #tpu.memory_space<vmem>>, vector<32x16xf32>
    %cst_206 = arith.constant dense<0.000000e+00> : vector<16x16xf32>
    %490 = tpu.matmul %488, %489, %cst_206 {dimension_numbers = #tpu.dot_dimension_numbers<[1], [0], [0], [1], [0, 0, 1, 1], [], []>} : vector<16x32xf32>, vector<32x16xf32>, vector<16x16xf32> -> vector<16x16xf32>
    %c0_207 = arith.constant 0 : index
    %c0_208 = arith.constant 0 : index
    %491 = vector.load %arg34[%c0_207, %c0_208] : memref<1x16xf32, #tpu.memory_space<vmem>>, vector<1x16xf32>
    %492 = vector.broadcast %491 : vector<1x16xf32> to vector<16x16xf32>
    %493 = arith.addf %490, %492 : vector<16x16xf32>
    %494 = vector.extract_strided_slice %493 {offsets = [0, 0], sizes = [16, 1], strides = [1, 1]} : vector<16x16xf32> to vector<16x1xf32>
    %cst_209 = arith.constant 0.000000e+00 : f32
    %495 = vector.broadcast %cst_209 : f32 to vector<16x1xf32>
    %496 = arith.cmpf oge, %494, %495 : vector<16x1xf32>
    %cst_210 = arith.constant 0.000000e+00 : f32
    %497 = vector.broadcast %cst_210 : f32 to vector<16x1xf32>
    %498 = arith.subf %497, %494 : vector<16x1xf32>
    %499 = math.exp %498 : vector<16x1xf32>
    %500 = math.log1p %499 : vector<16x1xf32>
    %cst_211 = arith.constant 0.000000e+00 : f32
    %501 = vector.broadcast %cst_211 : f32 to vector<16x1xf32>
    %502 = arith.subf %501, %500 : vector<16x1xf32>
    %503 = math.exp %494 : vector<16x1xf32>
    %504 = math.log1p %503 : vector<16x1xf32>
    %505 = arith.subf %494, %504 : vector<16x1xf32>
    %506 = arith.select %496, %502, %505 : vector<16x1xi1>, vector<16x1xf32>
    %cst_212 = arith.constant 2.30258512 : f32
    %507 = vector.broadcast %cst_212 : f32 to vector<16x1xf32>
    %508 = arith.mulf %507, %506 : vector<16x1xf32>
    %509 = math.exp %508 : vector<16x1xf32>
    %cst_213 = arith.constant 2.000000e+00 : f32
    %510 = vector.broadcast %cst_213 : f32 to vector<16x1xf32>
    %511 = arith.mulf %510, %509 : vector<16x1xf32>
    %cst_214 = arith.constant 1.000000e-07 : f32
    %512 = vector.broadcast %cst_214 : f32 to vector<16x1xf32>
    %513 = arith.addf %511, %512 : vector<16x1xf32>
    %514 = vector.extract_strided_slice %493 {offsets = [0, 1], sizes = [16, 8], strides = [1, 1]} : vector<16x16xf32> to vector<16x8xf32>
    %cst_215 = arith.constant 0.000000e+00 : f32
    %515 = vector.broadcast %cst_215 : f32 to vector<16x8xf32>
    %516 = arith.cmpf oge, %514, %515 : vector<16x8xf32>
    %cst_216 = arith.constant 0.000000e+00 : f32
    %517 = vector.broadcast %cst_216 : f32 to vector<16x8xf32>
    %518 = arith.subf %517, %514 : vector<16x8xf32>
    %519 = math.exp %518 : vector<16x8xf32>
    %520 = math.log1p %519 : vector<16x8xf32>
    %cst_217 = arith.constant 0.000000e+00 : f32
    %521 = vector.broadcast %cst_217 : f32 to vector<16x8xf32>
    %522 = arith.subf %521, %520 : vector<16x8xf32>
    %523 = math.exp %514 : vector<16x8xf32>
    %524 = math.log1p %523 : vector<16x8xf32>
    %525 = arith.subf %514, %524 : vector<16x8xf32>
    %526 = arith.select %516, %522, %525 : vector<16x8xi1>, vector<16x8xf32>
    %cst_218 = arith.constant 2.30258512 : f32
    %527 = vector.broadcast %cst_218 : f32 to vector<16x8xf32>
    %528 = arith.mulf %527, %526 : vector<16x8xf32>
    %529 = math.exp %528 : vector<16x8xf32>
    %cst_219 = arith.constant 2.000000e+00 : f32
    %530 = vector.broadcast %cst_219 : f32 to vector<16x8xf32>
    %531 = arith.mulf %530, %529 : vector<16x8xf32>
    %cst_220 = arith.constant 1.000000e-07 : f32
    %532 = vector.broadcast %cst_220 : f32 to vector<16x8xf32>
    %533 = arith.addf %531, %532 : vector<16x8xf32>
    %cst_221 = arith.constant dense<0.000000e+00> : vector<16xf32>
    %534 = vector.multi_reduction <add>, %533, %cst_221 [1] : vector<16x8xf32> to vector<16xf32>
    %535 = vector.shape_cast %534 : vector<16xf32> to vector<16x1xf32>
    %536 = vector.broadcast %535 : vector<16x1xf32> to vector<16x8xf32>
    %537 = arith.divf %533, %536 : vector<16x8xf32>
    %538 = vector.extract_strided_slice %493 {offsets = [0, 9], sizes = [16, 5], strides = [1, 1]} : vector<16x16xf32> to vector<16x5xf32>
    %cst_222 = arith.constant 0.000000e+00 : f32
    %539 = vector.broadcast %cst_222 : f32 to vector<16x5xf32>
    %540 = arith.cmpf oge, %538, %539 : vector<16x5xf32>
    %cst_223 = arith.constant 0.000000e+00 : f32
    %541 = vector.broadcast %cst_223 : f32 to vector<16x5xf32>
    %542 = arith.subf %541, %538 : vector<16x5xf32>
    %543 = math.exp %542 : vector<16x5xf32>
    %544 = math.log1p %543 : vector<16x5xf32>
    %cst_224 = arith.constant 0.000000e+00 : f32
    %545 = vector.broadcast %cst_224 : f32 to vector<16x5xf32>
    %546 = arith.subf %545, %544 : vector<16x5xf32>
    %547 = math.exp %538 : vector<16x5xf32>
    %548 = math.log1p %547 : vector<16x5xf32>
    %549 = arith.subf %538, %548 : vector<16x5xf32>
    %550 = arith.select %540, %546, %549 : vector<16x5xi1>, vector<16x5xf32>
    %cst_225 = arith.constant 2.30258512 : f32
    %551 = vector.broadcast %cst_225 : f32 to vector<16x5xf32>
    %552 = arith.mulf %551, %550 : vector<16x5xf32>
    %553 = math.exp %552 : vector<16x5xf32>
    %cst_226 = arith.constant 2.000000e+00 : f32
    %554 = vector.broadcast %cst_226 : f32 to vector<16x5xf32>
    %555 = arith.mulf %554, %553 : vector<16x5xf32>
    %cst_227 = arith.constant 1.000000e-07 : f32
    %556 = vector.broadcast %cst_227 : f32 to vector<16x5xf32>
    %557 = arith.addf %555, %556 : vector<16x5xf32>
    %c0_228 = arith.constant 0 : index
    %c0_229 = arith.constant 0 : index
    %558 = vector.load %arg35[%c0_228, %c0_229] : memref<5x9xf32, #tpu.memory_space<vmem>>, vector<5x9xf32>
    %cst_230 = arith.constant dense<0.000000e+00> : vector<16x9xf32>
    %559 = tpu.matmul %557, %558, %cst_230 {dimension_numbers = #tpu.dot_dimension_numbers<[1], [0], [0], [1], [0, 0, 1, 1], [], []>} : vector<16x5xf32>, vector<5x9xf32>, vector<16x9xf32> -> vector<16x9xf32>
    %c0_231 = arith.constant 0 : index
    %c0_232 = arith.constant 0 : index
    %560 = vector.load %arg36[%c0_231, %c0_232] : memref<5x9xf32, #tpu.memory_space<vmem>>, vector<5x9xf32>
    %cst_233 = arith.constant dense<0.000000e+00> : vector<16x9xf32>
    %561 = tpu.matmul %557, %560, %cst_233 {dimension_numbers = #tpu.dot_dimension_numbers<[1], [0], [0], [1], [0, 0, 1, 1], [], []>} : vector<16x5xf32>, vector<5x9xf32>, vector<16x9xf32> -> vector<16x9xf32>
    %c0_234 = arith.constant 0 : index
    %c0_235 = arith.constant 0 : index
    %562 = vector.load %arg5[%c0_234, %c0_235] : memref<16x16xf32, #tpu.memory_space<vmem>>, vector<16x16xf32>
    %c0_236 = arith.constant 0 : index
    %c0_237 = arith.constant 0 : index
    %563 = vector.load %arg37[%c0_236, %c0_237] : memref<16x9xf32, #tpu.memory_space<vmem>>, vector<16x9xf32>
    %cst_238 = arith.constant dense<0.000000e+00> : vector<16x9xf32>
    %564 = tpu.matmul %562, %563, %cst_238 {dimension_numbers = #tpu.dot_dimension_numbers<[1], [0], [0], [1], [0, 0, 1, 1], [], []>} : vector<16x16xf32>, vector<16x9xf32>, vector<16x9xf32> -> vector<16x9xf32>
    %c0_239 = arith.constant 0 : index
    %c0_240 = arith.constant 0 : index
    %565 = vector.load %arg5[%c0_239, %c0_240] : memref<16x16xf32, #tpu.memory_space<vmem>>, vector<16x16xf32>
    %c0_241 = arith.constant 0 : index
    %c0_242 = arith.constant 0 : index
    %566 = vector.load %arg38[%c0_241, %c0_242] : memref<16x9xf32, #tpu.memory_space<vmem>>, vector<16x9xf32>
    %cst_243 = arith.constant dense<0.000000e+00> : vector<16x9xf32>
    %567 = tpu.matmul %565, %566, %cst_243 {dimension_numbers = #tpu.dot_dimension_numbers<[1], [0], [0], [1], [0, 0, 1, 1], [], []>} : vector<16x16xf32>, vector<16x9xf32>, vector<16x9xf32> -> vector<16x9xf32>
    %568 = arith.mulf %559, %564 : vector<16x9xf32>
    %569 = arith.mulf %561, %567 : vector<16x9xf32>
    %570 = arith.subf %568, %569 : vector<16x9xf32>
    %c0_244 = arith.constant 0 : index
    %c0_245 = arith.constant 0 : index
    %571 = vector.load %arg49[%c0_244, %c0_245] : memref<16x9xf32, #tpu.memory_space<vmem>>, vector<16x9xf32>
    tpu.vector_store %arg49[%c0_244, %c0_245], %570 {strides = array<i32>} : memref<16x9xf32, #tpu.memory_space<vmem>>, vector<16x9xf32>,
    %572 = arith.mulf %559, %567 : vector<16x9xf32>
    %573 = arith.mulf %561, %564 : vector<16x9xf32>
    %574 = arith.addf %572, %573 : vector<16x9xf32>
    %c0_246 = arith.constant 0 : index
    %c0_247 = arith.constant 0 : index
    %575 = vector.load %arg50[%c0_246, %c0_247] : memref<16x9xf32, #tpu.memory_space<vmem>>, vector<16x9xf32>
    tpu.vector_store %arg50[%c0_246, %c0_247], %574 {strides = array<i32>} : memref<16x9xf32, #tpu.memory_space<vmem>>, vector<16x9xf32>,
    %c0_248 = arith.constant 0 : index
    %c0_249 = arith.constant 0 : index
    %576 = vector.load %arg39[%c0_248, %c0_249] : memref<8x128xf32, #tpu.memory_space<vmem>>, vector<8x128xf32>
    %c0_250 = arith.constant 0 : index
    %c0_251 = arith.constant 0 : index
    %577 = vector.load %arg3[%c0_250, %c0_251] : memref<2x8xf32, #tpu.memory_space<vmem>>, vector<2x8xf32>
    %cst_252 = arith.constant dense<0.000000e+00> : vector<2x128xf32>
    %578 = tpu.matmul %577, %576, %cst_252 {dimension_numbers = #tpu.dot_dimension_numbers<[1], [0], [0], [1], [0, 0, 1, 1], [], []>} : vector<2x8xf32>, vector<8x128xf32>, vector<2x128xf32> -> vector<2x128xf32>
    %cst_253 = arith.constant 6.250000e-05 : f32
    %579 = vector.broadcast %cst_253 : f32 to vector<2x128xf32>
    %580 = arith.mulf %578, %579 : vector<2x128xf32>
    %c0_254 = arith.constant 0 : index
    %c0_255 = arith.constant 0 : index
    %581 = vector.load %arg40[%c0_254, %c0_255] : memref<128x128xf32, #tpu.memory_space<vmem>>, vector<128x128xf32>
    %cst_256 = arith.constant dense<0.000000e+00> : vector<2x128xf32>
    %582 = tpu.matmul %580, %581, %cst_256 {dimension_numbers = #tpu.dot_dimension_numbers<[1], [0], [0], [1], [0, 0, 1, 1], [], []>} : vector<2x128xf32>, vector<128x128xf32>, vector<2x128xf32> -> vector<2x128xf32>
    %cst_257 = arith.constant 6.28318548 : f32
    %583 = vector.broadcast %cst_257 : f32 to vector<2x128xf32>
    %584 = arith.mulf %583, %582 : vector<2x128xf32>
    %585 = vector.extract_strided_slice %513 {offsets = [0, 0], sizes = [8, 1], strides = [1, 1]} : vector<16x1xf32> to vector<8x1xf32>
    %cst_258 = arith.constant dense<0.000000e+00> : vector<1x128xf32>
    %586 = tpu.matmul %585, %576, %cst_258 {dimension_numbers = #tpu.dot_dimension_numbers<[0], [0], [1], [1], [0, 1, 1, 1], [], []>} : vector<8x1xf32>, vector<8x128xf32>, vector<1x128xf32> -> vector<1x128xf32>
    %587 = vector.extract_strided_slice %537 {offsets = [0, 0], sizes = [8, 8], strides = [1, 1]} : vector<16x8xf32> to vector<8x8xf32>
    %cst_259 = arith.constant dense<0.000000e+00> : vector<8x128xf32>
    %588 = tpu.matmul %587, %576, %cst_259 {dimension_numbers = #tpu.dot_dimension_numbers<[0], [0], [1], [1], [0, 1, 1, 1], [], []>} : vector<8x8xf32>, vector<8x128xf32>, vector<8x128xf32> -> vector<8x128xf32>
    %589 = vector.extract_strided_slice %513 {offsets = [8, 0], sizes = [8, 1], strides = [1, 1]} : vector<16x1xf32> to vector<8x1xf32>
    %cst_260 = arith.constant dense<0.000000e+00> : vector<1x128xf32>
    %590 = tpu.matmul %589, %576, %cst_260 {dimension_numbers = #tpu.dot_dimension_numbers<[0], [0], [1], [1], [0, 1, 1, 1], [], []>} : vector<8x1xf32>, vector<8x128xf32>, vector<1x128xf32> -> vector<1x128xf32>
    %591 = vector.extract_strided_slice %537 {offsets = [8, 0], sizes = [8, 8], strides = [1, 1]} : vector<16x8xf32> to vector<8x8xf32>
    %cst_261 = arith.constant dense<0.000000e+00> : vector<8x128xf32>
    %592 = tpu.matmul %591, %576, %cst_261 {dimension_numbers = #tpu.dot_dimension_numbers<[0], [0], [1], [1], [0, 1, 1, 1], [], []>} : vector<8x8xf32>, vector<8x128xf32>, vector<8x128xf32> -> vector<8x128xf32>
    %593 = tpu.concatenate %586, %590 in 0 : vector<1x128xf32>, vector<1x128xf32> -> vector<2x128xf32>
    %594 = tpu.concatenate %588, %592 in 0 : vector<8x128xf32>, vector<8x128xf32> -> vector<16x128xf32>
    %c0_262 = arith.constant 0 : index
    %c0_263 = arith.constant 0 : index
    %595 = vector.load %arg42[%c0_262, %c0_263] : memref<16x2xf32, #tpu.memory_space<vmem>>, vector<16x2xf32>
    %cst_264 = arith.constant dense<0.000000e+00> : vector<16x128xf32>
    %596 = tpu.matmul %595, %580, %cst_264 {dimension_numbers = #tpu.dot_dimension_numbers<[1], [0], [0], [1], [0, 0, 1, 1], [], []>} : vector<16x2xf32>, vector<2x128xf32>, vector<16x128xf32> -> vector<16x128xf32>
    %c0_265 = arith.constant 0 : index
    %c0_266 = arith.constant 0 : index
    %597 = vector.load %arg42[%c0_265, %c0_266] : memref<16x2xf32, #tpu.memory_space<vmem>>, vector<16x2xf32>
    %cst_267 = arith.constant dense<0.000000e+00> : vector<16x128xf32>
    %598 = tpu.matmul %597, %584, %cst_267 {dimension_numbers = #tpu.dot_dimension_numbers<[1], [0], [0], [1], [0, 0, 1, 1], [], []>} : vector<16x2xf32>, vector<2x128xf32>, vector<16x128xf32> -> vector<16x128xf32>
    %c0_268 = arith.constant 0 : index
    %c0_269 = arith.constant 0 : index
    %599 = vector.load %arg41[%c0_268, %c0_269] : memref<16x1xf32, #tpu.memory_space<vmem>>, vector<16x1xf32>
    %600 = vector.broadcast %599 : vector<16x1xf32> to vector<16x128xf32>
    %601 = arith.mulf %600, %596 : vector<16x128xf32>
    %cst_270 = arith.constant 5.000000e-01 : f32
    %602 = vector.broadcast %cst_270 : f32 to vector<16x128xf32>
    %603 = arith.cmpf olt, %601, %602 : vector<16x128xf32>
    %604 = arith.extui %603 : vector<16x128xi1> to vector<16x128xi32>
    %605 = arith.sitofp %604 : vector<16x128xi32> to vector<16x128xf32>
    %606 = arith.mulf %605, %594 : vector<16x128xf32>
    %607 = vector.broadcast %599 : vector<16x1xf32> to vector<16x128xf32>
    %608 = arith.mulf %607, %598 : vector<16x128xf32>
    %609 = math.sin %608 : vector<16x128xf32>
    %610 = arith.mulf %606, %609 : vector<16x128xf32>
    %c0_271 = arith.constant 0 : index
    %c0_272 = arith.constant 0 : index
    %611 = vector.load %arg43[%c0_271, %c0_272] : memref<2x16xf32, #tpu.memory_space<vmem>>, vector<2x16xf32>
    %cst_273 = arith.constant dense<0.000000e+00> : vector<2x128xf32>
    %612 = tpu.matmul %611, %610, %cst_273 {dimension_numbers = #tpu.dot_dimension_numbers<[1], [0], [0], [1], [0, 0, 1, 1], [], []>} : vector<2x16xf32>, vector<16x128xf32>, vector<2x128xf32> -> vector<2x128xf32>
    %613 = arith.mulf %593, %612 : vector<2x128xf32>
    %c0_274 = arith.constant 0 : index
    %c0_275 = arith.constant 0 : index
    %614 = vector.load %arg44[%c0_274, %c0_275] : memref<128x128xf32, #tpu.memory_space<vmem>>, vector<128x128xf32>
    %cst_276 = arith.constant dense<0.000000e+00> : vector<2x128xf32>
    %615 = tpu.matmul %613, %614, %cst_276 {dimension_numbers = #tpu.dot_dimension_numbers<[1], [0], [0], [1], [0, 0, 1, 1], [], []>} : vector<2x128xf32>, vector<128x128xf32>, vector<2x128xf32> -> vector<2x128xf32>
    %c0_277 = arith.constant 0 : index
    %c0_278 = arith.constant 0 : index
    %616 = vector.load %arg46[%c0_277, %c0_278] : memref<2x128xf32, #tpu.memory_space<vmem>>, vector<2x128xf32>
    tpu.vector_store %arg46[%c0_277, %c0_278], %615 {strides = array<i32>} : memref<2x128xf32, #tpu.memory_space<vmem>>, vector<2x128xf32>,
    %c0_279 = arith.constant 0 : index
    %c0_280 = arith.constant 0 : index
    %617 = vector.load %arg47[%c0_279, %c0_280] : memref<2x128xf32, #tpu.memory_space<vmem>>, vector<2x128xf32>
    tpu.vector_store %arg47[%c0_279, %c0_280], %593 {strides = array<i32>} : memref<2x128xf32, #tpu.memory_space<vmem>>, vector<2x128xf32>,
    %c0_281 = arith.constant 0 : index
    %c0_282 = arith.constant 0 : index
    %618 = vector.load %arg48[%c0_281, %c0_282] : memref<16x128xf32, #tpu.memory_space<vmem>>, vector<16x128xf32>
    tpu.vector_store %arg48[%c0_281, %c0_282], %594 {strides = array<i32>} : memref<16x128xf32, #tpu.memory_space<vmem>>, vector<16x128xf32>,
    return
  }
}

</mosaic_0001>

<bundles_post_ra>
// kernel: neural_synth_forward.3
= control target key start
LH: loop header
LB: loop body
LE: loop exit
PB: predicated region body
PF: predicated region fallthrough
CT: control target
= control target key end

     0   :  { %s11024_s6 = smov 1   ;;  %s11025_s10 = smov 2   ;;  %s12194_s0 = inlined_call_operand.smem [shape: u32[51], index: -1, kind: input, shape index: {}] }
   0x1   :  { %s11134_s5 = sld [smem:[%s12194_s0]]   ;;  %s11026_s14 = smov 3  }
   0x2   :  { %s11139_s9 = sld [smem:[%s12194_s0 + %s11024_s6]]   ;;  %s11027_s18 = smov 4  }
   0x3   :  { %s11144_s13 = sld [smem:[%s12194_s0 + %s11025_s10]]   ;;  %s11028_s22 = smov 5  }
   0x4   :  { %s11149_s17 = sld [smem:[%s12194_s0 + %s11026_s14]]   ;;  %s11029_s26 = smov 6  }
   0x5   :  { %s11154_s21 = sld [smem:[%s12194_s0 + %s11027_s18]]   ;;  %s11030_s30 = smov 7  }
   0x6   :  { %s11159_s25 = sld [smem:[%s12194_s0 + %s11028_s22]]   ;;  %s11031_s4 = smov 8  }
   0x7   :  { %s11164_s29 = sld [smem:[%s12194_s0 + %s11029_s26]]   ;;  %s11032_s10 = smov 9  }
   0x8   :  { %12224 = sst [smem:[#allocation65_spill]] %s11139_s9  ;;  %s11033_s15 = smov 10  }
   0x9   :  { %12225 = sst [smem:[#allocation66_spill]] %s11144_s13  ;;  %s11034_s20 = smov 11  }
   0xa   :  { %12226 = sst [smem:[#allocation67_spill]] %s11149_s17  ;;  %s11035_s26 = smov 12  }
   0xb   :  { %12227 = sst [smem:[#allocation68_spill]] %s11154_s21  ;;  %s11036_s1 = smov 13  }
   0xc   :  { %12228 = sst [smem:[#allocation69_spill]] %s11159_s25  ;;  %s11037_s7 = smov 14  }
   0xd   :  { %s11169_s3 = sld [smem:[%s12194_s0 + %s11030_s30]]   ;;  %s11039_s22 = smov 16  }
   0xe   :  { %s11174_s8 = sld [smem:[%s12194_s0 + %s11031_s4]]   ;;  %s11040_s28 = smov 17  }
   0xf   :  { %s11179_s14 = sld [smem:[%s12194_s0 + %s11032_s10]]  }
  0x10   :  { %s11184_s19 = sld [smem:[%s12194_s0 + %s11033_s15]]   ;;  %s11038_s15 = smov 15  }
  0x11   :  { %s11189_s24 = sld [smem:[%s12194_s0 + %s11034_s20]]  }
  0x12   :  { %s11194_s30 = sld [smem:[%s12194_s0 + %s11035_s26]]  }
  0x13   :  { %12229 = sst [smem:[#allocation70_spill]] %s11169_s3 }
  0x14   :  { %s11199_s6 = sld [smem:[%s12194_s0 + %s11036_s1]]  }
  0x15   :  { %12230 = sst [smem:[#allocation71_spill]] %s11179_s14 }
  0x16   :  { %12231 = sst [smem:[#allocation72_spill]] %s11184_s19 }
  0x17   :  { %s11204_s12 = sld [smem:[%s12194_s0 + %s11037_s7]]   ;;  %s11041_s7 = smov 18  }
  0x18   :  { %12232 = sst [smem:[#allocation73_spill]] %s11194_s30 }
  0x19   :  { %s11209_s20 = sld [smem:[%s12194_s0 + %s11038_s15]]   ;;  %s11042_s15 = smov 19  }
  0x1a   :  { %12233 = sst [smem:[#allocation74_spill]] %s11199_s6 }
  0x1b   :  { %s11214_s27 = sld [smem:[%s12194_s0 + %s11039_s22]]   ;;  %s11043_s22 = smov 20  }
  0x1c   :  { %s11219_s4 = sld [smem:[%s12194_s0 + %s11040_s28]]   ;;  %s11044_s28 = smov 21  }
  0x1d   :  { %12234 = sst [smem:[#allocation75_spill]] %s11204_s12 }
  0x1e   :  { %s11224_s17 = sld [smem:[%s12194_s0 + %s11041_s7]]   ;;  %s11045_s7 = smov 22  }
  0x1f   :  { %s11229_s25 = sld [smem:[%s12194_s0 + %s11042_s15]]   ;;  %s11046_s15 = smov 23  }
  0x20   :  { %s11234_s13 = sld [smem:[%s12194_s0 + %s11043_s22]]   ;;  %s11047_s22 = smov 24  }
  0x21   :  { %12235 = sst [smem:[#allocation76_spill]] %s11214_s27 }
  0x22   :  { %s11239_s9 = sld [smem:[%s12194_s0 + %s11044_s28]]   ;;  %s11048_s28 = smov 25  }
  0x23   :  { %s11254_s21 = sld [smem:[%s12194_s0 + %s11047_s22]]   ;;  %s11051_s22 = smov 28  }
  0x24   :  { %12236 = sst [smem:[#allocation77_spill]] %s11224_s17 }
  0x25   :  { %12237 = sst [smem:[#allocation78_spill]] %s11229_s25 }
  0x26   :  { %12238 = sst [smem:[#allocation79_spill]] %s11234_s13 }
  0x27   :  { %s11244_s17 = sld [smem:[%s12194_s0 + %s11045_s7]]   ;;  %s11049_s7 = smov 26  }
  0x28   :  { %s11249_s25 = sld [smem:[%s12194_s0 + %s11046_s15]]   ;;  %s11050_s15 = smov 27  }
  0x29   :  { %12240 = sst [smem:[#allocation81_spill]] %s11254_s21 }
  0x2a   :  { %s11259_s12 = sld [smem:[%s12194_s0 + %s11048_s28]]   ;;  %s11052_s28 = smov 29  }
  0x2b   :  { %s11264_s30 = sld [smem:[%s12194_s0 + %s11049_s7]]   ;;  %s11053_s7 = smov 30  }
  0x2c   :  { %s11269_s19 = sld [smem:[%s12194_s0 + %s11050_s15]]   ;;  %s11054_s15 = smov 31  }
  0x2d   :  { %12239 = sst [smem:[#allocation80_spill]] %s11244_s17 }
  0x2e   :  { %s11274_s21 = sld [smem:[%s12194_s0 + %s11051_s22]]   ;;  %s11055_s22 = smov 32  }
  0x2f   :  { %s11279_s17 = sld [smem:[%s12194_s0 + %s11052_s28]]   ;;  %s11056_s28 = smov 33  }
  0x30   :  { %s11289_s13 = sld [smem:[%s12194_s0 + %s11054_s15]]   ;;  %s11058_s15 = smov 35  }
  0x31   :  { %12241 = sst [smem:[#allocation82_spill]] %s11264_s30 }
  0x32   :  { %s11284_s30 = sld [smem:[%s12194_s0 + %s11053_s7]]   ;;  %s11057_s7 = smov 34  }
  0x33   :  { %s11299_s27 = sld [smem:[%s12194_s0 + %s11056_s28]]   ;;  %s11060_s28 = smov 37  }
  0x34   :  { %12242 = sst [smem:[#allocation83_spill]] %s11274_s21 }
  0x35   :  { %s11294_s21 = sld [smem:[%s12194_s0 + %s11055_s22]]   ;;  %s11059_s22 = smov 36  }
  0x36   :  { %s11309_s6 = sld [smem:[%s12194_s0 + %s11058_s15]]   ;;  %s11062_s15 = smov 39  }
  0x38   :  { %12243 = sst [smem:[#allocation84_spill]] %s11284_s30 }
  0x39   :  { %12245 = sst [smem:[#allocation86_spill]] %s11299_s27 }
  0x3a   :  { %s11304_s30 = sld [smem:[%s12194_s0 + %s11057_s7]]   ;;  %s11061_s7 = smov 38  }
  0x3b   :  { %12244 = sst [smem:[#allocation85_spill]] %s11294_s21 }
  0x3c   :  { %12246 = sst [smem:[#allocation87_spill]] %s11309_s6 }
  0x3d   :  { %s11314_s21 = sld [smem:[%s12194_s0 + %s11059_s22]]   ;;  %s11063_s22 = smov 40  }
  0x3e   :  { %s11319_s27 = sld [smem:[%s12194_s0 + %s11060_s28]]   ;;  %s11064_s28 = smov 41  }
  0x3f   :  { %s11324_s14 = sld [smem:[%s12194_s0 + %s11061_s7]]   ;;  %s11065_s7 = smov 42  }
  0x40   :  { %s11329_s6 = sld [smem:[%s12194_s0 + %s11062_s15]]   ;;  %s11066_s15 = smov 43  }
  0x41   :  { %s11334_s3 = sld [smem:[%s12194_s0 + %s11063_s22]]   ;;  %s11067_s22 = smov 44  }
  0x44   :  { %12247 = sst [smem:[#allocation88_spill]] %s11319_s27 }
  0x45   :  { %12248 = sst [smem:[#allocation89_spill]] %s11324_s14 }
  0x46   :  { %12249 = sst [smem:[#allocation90_spill]] %s11329_s6 }
  0x47   :  { %12250 = sst [smem:[#allocation91_spill]] %s11334_s3 }
  0x48   :  { %s11339_s27 = sld [smem:[%s12194_s0 + %s11064_s28]]   ;;  %s11068_s28 = smov 45  }
  0x49   :  { %s11344_s14 = sld [smem:[%s12194_s0 + %s11065_s7]]   ;;  %s11069_s7 = smov 46  }
  0x4a   :  { %s11349_s6 = sld [smem:[%s12194_s0 + %s11066_s15]]   ;;  %s11070_s15 = smov 47  }
  0x4b   :  { %s11354_s3 = sld [smem:[%s12194_s0 + %s11067_s22]]   ;;  %s11071_s22 = smov 48  }
  0x4e   :  { %12251 = sst [smem:[#allocation92_spill]] %s11339_s27 }
  0x4f   :  { %12252 = sst [smem:[#allocation93_spill]] %s11344_s14 }
  0x50   :  { %12253 = sst [smem:[#allocation94_spill]] %s11349_s6 }
  0x51   :  { %12254 = sst [smem:[#allocation95_spill]] %s11354_s3 }
  0x52   :  { %s11359_s27 = sld [smem:[%s12194_s0 + %s11068_s28]]   ;;  %s11072_s28 = smov 49  }
  0x53   :  { %s11364_s14 = sld [smem:[%s12194_s0 + %s11069_s7]]   ;;  %s11073_s7 = smov 50  }
  0x54   :  { %s11369_s6 = sld [smem:[%s12194_s0 + %s11070_s15]]  }
  0x55   :  { %s11374_s3 = sld [smem:[%s12194_s0 + %s11071_s22]]  }
  0x58   :  { %12255 = sst [smem:[#allocation96_spill]] %s11359_s27 }
  0x59   :  { %12256 = sst [smem:[#allocation97_spill]] %s11364_s14 }
  0x5a   :  { %s11379_s27 = sld [smem:[%s12194_s0 + %s11072_s28]]  }
  0x5b   :  { %s11384_s14 = sld [smem:[%s12194_s0 + %s11073_s7]]  }
  0x5c   :  { %107 = vsyncpa [#allocation4], 0 }
  0x5d   :  { %108 = vsyncpa [#allocation7], 0 }
  0x5e   :  { %109 = vsyncpa [#allocation10], 0 }
  0x5f   :  { %110 = vsyncpa [#allocation13], 0 }
  0x60   :  { %111 = vsyncpa [#allocation16], 0 }
  0x61   :  { %112 = vsyncpa [#allocation19], 0 }
  0x62   :  { %113 = vsyncpa [#allocation22], 0 }
  0x63   :  { %114 = vsyncpa [#allocation25], 0 }
  0x64   :  { %115 = vsyncpa [#allocation28], 0 }
  0x65   :  { %116 = vsyncpa [#allocation31], 0 }
  0x66   :  { %117 = vsyncpa [#allocation34], 0 }
  0x67   :  { %118 = vsyncpa [#allocation37], 0 }
  0x68   :  { %119 = vsyncpa [#allocation40], 0 }
  0x69   :  { %120 = vsyncpa [#allocation43], 0 }
  0x6a   :  { %121 = vsyncpa [#allocation5], 0 }
  0x6b   :  { %122 = vsyncpa [#allocation47], 0  ;;  %s11074_s0 = smov [#allocation6]   ;;  %s10332_s16 = scalar_lea.hbm %s11164_s29, 8192 }
  0x6c   :  { %s148_s15 = sshll.u32 %s11074_s0, 4  ;;  %p10333_p0 = scmp.ne.s32.totalorder %s11164_s29, %s10332_s16  ;;  %s149_s15 = int_to_ptr.vmem [resolvable:$true] %s148_s15 }
  0x6d   :  { %p10336_p1 = scmp.lt.u32.totalorder %s10332_s16, %s11164_s29 }
  0x6f   :  { %p10338_p2 = pnand %p10336_p1, %p10333_p0 }
  0x71   :  { %10341 = shalt.err (!%p10338_p2)
}
  0x72   :  { %s10342_s18 = scalar_lea.vmem %s149_s15, 8192  ;;  %p10347_p4 = scmp.lt.s32.totalorder %s149_s15, %s149_s15 }
  0x73   :  { %p10343_p3 = scmp.ne.s32.totalorder %s149_s15, %s10342_s18  ;;  %p10348_p5 = scmp.lt.s32.totalorder %s10342_s18, %s10342_s18 }
  0x75   :  { %p10349_p6 = por %p10348_p5, %p10347_p4 }
  0x77   :  { %p10350_p7 = pnand %p10349_p6, %p10343_p3 }
  0x79   :  { %10353 = shalt.err (!%p10350_p7)
}
  0x7a   :  { %s11075_s22 = smov 512   ;;  %s11076_s23 = smov 32  }
  0x7b   :  { %154 = dma.hbm_to_vmem [thread:$0]  %s11164_s29, 8192, %s149_s15, [#allocation7], %s11075_s22, %s11075_s22, %s11076_s23  }
  0x7c   :  { %s11077_s26 = smov [#allocation9]   ;;  %s10354_s1 = scalar_lea.hbm %s11174_s8, 32768 }
  0x7d   :  { %s170_s28 = sshll.u32 %s11077_s26, 4  ;;  %p10355_p8 = scmp.ne.s32.totalorder %s11174_s8, %s10354_s1  ;;  %s171_s28 = int_to_ptr.vmem [resolvable:$true] %s170_s28 }
  0x7e   :  { %p10358_p9 = scmp.lt.u32.totalorder %s10354_s1, %s11174_s8 }
  0x80   :  { %p10360_p10 = pnand %p10358_p9, %p10355_p8 }
  0x82   :  { %10363 = shalt.err (!%p10360_p10)
}
  0x83   :  { %s10364_s2 = scalar_lea.vmem %s171_s28, 32768  ;;  %p10369_p12 = scmp.lt.s32.totalorder %s171_s28, %s171_s28 }
  0x84   :  { %p10365_p11 = scmp.ne.s32.totalorder %s171_s28, %s10364_s2  ;;  %p10370_p13 = scmp.lt.s32.totalorder %s10364_s2, %s10364_s2 }
  0x86   :  { %p10371_p0 = por %p10370_p13, %p10369_p12 }
  0x88   :  { %p10372_p1 = pnand %p10371_p0, %p10365_p11 }
  0x8a   :  { %10375 = shalt.err (!%p10372_p1)
}
  0x8b   :  { %s11078_s7 = smov 256   ;;  %s11079_s29 = smov 16  }
  0x8c   :  { %176 = dma.hbm_to_vmem [thread:$0]  %s11174_s8, 32768, %s171_s28, [#allocation10], %s11078_s7, %s11078_s7, %s11079_s29  }
  0x8d   :  { %s11080_s10 = smov [#allocation12]   ;;  %s11081_s0 = smov [#allocation15]  }
  0x8e   :  { %s195_s11 = sshll.u32 %s11080_s10, 4  ;;  %s221_s15 = sshll.u32 %s11081_s0, 4  ;;  %s196_s11 = int_to_ptr.vmem [resolvable:$true] %s195_s11  ;;  %s222_s15 = int_to_ptr.vmem [resolvable:$true] %s221_s15 }
  0x8f   :  { %s10376_s16 = scalar_lea.hbm %s11189_s24, 16 }
  0x90   :  { %p10377_p2 = scmp.ne.s32.totalorder %s11189_s24, %s10376_s16  ;;  %p10380_p3 = scmp.lt.u32.totalorder %s10376_s16, %s11189_s24 }
  0x92   :  { %p10382_p4 = pnand %p10380_p3, %p10377_p2 }
  0x94   :  { %10385 = shalt.err (!%p10382_p4)
}
  0x95   :  { %s10386_s18 = scalar_lea.vmem %s196_s11, 16  ;;  %s10390_s22 = scalar_lea.vmem %s196_s11, 32 }
  0x96   :  { %p10387_p5 = scmp.ne.s32.totalorder %s196_s11, %s10386_s18  ;;  %p10391_p6 = scmp.lt.s32.totalorder %s196_s11, %s196_s11 }
  0x97   :  { %p10392_p7 = scmp.lt.s32.totalorder %s10390_s22, %s10386_s18 }
  0x99   :  { %p10393_p8 = por %p10392_p7, %p10391_p6 }
  0x9b   :  { %p10394_p9 = pnand %p10393_p8, %p10387_p5 }
  0x9d   :  { %10397 = shalt.err (!%p10394_p9)
}
  0x9e   :  { %198 = dma.hbm_to_vmem [thread:$0]  %s11189_s24, 16, %s196_s11, [#allocation13]  }
  0x9f   :  { %s10398_s8 = scalar_lea.hbm %s11209_s20, 128 }
  0xa0   :  { %p10399_p10 = scmp.ne.s32.totalorder %s11209_s20, %s10398_s8  ;;  %p10402_p11 = scmp.lt.u32.totalorder %s10398_s8, %s11209_s20 }
  0xa2   :  { %p10404_p12 = pnand %p10402_p11, %p10399_p10 }
  0xa4   :  { %10407 = shalt.err (!%p10404_p12)
}
  0xa5   :  { %s10408_s23 = scalar_lea.vmem %s222_s15, 128  ;;  %p10413_p0 = scmp.lt.s32.totalorder %s222_s15, %s222_s15 }
  0xa6   :  { %p10409_p13 = scmp.ne.s32.totalorder %s222_s15, %s10408_s23  ;;  %p10414_p1 = scmp.lt.s32.totalorder %s10408_s23, %s10408_s23 }
  0xa8   :  { %p10415_p2 = por %p10414_p1, %p10413_p0 }
  0xaa   :  { %p10416_p3 = pnand %p10415_p2, %p10409_p13 }
  0xac   :  { %10419 = shalt.err (!%p10416_p3)
}
  0xad   :  { %224 = dma.hbm_to_vmem [thread:$0]  %s11209_s20, 128, %s222_s15, [#allocation16]  }
  0xae   :  { %s11082_s26 = smov [#allocation18]   ;;  %s11083_s24 = smov [#allocation21]  }
  0xaf   :  { %s241_s28 = sshll.u32 %s11082_s26, 4  ;;  %s266_s1 = sshll.u32 %s11083_s24, 4  ;;  %s242_s28 = int_to_ptr.vmem [resolvable:$true] %s241_s28  ;;  %s267_s1 = int_to_ptr.vmem [resolvable:$true] %s266_s1 }
  0xb0   :  { %s10420_s2 = scalar_lea.hbm %s11219_s4, 16 }
  0xb1   :  { %p10421_p4 = scmp.ne.s32.totalorder %s11219_s4, %s10420_s2  ;;  %p10424_p5 = scmp.lt.u32.totalorder %s10420_s2, %s11219_s4 }
  0xb3   :  { %p10426_p6 = pnand %p10424_p5, %p10421_p4 }
  0xb5   :  { %10429 = shalt.err (!%p10426_p6)
}
  0xb6   :  { %s10430_s7 = scalar_lea.vmem %s242_s28, 16  ;;  %s10434_s10 = scalar_lea.vmem %s242_s28, 32 }
  0xb7   :  { %p10431_p7 = scmp.ne.s32.totalorder %s242_s28, %s10430_s7  ;;  %p10435_p8 = scmp.lt.s32.totalorder %s242_s28, %s242_s28 }
  0xb8   :  { %p10436_p9 = scmp.lt.s32.totalorder %s10434_s10, %s10430_s7 }
  0xba   :  { %p10437_p10 = por %p10436_p9, %p10435_p8 }
  0xbc   :  { %p10438_p11 = pnand %p10437_p10, %p10431_p7 }
  0xbe   :  { %10441 = shalt.err (!%p10438_p11)
}
  0xbf   :  { %244 = dma.hbm_to_vmem [thread:$0]  %s11219_s4, 16, %s242_s28, [#allocation19]  }
  0xc0   :  { %s10442_s20 = scalar_lea.hbm %s11239_s9, 48 }
  0xc1   :  { %p10443_p12 = scmp.ne.s32.totalorder %s11239_s9, %s10442_s20  ;;  %p10446_p13 = scmp.lt.u32.totalorder %s10442_s20, %s11239_s9 }
  0xc3   :  { %p10448_p0 = pnand %p10446_p13, %p10443_p12 }
  0xc5   :  { %10451 = shalt.err (!%p10448_p0)
}
  0xc6   :  { %s10452_s11 = scalar_lea.vmem %s267_s1, 48  ;;  %s10456_s0 = scalar_lea.vmem %s267_s1, 64 }
  0xc7   :  { %p10453_p1 = scmp.ne.s32.totalorder %s267_s1, %s10452_s11  ;;  %p10457_p2 = scmp.lt.s32.totalorder %s267_s1, %s267_s1 }
  0xc8   :  { %p10458_p3 = scmp.lt.s32.totalorder %s10456_s0, %s10452_s11 }
  0xca   :  { %p10459_p4 = por %p10458_p3, %p10457_p2 }
  0xcc   :  { %p10460_p5 = pnand %p10459_p4, %p10453_p1 }
  0xce   :  { %10463 = shalt.err (!%p10460_p5)
}
  0xcf   :  { %s11084_s15 = smov 1   ;;  %s11085_s4 = smov [#allocation24]  }
  0xd0   :  { %272 = dma.hbm_to_vmem [thread:$0]  %s11239_s9, 48, %s267_s1, [#allocation22], %s11079_s29, %s11079_s29, %s11084_s15  }
  0xd1   :  { %s290_s16 = sshll.u32 %s11085_s4, 4  ;;  %s11086_s18 = smov [#allocation27]   ;;  %s291_s16 = int_to_ptr.vmem [resolvable:$true] %s290_s16 }
  0xd2   :  { %s312_s22 = sshll.u32 %s11086_s18, 4  ;;  %s10464_s8 = scalar_lea.hbm %s11249_s25, 1536  ;;  %s313_s22 = int_to_ptr.vmem [resolvable:$true] %s312_s22 }
  0xd3   :  { %p10465_p6 = scmp.ne.s32.totalorder %s11249_s25, %s10464_s8  ;;  %p10468_p7 = scmp.lt.u32.totalorder %s10464_s8, %s11249_s25 }
  0xd5   :  { %p10470_p8 = pnand %p10468_p7, %p10465_p6 }
  0xd7   :  { %10473 = shalt.err (!%p10470_p8)
}
  0xd8   :  { %s10474_s23 = scalar_lea.vmem %s291_s16, 1536  ;;  %p10479_p10 = scmp.lt.s32.totalorder %s291_s16, %s291_s16 }
  0xd9   :  { %p10475_p9 = scmp.ne.s32.totalorder %s291_s16, %s10474_s23  ;;  %p10480_p11 = scmp.lt.s32.totalorder %s10474_s23, %s10474_s23 }
  0xdb   :  { %p10481_p12 = por %p10480_p11, %p10479_p10 }
  0xdd   :  { %p10482_p13 = pnand %p10481_p12, %p10475_p9 }
  0xdf   :  { %10485 = shalt.err (!%p10482_p13)
}
  0xe0   :  { %s11087_s26 = smov 128   ;;  %s11088_s9 = smov 8  }
  0xe1   :  { %296 = dma.hbm_to_vmem [thread:$0]  %s11249_s25, 1536, %s291_s16, [#allocation25], %s11087_s26, %s11087_s26, %s11088_s9  }
  0xe2   :  { %s10486_s28 = scalar_lea.hbm %s11259_s12, 512 }
  0xe3   :  { %p10487_p0 = scmp.ne.s32.totalorder %s11259_s12, %s10486_s28  ;;  %p10490_p1 = scmp.lt.u32.totalorder %s10486_s28, %s11259_s12 }
  0xe5   :  { %p10492_p2 = pnand %p10490_p1, %p10487_p0 }
  0xe7   :  { %10495 = shalt.err (!%p10492_p2)
}
  0xe8   :  { %s10496_s24 = scalar_lea.vmem %s313_s22, 512  ;;  %p10501_p4 = scmp.lt.s32.totalorder %s313_s22, %s313_s22 }
  0xe9   :  { %p10497_p3 = scmp.ne.s32.totalorder %s313_s22, %s10496_s24  ;;  %p10502_p5 = scmp.lt.s32.totalorder %s10496_s24, %s10496_s24 }
  0xeb   :  { %p10503_p6 = por %p10502_p5, %p10501_p4 }
  0xed   :  { %p10504_p7 = pnand %p10503_p6, %p10497_p3 }
  0xef   :  { %10507 = shalt.err (!%p10504_p7)
}
  0xf0   :  { %318 = dma.hbm_to_vmem [thread:$0]  %s11259_s12, 512, %s313_s22, [#allocation28], %s11087_s26, %s11087_s26, %s11088_s9  }
  0xf1   :  { %s11089_s25 = smov [#allocation30]   ;;  %s11090_s2 = smov [#allocation33]  }
  0xf2   :  { %s334_s1 = sshll.u32 %s11089_s25, 4  ;;  %s358_s7 = sshll.u32 %s11090_s2, 4  ;;  %s335_s1 = int_to_ptr.vmem [resolvable:$true] %s334_s1  ;;  %s359_s7 = int_to_ptr.vmem [resolvable:$true] %s358_s7 }
  0xf3   :  { %s10508_s10 = scalar_lea.hbm %s11269_s19, 256 }
  0xf4   :  { %p10509_p8 = scmp.ne.s32.totalorder %s11269_s19, %s10508_s10  ;;  %p10512_p9 = scmp.lt.u32.totalorder %s10508_s10, %s11269_s19 }
  0xf6   :  { %p10514_p10 = pnand %p10512_p9, %p10509_p8 }
  0xf8   :  { %10517 = shalt.err (!%p10514_p10)
}
  0xf9   :  { %s10518_s20 = scalar_lea.vmem %s335_s1, 256  ;;  %p10523_p12 = scmp.lt.s32.totalorder %s335_s1, %s335_s1 }
  0xfa   :  { %p10519_p11 = scmp.ne.s32.totalorder %s335_s1, %s10518_s20  ;;  %p10524_p13 = scmp.lt.s32.totalorder %s10518_s20, %s10518_s20 }
  0xfc   :  { %p10525_p0 = por %p10524_p13, %p10523_p12 }
  0xfe   :  { %p10526_p1 = pnand %p10525_p0, %p10519_p11 }
 0x100   :  { %10529 = shalt.err (!%p10526_p1)
}
 0x101   :  { %340 = dma.hbm_to_vmem [thread:$0]  %s11269_s19, 256, %s335_s1, [#allocation31], %s11087_s26, %s11087_s26, %s11088_s9  }
 0x102   :  { %s10530_s12 = scalar_lea.hbm %s11279_s17, 1536 }
 0x103   :  { %p10531_p2 = scmp.ne.s32.totalorder %s11279_s17, %s10530_s12  ;;  %p10534_p3 = scmp.lt.u32.totalorder %s10530_s12, %s11279_s17 }
 0x105   :  { %p10536_p4 = pnand %p10534_p3, %p10531_p2 }
 0x107   :  { %10539 = shalt.err (!%p10536_p4)
}
 0x108   :  { %s10540_s11 = scalar_lea.vmem %s359_s7, 1536  ;;  %p10545_p6 = scmp.lt.s32.totalorder %s359_s7, %s359_s7 }
 0x109   :  { %p10541_p5 = scmp.ne.s32.totalorder %s359_s7, %s10540_s11  ;;  %p10546_p7 = scmp.lt.s32.totalorder %s10540_s11, %s10540_s11 }
 0x10b   :  { %p10547_p8 = por %p10546_p7, %p10545_p6 }
 0x10d   :  { %p10548_p9 = pnand %p10547_p8, %p10541_p5 }
 0x10f   :  { %10551 = shalt.err (!%p10548_p9)
}
 0x110   :  { %364 = dma.hbm_to_vmem [thread:$0]  %s11279_s17, 1536, %s359_s7, [#allocation34], %s11087_s26, %s11087_s26, %s11088_s9  }
 0x111   :  { %s11091_s19 = smov [#allocation36]   ;;  %s11092_s4 = smov [#allocation39]  }
 0x112   :  { %s382_s0 = sshll.u32 %s11091_s19, 4  ;;  %s409_s16 = sshll.u32 %s11092_s4, 4  ;;  %s383_s0 = int_to_ptr.vmem [resolvable:$true] %s382_s0  ;;  %s410_s16 = int_to_ptr.vmem [resolvable:$true] %s409_s16 }
 0x113   :  { %s10552_s18 = scalar_lea.hbm %s11289_s13, 48 }
 0x114   :  { %p10553_p10 = scmp.ne.s32.totalorder %s11289_s13, %s10552_s18  ;;  %p10556_p11 = scmp.lt.u32.totalorder %s10552_s18, %s11289_s13 }
 0x116   :  { %p10558_p12 = pnand %p10556_p11, %p10553_p10 }
 0x118   :  { %10561 = shalt.err (!%p10558_p12)
}
 0x119   :  { %s10562_s22 = scalar_lea.vmem %s383_s0, 48  ;;  %s10566_s8 = scalar_lea.vmem %s383_s0, 64 }
 0x11a   :  { %p10563_p13 = scmp.ne.s32.totalorder %s383_s0, %s10562_s22  ;;  %p10567_p0 = scmp.lt.s32.totalorder %s383_s0, %s383_s0 }
 0x11b   :  { %p10568_p1 = scmp.lt.s32.totalorder %s10566_s8, %s10562_s22 }
 0x11d   :  { %p10569_p2 = por %p10568_p1, %p10567_p0 }
 0x11f   :  { %p10570_p3 = pnand %p10569_p2, %p10563_p13 }
 0x121   :  { %10573 = shalt.err (!%p10570_p3)
}
 0x122   :  { %388 = dma.hbm_to_vmem [thread:$0]  %s11289_s13, 48, %s383_s0, [#allocation37], %s11079_s29, %s11079_s29, %s11084_s15  }
 0x123   :  { %s10574_s17 = scalar_lea.hbm %s11304_s30, 16 }
 0x124   :  { %p10575_p4 = scmp.ne.s32.totalorder %s11304_s30, %s10574_s17  ;;  %p10578_p5 = scmp.lt.u32.totalorder %s10574_s17, %s11304_s30 }
 0x126   :  { %p10580_p6 = pnand %p10578_p5, %p10575_p4 }
 0x128   :  { %10583 = shalt.err (!%p10580_p6)
}
 0x129   :  { %s10584_s23 = scalar_lea.vmem %s410_s16, 16  ;;  %s10588_s28 = scalar_lea.vmem %s410_s16, 32 }
 0x12a   :  { %p10585_p7 = scmp.ne.s32.totalorder %s410_s16, %s10584_s23  ;;  %p10589_p8 = scmp.lt.s32.totalorder %s410_s16, %s410_s16 }
 0x12b   :  { %p10590_p9 = scmp.lt.s32.totalorder %s10588_s28, %s10584_s23 }
 0x12d   :  { %p10591_p10 = por %p10590_p9, %p10589_p8 }
 0x12f   :  { %p10592_p11 = pnand %p10591_p10, %p10585_p7 }
 0x131   :  { %10595 = shalt.err (!%p10592_p11)
}
 0x132   :  { %412 = dma.hbm_to_vmem [thread:$0]  %s11304_s30, 16, %s410_s16, [#allocation40]  }
 0x133   :  { %s11093_s13 = smov [#allocation42]   ;;  %s11094_s25 = smov [#allocation3]  }
 0x134   :  { %s429_s24 = sshll.u32 %s11093_s13, 4  ;;  %s129_s1 = sshll.u32 %s11094_s25, 4  ;;  %s430_s24 = int_to_ptr.vmem [resolvable:$true] %s429_s24  ;;  %s130_s1 = int_to_ptr.vmem [resolvable:$true] %s129_s1 }
 0x135   :  { %s10596_s2 = scalar_lea.hbm %s11314_s21, 128 }
 0x136   :  { %p10597_p12 = scmp.ne.s32.totalorder %s11314_s21, %s10596_s2  ;;  %p10600_p13 = scmp.lt.u32.totalorder %s10596_s2, %s11314_s21 }
 0x138   :  { %p10602_p0 = pnand %p10600_p13, %p10597_p12 }
 0x13a   :  { %10605 = shalt.err (!%p10602_p0)
}
 0x13b   :  { %s10606_s7 = scalar_lea.vmem %s430_s24, 128  ;;  %p10611_p2 = scmp.lt.s32.totalorder %s430_s24, %s430_s24 }
 0x13c   :  { %p10607_p1 = scmp.ne.s32.totalorder %s430_s24, %s10606_s7  ;;  %p10612_p3 = scmp.lt.s32.totalorder %s10606_s7, %s10606_s7 }
 0x13e   :  { %p10613_p4 = por %p10612_p3, %p10611_p2 }
 0x140   :  { %p10614_p5 = pnand %p10613_p4, %p10607_p1 }
 0x142   :  { %10617 = shalt.err (!%p10614_p5)
}
 0x143   :  { %432 = dma.hbm_to_vmem [thread:$0]  %s11314_s21, 128, %s430_s24, [#allocation43]  }
 0x144   :  { %s10618_s30 = scalar_lea.hbm %s11134_s5, 32 }
 0x145   :  { %p10619_p6 = scmp.ne.s32.totalorder %s11134_s5, %s10618_s30  ;;  %p10622_p7 = scmp.lt.u32.totalorder %s10618_s30, %s11134_s5 }
 0x147   :  { %p10624_p8 = pnand %p10622_p7, %p10619_p6 }
 0x149   :  { %10627 = shalt.err (!%p10624_p8)
}
 0x14a   :  { %s10628_s10 = scalar_lea.vmem %s130_s1, 32  ;;  %p10633_p10 = scmp.lt.s32.totalorder %s130_s1, %s130_s1 }
 0x14b   :  { %p10629_p9 = scmp.ne.s32.totalorder %s130_s1, %s10628_s10  ;;  %p10634_p11 = scmp.lt.s32.totalorder %s10628_s10, %s10628_s10 }
 0x14d   :  { %p10635_p12 = por %p10634_p11, %p10633_p10 }
 0x14f   :  { %p10636_p13 = pnand %p10635_p12, %p10629_p9 }
 0x151   :  { %10639 = shalt.err (!%p10636_p13)
}
 0x152   :  { %s12257_s20 = sld [smem:[#allocation70_spill]]  ;;  %s11095_s12 = smov [#allocation8]  }
 0x153   :  { %132 = dma.hbm_to_vmem [thread:$0]  %s11134_s5, 32, %s130_s1, [#allocation4]  }
 0x154   :  { %s161_s21 = sshll.u32 %s11095_s12, 4  ;;  %s11096_s11 = smov [#allocation11]   ;;  %s162_s21 = int_to_ptr.vmem [resolvable:$true] %s161_s21 }
 0x155   :  { %s183_s19 = sshll.u32 %s11096_s11, 4  ;;  %s184_s19 = int_to_ptr.vmem [resolvable:$true] %s183_s19 }
 0x158   :  { %s10640_s0 = scalar_lea.hbm %s12257_s20, 128 }
 0x159   :  { %p10641_p0 = scmp.ne.s32.totalorder %s12257_s20, %s10640_s0  ;;  %p10644_p1 = scmp.lt.u32.totalorder %s10640_s0, %s12257_s20 }
 0x15b   :  { %p10646_p2 = pnand %p10644_p1, %p10641_p0 }
 0x15d   :  { %10649 = shalt.err (!%p10646_p2)
}
 0x15e   :  { %s10650_s4 = scalar_lea.vmem %s162_s21, 128  ;;  %p10655_p4 = scmp.lt.s32.totalorder %s162_s21, %s162_s21 }
 0x15f   :  { %p10651_p3 = scmp.ne.s32.totalorder %s162_s21, %s10650_s4  ;;  %p10656_p5 = scmp.lt.s32.totalorder %s10650_s4, %s10650_s4 }
 0x161   :  { %p10657_p6 = por %p10656_p5, %p10655_p4 }
 0x163   :  { %p10658_p7 = pnand %p10657_p6, %p10651_p3 }
 0x165   :  { %10661 = shalt.err (!%p10658_p7)
}
 0x166   :  { %s12258_s16 = sld [smem:[#allocation71_spill]] }
 0x167   :  { %164 = dma.hbm_to_vmem [thread:$0]  %s12257_s20, 128, %s162_s21, [#allocation7]  }
 0x16c   :  { %s10662_s5 = scalar_lea.hbm %s12258_s16, 64 }
 0x16d   :  { %p10663_p8 = scmp.ne.s32.totalorder %s12258_s16, %s10662_s5  ;;  %p10666_p9 = scmp.lt.u32.totalorder %s10662_s5, %s12258_s16 }
 0x16f   :  { %p10668_p10 = pnand %p10666_p9, %p10663_p8 }
 0x171   :  { %10671 = shalt.err (!%p10668_p10)
}
 0x172   :  { %s10672_s18 = scalar_lea.vmem %s184_s19, 64  ;;  %p10677_p12 = scmp.lt.s32.totalorder %s184_s19, %s184_s19 }
 0x173   :  { %p10673_p11 = scmp.ne.s32.totalorder %s184_s19, %s10672_s18  ;;  %p10678_p13 = scmp.lt.s32.totalorder %s10672_s18, %s10672_s18 }
 0x175   :  { %p10679_p0 = por %p10678_p13, %p10677_p12 }
 0x177   :  { %p10680_p1 = pnand %p10679_p0, %p10673_p11 }
 0x179   :  { %10683 = shalt.err (!%p10680_p1)
}
 0x17a   :  { %s12259_s22 = sld [smem:[#allocation74_spill]]  ;;  %s11097_s8 = smov [#allocation14]  }
 0x17b   :  { %186 = dma.hbm_to_vmem [thread:$0]  %s12258_s16, 64, %s184_s19, [#allocation10]  }
 0x17c   :  { %s206_s17 = sshll.u32 %s11097_s8, 4  ;;  %s11098_s23 = smov [#allocation17]   ;;  %s207_s17 = int_to_ptr.vmem [resolvable:$true] %s206_s17 }
 0x17d   :  { %s231_s28 = sshll.u32 %s11098_s23, 4  ;;  %s232_s28 = int_to_ptr.vmem [resolvable:$true] %s231_s28 }
 0x180   :  { %s10684_s13 = scalar_lea.hbm %s12259_s22, 256 }
 0x181   :  { %p10685_p2 = scmp.ne.s32.totalorder %s12259_s22, %s10684_s13  ;;  %p10688_p3 = scmp.lt.u32.totalorder %s10684_s13, %s12259_s22 }
 0x183   :  { %p10690_p4 = pnand %p10688_p3, %p10685_p2 }
 0x185   :  { %10693 = shalt.err (!%p10690_p4)
}
 0x186   :  { %s10694_s24 = scalar_lea.vmem %s207_s17, 256  ;;  %p10699_p6 = scmp.lt.s32.totalorder %s207_s17, %s207_s17 }
 0x187   :  { %p10695_p5 = scmp.ne.s32.totalorder %s207_s17, %s10694_s24  ;;  %p10700_p7 = scmp.lt.s32.totalorder %s10694_s24, %s10694_s24 }
 0x189   :  { %p10701_p8 = por %p10700_p7, %p10699_p6 }
 0x18b   :  { %p10702_p9 = pnand %p10701_p8, %p10695_p5 }
 0x18d   :  { %10705 = shalt.err (!%p10702_p9)
}
 0x18e   :  { %s12260_s25 = sld [smem:[#allocation76_spill]] }
 0x18f   :  { %212 = dma.hbm_to_vmem [thread:$0]  %s12259_s22, 256, %s207_s17, [#allocation13], %s11087_s26, %s11087_s26, %s11088_s9  }
 0x194   :  { %s10706_s1 = scalar_lea.hbm %s12260_s25, 16 }
 0x195   :  { %p10707_p10 = scmp.ne.s32.totalorder %s12260_s25, %s10706_s1  ;;  %p10710_p11 = scmp.lt.u32.totalorder %s10706_s1, %s12260_s25 }
 0x197   :  { %p10712_p12 = pnand %p10710_p11, %p10707_p10 }
 0x199   :  { %10715 = shalt.err (!%p10712_p12)
}
 0x19a   :  { %s10716_s2 = scalar_lea.vmem %s232_s28, 16  ;;  %s10720_s7 = scalar_lea.vmem %s232_s28, 32 }
 0x19b   :  { %p10717_p13 = scmp.ne.s32.totalorder %s232_s28, %s10716_s2  ;;  %p10721_p0 = scmp.lt.s32.totalorder %s232_s28, %s232_s28 }
 0x19c   :  { %p10722_p1 = scmp.lt.s32.totalorder %s10720_s7, %s10716_s2 }
 0x19e   :  { %p10723_p2 = por %p10722_p1, %p10721_p0 }
 0x1a0   :  { %p10724_p3 = pnand %p10723_p2, %p10717_p13 }
 0x1a2   :  { %10727 = shalt.err (!%p10724_p3)
}
 0x1a3   :  { %s12261_s30 = sld [smem:[#allocation79_spill]]  ;;  %s11099_s10 = smov [#allocation20]  }
 0x1a4   :  { %234 = dma.hbm_to_vmem [thread:$0]  %s12260_s25, 16, %s232_s28, [#allocation16]  }
 0x1a5   :  { %s254_s20 = sshll.u32 %s11099_s10, 4  ;;  %s11100_s12 = smov [#allocation23]   ;;  %s255_s20 = int_to_ptr.vmem [resolvable:$true] %s254_s20 }
 0x1a6   :  { %s278_s21 = sshll.u32 %s11100_s12, 4  ;;  %s279_s21 = int_to_ptr.vmem [resolvable:$true] %s278_s21 }
 0x1a9   :  { %s10728_s11 = scalar_lea.hbm %s12261_s30, 48 }
 0x1aa   :  { %p10729_p4 = scmp.ne.s32.totalorder %s12261_s30, %s10728_s11  ;;  %p10732_p5 = scmp.lt.u32.totalorder %s10728_s11, %s12261_s30 }
 0x1ac   :  { %p10734_p6 = pnand %p10732_p5, %p10729_p4 }
 0x1ae   :  { %10737 = shalt.err (!%p10734_p6)
}
 0x1af   :  { %s10738_s19 = scalar_lea.vmem %s255_s20, 48  ;;  %s10742_s0 = scalar_lea.vmem %s255_s20, 64 }
 0x1b0   :  { %p10739_p7 = scmp.ne.s32.totalorder %s255_s20, %s10738_s19  ;;  %p10743_p8 = scmp.lt.s32.totalorder %s255_s20, %s255_s20 }
 0x1b1   :  { %p10744_p9 = scmp.lt.s32.totalorder %s10742_s0, %s10738_s19 }
 0x1b3   :  { %p10745_p10 = por %p10744_p9, %p10743_p8 }
 0x1b5   :  { %p10746_p11 = pnand %p10745_p10, %p10739_p7 }
 0x1b7   :  { %10749 = shalt.err (!%p10746_p11)
}
 0x1b8   :  { %s12262_s4 = sld [smem:[#allocation80_spill]] }
 0x1b9   :  { %260 = dma.hbm_to_vmem [thread:$0]  %s12261_s30, 48, %s255_s20, [#allocation19], %s11079_s29, %s11079_s29, %s11084_s15  }
 0x1be   :  { %s10750_s16 = scalar_lea.hbm %s12262_s4, 1536 }
 0x1bf   :  { %p10751_p12 = scmp.ne.s32.totalorder %s12262_s4, %s10750_s16  ;;  %p10754_p13 = scmp.lt.u32.totalorder %s10750_s16, %s12262_s4 }
 0x1c1   :  { %p10756_p0 = pnand %p10754_p13, %p10751_p12 }
 0x1c3   :  { %10759 = shalt.err (!%p10756_p0)
}
 0x1c4   :  { %s10760_s5 = scalar_lea.vmem %s279_s21, 1536  ;;  %p10765_p2 = scmp.lt.s32.totalorder %s279_s21, %s279_s21 }
 0x1c5   :  { %p10761_p1 = scmp.ne.s32.totalorder %s279_s21, %s10760_s5  ;;  %p10766_p3 = scmp.lt.s32.totalorder %s10760_s5, %s10760_s5 }
 0x1c7   :  { %p10767_p4 = por %p10766_p3, %p10765_p2 }
 0x1c9   :  { %p10768_p5 = pnand %p10767_p4, %p10761_p1 }
 0x1cb   :  { %10771 = shalt.err (!%p10768_p5)
}
 0x1cc   :  { %s12263_s18 = sld [smem:[#allocation81_spill]]  ;;  %s11101_s22 = smov [#allocation26]  }
 0x1cd   :  { %284 = dma.hbm_to_vmem [thread:$0]  %s12262_s4, 1536, %s279_s21, [#allocation22], %s11087_s26, %s11087_s26, %s11088_s9  }
 0x1ce   :  { %s303_s8 = sshll.u32 %s11101_s22, 4  ;;  %s11102_s17 = smov [#allocation29]   ;;  %s304_s8 = int_to_ptr.vmem [resolvable:$true] %s303_s8 }
 0x1cf   :  { %s325_s23 = sshll.u32 %s11102_s17, 4  ;;  %s326_s23 = int_to_ptr.vmem [resolvable:$true] %s325_s23 }
 0x1d2   :  { %s10772_s28 = scalar_lea.hbm %s12263_s18, 16 }
 0x1d3   :  { %p10773_p6 = scmp.ne.s32.totalorder %s12263_s18, %s10772_s28  ;;  %p10776_p7 = scmp.lt.u32.totalorder %s10772_s28, %s12263_s18 }
 0x1d5   :  { %p10778_p8 = pnand %p10776_p7, %p10773_p6 }
 0x1d7   :  { %10781 = shalt.err (!%p10778_p8)
}
 0x1d8   :  { %s10782_s13 = scalar_lea.vmem %s304_s8, 16  ;;  %s10786_s24 = scalar_lea.vmem %s304_s8, 32 }
 0x1d9   :  { %p10783_p9 = scmp.ne.s32.totalorder %s304_s8, %s10782_s13  ;;  %p10787_p10 = scmp.lt.s32.totalorder %s304_s8, %s304_s8 }
 0x1da   :  { %p10788_p11 = scmp.lt.s32.totalorder %s10786_s24, %s10782_s13 }
 0x1dc   :  { %p10789_p12 = por %p10788_p11, %p10787_p10 }
 0x1de   :  { %p10790_p13 = pnand %p10789_p12, %p10783_p9 }
 0x1e0   :  { %10793 = shalt.err (!%p10790_p13)
}
 0x1e1   :  { %s12264_s25 = sld [smem:[#allocation82_spill]] }
 0x1e2   :  { %306 = dma.hbm_to_vmem [thread:$0]  %s12263_s18, 16, %s304_s8, [#allocation25]  }
 0x1e7   :  { %s10794_s1 = scalar_lea.hbm %s12264_s25, 16 }
 0x1e8   :  { %p10795_p0 = scmp.ne.s32.totalorder %s12264_s25, %s10794_s1  ;;  %p10798_p1 = scmp.lt.u32.totalorder %s10794_s1, %s12264_s25 }
 0x1ea   :  { %p10800_p2 = pnand %p10798_p1, %p10795_p0 }
 0x1ec   :  { %10803 = shalt.err (!%p10800_p2)
}
 0x1ed   :  { %s10804_s2 = scalar_lea.vmem %s326_s23, 16  ;;  %s10808_s7 = scalar_lea.vmem %s326_s23, 32 }
 0x1ee   :  { %p10805_p3 = scmp.ne.s32.totalorder %s326_s23, %s10804_s2  ;;  %p10809_p4 = scmp.lt.s32.totalorder %s326_s23, %s326_s23 }
 0x1ef   :  { %p10810_p5 = scmp.lt.s32.totalorder %s10808_s7, %s10804_s2 }
 0x1f1   :  { %p10811_p6 = por %p10810_p5, %p10809_p4 }
 0x1f3   :  { %p10812_p7 = pnand %p10811_p6, %p10805_p3 }
 0x1f5   :  { %10815 = shalt.err (!%p10812_p7)
}
 0x1f6   :  { %s12265_s30 = sld [smem:[#allocation83_spill]]  ;;  %s11103_s10 = smov [#allocation32]  }
 0x1f7   :  { %328 = dma.hbm_to_vmem [thread:$0]  %s12264_s25, 16, %s326_s23, [#allocation28]  }
 0x1f8   :  { %s346_s20 = sshll.u32 %s11103_s10, 4  ;;  %s11104_s12 = smov [#allocation35]   ;;  %s347_s20 = int_to_ptr.vmem [resolvable:$true] %s346_s20 }
 0x1f9   :  { %s370_s21 = sshll.u32 %s11104_s12, 4  ;;  %s371_s21 = int_to_ptr.vmem [resolvable:$true] %s370_s21 }
 0x1fc   :  { %s10816_s11 = scalar_lea.hbm %s12265_s30, 256 }
 0x1fd   :  { %p10817_p8 = scmp.ne.s32.totalorder %s12265_s30, %s10816_s11  ;;  %p10820_p9 = scmp.lt.u32.totalorder %s10816_s11, %s12265_s30 }
 0x1ff   :  { %p10822_p10 = pnand %p10820_p9, %p10817_p8 }
 0x201   :  { %10825 = shalt.err (!%p10822_p10)
}
 0x202   :  { %s10826_s19 = scalar_lea.vmem %s347_s20, 256  ;;  %p10831_p12 = scmp.lt.s32.totalorder %s347_s20, %s347_s20 }
 0x203   :  { %p10827_p11 = scmp.ne.s32.totalorder %s347_s20, %s10826_s19  ;;  %p10832_p13 = scmp.lt.s32.totalorder %s10826_s19, %s10826_s19 }
 0x205   :  { %p10833_p0 = por %p10832_p13, %p10831_p12 }
 0x207   :  { %p10834_p1 = pnand %p10833_p0, %p10827_p11 }
 0x209   :  { %10837 = shalt.err (!%p10834_p1)
}
 0x20a   :  { %s12266_s0 = sld [smem:[#allocation84_spill]] }
 0x20b   :  { %352 = dma.hbm_to_vmem [thread:$0]  %s12265_s30, 256, %s347_s20, [#allocation31], %s11087_s26, %s11087_s26, %s11088_s9  }
 0x210   :  { %s10838_s4 = scalar_lea.hbm %s12266_s0, 48 }
 0x211   :  { %p10839_p2 = scmp.ne.s32.totalorder %s12266_s0, %s10838_s4  ;;  %p10842_p3 = scmp.lt.u32.totalorder %s10838_s4, %s12266_s0 }
 0x213   :  { %p10844_p4 = pnand %p10842_p3, %p10839_p2 }
 0x215   :  { %10847 = shalt.err (!%p10844_p4)
}
 0x216   :  { %s10848_s16 = scalar_lea.vmem %s371_s21, 48  ;;  %s10852_s5 = scalar_lea.vmem %s371_s21, 64 }
 0x217   :  { %p10849_p5 = scmp.ne.s32.totalorder %s371_s21, %s10848_s16  ;;  %p10853_p6 = scmp.lt.s32.totalorder %s371_s21, %s371_s21 }
 0x218   :  { %p10854_p7 = scmp.lt.s32.totalorder %s10852_s5, %s10848_s16 }
 0x21a   :  { %p10855_p8 = por %p10854_p7, %p10853_p6 }
 0x21c   :  { %p10856_p9 = pnand %p10855_p8, %p10849_p5 }
 0x21e   :  { %10859 = shalt.err (!%p10856_p9)
}
 0x21f   :  { %s12267_s18 = sld [smem:[#allocation85_spill]]  ;;  %s11105_s22 = smov [#allocation38]  }
 0x220   :  { %376 = dma.hbm_to_vmem [thread:$0]  %s12266_s0, 48, %s371_s21, [#allocation34], %s11079_s29, %s11079_s29, %s11084_s15  }
 0x221   :  { %s394_s8 = sshll.u32 %s11105_s22, 4  ;;  %s11106_s17 = smov [#allocation41]   ;;  %s395_s8 = int_to_ptr.vmem [resolvable:$true] %s394_s8 }
 0x222   :  { %s419_s23 = sshll.u32 %s11106_s17, 4  ;;  %s420_s23 = int_to_ptr.vmem [resolvable:$true] %s419_s23 }
 0x225   :  { %s10860_s28 = scalar_lea.hbm %s12267_s18, 48 }
 0x226   :  { %p10861_p10 = scmp.ne.s32.totalorder %s12267_s18, %s10860_s28  ;;  %p10864_p11 = scmp.lt.u32.totalorder %s10860_s28, %s12267_s18 }
 0x228   :  { %p10866_p12 = pnand %p10864_p11, %p10861_p10 }
 0x22a   :  { %10869 = shalt.err (!%p10866_p12)
}
 0x22b   :  { %s10870_s13 = scalar_lea.vmem %s395_s8, 48  ;;  %s10874_s24 = scalar_lea.vmem %s395_s8, 64 }
 0x22c   :  { %p10871_p13 = scmp.ne.s32.totalorder %s395_s8, %s10870_s13  ;;  %p10875_p0 = scmp.lt.s32.totalorder %s395_s8, %s395_s8 }
 0x22d   :  { %p10876_p1 = scmp.lt.s32.totalorder %s10874_s24, %s10870_s13 }
 0x22f   :  { %p10877_p2 = por %p10876_p1, %p10875_p0 }
 0x231   :  { %p10878_p3 = pnand %p10877_p2, %p10871_p13 }
 0x233   :  { %10881 = shalt.err (!%p10878_p3)
}
 0x234   :  { %s12268_s25 = sld [smem:[#allocation87_spill]] }
 0x235   :  { %400 = dma.hbm_to_vmem [thread:$0]  %s12267_s18, 48, %s395_s8, [#allocation37], %s11079_s29, %s11079_s29, %s11084_s15  }
 0x23a   :  { %s10882_s1 = scalar_lea.hbm %s12268_s25, 128 }
 0x23b   :  { %p10883_p4 = scmp.ne.s32.totalorder %s12268_s25, %s10882_s1  ;;  %p10886_p5 = scmp.lt.u32.totalorder %s10882_s1, %s12268_s25 }
 0x23d   :  { %p10888_p6 = pnand %p10886_p5, %p10883_p4 }
 0x23f   :  { %10891 = shalt.err (!%p10888_p6)
}
 0x240   :  { %s10892_s2 = scalar_lea.vmem %s420_s23, 128  ;;  %p10897_p8 = scmp.lt.s32.totalorder %s420_s23, %s420_s23 }
 0x241   :  { %p10893_p7 = scmp.ne.s32.totalorder %s420_s23, %s10892_s2  ;;  %p10898_p9 = scmp.lt.s32.totalorder %s10892_s2, %s10892_s2 }
 0x243   :  { %p10899_p10 = por %p10898_p9, %p10897_p8 }
 0x245   :  { %p10900_p11 = pnand %p10899_p10, %p10893_p7 }
 0x247   :  { %10903 = shalt.err (!%p10900_p11)
}
 0x248   :  { %s12269_s7 = sld [smem:[#allocation95_spill]]  ;;  %s11107_s30 = smov [#allocation44]  }
 0x249   :  { %422 = dma.hbm_to_vmem [thread:$0]  %s12268_s25, 128, %s420_s23, [#allocation40]  }
 0x24a   :  { %s452_s29 = sshll.u32 %s11107_s30, 4  ;;  %s453_s29 = int_to_ptr.vmem [resolvable:$true] %s452_s29 }
 0x24e   :  { %s10904_s15 = scalar_lea.hbm %s12269_s7, 2048 }
 0x24f   :  { %p10905_p12 = scmp.ne.s32.totalorder %s12269_s7, %s10904_s15  ;;  %p10908_p13 = scmp.lt.u32.totalorder %s10904_s15, %s12269_s7 }
 0x251   :  { %p10910_p0 = pnand %p10908_p13, %p10905_p12 }
 0x253   :  { %10913 = shalt.err (!%p10910_p0)
}
 0x254   :  { %s10914_s10 = scalar_lea.vmem %s453_s29, 2048  ;;  %p10919_p2 = scmp.lt.s32.totalorder %s453_s29, %s453_s29 }
 0x255   :  { %p10915_p1 = scmp.ne.s32.totalorder %s453_s29, %s10914_s10  ;;  %p10920_p3 = scmp.lt.s32.totalorder %s10914_s10, %s10914_s10 }
 0x257   :  { %p10921_p4 = por %p10920_p3, %p10919_p2 }
 0x259   :  { %p10922_p5 = pnand %p10921_p4, %p10915_p1 }
 0x25b   :  { %10925 = shalt.err (!%p10922_p5)
}
 0x25c   :  { %458 = dma.hbm_to_vmem [thread:$0]  %s12269_s7, 2048, %s453_s29, [#allocation43], %s11087_s26, %s11087_s26, %s11088_s9  }
 0x25d   :  { %10992 = dma.done.wait [#allocation4], 32  }
 0x25e   :  { %10993 = vsyncadd [#allocation4], 4294967264 }
 0x25f   :  { %10994 = dma.done.wait [#allocation7], 8320  }
 0x260   :  { %10995 = vsyncadd [#allocation7], 4294958976 }
 0x261   :  { %10996 = dma.done.wait [#allocation10], 32832  }
 0x262   :  { %10997 = vsyncadd [#allocation10], 4294934464 }
 0x263   :  { %10998 = dma.done.wait [#allocation13], 272  }
 0x264   :  { %10999 = vsyncadd [#allocation13], 4294967024 }
 0x265   :  { %11000 = dma.done.wait [#allocation16], 144  }
 0x266   :  { %11001 = vsyncadd [#allocation16], 4294967152 }
 0x267   :  { %11002 = dma.done.wait [#allocation19], 64  }
 0x268   :  { %11003 = vsyncadd [#allocation19], 4294967232 }
 0x269   :  { %11004 = dma.done.wait [#allocation22], 1584  }
 0x26a   :  { %11005 = vsyncadd [#allocation22], 4294965712 }
 0x26b   :  { %11006 = dma.done.wait [#allocation25], 1552  }
 0x26c   :  { %11007 = vsyncadd [#allocation25], 4294965744 }
 0x26d   :  { %11008 = dma.done.wait [#allocation28], 528  }
 0x26e   :  { %11009 = vsyncadd [#allocation28], 4294966768 }
 0x26f   :  { %11010 = dma.done.wait [#allocation31], 512  }
 0x270   :  { %11011 = vsyncadd [#allocation31], 4294966784 }
 0x271   :  { %11012 = dma.done.wait [#allocation34], 1584  }
 0x272   :  { %11013 = vsyncadd [#allocation34], 4294965712 }
 0x273   :  { %11014 = dma.done.wait [#allocation37], 96  }
 0x274   :  { %11015 = vsyncadd [#allocation37], 4294967200 }
 0x275   :  { %11016 = dma.done.wait [#allocation40], 144  }
 0x276   :  { %11017 = vsyncadd [#allocation40], 4294967152 }
 0x277   :  { %11018 = dma.done.wait [#allocation43], 2176  }
 0x278   :  { %11019 = vsyncadd [#allocation43], 4294965120  ;;  %v11108_v0 = vmov 0   ;;  %v543_v1 = vld [vmem:[#allocation6] sm:$0xff]  ;;  %v544_v14 = vld [vmem:[#allocation6 + $0x8] sm:$0xff]  ;;  %s12270_s20 = sld [smem:[#allocation72_spill]] }
 0x279   :  { %1001 = vmatprep.mubr.bf16.mxu0 %v11108_v0  ;;  %1042 = vmatprep.mubr.bf16.mxu1 %v11108_v0  ;;  %v547_v2 = vld [vmem:[#allocation6 + $0x20] sm:$0xff]  ;;  %v548_v15 = vld [vmem:[#allocation6 + $0x28] sm:$0xff]  ;;  %v541_v57 = vld [vmem:[#allocation3] sm:$0x3]  ;;  %s12271_s12 = sld [smem:[#allocation73_spill]]  ;;  %s12272_s21 = sld [smem:[#allocation75_spill]] }
 0x27a   :  { %9806 = vset.pattern.permute.xlu0 %v11108_v0  ;;  %9807 = vset.pattern.permute.xlu1 %v11108_v0  ;;  %v551_v3 = vld [vmem:[#allocation6 + $0x40] sm:$0xff]  ;;  %v7899_v4 = vcombine.high %v543_v1, %v547_v2  ;;  %v7898_v5 = vcombine.low %v543_v1, %v547_v2  ;;  %v552_v16 = vld [vmem:[#allocation6 + $0x48] sm:$0xff]  ;;  %v7901_v18 = vcombine.high %v544_v14, %v548_v15  ;;  %v545_v59 = vld [vmem:[#allocation6 + $0x10] sm:$0xff]  ;;  %vm3389_vm0 = vcmask 15360   ;;  %s12273_s11 = sld [smem:[#allocation96_spill]]  ;;  %s12274_s19 = sld [smem:[#allocation68_spill]] }
 0x27b   :  { %v555_v6 = vld [vmem:[#allocation6 + $0x60] sm:$0xff]  ;;  %v556_v17 = vld [vmem:[#allocation6 + $0x68] sm:$0xff]  ;;  %v7900_v19 = vcombine.low %v544_v14, %v548_v15  ;;  %v549_v60 = vld [vmem:[#allocation6 + $0x30] sm:$0xff]  ;;  %vm3396_vm1 = vcmask 1041408   ;;  %s12275_s0 = sld [smem:[#allocation65_spill]]  ;;  %s12276_s4 = sld [smem:[#allocation66_spill]] }
 0x27c   :  { %v7907_v7 = vcombine.high %v551_v3, %v555_v6  ;;  %v559_v8 = vld [vmem:[#allocation6 + $0x80] sm:$0xff]  ;;  %969 = vmatprep.subr.bf16.mxu0 %v7899_v4  ;;  %v7906_v10 = vcombine.low %v551_v3, %v555_v6  ;;  %v7909_v20 = vcombine.high %v552_v16, %v556_v17  ;;  %v560_v22 = vld [vmem:[#allocation6 + $0x88] sm:$0xff]  ;;  %1010 = vmatprep.subr.bf16.mxu1 %v7901_v18  ;;  %v553_v4 = vld [vmem:[#allocation6 + $0x50] sm:$0xff]  ;;  %s11109_s16 = smov 120   ;;  %vm3636_vm2 = vcmask 64512   ;;  %s12277_s5 = sld [smem:[#allocation78_spill]] }
 0x27d   :  { %v563_v9 = vld [vmem:[#allocation6 + $0xa0] sm:$0xff]  ;;  %970 = vmatpush1.bf16.msra.mxu0 %v7898_v5  ;;  %v564_v23 = vld [vmem:[#allocation6 + $0xa8] sm:$0xff]  ;;  %1011 = vmatpush1.bf16.msra.mxu1 %v7900_v19  ;;  %v7908_v27 = vcombine.low %v552_v16, %v556_v17  ;;  %v7903_v2 = vcombine.high %v545_v59, %v549_v60  ;;  %v557_v5 = vld [vmem:[#allocation6 + $0x70] sm:$0xff]  ;;  %v11538_v6 = vpack.c.bf16 %v541_v57, %v541_v57  ;;  %vm3750_vm3 = vcmask 785408   ;;  %s12278_s18 = sld [smem:[#allocation77_spill]]  ;;  %s11113_s22 = smov 64  }
 0x27e   :  { %971 = vmatprep.subr.bf16.mxu0 %v7907_v7  ;;  %v7915_v11 = vcombine.high %v559_v8, %v563_v9  ;;  %v567_v12 = vld [vmem:[#allocation6 + $0xc0] sm:$0xff]  ;;  %v7914_v21 = vcombine.low %v559_v8, %v563_v9  ;;  %1012 = vmatprep.subr.bf16.mxu1 %v7909_v20  ;;  %v7917_v28 = vcombine.high %v560_v22, %v564_v23  ;;  %v568_v30 = vld [vmem:[#allocation6 + $0xc8] sm:$0xff]  ;;  %v546_v8 = vld [vmem:[#allocation6 + $0x18] sm:$0xff]  ;;  %vm4628_vm4 = vcmask 130048   ;;  %s11114_s8 = smov 96   ;;  %s12279_s17 = sld [smem:[#allocation86_spill]] }
 0x27f   :  { %v571_v13 = vld [vmem:[#allocation6 + $0xe0] sm:$0xff]  ;;  %v572_v31 = vld [vmem:[#allocation6 + $0xe8] sm:$0xff]  ;;  %v7916_v35 = vcombine.low %v560_v22, %v564_v23  ;;  %v7902_v9 = vcombine.low %v545_v59, %v549_v60  ;;  %v565_v14 = vld [vmem:[#allocation6 + $0xb0] sm:$0xff]  ;;  %v7910_v17 = vcombine.low %v553_v4, %v557_v5  ;;  %vm11111_vm5 = vmmov 0   ;;  %s12280_s23 = sld [smem:[#allocation88_spill]]  ;;  %s12281_s28 = sld [smem:[#allocation89_spill]] }
 0x280   :  { %v7923_v24 = vcombine.high %v567_v12, %v571_v13  ;;  %v575_v25 = vld [vmem:[#allocation6 + $0x100] sm:$0xff]  ;;  %v7922_v29 = vcombine.low %v567_v12, %v571_v13  ;;  %v7925_v36 = vcombine.high %v568_v30, %v572_v31  ;;  %v576_v38 = vld [vmem:[#allocation6 + $0x108] sm:$0xff]  ;;  %v7924_v43 = vcombine.low %v568_v30, %v572_v31  ;;  %v561_v13 = vld [vmem:[#allocation6 + $0x90] sm:$0xff]  ;;  %s12282_s13 = sld [smem:[#allocation69_spill]]  ;;  %s11115_s24 = smov 119  }
 0x281   :  { %972 = vmatpush1.bf16.msra.mxu0 %v7906_v10  ;;  %v579_v26 = vld [vmem:[#allocation6 + $0x120] sm:$0xff]  ;;  %1013 = vmatpush1.bf16.msra.mxu1 %v7908_v27  ;;  %v580_v39 = vld [vmem:[#allocation6 + $0x128] sm:$0xff]  ;;  %v550_v10 = vld [vmem:[#allocation6 + $0x38] sm:$0xff]  ;;  %v7919_v19 = vcombine.high %v561_v13, %v565_v14  ;;  %vm4825_vm6 = vcmask 254976   ;;  %vm4721_vm7 = vcmask 261120   ;;  %vm4933_vm8 = vcmask 257026  }
 0x282   :  { %973 = vmatprep.subr.bf16.mxu0 %v7915_v11  ;;  %v7931_v32 = vcombine.high %v575_v25, %v579_v26  ;;  %v583_v33 = vld [vmem:[#allocation6 + $0x140] sm:$0xff]  ;;  %1014 = vmatprep.subr.bf16.mxu1 %v7917_v28  ;;  %v7930_v37 = vcombine.low %v575_v25, %v579_v26  ;;  %v7933_v44 = vcombine.high %v576_v38, %v580_v39  ;;  %v584_v46 = vld [vmem:[#allocation6 + $0x148] sm:$0xff]  ;;  %v554_v16 = vld [vmem:[#allocation6 + $0x58] sm:$0xff]  ;;  %vm5155_vm9 = vcmask 261126   ;;  %s11116_s25 = smov 127   ;;  %s12283_s1 = sld [smem:[#allocation90_spill]] }
 0x283   :  { %v587_v34 = vld [vmem:[#allocation6 + $0x160] sm:$0xff]  ;;  %v588_v47 = vld [vmem:[#allocation6 + $0x168] sm:$0xff]  ;;  %v7932_v51 = vcombine.low %v576_v38, %v580_v39  ;;  %v7911_v11 = vcombine.high %v553_v4, %v557_v5  ;;  %v7905_v15 = vcombine.high %v546_v8, %v550_v10  ;;  %v558_v18 = vld [vmem:[#allocation6 + $0x78] sm:$0xff]  ;;  %v7904_v22 = vcombine.low %v546_v8, %v550_v10  ;;  %s12284_s2 = sld [smem:[#allocation67_spill]]  ;;  %s12286_s30 = sld [smem:[#allocation92_spill]] }
 0x284   :  { %v7939_v40 = vcombine.high %v583_v33, %v587_v34  ;;  %v591_v41 = vld [vmem:[#allocation6 + $0x180] sm:$0xff]  ;;  %v7938_v45 = vcombine.low %v583_v33, %v587_v34  ;;  %v7941_v52 = vcombine.high %v584_v46, %v588_v47  ;;  %v592_v53 = vld [vmem:[#allocation6 + $0x188] sm:$0xff]  ;;  %v7940_v58 = vcombine.low %v584_v46, %v588_v47  ;;  %v569_v20 = vld [vmem:[#allocation6 + $0xd0] sm:$0xff]  ;;  %s12285_s7 = sld [smem:[#allocation91_spill]]  ;;  %s12287_s29 = sld [smem:[#allocation93_spill]] }
 0x285   :  { %974 = vmatpush1.bf16.msra.mxu0 %v7914_v21  ;;  %v595_v42 = vld [vmem:[#allocation6 + $0x1a0] sm:$0xff]  ;;  %1015 = vmatpush1.bf16.msra.mxu1 %v7916_v35  ;;  %v596_v55 = vld [vmem:[#allocation6 + $0x1a8] sm:$0xff]  ;;  %v573_v21 = vld [vmem:[#allocation6 + $0xf0] sm:$0xff]  ;;  %v7913_v23 = vcombine.high %v554_v16, %v558_v18  ;;  %v7918_v25 = vcombine.low %v561_v13, %v565_v14  ;;  %v7912_v30 = vcombine.low %v554_v16, %v558_v18  ;;  %vm5044_vm10 = vcmask 259076  }
 0x286   :  { %975 = vmatprep.subr.bf16.mxu0 %v7923_v24  ;;  %1016 = vmatprep.subr.bf16.mxu1 %v7925_v36  ;;  %v7947_v48 = vcombine.high %v591_v41, %v595_v42  ;;  %v599_v49 = vld [vmem:[#allocation6 + $0x1c0] sm:$0xff]  ;;  %v7946_v54 = vcombine.low %v591_v41, %v595_v42  ;;  %v7949_v61 = vcombine.high %v592_v53, %v596_v55  ;;  %v600_v62 = vld [vmem:[#allocation6 + $0x1c8] sm:$0xff]  ;;  %v562_v24 = vld [vmem:[#allocation6 + $0x98] sm:$0xff] }
 0x287   :  { %v603_v50 = vld [vmem:[#allocation6 + $0x1e0] sm:$0xff]  ;;  %v604_v1 = vld [vmem:[#allocation6 + $0x1e8] sm:$0xff]  ;;  %v7948_v3 = vcombine.low %v592_v53, %v596_v55  ;;  %v566_v26 = vld [vmem:[#allocation6 + $0xb8] sm:$0xff]  ;;  %v7927_v27 = vcombine.high %v569_v20, %v573_v21  ;;  %v7926_v33 = vcombine.low %v569_v20, %v573_v21 }
 0x288   :  { %v7955_v56 = vcombine.high %v599_v49, %v603_v50  ;;  %v7954_v63 = vcombine.low %v599_v49, %v603_v50  ;;  %v7957_v7 = vcombine.high %v600_v62, %v604_v1  ;;  %v7956_v12 = vcombine.low %v600_v62, %v604_v1  ;;  %v577_v28 = vld [vmem:[#allocation6 + $0x110] sm:$0xff]  ;;  %v574_v34 = vld [vmem:[#allocation6 + $0xf8] sm:$0xff] }
 0x289   :  { %976 = vmatpush1.bf16.msra.mxu0 %v7922_v29  ;;  %1017 = vmatpush1.bf16.msra.mxu1 %v7924_v43  ;;  %v581_v29 = vld [vmem:[#allocation6 + $0x130] sm:$0xff]  ;;  %v7921_v31 = vcombine.high %v562_v24, %v566_v26  ;;  %v7920_v38 = vcombine.low %v562_v24, %v566_v26  ;;  %v582_v42 = vld [vmem:[#allocation6 + $0x138] sm:$0xff] }
 0x28a   :  { %977 = vmatprep.subr.bf16.mxu0 %v7931_v32  ;;  %1018 = vmatprep.subr.bf16.mxu1 %v7933_v44  ;;  %v570_v32 = vld [vmem:[#allocation6 + $0xd8] sm:$0xff]  ;;  %v7935_v35 = vcombine.high %v577_v28, %v581_v29  ;;  %v585_v36 = vld [vmem:[#allocation6 + $0x150] sm:$0xff]  ;;  %v7934_v41 = vcombine.low %v577_v28, %v581_v29 }
 0x28b   :  { %v7929_v39 = vcombine.high %v570_v32, %v574_v34  ;;  %v593_v43 = vld [vmem:[#allocation6 + $0x190] sm:$0xff]  ;;  %v586_v47 = vld [vmem:[#allocation6 + $0x158] sm:$0xff] }
 0x28c   :  { %v597_v44 = vld [vmem:[#allocation6 + $0x1b0] sm:$0xff]  ;;  %v590_v49 = vld [vmem:[#allocation6 + $0x178] sm:$0xff] }
 0x28d   :  { %978 = vmatpush1.bf16.msra.mxu0 %v7930_v37  ;;  %1019 = vmatpush1.bf16.msra.mxu1 %v7932_v51  ;;  %v589_v37 = vld [vmem:[#allocation6 + $0x170] sm:$0xff]  ;;  %v7951_v50 = vcombine.high %v593_v43, %v597_v44  ;;  %v594_v55 = vld [vmem:[#allocation6 + $0x198] sm:$0xff]  ;;  %v7944_v59 = vcombine.low %v586_v47, %v590_v49 }
 0x28e   :  { %979 = vmatprep.subr.bf16.mxu0 %v7939_v40  ;;  %1020 = vmatprep.subr.bf16.mxu1 %v7941_v52  ;;  %v578_v40 = vld [vmem:[#allocation6 + $0x118] sm:$0xff]  ;;  %v601_v51 = vld [vmem:[#allocation6 + $0x1d0] sm:$0xff] }
 0x28f   :  { %v7937_v46 = vcombine.high %v578_v40, %v582_v42  ;;  %v605_v52 = vld [vmem:[#allocation6 + $0x1f0] sm:$0xff]  ;;  %v7936_v53 = vcombine.low %v578_v40, %v582_v42  ;;  %v598_v57 = vld [vmem:[#allocation6 + $0x1b8] sm:$0xff] }
 0x290   :  { %v602_v60 = vld [vmem:[#allocation6 + $0x1d8] sm:$0xff]  ;;  %v7953_v62 = vcombine.high %v594_v55, %v598_v57  ;;  %v7958_v1 = vcombine.low %v601_v51, %v605_v52  ;;  %v9825_v16 = vld [vmem:[#allocation9 + $0x4c] ss:$16 sps:$4 sm:$0xff]   ;;  %v9835_v26 = vld [vmem:[#allocation9 + $0x88] ss:$16 sps:$4 sm:$0xff]  }
 0x291   :  { %980 = vmatpush1.bf16.msra.mxu0 %v7938_v45  ;;  %1021 = vmatpush1.bf16.msra.mxu1 %v7940_v58  ;;  %v7928_v45 = vcombine.low %v570_v32, %v574_v34  ;;  %v7959_v58 = vcombine.high %v601_v51, %v605_v52  ;;  %v9816_v5 = vld [vmem:[#allocation9 + $0x24] ss:$16 sps:$4 sm:$0xff]   ;;  %v9820_v13 = vld [vmem:[#allocation9 + $0x40] ss:$16 sps:$4 sm:$0xff]   ;;  %v9831_v20 = vld [vmem:[#allocation9 + $0x6c] ss:$16 sps:$4 sm:$0xff]  }
 0x292   :  { %981 = vmatprep.subr.bf16.mxu0 %v7947_v48  ;;  %1022 = vmatprep.subr.bf16.mxu1 %v7949_v61  ;;  %v7942_v48 = vcombine.low %v585_v36, %v589_v37  ;;  %v606_v61 = vld [vmem:[#allocation6 + $0x1f8] sm:$0xff]  ;;  %v9837_v24 = vld [vmem:[#allocation9 + $0x8c] ss:$16 sps:$4 sm:$0xff]   ;;  %v9847_v34 = vld [vmem:[#allocation9 + $0xc8] ss:$16 sps:$4 sm:$0xff]  }
 0x293   :  { %v7961_v4 = vcombine.high %v602_v60, %v606_v61  ;;  %v7960_v8 = vcombine.low %v602_v60, %v606_v61  ;;  %v9822_v10 = vld [vmem:[#allocation9 + $0x44] ss:$16 sps:$4 sm:$0xff]   ;;  %v9832_v21 = vld [vmem:[#allocation9 + $0x80] ss:$16 sps:$4 sm:$0xff]   ;;  %v9859_v42 = vld [vmem:[#allocation9 + $0x108] ss:$16 sps:$4 sm:$0xff]  }
 0x294   :  { %v9828_v14 = vld [vmem:[#allocation9 + $0x64] ss:$16 sps:$4 sm:$0xff]   ;;  %v9844_v28 = vld [vmem:[#allocation9 + $0xc0] ss:$16 sps:$4 sm:$0xff]   ;;  %v9897_v61 = vld [vmem:[#allocation9 + $0x1cc] ss:$16 sps:$4 sm:$0xff]  }
 0x295   :  { %982 = vmatpush1.bf16.msra.mxu0 %v7946_v54  ;;  %1023 = vmatpush1.bf16.msra.mxu1 %v7948_v3  ;;  %v7945_v54 = vcombine.high %v586_v47, %v590_v49  ;;  %v9808_v3 = vld [vmem:[#allocation9] ss:$16 sps:$4 sm:$0xff]   ;;  %v9834_v18 = vld [vmem:[#allocation9 + $0x84] ss:$16 sps:$4 sm:$0xff]   ;;  %v9871_v49 = vld [vmem:[#allocation9 + $0x148] ss:$16 sps:$4 sm:$0xff]  }
 0x296   :  { %983 = vmatprep.subr.bf16.mxu0 %v7955_v56  ;;  %1024 = vmatprep.subr.bf16.mxu1 %v7957_v7  ;;  %v7950_v56 = vcombine.low %v593_v43, %v597_v44  ;;  %v9813_v7 = vld [vmem:[#allocation9 + $0xc] ss:$16 sps:$4 sm:$0xff]   ;;  %v9852_v29 = vld [vmem:[#allocation9 + $0xe4] ss:$16 sps:$4 sm:$0xff]   ;;  %v9850_v32 = vld [vmem:[#allocation9 + $0xe0] ss:$16 sps:$4 sm:$0xff]  }
 0x297   :  { %v9862_v40 = vld [vmem:[#allocation9 + $0x120] ss:$16 sps:$4 sm:$0xff]   ;;  %v9876_v44 = vld [vmem:[#allocation9 + $0x164] ss:$16 sps:$4 sm:$0xff]  }
 0x298   :  { %v9868_v43 = vld [vmem:[#allocation9 + $0x140] ss:$16 sps:$4 sm:$0xff]   ;;  %v9888_v52 = vld [vmem:[#allocation9 + $0x1a4] ss:$16 sps:$4 sm:$0xff]  }
 0x299   :  { %984 = vmatpush1.bf16.msra.mxu0 %v7954_v63  ;;  %1025 = vmatpush1.bf16.msra.mxu1 %v7956_v12  ;;  %v9810_v63 = vld [vmem:[#allocation9 + $0x4] ss:$16 sps:$4 sm:$0xff]   ;;  %v9819_v12 = vld [vmem:[#allocation9 + $0x2c] ss:$16 sps:$4 sm:$0xff]   ;;  %v9874_v47 = vld [vmem:[#allocation9 + $0x160] ss:$16 sps:$4 sm:$0xff]  }
 0x29a   :  { %1051 = vmatprep.subr.bf16.mxu0 %v7903_v2  ;;  %1092 = vmatprep.subr.bf16.mxu1 %v7905_v15  ;;  %v7952_v2 = vcombine.low %v594_v55, %v598_v57  ;;  %v9817_v15 = vld [vmem:[#allocation9 + $0x28] ss:$16 sps:$4 sm:$0xff]   ;;  %v9880_v51 = vld [vmem:[#allocation9 + $0x180] ss:$16 sps:$4 sm:$0xff]   ;;  %v9891_v57 = vld [vmem:[#allocation9 + $0x1ac] ss:$16 sps:$4 sm:$0xff]  }
 0x29b   :  { %v9883_v55 = vld [vmem:[#allocation9 + $0x188] ss:$16 sps:$4 sm:$0xff]   ;;  %v9892_v60 = vld [vmem:[#allocation9 + $0x1c0] ss:$16 sps:$4 sm:$0xff]  }
 0x29c   :  { %1002 = vmatmul.mubr.bf16.vlgmr.msra.gmra.mrb[0].mxu0 %v11538_v6  ;;  %1043 = vmatmul.mubr.bf16.vlgmr.msra.gmra.mrb[0].mxu1 %v11538_v6 }
 0x29d   :  { %1052 = vmatpush1.bf16.msra.mxu0 %v7902_v9  ;;  %1083 = vmatprep.mubr.bf16.mxu0 %v11108_v0  ;;  %v9814_v9 = vld [vmem:[#allocation9 + $0x20] ss:$16 sps:$4 sm:$0xff]  }
 0x29e   :  { %1053 = vmatprep.subr.bf16.mxu0 %v7911_v11  ;;  %1093 = vmatpush1.bf16.msra.mxu1 %v7904_v22  ;;  %v9811_v11 = vld [vmem:[#allocation9 + $0x8] ss:$16 sps:$4 sm:$0xff]   ;;  %v9840_v22 = vld [vmem:[#allocation9 + $0xa4] ss:$16 sps:$4 sm:$0xff]  }
 0x29f   :  { %1124 = vmatprep.mubr.bf16.mxu1 %v11108_v0  ;;  %1094 = vmatprep.subr.bf16.mxu1 %v7913_v23  ;;  %v7943_v0 = vcombine.high %v585_v36, %v589_v37  ;;  %v9829_v23 = vld [vmem:[#allocation9 + $0x68] ss:$16 sps:$4 sm:$0xff]   ;;  %v9856_v36 = vld [vmem:[#allocation9 + $0x100] ss:$16 sps:$4 sm:$0xff]   ;;  %v9864_v37 = vld [vmem:[#allocation9 + $0x124] ss:$16 sps:$4 sm:$0xff]  }
 0x2a1   :  { %1054 = vmatpush1.bf16.msra.mxu0 %v7910_v17  ;;  %v9826_v17 = vld [vmem:[#allocation9 + $0x60] ss:$16 sps:$4 sm:$0xff]  }
 0x2a2   :  { %1055 = vmatprep.subr.bf16.mxu0 %v7919_v19  ;;  %1095 = vmatpush1.bf16.msra.mxu1 %v7912_v30  ;;  %v9823_v19 = vld [vmem:[#allocation9 + $0x48] ss:$16 sps:$4 sm:$0xff]  }
 0x2a3   :  { %1096 = vmatprep.subr.bf16.mxu1 %v7921_v31  ;;  %v9841_v30 = vld [vmem:[#allocation9 + $0xa8] ss:$16 sps:$4 sm:$0xff]   ;;  %v9849_v31 = vld [vmem:[#allocation9 + $0xcc] ss:$16 sps:$4 sm:$0xff]  }
 0x2a5   :  { %1056 = vmatpush1.bf16.msra.mxu0 %v7918_v25  ;;  %v9846_v25 = vld [vmem:[#allocation9 + $0xc4] ss:$16 sps:$4 sm:$0xff]  }
 0x2a6   :  { %1057 = vmatprep.subr.bf16.mxu0 %v7927_v27  ;;  %1097 = vmatpush1.bf16.msra.mxu1 %v7920_v38  ;;  %v9843_v27 = vld [vmem:[#allocation9 + $0xac] ss:$16 sps:$4 sm:$0xff]   ;;  %v9853_v38 = vld [vmem:[#allocation9 + $0xe8] ss:$16 sps:$4 sm:$0xff]  }
 0x2a7   :  { %1098 = vmatprep.subr.bf16.mxu1 %v7929_v39  ;;  %v9861_v39 = vld [vmem:[#allocation9 + $0x10c] ss:$16 sps:$4 sm:$0xff]  }
 0x2a9   :  { %1058 = vmatpush1.bf16.msra.mxu0 %v7926_v33  ;;  %v9858_v33 = vld [vmem:[#allocation9 + $0x104] ss:$16 sps:$4 sm:$0xff]  }
 0x2aa   :  { %1059 = vmatprep.subr.bf16.mxu0 %v7935_v35  ;;  %1099 = vmatpush1.bf16.msra.mxu1 %v7928_v45  ;;  %v9855_v35 = vld [vmem:[#allocation9 + $0xec] ss:$16 sps:$4 sm:$0xff]   ;;  %v9865_v45 = vld [vmem:[#allocation9 + $0x128] ss:$16 sps:$4 sm:$0xff]  }
 0x2ab   :  { %1100 = vmatprep.subr.bf16.mxu1 %v7937_v46  ;;  %v9873_v46 = vld [vmem:[#allocation9 + $0x14c] ss:$16 sps:$4 sm:$0xff]  }
 0x2ad   :  { %1060 = vmatpush1.bf16.msra.mxu0 %v7934_v41  ;;  %v9870_v41 = vld [vmem:[#allocation9 + $0x144] ss:$16 sps:$4 sm:$0xff]  }
 0x2ae   :  { %1061 = vmatprep.subr.bf16.mxu0 %v7943_v0  ;;  %1101 = vmatpush1.bf16.msra.mxu1 %v7936_v53  ;;  %v9867_v0 = vld [vmem:[#allocation9 + $0x12c] ss:$16 sps:$4 sm:$0xff]   ;;  %v9877_v53 = vld [vmem:[#allocation9 + $0x168] ss:$16 sps:$4 sm:$0xff]  }
 0x2af   :  { %1102 = vmatprep.subr.bf16.mxu1 %v7945_v54  ;;  %v9885_v54 = vld [vmem:[#allocation9 + $0x18c] ss:$16 sps:$4 sm:$0xff]  }
 0x2b1   :  { %1062 = vmatpush1.bf16.msra.mxu0 %v7942_v48  ;;  %v9882_v48 = vld [vmem:[#allocation9 + $0x184] ss:$16 sps:$4 sm:$0xff]  }
 0x2b2   :  { %1063 = vmatprep.subr.bf16.mxu0 %v7951_v50  ;;  %1103 = vmatpush1.bf16.msra.mxu1 %v7944_v59  ;;  %v9879_v50 = vld [vmem:[#allocation9 + $0x16c] ss:$16 sps:$4 sm:$0xff]   ;;  %v9889_v59 = vld [vmem:[#allocation9 + $0x1a8] ss:$16 sps:$4 sm:$0xff]  }
 0x2b3   :  { %1104 = vmatprep.subr.bf16.mxu1 %v7953_v62  ;;  %v9900_v62 = vld [vmem:[#allocation9 + $0x1e4] ss:$16 sps:$4 sm:$0xff]  }
 0x2b5   :  { %1064 = vmatpush1.bf16.msra.mxu0 %v7950_v56  ;;  %v9886_v56 = vld [vmem:[#allocation9 + $0x1a0] ss:$16 sps:$4 sm:$0xff]  }
 0x2b6   :  { %1065 = vmatprep.subr.bf16.mxu0 %v7959_v58  ;;  %1105 = vmatpush1.bf16.msra.mxu1 %v7952_v2  ;;  %v9894_v58 = vld [vmem:[#allocation9 + $0x1c4] ss:$16 sps:$4 sm:$0xff]   ;;  %v9903_v2 = vld [vmem:[#allocation9 + $0x1ec] ss:$16 sps:$4 sm:$0xff]  }
 0x2b7   :  { %1106 = vmatprep.subr.bf16.mxu1 %v7961_v4  ;;  %v9901_v4 = vld [vmem:[#allocation9 + $0x1e8] ss:$16 sps:$4 sm:$0xff]  }
 0x2b9   :  { %1066 = vmatpush1.bf16.msra.mxu0 %v7958_v1  ;;  %v9898_v1 = vld [vmem:[#allocation9 + $0x1e0] ss:$16 sps:$4 sm:$0xff]  }
 0x2ba   :  { %2707 = vmatprep.subr.bf16.mxu0 %v9810_v63  ;;  %1107 = vmatpush1.bf16.msra.mxu1 %v7960_v8  ;;  %v9895_v63 = vld [vmem:[#allocation9 + $0x1c8] ss:$16 sps:$4 sm:$0xff]  }
 0x2bb   :  { %2871 = vmatprep.subr.bf16.mxu1 %v9813_v7  ;;  %v609_v7 = vlaneseq }
 0x2bc   :  { %1084 = vmatmul.mubr.bf16.vlgmr.msra.gmra.mrb[4].mxu0 %v11538_v6 }
 0x2bd   :  { %2708 = vmatpush1.bf16.msra.mxu0 %v9808_v3  ;;  %1125 = vmatmul.mubr.bf16.vlgmr.msra.gmra.mrb[4].mxu1 %v11538_v6  ;;  %v9838_v6 = vld [vmem:[#allocation9 + $0xa0] ss:$16 sps:$4 sm:$0xff]   ;;  %v9906_v3 = vld [vmem:[#allocation9 + $0x204] ss:$16 sps:$4 sm:$0xff]   ;;  %v11546_v8 = vshrl.u32 %v609_v7, 7 }
 0x2be   :  { %2709 = vmatprep.subr.bf16.mxu0 %v9816_v5  ;;  %2872 = vmatpush1.bf16.msra.mxu1 %v9811_v11  ;;  %v9909_v5 = vld [vmem:[#allocation9 + $0x20c] ss:$16 sps:$4 sm:$0xff]  }
 0x2bf   :  { %2873 = vmatprep.subr.bf16.mxu1 %v9819_v12  ;;  %v615_v11 = vsub.s32 1, %v11546_v8 }
 0x2c1   :  { %2710 = vmatpush1.bf16.msra.mxu0 %v9814_v9  ;;  %v611_v9 = vsub.s32 0, %v11546_v8 }
 0x2c2   :  { %2711 = vmatprep.subr.bf16.mxu0 %v9822_v10  ;;  %2874 = vmatpush1.bf16.msra.mxu1 %v9817_v15  ;;  %v11549_v10 = vld [vmem:[#allocation8] sm:$0xff]  ;;  %v623_v15 = vsub.s32 3, %v11546_v8 }
 0x2c3   :  { %2875 = vmatprep.subr.bf16.mxu1 %v9825_v16  ;;  %v612_v12 = vrot.slane %v11549_v10, %v611_v9 }
 0x2c5   :  { %2712 = vmatpush1.bf16.msra.mxu0 %v9820_v13  ;;  %v616_v13 = vrot.slane %v11549_v10, %v615_v11 }
 0x2c6   :  { %2713 = vmatprep.subr.bf16.mxu0 %v9828_v14  ;;  %2876 = vmatpush1.bf16.msra.mxu1 %v9823_v19 }
 0x2c7   :  { %2877 = vmatprep.subr.bf16.mxu1 %v9831_v20 }
 0x2c9   :  { %2714 = vmatpush1.bf16.msra.mxu0 %v9826_v17 }
 0x2ca   :  { %2715 = vmatprep.subr.bf16.mxu0 %v9834_v18  ;;  %2878 = vmatpush1.bf16.msra.mxu1 %v9829_v23  ;;  %v624_v23 = vrot.slane %v11549_v10, %v623_v15 }
 0x2cb   :  { %2879 = vmatprep.subr.bf16.mxu1 %v9837_v24 }
 0x2cd   :  { %2716 = vmatpush1.bf16.msra.mxu0 %v9832_v21 }
 0x2ce   :  { %2717 = vmatprep.subr.bf16.mxu0 %v9840_v22  ;;  %2880 = vmatpush1.bf16.msra.mxu1 %v9835_v26 }
 0x2cf   :  { %2881 = vmatprep.subr.bf16.mxu1 %v9843_v27 }
 0x2d1   :  { %2718 = vmatpush1.bf16.msra.mxu0 %v9838_v6  ;;  %v9904_v6 = vld [vmem:[#allocation9 + $0x200] ss:$16 sps:$4 sm:$0xff]  }
 0x2d2   :  { %2719 = vmatprep.subr.bf16.mxu0 %v9846_v25  ;;  %2882 = vmatpush1.bf16.msra.mxu1 %v9841_v30  ;;  %v9907_v25 = vld [vmem:[#allocation9 + $0x208] ss:$16 sps:$4 sm:$0xff]  }
 0x2d3   :  { %2883 = vmatprep.subr.bf16.mxu1 %v9849_v31 }
 0x2d5   :  { %2720 = vmatpush1.bf16.msra.mxu0 %v9844_v28  ;;  %v9912_v28 = vld [vmem:[#allocation9 + $0x224] ss:$16 sps:$4 sm:$0xff]  }
 0x2d6   :  { %2721 = vmatprep.subr.bf16.mxu0 %v9852_v29  ;;  %2884 = vmatpush1.bf16.msra.mxu1 %v9847_v34  ;;  %v9915_v29 = vld [vmem:[#allocation9 + $0x22c] ss:$16 sps:$4 sm:$0xff]   ;;  %v9910_v34 = vld [vmem:[#allocation9 + $0x220] ss:$16 sps:$4 sm:$0xff]  }
 0x2d7   :  { %2885 = vmatprep.subr.bf16.mxu1 %v9855_v35  ;;  %v9913_v35 = vld [vmem:[#allocation9 + $0x228] ss:$16 sps:$4 sm:$0xff]  }
 0x2d9   :  { %2722 = vmatpush1.bf16.msra.mxu0 %v9850_v32 }
 0x2da   :  { %2723 = vmatprep.subr.bf16.mxu0 %v9858_v33  ;;  %2886 = vmatpush1.bf16.msra.mxu1 %v9853_v38  ;;  %v9921_v38 = vld [vmem:[#allocation9 + $0x24c] ss:$16 sps:$4 sm:$0xff]  }
 0x2db   :  { %2887 = vmatprep.subr.bf16.mxu1 %v9861_v39 }
 0x2dd   :  { %2724 = vmatpush1.bf16.msra.mxu0 %v9856_v36 }
 0x2de   :  { %2725 = vmatprep.subr.bf16.mxu0 %v9864_v37  ;;  %2888 = vmatpush1.bf16.msra.mxu1 %v9859_v42  ;;  %v9918_v37 = vld [vmem:[#allocation9 + $0x244] ss:$16 sps:$4 sm:$0xff]  }
 0x2df   :  { %2889 = vmatprep.subr.bf16.mxu1 %v9867_v0  ;;  %v9924_v42 = vld [vmem:[#allocation9 + $0x264] ss:$16 sps:$4 sm:$0xff]   ;;  %v9927_v0 = vld [vmem:[#allocation9 + $0x26c] ss:$16 sps:$4 sm:$0xff]  }
 0x2e1   :  { %2726 = vmatpush1.bf16.msra.mxu0 %v9862_v40  ;;  %v9916_v40 = vld [vmem:[#allocation9 + $0x240] ss:$16 sps:$4 sm:$0xff]  }
 0x2e2   :  { %2727 = vmatprep.subr.bf16.mxu0 %v9870_v41  ;;  %2890 = vmatpush1.bf16.msra.mxu1 %v9865_v45  ;;  %v9919_v41 = vld [vmem:[#allocation9 + $0x248] ss:$16 sps:$4 sm:$0xff]   ;;  %v9930_v45 = vld [vmem:[#allocation9 + $0x284] ss:$16 sps:$4 sm:$0xff]  }
 0x2e3   :  { %2891 = vmatprep.subr.bf16.mxu1 %v9873_v46  ;;  %v9933_v46 = vld [vmem:[#allocation9 + $0x28c] ss:$16 sps:$4 sm:$0xff]  }
 0x2e5   :  { %2728 = vmatpush1.bf16.msra.mxu0 %v9868_v43  ;;  %v9922_v43 = vld [vmem:[#allocation9 + $0x260] ss:$16 sps:$4 sm:$0xff]  }
 0x2e6   :  { %2729 = vmatprep.subr.bf16.mxu0 %v9876_v44  ;;  %2892 = vmatpush1.bf16.msra.mxu1 %v9871_v49  ;;  %v9925_v44 = vld [vmem:[#allocation9 + $0x268] ss:$16 sps:$4 sm:$0xff]   ;;  %v9936_v49 = vld [vmem:[#allocation9 + $0x2a4] ss:$16 sps:$4 sm:$0xff]  }
 0x2e7   :  { %2893 = vmatprep.subr.bf16.mxu1 %v9879_v50  ;;  %v9939_v50 = vld [vmem:[#allocation9 + $0x2ac] ss:$16 sps:$4 sm:$0xff]  }
 0x2e9   :  { %2730 = vmatpush1.bf16.msra.mxu0 %v9874_v47  ;;  %v9928_v47 = vld [vmem:[#allocation9 + $0x280] ss:$16 sps:$4 sm:$0xff]  }
 0x2ea   :  { %2731 = vmatprep.subr.bf16.mxu0 %v9882_v48  ;;  %2894 = vmatpush1.bf16.msra.mxu1 %v9877_v53  ;;  %v9931_v48 = vld [vmem:[#allocation9 + $0x288] ss:$16 sps:$4 sm:$0xff]   ;;  %v9942_v53 = vld [vmem:[#allocation9 + $0x2c4] ss:$16 sps:$4 sm:$0xff]  }
 0x2eb   :  { %2895 = vmatprep.subr.bf16.mxu1 %v9885_v54  ;;  %v9945_v54 = vld [vmem:[#allocation9 + $0x2cc] ss:$16 sps:$4 sm:$0xff]  }
 0x2ed   :  { %2732 = vmatpush1.bf16.msra.mxu0 %v9880_v51  ;;  %v9934_v51 = vld [vmem:[#allocation9 + $0x2a0] ss:$16 sps:$4 sm:$0xff]  }
 0x2ee   :  { %2733 = vmatprep.subr.bf16.mxu0 %v9888_v52  ;;  %2896 = vmatpush1.bf16.msra.mxu1 %v9883_v55  ;;  %v9937_v52 = vld [vmem:[#allocation9 + $0x2a8] ss:$16 sps:$4 sm:$0xff]   ;;  %v9940_v55 = vld [vmem:[#allocation9 + $0x2c0] ss:$16 sps:$4 sm:$0xff]  }
 0x2ef   :  { %2897 = vmatprep.subr.bf16.mxu1 %v9891_v57  ;;  %v9948_v57 = vld [vmem:[#allocation9 + $0x2e4] ss:$16 sps:$4 sm:$0xff]  }
 0x2f1   :  { %2734 = vmatpush1.bf16.msra.mxu0 %v9886_v56  ;;  %v9943_v56 = vld [vmem:[#allocation9 + $0x2c8] ss:$16 sps:$4 sm:$0xff]  }
 0x2f2   :  { %2735 = vmatprep.subr.bf16.mxu0 %v9894_v58  ;;  %2898 = vmatpush1.bf16.msra.mxu1 %v9889_v59  ;;  %v9951_v58 = vld [vmem:[#allocation9 + $0x2ec] ss:$16 sps:$4 sm:$0xff]  }
 0x2f3   :  { %2899 = vmatprep.subr.bf16.mxu1 %v9897_v61  ;;  %v9946_v61 = vld [vmem:[#allocation9 + $0x2e0] ss:$16 sps:$4 sm:$0xff]  }
 0x2f5   :  { %2736 = vmatpush1.bf16.msra.mxu0 %v9892_v60 }
 0x2f6   :  { %2737 = vmatprep.subr.bf16.mxu0 %v9900_v62  ;;  %2900 = vmatpush1.bf16.msra.mxu1 %v9895_v63  ;;  %v9949_v62 = vld [vmem:[#allocation9 + $0x2e8] ss:$16 sps:$4 sm:$0xff]  }
 0x2f7   :  { %2901 = vmatprep.subr.bf16.mxu1 %v9903_v2  ;;  %v9957_v2 = vld [vmem:[#allocation9 + $0x30c] ss:$16 sps:$4 sm:$0xff]  }
 0x2f9   :  { %2738 = vmatpush1.bf16.msra.mxu0 %v9898_v1  ;;  %v9954_v1 = vld [vmem:[#allocation9 + $0x304] ss:$16 sps:$4 sm:$0xff]  }
 0x2fa   :  { %2748 = vmatprep.subr.bf16.mxu0 %v9906_v3  ;;  %2902 = vmatpush1.bf16.msra.mxu1 %v9901_v4  ;;  %v9952_v4 = vld [vmem:[#allocation9 + $0x300] ss:$16 sps:$4 sm:$0xff]  }
 0x2fb   :  { %2912 = vmatprep.subr.bf16.mxu1 %v9909_v5  ;;  %v9955_v5 = vld [vmem:[#allocation9 + $0x308] ss:$16 sps:$4 sm:$0xff]  }
 0x36f   :  { %v1003_v14 = vpop.f32.mrb[0].mxu0  ;;  %v11562_v26 = vpop.f32.mrb[0].mxu1 }
 0x370   :  { %v1004_v16 = vadd.f32 %v1003_v14, %v612_v12  ;;  %v1005_v17 = vpop.f32.mrb[1].mxu0  ;;  %v1046_v30 = vpop.f32.mrb[1].mxu1  ;;  %v9960_v12 = vld [vmem:[#allocation9 + $0x324] ss:$16 sps:$4 sm:$0xff]  }
 0x371   :  { %v1006_v18 = vadd.f32 %v1005_v17, %v616_v13  ;;  %v1007_v19 = vpop.f32.mrb[2].mxu0  ;;  %v1047_v31 = vadd.f32 %v1046_v30, %v624_v23  ;;  %v1048_v32 = vpop.f32.mrb[2].mxu1  ;;  %v9963_v13 = vld [vmem:[#allocation9 + $0x32c] ss:$16 sps:$4 sm:$0xff]   ;;  %v9967_v23 = vld [vmem:[#allocation9 + $0x348] ss:$16 sps:$4 sm:$0xff]  }
 0x372   :  { %v1133_v20 = vmax.f32 %v1004_v16, 0.0  ;;  %v1008_v21 = vpop.f32.mrb[3].mxu0  ;;  %v1049_v33 = vpop.f32.mrb[3].mxu1  ;;  %v9961_v19 = vld [vmem:[#allocation9 + $0x328] ss:$16 sps:$4 sm:$0xff]   ;;  %v619_v30 = vsub.s32 2, %v11546_v8 }
 0x373   :  { %v1134_v22 = vmax.f32 %v1006_v18, 0.0  ;;  %v1136_v36 = vmax.f32 %v1047_v31, 0.0  ;;  %v9958_v18 = vld [vmem:[#allocation9 + $0x320] ss:$16 sps:$4 sm:$0xff]   ;;  %v9969_v21 = vld [vmem:[#allocation9 + $0x34c] ss:$16 sps:$4 sm:$0xff]  }
 0x374   :  { %v1141_v27 = vpack.c.bf16 %v1133_v20, %v1133_v20  ;;  %v9966_v20 = vld [vmem:[#allocation9 + $0x344] ss:$16 sps:$4 sm:$0xff]   ;;  %v9976_v31 = vld [vmem:[#allocation9 + $0x380] ss:$16 sps:$4 sm:$0xff]   ;;  %v9979_v32 = vld [vmem:[#allocation9 + $0x388] ss:$16 sps:$4 sm:$0xff]  }
 0x375   :  { %v1142_v24 = vpack.c.bf16 %v1134_v22, %v1134_v22  ;;  %v1144_v39 = vpack.c.bf16 %v1136_v36, %v1136_v36  ;;  %v9964_v22 = vld [vmem:[#allocation9 + $0x340] ss:$16 sps:$4 sm:$0xff]   ;;  %v9984_v33 = vld [vmem:[#allocation9 + $0x3a4] ss:$16 sps:$4 sm:$0xff]   ;;  %v620_v36 = vrot.slane %v11549_v10, %v619_v30 }
 0x377   :  { %2739 = vmatprep.mubr.bf16.mxu0 %v1142_v24  ;;  %2903 = vmatprep.mubr.bf16.mxu1 %v1142_v24  ;;  %v9972_v24 = vld [vmem:[#allocation9 + $0x364] ss:$16 sps:$4 sm:$0xff]  }
 0x378   :  { %2740 = vmatmul.mubr.bf16.vlgmr.msra.gmra.mrb[8].mxu0 %v1141_v27  ;;  %2904 = vmatmul.mubr.bf16.vlgmr.msra.gmra.mrb[8].mxu1 %v1141_v27  ;;  %v9973_v27 = vld [vmem:[#allocation9 + $0x368] ss:$16 sps:$4 sm:$0xff]  }
 0x379   :  { %2749 = vmatpush1.bf16.msra.mxu0 %v9904_v6  ;;  %2913 = vmatpush1.bf16.msra.mxu1 %v9907_v25  ;;  %v9975_v6 = vld [vmem:[#allocation9 + $0x36c] ss:$16 sps:$4 sm:$0xff]   ;;  %v9970_v25 = vld [vmem:[#allocation9 + $0x360] ss:$16 sps:$4 sm:$0xff]  }
 0x37a   :  { %2750 = vmatprep.subr.bf16.mxu0 %v9912_v28  ;;  %2914 = vmatprep.subr.bf16.mxu1 %v9915_v29  ;;  %v9978_v28 = vld [vmem:[#allocation9 + $0x384] ss:$16 sps:$4 sm:$0xff]   ;;  %v9981_v29 = vld [vmem:[#allocation9 + $0x38c] ss:$16 sps:$4 sm:$0xff]  }
 0x37b   :  { %2780 = vmatprep.mubr.bf16.mxu0 %v1144_v39  ;;  %2944 = vmatprep.mubr.bf16.mxu1 %v1144_v39  ;;  %v9990_v39 = vld [vmem:[#allocation9 + $0x3c4] ss:$16 sps:$4 sm:$0xff]  }
 0x37d   :  { %2751 = vmatpush1.bf16.msra.mxu0 %v9910_v34  ;;  %2915 = vmatpush1.bf16.msra.mxu1 %v9913_v35  ;;  %v9987_v34 = vld [vmem:[#allocation9 + $0x3ac] ss:$16 sps:$4 sm:$0xff]   ;;  %v631_v35 = vsub.s32 5, %v11546_v8 }
 0x37e   :  { %2752 = vmatprep.subr.bf16.mxu0 %v9918_v37  ;;  %2916 = vmatprep.subr.bf16.mxu1 %v9921_v38  ;;  %v9982_v37 = vld [vmem:[#allocation9 + $0x3a0] ss:$16 sps:$4 sm:$0xff]   ;;  %v9985_v38 = vld [vmem:[#allocation9 + $0x3a8] ss:$16 sps:$4 sm:$0xff]  }
 0x381   :  { %2753 = vmatpush1.bf16.msra.mxu0 %v9916_v40  ;;  %2917 = vmatpush1.bf16.msra.mxu1 %v9919_v41  ;;  %v9993_v40 = vld [vmem:[#allocation9 + $0x3cc] ss:$16 sps:$4 sm:$0xff]   ;;  %v632_v41 = vrot.slane %v11549_v10, %v631_v35  ;;  %v10056_v35 = vld [vmem:[#allocation9 + $0x524] ss:$16 sps:$4 sm:$0xff]  }
 0x382   :  { %2754 = vmatprep.subr.bf16.mxu0 %v9924_v42  ;;  %2918 = vmatprep.subr.bf16.mxu1 %v9927_v0  ;;  %v1045_v42 = vadd.f32 %v11562_v26, %v620_v36  ;;  %v9988_v0 = vld [vmem:[#allocation9 + $0x3c0] ss:$16 sps:$4 sm:$0xff]   ;;  %v10059_v36 = vld [vmem:[#allocation9 + $0x52c] ss:$16 sps:$4 sm:$0xff]  }
 0x385   :  { %2755 = vmatpush1.bf16.msra.mxu0 %v9922_v43  ;;  %2919 = vmatpush1.bf16.msra.mxu1 %v9925_v44  ;;  %v9991_v43 = vld [vmem:[#allocation9 + $0x3c8] ss:$16 sps:$4 sm:$0xff]   ;;  %v9996_v44 = vld [vmem:[#allocation9 + $0x3e4] ss:$16 sps:$4 sm:$0xff]  }
 0x386   :  { %2756 = vmatprep.subr.bf16.mxu0 %v9930_v45  ;;  %2920 = vmatprep.subr.bf16.mxu1 %v9933_v46  ;;  %v9999_v45 = vld [vmem:[#allocation9 + $0x3ec] ss:$16 sps:$4 sm:$0xff]  }
 0x389   :  { %2757 = vmatpush1.bf16.msra.mxu0 %v9928_v47  ;;  %2921 = vmatpush1.bf16.msra.mxu1 %v9931_v48  ;;  %v1135_v47 = vmax.f32 %v1045_v42, 0.0  ;;  %v9994_v48 = vld [vmem:[#allocation9 + $0x3e0] ss:$16 sps:$4 sm:$0xff]   ;;  %v10063_v42 = vld [vmem:[#allocation9 + $0x548] ss:$16 sps:$4 sm:$0xff]  }
 0x38a   :  { %2758 = vmatprep.subr.bf16.mxu0 %v9936_v49  ;;  %2922 = vmatprep.subr.bf16.mxu1 %v9939_v50  ;;  %v9997_v49 = vld [vmem:[#allocation9 + $0x3e8] ss:$16 sps:$4 sm:$0xff]   ;;  %v10002_v50 = vld [vmem:[#allocation9 + $0x404] ss:$16 sps:$4 sm:$0xff]  }
 0x38d   :  { %2759 = vmatpush1.bf16.msra.mxu0 %v9934_v51  ;;  %2923 = vmatpush1.bf16.msra.mxu1 %v9937_v52  ;;  %v10005_v51 = vld [vmem:[#allocation9 + $0x40c] ss:$16 sps:$4 sm:$0xff]   ;;  %v1143_v52 = vpack.c.bf16 %v1135_v47, %v1135_v47 }
 0x38e   :  { %2760 = vmatprep.subr.bf16.mxu0 %v9942_v53  ;;  %2924 = vmatprep.subr.bf16.mxu1 %v9945_v54  ;;  %v10000_v53 = vld [vmem:[#allocation9 + $0x400] ss:$16 sps:$4 sm:$0xff]   ;;  %v10003_v54 = vld [vmem:[#allocation9 + $0x408] ss:$16 sps:$4 sm:$0xff]   ;;  %v10077_v47 = vld [vmem:[#allocation9 + $0x58c] ss:$16 sps:$4 sm:$0xff]  }
 0x38f   :  { %v11564_v59 = vpop.f32.mrb[4].mxu0 }
 0x390   :  { %v11566_v60 = vpop.f32.mrb[5].mxu0  ;;  %v11568_v7 = vpop.f32.mrb[4].mxu1 }
 0x391   :  { %2761 = vmatpush1.bf16.msra.mxu0 %v9940_v55  ;;  %2925 = vmatpush1.bf16.msra.mxu1 %v9943_v56  ;;  %v1089_v63 = vpop.f32.mrb[6].mxu0  ;;  %v11570_v14 = vpop.f32.mrb[5].mxu1  ;;  %v1088_v46 = vadd.f32 %v11566_v60, %v632_v41  ;;  %v10008_v55 = vld [vmem:[#allocation9 + $0x424] ss:$16 sps:$4 sm:$0xff]   ;;  %v10011_v56 = vld [vmem:[#allocation9 + $0x42c] ss:$16 sps:$4 sm:$0xff]  }
 0x392   :  { %2762 = vmatprep.subr.bf16.mxu0 %v9948_v57  ;;  %2926 = vmatprep.subr.bf16.mxu1 %v9951_v58  ;;  %v1090_v3 = vpop.f32.mrb[7].mxu0  ;;  %v1130_v16 = vpop.f32.mrb[6].mxu1  ;;  %v10006_v58 = vld [vmem:[#allocation9 + $0x420] ss:$16 sps:$4 sm:$0xff]   ;;  %v10009_v60 = vld [vmem:[#allocation9 + $0x428] ss:$16 sps:$4 sm:$0xff]  }
 0x393   :  { %v1131_v17 = vpop.f32.mrb[7].mxu1  ;;  %v1138_v26 = vmax.f32 %v1088_v46, 0.0  ;;  %v10012_v63 = vld [vmem:[#allocation9 + $0x440] ss:$16 sps:$4 sm:$0xff]   ;;  %v10023_v3 = vld [vmem:[#allocation9 + $0x46c] ss:$16 sps:$4 sm:$0xff]  }
 0x394   :  { %v10024_v16 = vld [vmem:[#allocation9 + $0x480] ss:$16 sps:$4 sm:$0xff]   ;;  %v10027_v17 = vld [vmem:[#allocation9 + $0x488] ss:$16 sps:$4 sm:$0xff]   ;;  %v10074_v46 = vld [vmem:[#allocation9 + $0x584] ss:$16 sps:$4 sm:$0xff]  }
 0x395   :  { %2763 = vmatpush1.bf16.msra.mxu0 %v9946_v61  ;;  %2927 = vmatpush1.bf16.msra.mxu1 %v9949_v62  ;;  %v1146_v57 = vpack.c.bf16 %v1138_v26, %v1138_v26  ;;  %v10014_v61 = vld [vmem:[#allocation9 + $0x444] ss:$16 sps:$4 sm:$0xff]   ;;  %v10017_v62 = vld [vmem:[#allocation9 + $0x44c] ss:$16 sps:$4 sm:$0xff]   ;;  %v10060_v41 = vld [vmem:[#allocation9 + $0x540] ss:$16 sps:$4 sm:$0xff]  }
 0x396   :  { %2764 = vmatprep.subr.bf16.mxu0 %v9954_v1  ;;  %2928 = vmatprep.subr.bf16.mxu1 %v9957_v2  ;;  %v10015_v1 = vld [vmem:[#allocation9 + $0x448] ss:$16 sps:$4 sm:$0xff]   ;;  %v10020_v2 = vld [vmem:[#allocation9 + $0x464] ss:$16 sps:$4 sm:$0xff]   ;;  %v10083_v26 = vld [vmem:[#allocation9 + $0x5ac] ss:$16 sps:$4 sm:$0xff]  }
 0x399   :  { %2765 = vmatpush1.bf16.msra.mxu0 %v9952_v4  ;;  %2929 = vmatpush1.bf16.msra.mxu1 %v9955_v5  ;;  %v10018_v4 = vld [vmem:[#allocation9 + $0x460] ss:$16 sps:$4 sm:$0xff]   ;;  %v10021_v5 = vld [vmem:[#allocation9 + $0x468] ss:$16 sps:$4 sm:$0xff]  }
 0x39a   :  { %2766 = vmatprep.subr.bf16.mxu0 %v9960_v12  ;;  %2930 = vmatprep.subr.bf16.mxu1 %v9963_v13  ;;  %v10026_v12 = vld [vmem:[#allocation9 + $0x484] ss:$16 sps:$4 sm:$0xff]   ;;  %v10029_v13 = vld [vmem:[#allocation9 + $0x48c] ss:$16 sps:$4 sm:$0xff]  }
 0x39d   :  { %2767 = vmatpush1.bf16.msra.mxu0 %v9958_v18  ;;  %2931 = vmatpush1.bf16.msra.mxu1 %v9961_v19  ;;  %v10032_v18 = vld [vmem:[#allocation9 + $0x4a4] ss:$16 sps:$4 sm:$0xff]   ;;  %v10035_v19 = vld [vmem:[#allocation9 + $0x4ac] ss:$16 sps:$4 sm:$0xff]  }
 0x39e   :  { %2768 = vmatprep.subr.bf16.mxu0 %v9966_v20  ;;  %2932 = vmatprep.subr.bf16.mxu1 %v9969_v21  ;;  %v10030_v20 = vld [vmem:[#allocation9 + $0x4a0] ss:$16 sps:$4 sm:$0xff]   ;;  %v10033_v21 = vld [vmem:[#allocation9 + $0x4a8] ss:$16 sps:$4 sm:$0xff]  }
 0x3a1   :  { %2769 = vmatpush1.bf16.msra.mxu0 %v9964_v22  ;;  %2933 = vmatpush1.bf16.msra.mxu1 %v9967_v23  ;;  %v10038_v22 = vld [vmem:[#allocation9 + $0x4c4] ss:$16 sps:$4 sm:$0xff]   ;;  %v10041_v23 = vld [vmem:[#allocation9 + $0x4cc] ss:$16 sps:$4 sm:$0xff]  }
 0x3a2   :  { %2770 = vmatprep.subr.bf16.mxu0 %v9972_v24  ;;  %2934 = vmatprep.subr.bf16.mxu1 %v9975_v6  ;;  %v10036_v24 = vld [vmem:[#allocation9 + $0x4c0] ss:$16 sps:$4 sm:$0xff]   ;;  %v10039_v6 = vld [vmem:[#allocation9 + $0x4c8] ss:$16 sps:$4 sm:$0xff]  }
 0x3a5   :  { %2771 = vmatpush1.bf16.msra.mxu0 %v9970_v25  ;;  %2935 = vmatpush1.bf16.msra.mxu1 %v9973_v27  ;;  %v10044_v25 = vld [vmem:[#allocation9 + $0x4e4] ss:$16 sps:$4 sm:$0xff]   ;;  %v10047_v27 = vld [vmem:[#allocation9 + $0x4ec] ss:$16 sps:$4 sm:$0xff]  }
 0x3a6   :  { %2772 = vmatprep.subr.bf16.mxu0 %v9978_v28  ;;  %2936 = vmatprep.subr.bf16.mxu1 %v9981_v29  ;;  %v10042_v28 = vld [vmem:[#allocation9 + $0x4e0] ss:$16 sps:$4 sm:$0xff]   ;;  %v10045_v29 = vld [vmem:[#allocation9 + $0x4e8] ss:$16 sps:$4 sm:$0xff]  }
 0x3a9   :  { %2773 = vmatpush1.bf16.msra.mxu0 %v9976_v31  ;;  %2937 = vmatpush1.bf16.msra.mxu1 %v9979_v32  ;;  %v10050_v31 = vld [vmem:[#allocation9 + $0x504] ss:$16 sps:$4 sm:$0xff]   ;;  %v10053_v32 = vld [vmem:[#allocation9 + $0x50c] ss:$16 sps:$4 sm:$0xff]  }
 0x3aa   :  { %2774 = vmatprep.subr.bf16.mxu0 %v9984_v33  ;;  %2938 = vmatprep.subr.bf16.mxu1 %v9987_v34  ;;  %v10048_v33 = vld [vmem:[#allocation9 + $0x500] ss:$16 sps:$4 sm:$0xff]   ;;  %v10051_v34 = vld [vmem:[#allocation9 + $0x508] ss:$16 sps:$4 sm:$0xff]  }
 0x3ad   :  { %2775 = vmatpush1.bf16.msra.mxu0 %v9982_v37  ;;  %2939 = vmatpush1.bf16.msra.mxu1 %v9985_v38  ;;  %v10054_v37 = vld [vmem:[#allocation9 + $0x520] ss:$16 sps:$4 sm:$0xff]   ;;  %v10057_v38 = vld [vmem:[#allocation9 + $0x528] ss:$16 sps:$4 sm:$0xff]  }
 0x3ae   :  { %2776 = vmatprep.subr.bf16.mxu0 %v9990_v39  ;;  %2940 = vmatprep.subr.bf16.mxu1 %v9993_v40  ;;  %v10062_v39 = vld [vmem:[#allocation9 + $0x544] ss:$16 sps:$4 sm:$0xff]   ;;  %v10065_v40 = vld [vmem:[#allocation9 + $0x54c] ss:$16 sps:$4 sm:$0xff]  }
 0x3b1   :  { %2777 = vmatpush1.bf16.msra.mxu0 %v9988_v0  ;;  %2941 = vmatpush1.bf16.msra.mxu1 %v9991_v43  ;;  %v10068_v0 = vld [vmem:[#allocation9 + $0x564] ss:$16 sps:$4 sm:$0xff]   ;;  %v10071_v43 = vld [vmem:[#allocation9 + $0x56c] ss:$16 sps:$4 sm:$0xff]  }
 0x3b2   :  { %2778 = vmatprep.subr.bf16.mxu0 %v9996_v44  ;;  %2942 = vmatprep.subr.bf16.mxu1 %v9999_v45  ;;  %v10066_v44 = vld [vmem:[#allocation9 + $0x560] ss:$16 sps:$4 sm:$0xff]   ;;  %v10069_v45 = vld [vmem:[#allocation9 + $0x568] ss:$16 sps:$4 sm:$0xff]  }
 0x3b5   :  { %2779 = vmatpush1.bf16.msra.mxu0 %v9994_v48  ;;  %2943 = vmatpush1.bf16.msra.mxu1 %v9997_v49  ;;  %v627_v48 = vsub.s32 4, %v11546_v8  ;;  %v10072_v49 = vld [vmem:[#allocation9 + $0x580] ss:$16 sps:$4 sm:$0xff]  }
 0x3b6   :  { %2789 = vmatprep.subr.bf16.mxu0 %v10002_v50  ;;  %2953 = vmatprep.subr.bf16.mxu1 %v10005_v51  ;;  %v10075_v50 = vld [vmem:[#allocation9 + $0x588] ss:$16 sps:$4 sm:$0xff]   ;;  %v10080_v51 = vld [vmem:[#allocation9 + $0x5a4] ss:$16 sps:$4 sm:$0xff]  }
 0x3b8   :  { %2781 = vmatmul.mubr.bf16.vlgmr.msra.gmra.mrb[8].mxu0 %v1143_v52  ;;  %2945 = vmatmul.mubr.bf16.vlgmr.msra.gmra.mrb[8].mxu1 %v1143_v52  ;;  %v639_v52 = vsub.s32 7, %v11546_v8 }
 0x3b9   :  { %2790 = vmatpush1.bf16.msra.mxu0 %v10000_v53  ;;  %2954 = vmatpush1.bf16.msra.mxu1 %v10003_v54  ;;  %v628_v53 = vrot.slane %v11549_v10, %v627_v48  ;;  %v10078_v54 = vld [vmem:[#allocation9 + $0x5a0] ss:$16 sps:$4 sm:$0xff]   ;;  %v10149_v48 = vld [vmem:[#allocation9 + $0x70c] ss:$16 sps:$4 sm:$0xff]  }
 0x3ba   :  { %2791 = vmatprep.subr.bf16.mxu0 %v10008_v55  ;;  %2955 = vmatprep.subr.bf16.mxu1 %v10011_v56  ;;  %v10081_v55 = vld [vmem:[#allocation9 + $0x5a8] ss:$16 sps:$4 sm:$0xff]   ;;  %v10086_v56 = vld [vmem:[#allocation9 + $0x5c4] ss:$16 sps:$4 sm:$0xff]  }
 0x3bb   :  { %2821 = vmatprep.mubr.bf16.mxu0 %v1146_v57  ;;  %2985 = vmatprep.mubr.bf16.mxu1 %v1146_v57  ;;  %v10089_v57 = vld [vmem:[#allocation9 + $0x5cc] ss:$16 sps:$4 sm:$0xff]  }
 0x3bd   :  { %2792 = vmatpush1.bf16.msra.mxu0 %v10006_v58  ;;  %2956 = vmatpush1.bf16.msra.mxu1 %v10009_v60  ;;  %v640_v58 = vrot.slane %v11549_v10, %v639_v52  ;;  %v1086_v60 = vadd.f32 %v11564_v59, %v628_v53  ;;  %v10150_v52 = vld [vmem:[#allocation9 + $0x720] ss:$16 sps:$4 sm:$0xff]   ;;  %v10153_v53 = vld [vmem:[#allocation9 + $0x728] ss:$16 sps:$4 sm:$0xff]  }
 0x3be   :  { %2793 = vmatprep.subr.bf16.mxu0 %v10014_v61  ;;  %2957 = vmatprep.subr.bf16.mxu1 %v10017_v62  ;;  %v10084_v61 = vld [vmem:[#allocation9 + $0x5c0] ss:$16 sps:$4 sm:$0xff]   ;;  %v10087_v62 = vld [vmem:[#allocation9 + $0x5c8] ss:$16 sps:$4 sm:$0xff]  }
 0x3c1   :  { %2794 = vmatpush1.bf16.msra.mxu0 %v10012_v63  ;;  %2958 = vmatpush1.bf16.msra.mxu1 %v10015_v1  ;;  %v10092_v63 = vld [vmem:[#allocation9 + $0x5e4] ss:$16 sps:$4 sm:$0xff]   ;;  %v10095_v1 = vld [vmem:[#allocation9 + $0x5ec] ss:$16 sps:$4 sm:$0xff]  }
 0x3c2   :  { %2795 = vmatprep.subr.bf16.mxu0 %v10020_v2  ;;  %2959 = vmatprep.subr.bf16.mxu1 %v10023_v3  ;;  %v1129_v2 = vadd.f32 %v11570_v14, %v640_v58  ;;  %v1137_v3 = vmax.f32 %v1086_v60, 0.0  ;;  %v10164_v58 = vld [vmem:[#allocation9 + $0x764] ss:$16 sps:$4 sm:$0xff]   ;;  %v10167_v60 = vld [vmem:[#allocation9 + $0x76c] ss:$16 sps:$4 sm:$0xff]  }
 0x3c4   :  { %v1140_v59 = vmax.f32 %v1129_v2, 0.0  ;;  %v10168_v2 = vld [vmem:[#allocation9 + $0x780] ss:$16 sps:$4 sm:$0xff]  }
 0x3c5   :  { %2796 = vmatpush1.bf16.msra.mxu0 %v10018_v4  ;;  %2960 = vmatpush1.bf16.msra.mxu1 %v10021_v5  ;;  %v10090_v4 = vld [vmem:[#allocation9 + $0x5e0] ss:$16 sps:$4 sm:$0xff]   ;;  %v10093_v5 = vld [vmem:[#allocation9 + $0x5e8] ss:$16 sps:$4 sm:$0xff]  }
 0x3c6   :  { %2797 = vmatprep.subr.bf16.mxu0 %v10026_v12  ;;  %2961 = vmatprep.subr.bf16.mxu1 %v10029_v13  ;;  %v10098_v12 = vld [vmem:[#allocation9 + $0x604] ss:$16 sps:$4 sm:$0xff]   ;;  %v10101_v13 = vld [vmem:[#allocation9 + $0x60c] ss:$16 sps:$4 sm:$0xff]   ;;  %v1148_v14 = vpack.c.bf16 %v1140_v59, %v1140_v59  ;;  %v10177_v59 = vld [vmem:[#allocation9 + $0x7a8] ss:$16 sps:$4 sm:$0xff]  }
 0x3c9   :  { %2798 = vmatpush1.bf16.msra.mxu0 %v10024_v16  ;;  %2962 = vmatpush1.bf16.msra.mxu1 %v10027_v17  ;;  %v1145_v16 = vpack.c.bf16 %v1137_v3, %v1137_v3  ;;  %v10096_v17 = vld [vmem:[#allocation9 + $0x600] ss:$16 sps:$4 sm:$0xff]   ;;  %v10171_v3 = vld [vmem:[#allocation9 + $0x788] ss:$16 sps:$4 sm:$0xff]  }
 0x3ca   :  { %2799 = vmatprep.subr.bf16.mxu0 %v10032_v18  ;;  %2963 = vmatprep.subr.bf16.mxu1 %v10035_v19  ;;  %v10099_v18 = vld [vmem:[#allocation9 + $0x608] ss:$16 sps:$4 sm:$0xff]   ;;  %v10104_v19 = vld [vmem:[#allocation9 + $0x624] ss:$16 sps:$4 sm:$0xff]  }
 0x3cd   :  { %2800 = vmatpush1.bf16.msra.mxu0 %v10030_v20  ;;  %2964 = vmatpush1.bf16.msra.mxu1 %v10033_v21  ;;  %v10107_v20 = vld [vmem:[#allocation9 + $0x62c] ss:$16 sps:$4 sm:$0xff]   ;;  %v10102_v21 = vld [vmem:[#allocation9 + $0x620] ss:$16 sps:$4 sm:$0xff]  }
 0x3ce   :  { %2801 = vmatprep.subr.bf16.mxu0 %v10038_v22  ;;  %2965 = vmatprep.subr.bf16.mxu1 %v10041_v23  ;;  %v10105_v22 = vld [vmem:[#allocation9 + $0x628] ss:$16 sps:$4 sm:$0xff]   ;;  %v10110_v23 = vld [vmem:[#allocation9 + $0x644] ss:$16 sps:$4 sm:$0xff]  }
 0x3d1   :  { %2802 = vmatpush1.bf16.msra.mxu0 %v10036_v24  ;;  %2966 = vmatpush1.bf16.msra.mxu1 %v10039_v6  ;;  %v10113_v24 = vld [vmem:[#allocation9 + $0x64c] ss:$16 sps:$4 sm:$0xff]   ;;  %v10108_v6 = vld [vmem:[#allocation9 + $0x640] ss:$16 sps:$4 sm:$0xff]  }
 0x3d2   :  { %2803 = vmatprep.subr.bf16.mxu0 %v10044_v25  ;;  %2967 = vmatprep.subr.bf16.mxu1 %v10047_v27  ;;  %v10111_v25 = vld [vmem:[#allocation9 + $0x648] ss:$16 sps:$4 sm:$0xff]   ;;  %v10116_v27 = vld [vmem:[#allocation9 + $0x664] ss:$16 sps:$4 sm:$0xff]  }
 0x3d5   :  { %2804 = vmatpush1.bf16.msra.mxu0 %v10042_v28  ;;  %2968 = vmatpush1.bf16.msra.mxu1 %v10045_v29  ;;  %v10119_v28 = vld [vmem:[#allocation9 + $0x66c] ss:$16 sps:$4 sm:$0xff]   ;;  %v10114_v29 = vld [vmem:[#allocation9 + $0x660] ss:$16 sps:$4 sm:$0xff]  }
 0x3d6   :  { %2805 = vmatprep.subr.bf16.mxu0 %v10050_v31  ;;  %2969 = vmatprep.subr.bf16.mxu1 %v10053_v32  ;;  %v10117_v31 = vld [vmem:[#allocation9 + $0x668] ss:$16 sps:$4 sm:$0xff]   ;;  %v10122_v32 = vld [vmem:[#allocation9 + $0x684] ss:$16 sps:$4 sm:$0xff]  }
 0x3d9   :  { %2806 = vmatpush1.bf16.msra.mxu0 %v10048_v33  ;;  %2970 = vmatpush1.bf16.msra.mxu1 %v10051_v34  ;;  %v10125_v33 = vld [vmem:[#allocation9 + $0x68c] ss:$16 sps:$4 sm:$0xff]   ;;  %v10120_v34 = vld [vmem:[#allocation9 + $0x680] ss:$16 sps:$4 sm:$0xff]  }
 0x3da   :  { %2807 = vmatprep.subr.bf16.mxu0 %v10056_v35  ;;  %2971 = vmatprep.subr.bf16.mxu1 %v10059_v36  ;;  %v10123_v35 = vld [vmem:[#allocation9 + $0x688] ss:$16 sps:$4 sm:$0xff]   ;;  %v10128_v36 = vld [vmem:[#allocation9 + $0x6a4] ss:$16 sps:$4 sm:$0xff]  }
 0x3dd   :  { %2808 = vmatpush1.bf16.msra.mxu0 %v10054_v37  ;;  %2972 = vmatpush1.bf16.msra.mxu1 %v10057_v38  ;;  %v10131_v37 = vld [vmem:[#allocation9 + $0x6ac] ss:$16 sps:$4 sm:$0xff]   ;;  %v10126_v38 = vld [vmem:[#allocation9 + $0x6a0] ss:$16 sps:$4 sm:$0xff]  }
 0x3de   :  { %2809 = vmatprep.subr.bf16.mxu0 %v10062_v39  ;;  %2973 = vmatprep.subr.bf16.mxu1 %v10065_v40  ;;  %v10129_v39 = vld [vmem:[#allocation9 + $0x6a8] ss:$16 sps:$4 sm:$0xff]   ;;  %v10134_v40 = vld [vmem:[#allocation9 + $0x6c4] ss:$16 sps:$4 sm:$0xff]  }
 0x3e1   :  { %2810 = vmatpush1.bf16.msra.mxu0 %v10060_v41  ;;  %2974 = vmatpush1.bf16.msra.mxu1 %v10063_v42  ;;  %v10137_v41 = vld [vmem:[#allocation9 + $0x6cc] ss:$16 sps:$4 sm:$0xff]   ;;  %v10132_v42 = vld [vmem:[#allocation9 + $0x6c0] ss:$16 sps:$4 sm:$0xff]  }
 0x3e2   :  { %2811 = vmatprep.subr.bf16.mxu0 %v10068_v0  ;;  %2975 = vmatprep.subr.bf16.mxu1 %v10071_v43  ;;  %v10135_v0 = vld [vmem:[#allocation9 + $0x6c8] ss:$16 sps:$4 sm:$0xff]   ;;  %v10140_v43 = vld [vmem:[#allocation9 + $0x6e4] ss:$16 sps:$4 sm:$0xff]  }
 0x3e5   :  { %2812 = vmatpush1.bf16.msra.mxu0 %v10066_v44  ;;  %2976 = vmatpush1.bf16.msra.mxu1 %v10069_v45  ;;  %v10143_v44 = vld [vmem:[#allocation9 + $0x6ec] ss:$16 sps:$4 sm:$0xff]   ;;  %v10138_v45 = vld [vmem:[#allocation9 + $0x6e0] ss:$16 sps:$4 sm:$0xff]  }
 0x3e6   :  { %2813 = vmatprep.subr.bf16.mxu0 %v10074_v46  ;;  %2977 = vmatprep.subr.bf16.mxu1 %v10077_v47  ;;  %v10141_v46 = vld [vmem:[#allocation9 + $0x6e8] ss:$16 sps:$4 sm:$0xff]   ;;  %v10146_v47 = vld [vmem:[#allocation9 + $0x704] ss:$16 sps:$4 sm:$0xff]  }
 0x3e9   :  { %2814 = vmatpush1.bf16.msra.mxu0 %v10072_v49  ;;  %2978 = vmatpush1.bf16.msra.mxu1 %v10075_v50  ;;  %v10144_v49 = vld [vmem:[#allocation9 + $0x700] ss:$16 sps:$4 sm:$0xff]   ;;  %v10147_v50 = vld [vmem:[#allocation9 + $0x708] ss:$16 sps:$4 sm:$0xff]  }
 0x3ea   :  { %2815 = vmatprep.subr.bf16.mxu0 %v10080_v51  ;;  %2979 = vmatprep.subr.bf16.mxu1 %v10083_v26  ;;  %v10152_v51 = vld [vmem:[#allocation9 + $0x724] ss:$16 sps:$4 sm:$0xff]   ;;  %v10155_v26 = vld [vmem:[#allocation9 + $0x72c] ss:$16 sps:$4 sm:$0xff]  }
 0x3ed   :  { %2816 = vmatpush1.bf16.msra.mxu0 %v10078_v54  ;;  %2980 = vmatpush1.bf16.msra.mxu1 %v10081_v55  ;;  %v10158_v54 = vld [vmem:[#allocation9 + $0x744] ss:$16 sps:$4 sm:$0xff]   ;;  %v10161_v55 = vld [vmem:[#allocation9 + $0x74c] ss:$16 sps:$4 sm:$0xff]  }
 0x3ee   :  { %2817 = vmatprep.subr.bf16.mxu0 %v10086_v56  ;;  %2981 = vmatprep.subr.bf16.mxu1 %v10089_v57  ;;  %v10156_v56 = vld [vmem:[#allocation9 + $0x740] ss:$16 sps:$4 sm:$0xff]   ;;  %v10159_v57 = vld [vmem:[#allocation9 + $0x748] ss:$16 sps:$4 sm:$0xff]  }
 0x3f1   :  { %2818 = vmatpush1.bf16.msra.mxu0 %v10084_v61  ;;  %2982 = vmatpush1.bf16.msra.mxu1 %v10087_v62  ;;  %v10162_v61 = vld [vmem:[#allocation9 + $0x760] ss:$16 sps:$4 sm:$0xff]   ;;  %v10165_v62 = vld [vmem:[#allocation9 + $0x768] ss:$16 sps:$4 sm:$0xff]  }
 0x3f2   :  { %2819 = vmatprep.subr.bf16.mxu0 %v10092_v63  ;;  %2983 = vmatprep.subr.bf16.mxu1 %v10095_v1  ;;  %v10170_v63 = vld [vmem:[#allocation9 + $0x784] ss:$16 sps:$4 sm:$0xff]   ;;  %v10173_v1 = vld [vmem:[#allocation9 + $0x78c] ss:$16 sps:$4 sm:$0xff]  }
 0x3f5   :  { %2820 = vmatpush1.bf16.msra.mxu0 %v10090_v4  ;;  %2984 = vmatpush1.bf16.msra.mxu1 %v10093_v5  ;;  %v635_v4 = vsub.s32 6, %v11546_v8  ;;  %v10176_v5 = vld [vmem:[#allocation9 + $0x7a4] ss:$16 sps:$4 sm:$0xff]  }
 0x3f6   :  { %2830 = vmatprep.subr.bf16.mxu0 %v10098_v12  ;;  %2994 = vmatprep.subr.bf16.mxu1 %v10101_v13  ;;  %v10179_v12 = vld [vmem:[#allocation9 + $0x7ac] ss:$16 sps:$4 sm:$0xff]   ;;  %v10174_v13 = vld [vmem:[#allocation9 + $0x7a0] ss:$16 sps:$4 sm:$0xff]  }
 0x3f8   :  { %2822 = vmatmul.mubr.bf16.vlgmr.msra.gmra.mrb[8].mxu0 %v1145_v16  ;;  %2986 = vmatmul.mubr.bf16.vlgmr.msra.gmra.mrb[8].mxu1 %v1145_v16  ;;  %v636_v16 = vrot.slane %v11549_v10, %v635_v4  ;;  %v10186_v10 = vld [vmem:[#allocation9 + $0x7e0] ss:$16 sps:$4 sm:$0xff]  }
 0x3f9   :  { %2831 = vmatpush1.bf16.msra.mxu0 %v10096_v17  ;;  %2995 = vmatpush1.bf16.msra.mxu1 %v10099_v18  ;;  %v10182_v17 = vld [vmem:[#allocation9 + $0x7c4] ss:$16 sps:$4 sm:$0xff]   ;;  %v10185_v18 = vld [vmem:[#allocation9 + $0x7cc] ss:$16 sps:$4 sm:$0xff]  }
 0x3fa   :  { %2832 = vmatprep.subr.bf16.mxu0 %v10104_v19  ;;  %2996 = vmatprep.subr.bf16.mxu1 %v10107_v20  ;;  %v10180_v19 = vld [vmem:[#allocation9 + $0x7c0] ss:$16 sps:$4 sm:$0xff]   ;;  %v10183_v20 = vld [vmem:[#allocation9 + $0x7c8] ss:$16 sps:$4 sm:$0xff]  }
 0x3fb   :  { %2862 = vmatprep.mubr.bf16.mxu0 %v1148_v14  ;;  %3026 = vmatprep.mubr.bf16.mxu1 %v1148_v14  ;;  %v1127_v14 = vadd.f32 %v11568_v7, %v636_v16  ;;  %v10194_v7 = vld [vmem:[%s12270_s20] sm:$0xff]  }
 0x3fd   :  { %2833 = vmatpush1.bf16.msra.mxu0 %v10102_v21  ;;  %2997 = vmatpush1.bf16.msra.mxu1 %v10105_v22  ;;  %v10188_v21 = vld [vmem:[#allocation9 + $0x7e4] ss:$16 sps:$4 sm:$0xff]   ;;  %v10191_v22 = vld [vmem:[#allocation9 + $0x7ec] ss:$16 sps:$4 sm:$0xff]  }
 0x3fe   :  { %2834 = vmatprep.subr.bf16.mxu0 %v10110_v23  ;;  %2998 = vmatprep.subr.bf16.mxu1 %v10113_v24  ;;  %v10189_v23 = vld [vmem:[#allocation9 + $0x7e8] ss:$16 sps:$4 sm:$0xff]   ;;  %v1139_v24 = vmax.f32 %v1127_v14, 0.0 }
 0x3ff   :  { %v3387_v14 = vld [vmem:[%s12271_s12] sm:$0xff] }
 0x401   :  { %2835 = vmatpush1.bf16.msra.mxu0 %v10108_v6  ;;  %2999 = vmatpush1.bf16.msra.mxu1 %v10111_v25  ;;  %v10192_v6 = vld [vmem:[%s12270_s20 + $0x40] sm:$0xff]  }
 0x402   :  { %2836 = vmatprep.subr.bf16.mxu0 %v10116_v27  ;;  %3000 = vmatprep.subr.bf16.mxu1 %v10119_v28  ;;  %v10193_v25 = vld [vmem:[%s12270_s20 + $0xc0] sm:$0xff]   ;;  %v1147_v28 = vpack.c.bf16 %v1139_v24, %v1139_v24  ;;  %v3482_v24 = vld [vmem:[%s12272_s21 + $0x18] sm:$0xff] }
 0x403   :  { %v10195_v27 = vld [vmem:[%s12270_s20 + $0x80] sm:$0xff]  }
 0x405   :  { %2837 = vmatpush1.bf16.msra.mxu0 %v10114_v29  ;;  %3001 = vmatpush1.bf16.msra.mxu1 %v10117_v31  ;;  %v10196_v29 = vld [vmem:[%s12270_s20 + $0x48] sm:$0xff]  }
 0x406   :  { %2838 = vmatprep.subr.bf16.mxu0 %v10122_v32  ;;  %3002 = vmatprep.subr.bf16.mxu1 %v10125_v33  ;;  %v10197_v31 = vld [vmem:[%s12270_s20 + $0xc8] sm:$0xff]  }
 0x407   :  { %v10198_v32 = vld [vmem:[%s12270_s20 + $0x8] sm:$0xff]  }
 0x408   :  { %v10199_v33 = vld [vmem:[%s12270_s20 + $0x88] sm:$0xff]  }
 0x409   :  { %2839 = vmatpush1.bf16.msra.mxu0 %v10120_v34  ;;  %3003 = vmatpush1.bf16.msra.mxu1 %v10123_v35  ;;  %v10200_v34 = vld [vmem:[%s12270_s20 + $0x50] sm:$0xff]  }
 0x40a   :  { %2840 = vmatprep.subr.bf16.mxu0 %v10128_v36  ;;  %3004 = vmatprep.subr.bf16.mxu1 %v10131_v37  ;;  %v10201_v35 = vld [vmem:[%s12270_s20 + $0xd0] sm:$0xff]  }
 0x40b   :  { %v10202_v36 = vld [vmem:[%s12270_s20 + $0x10] sm:$0xff]  }
 0x40c   :  { %v10203_v37 = vld [vmem:[%s12270_s20 + $0x90] sm:$0xff]  }
 0x40d   :  { %2841 = vmatpush1.bf16.msra.mxu0 %v10126_v38  ;;  %3005 = vmatpush1.bf16.msra.mxu1 %v10129_v39  ;;  %v10204_v38 = vld [vmem:[%s12270_s20 + $0x58] sm:$0xff]  }
 0x40e   :  { %2842 = vmatprep.subr.bf16.mxu0 %v10134_v40  ;;  %3006 = vmatprep.subr.bf16.mxu1 %v10137_v41  ;;  %v10205_v39 = vld [vmem:[%s12270_s20 + $0xd8] sm:$0xff]  }
 0x40f   :  { %v10206_v40 = vld [vmem:[%s12270_s20 + $0x18] sm:$0xff]  }
 0x410   :  { %v10207_v41 = vld [vmem:[%s12270_s20 + $0x98] sm:$0xff]  }
 0x411   :  { %2843 = vmatpush1.bf16.msra.mxu0 %v10132_v42  ;;  %3007 = vmatpush1.bf16.msra.mxu1 %v10135_v0  ;;  %v10208_v42 = vld [vmem:[%s12270_s20 + $0x60] sm:$0xff]  }
 0x412   :  { %2844 = vmatprep.subr.bf16.mxu0 %v10140_v43  ;;  %3008 = vmatprep.subr.bf16.mxu1 %v10143_v44  ;;  %v10209_v0 = vld [vmem:[%s12270_s20 + $0xe0] sm:$0xff]  }
 0x413   :  { %v10210_v43 = vld [vmem:[%s12270_s20 + $0x20] sm:$0xff]  }
 0x414   :  { %v10211_v44 = vld [vmem:[%s12270_s20 + $0xa0] sm:$0xff]  }
 0x415   :  { %2845 = vmatpush1.bf16.msra.mxu0 %v10138_v45  ;;  %3009 = vmatpush1.bf16.msra.mxu1 %v10141_v46  ;;  %v10212_v45 = vld [vmem:[%s12270_s20 + $0x68] sm:$0xff]  }
 0x416   :  { %2846 = vmatprep.subr.bf16.mxu0 %v10146_v47  ;;  %3010 = vmatprep.subr.bf16.mxu1 %v10149_v48  ;;  %v10213_v46 = vld [vmem:[%s12270_s20 + $0xe8] sm:$0xff]  }
 0x417   :  { %v10214_v47 = vld [vmem:[%s12270_s20 + $0x28] sm:$0xff]  }
 0x418   :  { %v10215_v48 = vld [vmem:[%s12270_s20 + $0xa8] sm:$0xff]  }
 0x419   :  { %2847 = vmatpush1.bf16.msra.mxu0 %v10144_v49  ;;  %3011 = vmatpush1.bf16.msra.mxu1 %v10147_v50  ;;  %v10216_v49 = vld [vmem:[%s12270_s20 + $0x70] sm:$0xff]  }
 0x41a   :  { %2848 = vmatprep.subr.bf16.mxu0 %v10152_v51  ;;  %3012 = vmatprep.subr.bf16.mxu1 %v10155_v26  ;;  %v10217_v50 = vld [vmem:[%s12270_s20 + $0xf0] sm:$0xff]  }
 0x41b   :  { %v10218_v51 = vld [vmem:[%s12270_s20 + $0x30] sm:$0xff]  }
 0x41c   :  { %v10219_v26 = vld [vmem:[%s12270_s20 + $0xb0] sm:$0xff]  }
 0x41d   :  { %2849 = vmatpush1.bf16.msra.mxu0 %v10150_v52  ;;  %3013 = vmatpush1.bf16.msra.mxu1 %v10153_v53  ;;  %v10220_v52 = vld [vmem:[%s12270_s20 + $0x78] sm:$0xff]  }
 0x41e   :  { %2850 = vmatprep.subr.bf16.mxu0 %v10158_v54  ;;  %3014 = vmatprep.subr.bf16.mxu1 %v10161_v55  ;;  %v10221_v53 = vld [vmem:[%s12270_s20 + $0xf8] sm:$0xff]  }
 0x41f   :  { %v10222_v54 = vld [vmem:[%s12270_s20 + $0x38] sm:$0xff]  }
 0x420   :  { %v10223_v55 = vld [vmem:[%s12270_s20 + $0xb8] sm:$0xff]  }
 0x421   :  { %2851 = vmatpush1.bf16.msra.mxu0 %v10156_v56  ;;  %3015 = vmatpush1.bf16.msra.mxu1 %v10159_v57  ;;  %v1405_v56 = vld [vmem:[#allocation11] sm:$0xf] }
 0x422   :  { %2852 = vmatprep.subr.bf16.mxu0 %v10164_v58  ;;  %3016 = vmatprep.subr.bf16.mxu1 %v10167_v60  ;;  %v1410_v57 = vrot.slane %v1405_v56, %v611_v9  ;;  %v1418_v58 = vrot.slane %v1405_v56, %v619_v30  ;;  %v1414_v60 = vrot.slane %v1405_v56, %v615_v11 }
 0x425   :  { %2853 = vmatpush1.bf16.msra.mxu0 %v10162_v61  ;;  %3017 = vmatpush1.bf16.msra.mxu1 %v10165_v62  ;;  %v1422_v61 = vrot.slane %v1405_v56, %v623_v15  ;;  %v3574_v56 = vld [vmem:[%s12274_s19] sm:$0xff] }
 0x426   :  { %2854 = vmatprep.subr.bf16.mxu0 %v10170_v63  ;;  %3018 = vmatprep.subr.bf16.mxu1 %v10173_v1 }
 0x427   :  { %3578 = vrot.lane.b32.xlu0 %v3574_v56, %s11088_s9 }
 0x429   :  { %2855 = vmatpush1.bf16.msra.mxu0 %v10168_v2  ;;  %3019 = vmatpush1.bf16.msra.mxu1 %v10171_v3 }
 0x42a   :  { %2856 = vmatprep.subr.bf16.mxu0 %v10176_v5  ;;  %3020 = vmatprep.subr.bf16.mxu1 %v10179_v12 }
 0x42d   :  { %2857 = vmatpush1.bf16.msra.mxu0 %v10174_v13  ;;  %3021 = vmatpush1.bf16.msra.mxu1 %v10177_v59 }
 0x42e   :  { %2858 = vmatprep.subr.bf16.mxu0 %v10182_v17  ;;  %3022 = vmatprep.subr.bf16.mxu1 %v10185_v18 }
 0x431   :  { %2859 = vmatpush1.bf16.msra.mxu0 %v10180_v19  ;;  %3023 = vmatpush1.bf16.msra.mxu1 %v10183_v20 }
 0x432   :  { %2860 = vmatprep.subr.bf16.mxu0 %v10188_v21  ;;  %3024 = vmatprep.subr.bf16.mxu1 %v10191_v22  ;;  %v3479_v21 = vld [vmem:[%s12272_s21] sm:$0xff]  ;;  %v3480_v22 = vld [vmem:[%s12272_s21 + $0x8] sm:$0xff] }
 0x435   :  { %2861 = vmatpush1.bf16.msra.mxu0 %v10186_v10  ;;  %3025 = vmatpush1.bf16.msra.mxu1 %v10189_v23  ;;  %v3481_v10 = vld [vmem:[%s12272_s21 + $0x10] sm:$0xff]  ;;  %v9273_v23 = vpack.c.bf16 %v3480_v22, %v3479_v21 }
 0x436   :  { %8370 = vmatprep.subr.bf16.mxu0 %v10192_v6  ;;  %8392 = vmatprep.subr.bf16.mxu1 %v10193_v25  ;;  %v9277_v6 = vpack.c.bf16 %v3482_v24, %v3481_v10  ;;  %v3483_v25 = vld [vmem:[%s12272_s21 + $0x20] sm:$0xff] }
 0x438   :  { %2863 = vmatmul.mubr.bf16.vlgmr.msra.gmra.mrb[8].mxu0 %v1147_v28  ;;  %3027 = vmatmul.mubr.bf16.vlgmr.msra.gmra.mrb[8].mxu1 %v1147_v28  ;;  %v3485_v28 = vld [vmem:[%s12272_s21 + $0x30] sm:$0xff] }
 0x439   :  { %8371 = vmatpush3.bf16.msra.mxu0 %v10194_v7  ;;  %8393 = vmatpush3.bf16.msra.mxu1 %v10195_v27  ;;  %v3484_v7 = vld [vmem:[%s12272_s21 + $0x28] sm:$0xff] }
 0x43a   :  { %8372 = vmatprep.subr.bf16.mxu0 %v10196_v29  ;;  %8394 = vmatprep.subr.bf16.mxu1 %v10197_v31  ;;  %v9281_v27 = vpack.c.bf16 %v3484_v7, %v3483_v25  ;;  %v3486_v29 = vld [vmem:[%s12272_s21 + $0x38] sm:$0xff]  ;;  %v3610_v7 = vld [vmem:[%s12275_s0 + $0x8] sm:$0xff] }
 0x43b   :  { %v9285_v31 = vpack.c.bf16 %v3486_v29, %v3485_v28  ;;  %v3602_v28 = vld [vmem:[#allocation23 + $0x30] sm:$0xff]  ;;  %v3603_v29 = vld [vmem:[#allocation23 + $0x38] sm:$0xff] }
 0x43d   :  { %8373 = vmatpush3.bf16.msra.mxu0 %v10198_v32  ;;  %8395 = vmatpush3.bf16.msra.mxu1 %v10199_v33  ;;  %v3487_v32 = vld [vmem:[%s12272_s21 + $0x40] sm:$0xff]  ;;  %v3488_v33 = vld [vmem:[%s12272_s21 + $0x48] sm:$0xff] }
 0x43e   :  { %8374 = vmatprep.subr.bf16.mxu0 %v10200_v34  ;;  %8396 = vmatprep.subr.bf16.mxu1 %v10201_v35  ;;  %v9289_v34 = vpack.c.bf16 %v3488_v33, %v3487_v32  ;;  %v3489_v35 = vld [vmem:[%s12272_s21 + $0x50] sm:$0xff]  ;;  %v11675_v32 = vpack.c.bf16 %v3603_v29, %v3602_v28 }
 0x441   :  { %8375 = vmatpush3.bf16.msra.mxu0 %v10202_v36  ;;  %8397 = vmatpush3.bf16.msra.mxu1 %v10203_v37  ;;  %v3490_v36 = vld [vmem:[%s12272_s21 + $0x58] sm:$0xff] }
 0x442   :  { %8376 = vmatprep.subr.bf16.mxu0 %v10204_v38  ;;  %8398 = vmatprep.subr.bf16.mxu1 %v10205_v39  ;;  %v9293_v37 = vpack.c.bf16 %v3490_v36, %v3489_v35  ;;  %v3491_v38 = vld [vmem:[%s12272_s21 + $0x60] sm:$0xff]  ;;  %v3492_v39 = vld [vmem:[%s12272_s21 + $0x68] sm:$0xff] }
 0x443   :  { %v3604_v35 = vld [vmem:[#allocation23 + $0x40] sm:$0xff]  ;;  %v3605_v36 = vld [vmem:[#allocation23 + $0x48] sm:$0xff] }
 0x445   :  { %8377 = vmatpush3.bf16.msra.mxu0 %v10206_v40  ;;  %8399 = vmatpush3.bf16.msra.mxu1 %v10207_v41  ;;  %v9297_v40 = vpack.c.bf16 %v3492_v39, %v3491_v38  ;;  %v3606_v38 = vld [vmem:[#allocation23 + $0x50] sm:$0xff]  ;;  %v3607_v39 = vld [vmem:[#allocation23 + $0x58] sm:$0xff] }
 0x446   :  { %8378 = vmatprep.subr.bf16.mxu0 %v10208_v42  ;;  %8400 = vmatprep.subr.bf16.mxu1 %v10209_v0  ;;  %v8218_v0 = vld [vmem:[#allocation12] ss:$0 sm:$0xff] }
 0x449   :  { %8379 = vmatpush3.bf16.msra.mxu0 %v10210_v43  ;;  %8401 = vmatpush3.bf16.msra.mxu1 %v10211_v44 }
 0x44a   :  { %8380 = vmatprep.subr.bf16.mxu0 %v10212_v45  ;;  %8402 = vmatprep.subr.bf16.mxu1 %v10213_v46 }
 0x44d   :  { %8381 = vmatpush3.bf16.msra.mxu0 %v10214_v47  ;;  %8403 = vmatpush3.bf16.msra.mxu1 %v10215_v48 }
 0x44e   :  { %8382 = vmatprep.subr.bf16.mxu0 %v10216_v49  ;;  %8404 = vmatprep.subr.bf16.mxu1 %v10217_v50 }
 0x451   :  { %8383 = vmatpush3.bf16.msra.mxu0 %v10218_v51  ;;  %8405 = vmatpush3.bf16.msra.mxu1 %v10219_v26 }
 0x452   :  { %8384 = vmatprep.subr.bf16.mxu0 %v10220_v52  ;;  %8406 = vmatprep.subr.bf16.mxu1 %v10221_v53  ;;  %v3388_v52 = vld [vmem:[%s12271_s12 + $0x8] sm:$0xff]  ;;  %v3493_v53 = vld [vmem:[%s12272_s21 + $0x70] sm:$0xff] }
 0x455   :  { %8385 = vmatpush3.bf16.msra.mxu0 %v10222_v54  ;;  %8407 = vmatpush3.bf16.msra.mxu1 %v10223_v55  ;;  %v3494_v54 = vld [vmem:[%s12272_s21 + $0x78] sm:$0xff] }
 0x456   :  { %9274 = vmatprep.subr.bf16.mxu1 %v9273_v23  ;;  %v9301_v55 = vpack.c.bf16 %v3494_v54, %v3493_v53  ;;  %v8258_v53 = vld [vmem:[%s12277_s5] ss:$0 sm:$0xff] }
 0x50b   :  { %v2864_v62 = vpop.f32.mrb[8].mxu0  ;;  %v3028_v63 = vpop.f32.mrb[8].mxu1 }
 0x50c   :  { %v9668_v1 = vadd.f32 %v2864_v62, %v1410_v57  ;;  %v9670_v2 = vadd.f32 %v3028_v63, %v1418_v58  ;;  %v2866_v3 = vpop.f32.mrb[9].mxu0  ;;  %v3030_v4 = vpop.f32.mrb[9].mxu1  ;;  %v3575_v57 = vld [vmem:[%s12274_s19 + $0x8] sm:$0xff]  ;;  %v3475_v58 = vld [vmem:[#allocation14] sm:$0xff] }
 0x50d   :  { %v9669_v5 = vadd.f32 %v2866_v3, %v1414_v60  ;;  %v9671_v12 = vadd.f32 %v3030_v4, %v1422_v61  ;;  %v2868_v13 = vpop.f32.mrb[10].mxu0  ;;  %v3032_v9 = vpop.f32.mrb[10].mxu1  ;;  %3580 = vrot.lane.b32.xlu0 %v3575_v57, %s11088_s9  ;;  %v3476_v61 = vld [vmem:[#allocation14 + $0x8] sm:$0xff] }
 0x50e   :  { %v3035_v59 = vmax.f32 %v9668_v1, 0.0  ;;  %v3037_v16 = vmax.f32 %v9670_v2, 0.0  ;;  %v2869_v30 = vpop.f32.mrb[11].mxu0  ;;  %v3033_v11 = vpop.f32.mrb[11].mxu1  ;;  %v3596_v9 = vld [vmem:[#allocation23] sm:$0xff] }
 0x50f   :  { %v3036_v8 = vmax.f32 %v9669_v5, 0.0  ;;  %v3038_v15 = vmax.f32 %v9671_v12, 0.0  ;;  %v3608_v12 = vld [vmem:[#allocation15] sm:$0xff]  ;;  %v3579_v13 = vpop.permute.xlu0 %3578 }
 0x510   :  { %v3039_v19 = vpack.c.bf16 %v3035_v59, %v3035_v59  ;;  %v3041_v20 = vpack.c.bf16 %v3037_v16, %v3037_v16  ;;  %v3597_v59 = vld [vmem:[#allocation23 + $0x8] sm:$0xff]  ;;  %v3598_v11 = vld [vmem:[#allocation23 + $0x10] sm:$0xff] }
 0x511   :  { %v3040_v17 = vpack.c.bf16 %v3036_v8, %v3036_v8  ;;  %v3042_v18 = vpack.c.bf16 %v3038_v15, %v3038_v15  ;;  %v11658_v30 = vpack.c.bf16 %v3597_v59, %v3596_v9  ;;  %v3599_v8 = vld [vmem:[#allocation23 + $0x18] sm:$0xff]  ;;  %v3944_v59 = vld [vmem:[%s12278_s18 + $0x28] sm:$0xff] }
 0x512   :  { %v11661_v15 = vpack.c.bf16 %v3599_v8, %v3598_v11  ;;  %v3943_v9 = vld [vmem:[%s12278_s18 + $0x20] sm:$0xff]  ;;  %v3945_v11 = vld [vmem:[%s12278_s18 + $0x30] sm:$0xff]  ;;  %v3946_v8 = vld [vmem:[%s12278_s18 + $0x38] sm:$0xff] }
 0x513   :  { %3338 = vmatprep.mubr.bf16.mxu0 %v3040_v17  ;;  %3378 = vmatprep.mubr.bf16.mxu1 %v3042_v18  ;;  %v3600_v18 = vld [vmem:[#allocation23 + $0x20] sm:$0xff] }
 0x514   :  { %3339 = vmatmul.mubr.bf16.vlgmr.msra.gmra.mrb[12].mxu0 %v3039_v19  ;;  %3379 = vmatmul.mubr.bf16.vlgmr.msra.gmra.mrb[12].mxu1 %v3041_v20  ;;  %v3601_v19 = vld [vmem:[#allocation23 + $0x28] sm:$0xff] }
 0x515   :  { %8705 = vmatprep.mubr.msk.f32.mxu0 %vm3389_vm0, %v3387_v14  ;;  %9276 = vmatpush3.bf16.msra.mxu1 %v9273_v23  ;;  %v11666_v10 = vpack.c.bf16 %v3601_v19, %v3600_v18  ;;  %v3947_v18 = vld [vmem:[%s12278_s18 + $0x40] sm:$0xff]  ;;  %v3948_v19 = vld [vmem:[%s12278_s18 + $0x48] sm:$0xff] }
 0x516   :  { %9278 = vmatprep.subr.bf16.mxu1 %v9277_v6 }
 0x519   :  { %9280 = vmatpush3.bf16.msra.mxu1 %v9277_v6  ;;  %v3609_v6 = vld [vmem:[%s12275_s0] sm:$0xff] }
 0x51a   :  { %9282 = vmatprep.subr.bf16.mxu1 %v9281_v27 }
 0x51d   :  { %9284 = vmatpush3.bf16.msra.mxu1 %v9281_v27  ;;  %v3717_v27 = vld [vmem:[%s12276_s4 + $0x8] sm:$0xff] }
 0x51e   :  { %9286 = vmatprep.subr.bf16.mxu1 %v9285_v31 }
 0x521   :  { %9288 = vmatpush3.bf16.msra.mxu1 %v9285_v31  ;;  %v3716_v31 = vld [vmem:[%s12276_s4] sm:$0xff] }
 0x522   :  { %9290 = vmatprep.subr.bf16.mxu1 %v9289_v34 }
 0x525   :  { %9292 = vmatpush3.bf16.msra.mxu1 %v9289_v34 }
 0x526   :  { %9294 = vmatprep.subr.bf16.mxu1 %v9293_v37 }
 0x529   :  { %9296 = vmatpush3.bf16.msra.mxu1 %v9293_v37  ;;  %v11688_v37 = vpack.c.bf16 %v3605_v36, %v3604_v35 }
 0x52a   :  { %9298 = vmatprep.subr.bf16.mxu1 %v9297_v40 }
 0x52d   :  { %9300 = vmatpush3.bf16.msra.mxu1 %v9297_v40  ;;  %v11694_v40 = vpack.c.bf16 %v3607_v39, %v3606_v38 }
 0x52e   :  { %9302 = vmatprep.subr.bf16.mxu1 %v9301_v55 }
 0x531   :  { %9304 = vmatpush3.bf16.msra.mxu1 %v9301_v55 }
 0x532   :  { %9330 = vmatprep.subr.bf16.mxu1 %v11658_v30 }
 0x57f   :  { %v3581_v14 = vpop.permute.xlu0 %3580 }
 0x5e7   :  { %v8386_v41 = vpop.f32.mrb[12].mxu0  ;;  %v8408_v42 = vpop.f32.mrb[12].mxu1 }
 0x5e8   :  { %v8387_v43 = vpop.f32.mrb[13].mxu0  ;;  %v8409_v44 = vpop.f32.mrb[13].mxu1 }
 0x5e9   :  { %v8388_v45 = vadd.f32 %v8387_v43, %v8386_v41  ;;  %v8410_v46 = vadd.f32 %v8409_v44, %v8408_v42  ;;  %v8389_v47 = vpop.f32.mrb[14].mxu0  ;;  %v8411_v48 = vpop.f32.mrb[14].mxu1 }
 0x5ea   :  { %v8390_v49 = vpop.f32.mrb[15].mxu0  ;;  %v8412_v50 = vpop.f32.mrb[15].mxu1 }
 0x5eb   :  { %v3341_v51 = vadd.f32 %v8388_v45, %v8218_v0  ;;  %v8254_v0 = vld [vmem:[#allocation17] ss:$0 sm:$0xff]  ;;  %v8257_v45 = vld [vmem:[#allocation18] ss:$0 sm:$0xff] }
 0x5ed   :  { %v3381_v26 = vadd.f32 %v8410_v46, %v3341_v51 }
 0x5ef   :  { %3386 = vst [vmem:[%s12273_s11] sm:$0x3] %v3381_v26  ;;  %8703 = vmatprep.subr.msk.mxu0 %vm3396_vm1, %v3381_v26 }
 0x5f0   :  { %8704 = vmatpush3.msk.msra.mxu0 %vm3396_vm1, %v3381_v26 }
 0x5f1   :  { %8706 = vmatmul.mubr.msk.f32.vlgmr.msra.gmra.mrb[16].mxu0 %vm3389_vm0, %v3388_v52  ;;  %8743 = vmatprep.subr.mxu0 %v3608_v12 }
 0x5f2   :  { %8744 = vmatpush3.msra.mxu0 %v3608_v12  ;;  %v3942_v12 = vld [vmem:[%s12278_s18 + $0x18] sm:$0xff] }
 0x5f3   :  { %9306 = vmatprep.subr.bf16.mxu0 %v11658_v30 }
 0x6c4   :  { %v8707_v60 = vpop.f32.mrb[16].mxu0 }
 0x6c5   :  { %v3466_v62 = vpop.f32.mrb[17].mxu0  ;;  %v3478_v1 = vmul.f32 %v8707_v60, %v3476_v61 }
 0x6c6   :  { %v3477_v63 = vmul.f32 %v3475_v58, %v3466_v62 }
 0x6c8   :  { %8740 = vmatprep.mubr.f32.mxu1 %v3477_v63 }
 0x6c9   :  { %8741 = vmatmul.mubr.f32.vlgmr.msra.gmra.mrb[16].mxu1 %v3478_v1 }
 0x6ca   :  { %9332 = vmatpush3.bf16.msra.mxu1 %v11658_v30 }
 0x6cb   :  { %9334 = vmatprep.subr.bf16.mxu1 %v11661_v15 }
 0x6ce   :  { %9336 = vmatpush3.bf16.msra.mxu1 %v11661_v15 }
 0x6cf   :  { %9338 = vmatprep.subr.bf16.mxu1 %v11666_v10 }
 0x6d2   :  { %9340 = vmatpush3.bf16.msra.mxu1 %v11666_v10 }
 0x6d3   :  { %9342 = vmatprep.subr.bf16.mxu1 %v11675_v32 }
 0x6d6   :  { %9344 = vmatpush3.bf16.msra.mxu1 %v11675_v32 }
 0x6d7   :  { %9346 = vmatprep.subr.bf16.mxu1 %v11688_v37 }
 0x6da   :  { %9348 = vmatpush3.bf16.msra.mxu1 %v11688_v37 }
 0x6db   :  { %9350 = vmatprep.subr.bf16.mxu1 %v11694_v40 }
 0x6de   :  { %9352 = vmatpush3.bf16.msra.mxu1 %v11694_v40 }
 0x6df   :  { %9378 = vmatprep.subr.bf16.mxu1 %v11658_v30 }
 0x79c   :  { %v8742_v2 = vpop.f32.mrb[16].mxu1 }
 0x79d   :  { %v3561_v3 = vpop.f32.mrb[17].mxu1  ;;  %v3572_v5 = vmul.f32 1.442695, %v8742_v2 }
 0x79e   :  { %3588 = vrot.lane.b32.xlu1 %v3561_v3, %s11088_s9  ;;  %v3570_v4 = vmul.f32 1.442695, %v3561_v3  ;;  %v3940_v3 = vld [vmem:[%s12278_s18 + $0x8] sm:$0xff] }
 0x7a0   :  { %10224 = vpow2.f32 %v3570_v4 }
 0x7a1   :  { %10226 = vpow2.f32 %v3572_v5  ;;  %v3941_v5 = vld [vmem:[%s12278_s18 + $0x10] sm:$0xff] }
 0x7a2   :  { %3590 = vrot.lane.b32.xlu1 %v8742_v2, %s11088_s9  ;;  %v3939_v2 = vld [vmem:[%s12278_s18] sm:$0xff] }
 0x7a3   :  { %v9353_v4 = vpack.c.bf16 %v3940_v3, %v3939_v2  ;;  %v8284_v2 = vld [vmem:[%s12278_s18 + $0xa8] sm:$0xff] }
 0x7aa   :  { %v10225_v16 = vpop.eup %10224 }
 0x7ab   :  { %v3584_v17 = vmul.f32 %v10225_v16, %v3579_v13  ;;  %v10227_v20 = vpop.eup %10226  ;;  %v9357_v13 = vpack.c.bf16 %v3942_v12, %v3941_v5  ;;  %v9361_v16 = vpack.c.bf16 %v3944_v59, %v3943_v9  ;;  %v8286_v5 = vld [vmem:[%s12278_s18 + $0xb8] sm:$0xff] }
 0x7ac   :  { %v3585_v23 = vmul.f32 %v10227_v20, %v3581_v14  ;;  %v9369_v20 = vpack.c.bf16 %v3948_v19, %v3947_v18  ;;  %v3949_v14 = vld [vmem:[%s12278_s18 + $0x50] sm:$0xff]  ;;  %v8274_v19 = vld [vmem:[#allocation21 + $0x1] ss:$0 sm:$0xff] }
 0x810   :  { %v3589_v21 = vpop.permute.xlu1 %3588 }
 0x811   :  { %v3594_v22 = vadd.f32 %v3589_v21, %v3584_v17  ;;  %v9365_v17 = vpack.c.bf16 %v3946_v8, %v3945_v11  ;;  %v3950_v21 = vld [vmem:[%s12278_s18 + $0x58] sm:$0xff] }
 0x812   :  { %v8273_v8 = vld [vmem:[#allocation20 + $0x1] ss:$0 sm:$0xff] }
 0x813   :  { %3632 = vrot.lane.b32.xlu0 %v3594_v22, %s11109_s16  ;;  %v9373_v22 = vpack.c.bf16 %v3950_v21, %v3949_v14 }
 0x814   :  { %v3591_v24 = vpop.permute.xlu1 %3590 }
 0x815   :  { %v3595_v25 = vadd.f32 %v3591_v24, %v3585_v23 }
 0x817   :  { %3634 = vrot.lane.b32.xlu1 %v3595_v25, %s11109_s16  ;;  %3614 = vperm.xlu0 %9806, %v3609_v6  }
 0x81b   :  { %3619 = vperm.xlu1 %9807, %v3610_v7   ;;  %3726 = vperm.xlu0 %9806, %v3717_v27   ;;  %v8263_v27 = vld [vmem:[#allocation20] ss:$0 sm:$0xff] }
 0x81f   :  { %3721 = vperm.xlu1 %9807, %v3716_v31   ;;  %v8264_v31 = vld [vmem:[#allocation21] ss:$0 sm:$0xff] }
 0x885   :  { %v3633_v33 = vpop.permute.xlu0 %3632 }
 0x886   :  { %8745 = vmatprep.mubr.msk.f32.mxu0 %vm3636_vm2, %v3633_v33 }
 0x889   :  { %v3635_v34 = vpop.permute.xlu1 %3634 }
 0x88a   :  { %8746 = vmatmul.mubr.msk.f32.vlgmr.msra.gmra.mrb[18].mxu0 %vm3636_vm2, %v3635_v34 }
 0x88b   :  { %9308 = vmatpush3.bf16.msra.mxu0 %v11658_v30 }
 0x88c   :  { %9310 = vmatprep.subr.bf16.mxu0 %v11661_v15 }
 0x88f   :  { %9312 = vmatpush3.bf16.msra.mxu0 %v11661_v15 }
 0x890   :  { %9314 = vmatprep.subr.bf16.mxu0 %v11666_v10 }
 0x893   :  { %9316 = vmatpush3.bf16.msra.mxu0 %v11666_v10 }
 0x894   :  { %9318 = vmatprep.subr.bf16.mxu0 %v11675_v32 }
 0x896   :  { %v3615_v41 = vpop.permute.xlu0 %3614 }
 0x897   :  { %9320 = vmatpush3.bf16.msra.mxu0 %v11675_v32  ;;  %v3628_v44 = vmul.f32 %v8254_v0, %v3615_v41 }
 0x898   :  { %9322 = vmatprep.subr.bf16.mxu0 %v11688_v37 }
 0x89a   :  { %v3620_v42 = vpop.permute.xlu1 %3619  ;;  %v3727_v46 = vpop.permute.xlu0 %3726 }
 0x89b   :  { %9324 = vmatpush3.bf16.msra.mxu0 %v11688_v37  ;;  %v3629_v43 = vmul.f32 %v8254_v0, %v3620_v42  ;;  %v3736_v50 = vmul.f32 %v8257_v45, %v3727_v46  ;;  %v8266_v42 = vld [vmem:[%s12277_s5 + $0x1] ss:$0 sm:$0xff] }
 0x89c   :  { %9326 = vmatprep.subr.bf16.mxu0 %v11694_v40 }
 0x89e   :  { %v3722_v47 = vpop.permute.xlu1 %3721 }
 0x89f   :  { %9328 = vmatpush3.bf16.msra.mxu0 %v11694_v40  ;;  %v3735_v26 = vmul.f32 %v8257_v45, %v3722_v47 }
 0x8a0   :  { %9354 = vmatprep.subr.bf16.mxu0 %v9353_v4 }
 0x95d   :  { %v8747_v48 = vpop.f32.mrb[18].mxu0 }
 0x95e   :  { %v3713_v49 = vadd.f32 %v8747_v48, %v3629_v43  ;;  %v3707_v51 = vpop.f32.mrb[19].mxu0 }
 0x95f   :  { %v3708_v52 = vadd.f32 %v3707_v51, %v3628_v44 }
 0x960   :  { %v3738_v54 = vadd.f32 %v3736_v50, %v3713_v49 }
 0x961   :  { %v3737_v55 = vadd.f32 %v3735_v26, %v3708_v52  ;;  %v8275_v26 = vld [vmem:[%s12278_s18 + $0x60] sm:$0xff]  ;;  %v8276_v52 = vld [vmem:[%s12278_s18 + $0x68] sm:$0xff] }
 0x962   :  { %v3747_v57 = vadd.f32 %v8258_v53, %v3738_v54  ;;  %v8277_v54 = vld [vmem:[%s12278_s18 + $0x70] sm:$0xff] }
 0x963   :  { %v3746_v56 = vadd.f32 %v8258_v53, %v3737_v55  ;;  %v9425_v53 = vpack.c.bf16 %v8276_v52, %v8275_v26  ;;  %v8278_v55 = vld [vmem:[%s12278_s18 + $0x78] sm:$0xff] }
 0x965   :  { %8772 = vmatprep.mubr.msk.f32.mxu0 %vm3750_vm3, %v3746_v56 }
 0x966   :  { %8773 = vmatmul.mubr.msk.f32.vlgmr.msra.gmra.mrb[20].mxu0 %vm3750_vm3, %v3747_v57 }
 0x967   :  { %9356 = vmatpush3.bf16.msra.mxu0 %v9353_v4  ;;  %v8285_v4 = vld [vmem:[%s12278_s18 + $0xb0] sm:$0xff] }
 0x968   :  { %9358 = vmatprep.subr.bf16.mxu0 %v9357_v13  ;;  %v9445_v12 = vpack.c.bf16 %v8286_v5, %v8285_v4  ;;  %v4626_v4 = vld [vmem:[#allocation30] sm:$0xff] }
 0x969   :  { %v4710_v5 = vld [vmem:[#allocation27] sm:$0xff] }
 0x96b   :  { %9360 = vmatpush3.bf16.msra.mxu0 %v9357_v13 }
 0x96c   :  { %9362 = vmatprep.subr.bf16.mxu0 %v9361_v16 }
 0x96f   :  { %9364 = vmatpush3.bf16.msra.mxu0 %v9361_v16 }
 0x970   :  { %9366 = vmatprep.subr.bf16.mxu0 %v9365_v17 }
 0x973   :  { %9368 = vmatpush3.bf16.msra.mxu0 %v9365_v17 }
 0x974   :  { %9370 = vmatprep.subr.bf16.mxu0 %v9369_v20 }
 0x977   :  { %9372 = vmatpush3.bf16.msra.mxu0 %v9369_v20 }
 0x978   :  { %9374 = vmatprep.subr.bf16.mxu0 %v9373_v22 }
 0x97b   :  { %9376 = vmatpush3.bf16.msra.mxu0 %v9373_v22 }
 0x97c   :  { %9402 = vmatprep.subr.bf16.mxu0 %v11658_v30 }
 0xa39   :  { %v8774_v58 = vpop.f32.mrb[20].mxu0 }
 0xa3a   :  { %v3833_v60 = vsub.f32 %v3747_v57, %v8774_v58  ;;  %v3823_v61 = vpop.f32.mrb[21].mxu0  ;;  %v8279_v57 = vld [vmem:[%s12278_s18 + $0x80] sm:$0xff]  ;;  %v8280_v58 = vld [vmem:[%s12278_s18 + $0x88] sm:$0xff] }
 0xa3b   :  { %v3832_v62 = vsub.f32 %v3746_v56, %v3823_v61  ;;  %v9429_v56 = vpack.c.bf16 %v8278_v55, %v8277_v54  ;;  %v8281_v61 = vld [vmem:[%s12278_s18 + $0x90] sm:$0xff]  ;;  %v8295_v55 = vld [vmem:[#allocation20 + $0x2] ss:$0 sm:$0xff] }
 0xa3c   :  { %v3835_v1 = vmul.f32 %v3833_v60, %v3833_v60 }
 0xa3d   :  { %v3834_v63 = vmul.f32 %v3832_v62, %v3832_v62 }
 0xa3f   :  { %8799 = vmatprep.mubr.msk.f32.mxu1 %vm3750_vm3, %v3834_v63 }
 0xa40   :  { %8800 = vmatmul.mubr.msk.f32.vlgmr.msra.gmra.mrb[18].mxu1 %vm3750_vm3, %v3835_v1  ;;  %v8283_v1 = vld [vmem:[%s12278_s18 + $0xa0] sm:$0xff] }
 0xa41   :  { %9380 = vmatpush3.bf16.msra.mxu1 %v11658_v30  ;;  %v9441_v3 = vpack.c.bf16 %v8284_v2, %v8283_v1 }
 0xa42   :  { %9382 = vmatprep.subr.bf16.mxu1 %v11661_v15 }
 0xa45   :  { %9384 = vmatpush3.bf16.msra.mxu1 %v11661_v15 }
 0xa46   :  { %9386 = vmatprep.subr.bf16.mxu1 %v11666_v10 }
 0xa49   :  { %9388 = vmatpush3.bf16.msra.mxu1 %v11666_v10 }
 0xa4a   :  { %9390 = vmatprep.subr.bf16.mxu1 %v11675_v32 }
 0xa4d   :  { %9392 = vmatpush3.bf16.msra.mxu1 %v11675_v32 }
 0xa4e   :  { %9394 = vmatprep.subr.bf16.mxu1 %v11688_v37 }
 0xa51   :  { %9396 = vmatpush3.bf16.msra.mxu1 %v11688_v37 }
 0xa52   :  { %9398 = vmatprep.subr.bf16.mxu1 %v11694_v40 }
 0xa55   :  { %9400 = vmatpush3.bf16.msra.mxu1 %v11694_v40 }
 0xa56   :  { %9426 = vmatprep.subr.bf16.mxu1 %v9425_v53 }
 0xb13   :  { %v8801_v23 = vpop.f32.mrb[18].mxu1 }
 0xb14   :  { %v3914_v24 = vadd.f32 1e-05, %v8801_v23  ;;  %v3908_v6 = vpop.f32.mrb[19].mxu1 }
 0xb15   :  { %v3909_v25 = vadd.f32 1e-05, %v3908_v6 }
 0xb16   :  { %10228 = vrsqrt.f32 %v3914_v24 }
 0xb17   :  { %10230 = vrsqrt.f32 %v3909_v25 }
 0xb20   :  { %v10229_v7 = vpop.eup %10228 }
 0xb21   :  { %v10231_v28 = vpop.eup %10230  ;;  %v3920_v29 = vmul.f32 %v10229_v7, %v3833_v60  ;;  %v9433_v60 = vpack.c.bf16 %v8280_v58, %v8279_v57  ;;  %v8296_v58 = vld [vmem:[#allocation21 + $0x2] ss:$0 sm:$0xff] }
 0xb22   :  { %v3919_v33 = vmul.f32 %v10231_v28, %v3832_v62  ;;  %v8282_v62 = vld [vmem:[%s12278_s18 + $0x98] sm:$0xff] }
 0xb23   :  { %v3928_v34 = vmul.f32 %v8263_v27, %v3920_v29  ;;  %v9437_v63 = vpack.c.bf16 %v8282_v62, %v8281_v61 }
 0xb24   :  { %v3927_v35 = vmul.f32 %v8263_v27, %v3919_v33 }
 0xb25   :  { %v3936_v36 = vadd.f32 %v8264_v31, %v3928_v34 }
 0xb26   :  { %v3935_v38 = vadd.f32 %v8264_v31, %v3927_v35  ;;  %v4528_v35 = vld [vmem:[#allocation24 + $0x10] sm:$0xff] }
 0xb27   :  { %v3938_v41 = vmax.f32 %v3936_v36, 0.0  ;;  %v4529_v36 = vld [vmem:[#allocation24 + $0x18] sm:$0xff] }
 0xb28   :  { %v3937_v39 = vmax.f32 %v3935_v38, 0.0  ;;  %v9501_v38 = vpack.c.bf16 %v4529_v36, %v4528_v35 }
 0xb2a   :  { %8826 = vmatprep.mubr.msk.f32.mxu0 %vm3750_vm3, %v3937_v39  ;;  %v4530_v39 = vld [vmem:[#allocation24 + $0x20] sm:$0xff] }
 0xb2b   :  { %8827 = vmatmul.mubr.msk.f32.vlgmr.msra.gmra.mrb[22].mxu0 %vm3750_vm3, %v3938_v41  ;;  %v4531_v41 = vld [vmem:[#allocation24 + $0x28] sm:$0xff] }
 0xb2c   :  { %9404 = vmatpush3.bf16.msra.mxu0 %v11658_v30 }
 0xb2d   :  { %9406 = vmatprep.subr.bf16.mxu0 %v11661_v15 }
 0xb30   :  { %9408 = vmatpush3.bf16.msra.mxu0 %v11661_v15 }
 0xb31   :  { %9410 = vmatprep.subr.bf16.mxu0 %v11666_v10 }
 0xb34   :  { %9412 = vmatpush3.bf16.msra.mxu0 %v11666_v10 }
 0xb35   :  { %9414 = vmatprep.subr.bf16.mxu0 %v11675_v32 }
 0xb38   :  { %9416 = vmatpush3.bf16.msra.mxu0 %v11675_v32 }
 0xb39   :  { %9418 = vmatprep.subr.bf16.mxu0 %v11688_v37 }
 0xb3c   :  { %9420 = vmatpush3.bf16.msra.mxu0 %v11688_v37 }
 0xb3d   :  { %9422 = vmatprep.subr.bf16.mxu0 %v11694_v40 }
 0xb40   :  { %9424 = vmatpush3.bf16.msra.mxu0 %v11694_v40 }
 0xb41   :  { %9450 = vmatprep.subr.bf16.mxu0 %v11658_v30 }
 0xbfe   :  { %v8828_v0 = vpop.f32.mrb[22].mxu0 }
 0xbff   :  { %v4031_v43 = vpop.f32.mrb[23].mxu0  ;;  %v4037_v45 = vadd.f32 %v8828_v0, %v8266_v42  ;;  %v4532_v0 = vld [vmem:[#allocation24 + $0x30] sm:$0xff] }
 0xc00   :  { %v4032_v44 = vadd.f32 %v8266_v42, %v4031_v43  ;;  %v9505_v42 = vpack.c.bf16 %v4531_v41, %v4530_v39  ;;  %v4533_v43 = vld [vmem:[#allocation24 + $0x38] sm:$0xff] }
 0xc02   :  { %8853 = vmatprep.mubr.msk.f32.mxu1 %vm3750_vm3, %v4032_v44 }
 0xc03   :  { %8854 = vmatmul.mubr.msk.f32.vlgmr.msra.gmra.mrb[20].mxu1 %vm3750_vm3, %v4037_v45 }
 0xc04   :  { %9428 = vmatpush3.bf16.msra.mxu1 %v9425_v53 }
 0xc05   :  { %9430 = vmatprep.subr.bf16.mxu1 %v9429_v56 }
 0xc08   :  { %9432 = vmatpush3.bf16.msra.mxu1 %v9429_v56 }
 0xc09   :  { %9434 = vmatprep.subr.bf16.mxu1 %v9433_v60 }
 0xc0c   :  { %9436 = vmatpush3.bf16.msra.mxu1 %v9433_v60 }
 0xc0d   :  { %9438 = vmatprep.subr.bf16.mxu1 %v9437_v63 }
 0xc10   :  { %9440 = vmatpush3.bf16.msra.mxu1 %v9437_v63 }
 0xc11   :  { %9442 = vmatprep.subr.bf16.mxu1 %v9441_v3 }
 0xc14   :  { %9444 = vmatpush3.bf16.msra.mxu1 %v9441_v3 }
 0xc15   :  { %9446 = vmatprep.subr.bf16.mxu1 %v9445_v12 }
 0xc18   :  { %9448 = vmatpush3.bf16.msra.mxu1 %v9445_v12  ;;  %v4711_v12 = vld [vmem:[#allocation27 + $0x8] sm:$0xff] }
 0xc19   :  { %9474 = vmatprep.subr.bf16.mxu1 %v11658_v30 }
 0xcd6   :  { %v8855_v46 = vpop.f32.mrb[20].mxu1 }
 0xcd7   :  { %v4126_v47 = vsub.f32 %v4037_v45, %v8855_v46  ;;  %v4116_v48 = vpop.f32.mrb[21].mxu1  ;;  %v4534_v45 = vld [vmem:[#allocation24 + $0x40] sm:$0xff]  ;;  %v4535_v46 = vld [vmem:[#allocation24 + $0x48] sm:$0xff] }
 0xcd8   :  { %v4125_v49 = vsub.f32 %v4032_v44, %v4116_v48  ;;  %v9509_v44 = vpack.c.bf16 %v4533_v43, %v4532_v0  ;;  %v4536_v48 = vld [vmem:[#allocation24 + $0x50] sm:$0xff] }
 0xcd9   :  { %v4128_v51 = vmul.f32 %v4126_v47, %v4126_v47 }
 0xcda   :  { %v4127_v50 = vmul.f32 %v4125_v49, %v4125_v49 }
 0xcdc   :  { %8880 = vmatprep.mubr.msk.f32.mxu0 %vm3750_vm3, %v4127_v50 }
 0xcdd   :  { %8881 = vmatmul.mubr.msk.f32.vlgmr.msra.gmra.mrb[24].mxu0 %vm3750_vm3, %v4128_v51 }
 0xcde   :  { %9452 = vmatpush3.bf16.msra.mxu0 %v11658_v30 }
 0xcdf   :  { %9454 = vmatprep.subr.bf16.mxu0 %v11661_v15 }
 0xce2   :  { %9456 = vmatpush3.bf16.msra.mxu0 %v11661_v15 }
 0xce3   :  { %9458 = vmatprep.subr.bf16.mxu0 %v11666_v10 }
 0xce6   :  { %9460 = vmatpush3.bf16.msra.mxu0 %v11666_v10 }
 0xce7   :  { %9462 = vmatprep.subr.bf16.mxu0 %v11675_v32 }
 0xcea   :  { %9464 = vmatpush3.bf16.msra.mxu0 %v11675_v32 }
 0xceb   :  { %9466 = vmatprep.subr.bf16.mxu0 %v11688_v37 }
 0xcee   :  { %9468 = vmatpush3.bf16.msra.mxu0 %v11688_v37 }
 0xcef   :  { %9470 = vmatprep.subr.bf16.mxu0 %v11694_v40 }
 0xcf2   :  { %9472 = vmatpush3.bf16.msra.mxu0 %v11694_v40 }
 0xdb0   :  { %v8882_v13 = vpop.f32.mrb[24].mxu0 }
 0xdb1   :  { %v4207_v9 = vadd.f32 1e-05, %v8882_v13  ;;  %v4201_v59 = vpop.f32.mrb[25].mxu0  ;;  %v11110_v13 = vmov 0.0|0.0  }
 0xdb2   :  { %v4202_v16 = vadd.f32 1e-05, %v4201_v59  ;;  %v4712_v59 = vld [vmem:[#allocation27 + $0x10] sm:$0xff] }
 0xdb3   :  { %10232 = vrsqrt.f32 %v4207_v9  ;;  %v11795_v9 = vpack.c.bf16 %v4711_v12, %v4710_v5 }
 0xdb4   :  { %10234 = vrsqrt.f32 %v4202_v16  ;;  %v4713_v16 = vld [vmem:[#allocation27 + $0x18] sm:$0xff] }
 0xdbd   :  { %v10233_v11 = vpop.eup %10232 }
 0xdbe   :  { %v10235_v17 = vpop.eup %10234  ;;  %v4213_v18 = vmul.f32 %v10233_v11, %v4126_v47  ;;  %v9513_v47 = vpack.c.bf16 %v4535_v46, %v4534_v45  ;;  %v11799_v11 = vpack.c.bf16 %v4713_v16, %v4712_v59 }
 0xdbf   :  { %v4212_v20 = vmul.f32 %v10235_v17, %v4125_v49  ;;  %v4537_v49 = vld [vmem:[#allocation24 + $0x58] sm:$0xff]  ;;  %v8297_v17 = vld [vmem:[#allocation26] ss:$0 sm:$0xff] }
 0xdc0   :  { %v4221_v14 = vmul.f32 %v8273_v8, %v4213_v18  ;;  %v9517_v50 = vpack.c.bf16 %v4537_v49, %v4536_v48 }
 0xdc1   :  { %v4220_v21 = vmul.f32 %v8273_v8, %v4212_v20  ;;  %v11112_v8 = vmov 0.0  }
 0xdc2   :  { %v4229_v22 = vadd.f32 %v8274_v19, %v4221_v14 }
 0xdc3   :  { %v4228_v23 = vadd.f32 %v8274_v19, %v4220_v21 }
 0xdc4   :  { %v4231_v6 = vmax.f32 %v4229_v22, 0.0  ;;  %v4627_v22 = vld [vmem:[#allocation30 + $0x8] sm:$0xff] }
 0xdc5   :  { %v4230_v24 = vmax.f32 %v4228_v23, 0.0 }
 0xdc7   :  { %8907 = vmatprep.mubr.msk.f32.mxu1 %vm3750_vm3, %v4230_v24 }
 0xdc8   :  { %8908 = vmatmul.mubr.msk.f32.vlgmr.msra.gmra.mrb[22].mxu1 %vm3750_vm3, %v4231_v6  ;;  %v11824_v6 = vld [vmem:[#allocation29] ss:$0 sm:$0xff] }
 0xdc9   :  { %9476 = vmatpush3.bf16.msra.mxu1 %v11658_v30  ;;  %v8288_v30 = vld [vmem:[%s12277_s5 + $0x2] ss:$0 sm:$0xff] }
 0xdca   :  { %9478 = vmatprep.subr.bf16.mxu1 %v11661_v15 }
 0xdcd   :  { %9480 = vmatpush3.bf16.msra.mxu1 %v11661_v15 }
 0xdce   :  { %9482 = vmatprep.subr.bf16.mxu1 %v11666_v10 }
 0xdd1   :  { %9484 = vmatpush3.bf16.msra.mxu1 %v11666_v10 }
 0xdd2   :  { %9486 = vmatprep.subr.bf16.mxu1 %v11675_v32 }
 0xdd5   :  { %9488 = vmatpush3.bf16.msra.mxu1 %v11675_v32 }
 0xdd6   :  { %9490 = vmatprep.subr.bf16.mxu1 %v11688_v37 }
 0xdd9   :  { %9492 = vmatpush3.bf16.msra.mxu1 %v11688_v37  ;;  %v4526_v37 = vld [vmem:[#allocation24] sm:$0xff] }
 0xdda   :  { %9494 = vmatprep.subr.bf16.mxu1 %v11694_v40 }
 0xddd   :  { %9496 = vmatpush3.bf16.msra.mxu1 %v11694_v40  ;;  %v4527_v40 = vld [vmem:[#allocation24 + $0x8] sm:$0xff] }
 0xdde   :  { %v9497_v34 = vpack.c.bf16 %v4527_v40, %v4526_v37  ;;  %9543 = vmatprep.subr.bf16.mxu1 %v11110_v13 }
 0xde0   :  { %9498 = vmatprep.subr.bf16.mxu0 %v9497_v34 }
 0xe9b   :  { %v8909_v25 = vpop.f32.mrb[22].mxu1 }
 0xe9c   :  { %v4325_v7 = vpop.f32.mrb[23].mxu1  ;;  %v4331_v27 = vadd.f32 %v8909_v25, %v8288_v30 }
 0xe9d   :  { %v4326_v15 = vadd.f32 %v8288_v30, %v4325_v7 }
 0xe9f   :  { %8934 = vmatprep.mubr.msk.f32.mxu0 %vm3750_vm3, %v4326_v15 }
 0xea0   :  { %8935 = vmatmul.mubr.msk.f32.vlgmr.msra.gmra.mrb[26].mxu0 %vm3750_vm3, %v4331_v27 }
 0xea1   :  { %9500 = vmatpush3.bf16.msra.mxu0 %v9497_v34 }
 0xea2   :  { %9502 = vmatprep.subr.bf16.mxu0 %v9501_v38 }
 0xea5   :  { %9504 = vmatpush3.bf16.msra.mxu0 %v9501_v38 }
 0xea6   :  { %9506 = vmatprep.subr.bf16.mxu0 %v9505_v42 }
 0xea9   :  { %9508 = vmatpush3.bf16.msra.mxu0 %v9505_v42 }
 0xeaa   :  { %9510 = vmatprep.subr.bf16.mxu0 %v9509_v44 }
 0xead   :  { %9512 = vmatpush3.bf16.msra.mxu0 %v9509_v44 }
 0xeae   :  { %9514 = vmatprep.subr.bf16.mxu0 %v9513_v47 }
 0xeb1   :  { %9516 = vmatpush3.bf16.msra.mxu0 %v9513_v47 }
 0xeb2   :  { %9518 = vmatprep.subr.bf16.mxu0 %v9517_v50 }
 0xeb5   :  { %9520 = vmatpush3.bf16.msra.mxu0 %v9517_v50 }
 0xf73   :  { %v8936_v10 = vpop.f32.mrb[26].mxu0 }
 0xf74   :  { %v4420_v28 = vsub.f32 %v4331_v27, %v8936_v10  ;;  %v4410_v32 = vpop.f32.mrb[27].mxu0 }
 0xf75   :  { %v4419_v29 = vsub.f32 %v4326_v15, %v4410_v32 }
 0xf76   :  { %v4422_v33 = vmul.f32 %v4420_v28, %v4420_v28 }
 0xf77   :  { %v4421_v31 = vmul.f32 %v4419_v29, %v4419_v29 }
 0xf79   :  { %8961 = vmatprep.mubr.msk.f32.mxu1 %vm3750_vm3, %v4421_v31 }
 0xf7a   :  { %8962 = vmatmul.mubr.msk.f32.vlgmr.msra.gmra.mrb[24].mxu1 %vm3750_vm3, %v4422_v33 }
 0xf7b   :  { %9545 = vmatpush3.bf16.msra.mxu1 %v11795_v9  ;;  %9039 = vmatprep.mubr.msk.f32.mxu1 %vm11111_vm5, %v11112_v8 }
 0xf7c   :  { %9546 = vmatprep.subr.bf16.mxu1 %v11110_v13 }
 0xf7f   :  { %9548 = vmatpush3.bf16.msra.mxu1 %v11799_v11 }
 0xf80   :  { %9555 = vmatprep.subr.bf16.mxu1 %v11110_v13 }
0x104d   :  { %v8963_v51 = vpop.f32.mrb[24].mxu1 }
0x104e   :  { %v4501_v26 = vadd.f32 1e-05, %v8963_v51  ;;  %v4495_v52 = vpop.f32.mrb[25].mxu1 }
0x104f   :  { %v4496_v53 = vadd.f32 1e-05, %v4495_v52 }
0x1050   :  { %10236 = vrsqrt.f32 %v4501_v26 }
0x1051   :  { %10238 = vrsqrt.f32 %v4496_v53 }
0x105a   :  { %v10237_v54 = vpop.eup %10236 }
0x105b   :  { %v10239_v56 = vpop.eup %10238  ;;  %v4507_v57 = vmul.f32 %v10237_v54, %v4420_v28 }
0x105c   :  { %v4506_v60 = vmul.f32 %v10239_v56, %v4419_v29 }
0x105d   :  { %v4515_v61 = vmul.f32 %v8295_v55, %v4507_v57 }
0x105e   :  { %v4514_v62 = vmul.f32 %v8295_v55, %v4506_v60 }
0x105f   :  { %v4523_v63 = vadd.f32 %v8296_v58, %v4515_v61 }
0x1060   :  { %v4522_v1 = vadd.f32 %v8296_v58, %v4514_v62 }
0x1061   :  { %v4525_v3 = vmax.f32 %v4523_v63, 0.0 }
0x1062   :  { %v4524_v2 = vmax.f32 %v4522_v1, 0.0 }
0x1064   :  { %8988 = vmatprep.mubr.msk.f32.mxu0 %vm3750_vm3, %v4524_v2 }
0x1065   :  { %8989 = vmatmul.mubr.msk.f32.vlgmr.msra.gmra.mrb[28].mxu0 %vm3750_vm3, %v4525_v3 }
0x1066   :  { %8995 = vmatprep.mubr.msk.f32.mxu0 %vm4628_vm4, %v4626_v4 }
0x1138   :  { %v8990_v18 = vpop.f32.mrb[28].mxu0 }
0x1139   :  { %v4623_v19 = vadd.f32 %v8990_v18, %v8297_v17  ;;  %v4617_v20 = vpop.f32.mrb[29].mxu0 }
0x113a   :  { %v4618_v14 = vadd.f32 %v8297_v17, %v4617_v20 }
0x113c   :  { %v9521_v21 = vpack.c.bf16 %v4623_v19, %v4618_v14 }
0x113e   :  { %9522 = vmatprep.subr.bf16.mxu0 %v9521_v21 }
0x113f   :  { %9524 = vmatpush3.bf16.msra.mxu0 %v9521_v21 }
0x1140   :  { %9525 = vmatprep.subr.bf16.mxu0 %v11110_v13 }
0x1142   :  { %8996 = vmatmul.mubr.msk.f32.vlgmr.msra.gmra.mrb[30].mxu0 %vm4628_vm4, %v4627_v22 }
0x1143   :  { %9527 = vmatpush3.bf16.msra.mxu0 %v11795_v9  ;;  %9006 = vmatprep.mubr.msk.f32.mxu0 %vm11111_vm5, %v11112_v8 }
0x1144   :  { %9528 = vmatprep.subr.bf16.mxu0 %v11110_v13 }
0x1147   :  { %9530 = vmatpush3.bf16.msra.mxu0 %v11799_v11 }
0x1148   :  { %9531 = vmatprep.subr.bf16.mxu0 %v11110_v13 }
0x114a   :  { %9007 = vmatmul.mubr.f32.vlgmr.msra.gmra.mrb[32].mxu0 %v11112_v8 }
0x114b   :  { %9533 = vmatpush3.bf16.msra.mxu0 %v11795_v9  ;;  %9017 = vmatprep.mubr.msk.f32.mxu0 %vm11111_vm5, %v11112_v8 }
0x114c   :  { %9534 = vmatprep.subr.bf16.mxu0 %v11110_v13 }
0x114f   :  { %9536 = vmatpush3.bf16.msra.mxu0 %v11799_v11 }
0x1150   :  { %9537 = vmatprep.subr.bf16.mxu0 %v11110_v13 }
0x1215   :  { %v11820_v23 = vpop.f32.mrb[30].mxu0 }
0x1216   :  { %v11822_v24 = vpop.f32.mrb[31].mxu0 }
0x121d   :  { %v4791_v30 = vpop.f32.mrb[32].mxu0 }
0x121e   :  { %v4792_v25 = vadd.f32 %v11824_v6, %v4791_v30  ;;  %v9008_v7 = vpop.f32.mrb[33].mxu0 }
0x1220   :  { %v4795_v15 = vadd.f32 %v4792_v25, %v11822_v24  ;;  %4803 = vrot.lane.b32.xlu1 %v4792_v25, %s11113_s22 }
0x1222   :  { %v8303_v27 = vmul.f32 -1.442695, %v4795_v15 }
0x1224   :  { %10240 = vpow2.f32 %v8303_v27 }
0x122e   :  { %v10241_v10 = vpop.eup %10240 }
0x122f   :  { %v4799_v28 = vadd.f32 1.0, %v10241_v10 }
0x1231   :  { %10242 = vrcp.f32 %v4799_v28 }
0x123b   :  { %v10243_v32 = vpop.eup %10242 }
0x123c   :  { %v4813_v34 = vsub.f32 1.0, %v10243_v32  ;;  %v4819_v36 = vmul.f32 0.0, %v10243_v32 }
0x1292   :  { %v4804_v29 = vpop.permute.xlu1 %4803 }
0x1293   :  { %v4806_v31 = vmul.f32 %v10243_v32, %v4804_v29 }
0x1295   :  { %4808 = vrot.lane.b32.xlu0 %v4806_v31, %s11113_s22 }
0x1307   :  { %v4809_v33 = vpop.permute.xlu0 %4808 }
0x1308   :  { %v4811_v37 = vadd.f32 %v4809_v33, %v11822_v24 }
0x130a   :  { %10244 = vtanh.f32 %v4811_v37 }
0x1314   :  { %v10245_v40 = vpop.eup %10244 }
0x1315   :  { %4815 = vrot.lane.b32.xlu1 %v10245_v40, %s11114_s8 }
0x1387   :  { %v4816_v35 = vpop.permute.xlu1 %4815 }
0x1388   :  { %v4818_v38 = vmul.f32 %v4816_v35, %v4813_v34 }
0x138a   :  { %v4820_v39 = vadd.f32 %v4819_v36, %v4818_v38 }
0x138c   :  { %4822 = vrot.lane.b32.xlu0 %v4820_v39, %s11114_s8  ;;  %v4925_v54 = vrot.slane %v4820_v39, 6 }
0x13fe   :  { %v4823_v41 = vpop.permute.xlu0 %4822 }
0x13ff   :  { %4826 = vst.msk [vmem:[#allocation2] sm:$0x3] %vm4825_vm6, %v4823_v41  ;;  %9018 = vmatmul.mubr.msk.f32.vlgmr.msra.gmra.mrb[34].mxu0 %vm4721_vm7, %v4823_v41 }
0x1400   :  { %9539 = vmatpush3.bf16.msra.mxu0 %v11795_v9  ;;  %9028 = vmatprep.mubr.msk.f32.mxu0 %vm11111_vm5, %v11112_v8 }
0x1401   :  { %9540 = vmatprep.subr.bf16.mxu0 %v11110_v13 }
0x1404   :  { %9542 = vmatpush3.bf16.msra.mxu0 %v11799_v11 }
0x1405   :  { %9549 = vmatprep.subr.bf16.mxu0 %v11110_v13 }
0x14d2   :  { %v4895_v42 = vpop.f32.mrb[34].mxu0 }
0x14d3   :  { %v4896_v0 = vadd.f32 %v11824_v6, %v4895_v42  ;;  %v9019_v43 = vpop.f32.mrb[35].mxu0 }
0x14d5   :  { %v4900_v44 = vrot.slane %v4896_v0, 6 }
0x14d7   :  { %v4902_v45 = vadd.f32 %v4900_v44, %v11822_v24  ;;  %4909 = vrot.lane.b32.xlu1 %v4900_v44, %s11113_s22 }
0x14d9   :  { %v8305_v46 = vmul.f32 -1.442695, %v4902_v45 }
0x14db   :  { %10246 = vpow2.f32 %v8305_v46 }
0x14e5   :  { %v10247_v47 = vpop.eup %10246 }
0x14e6   :  { %v4906_v48 = vadd.f32 1.0, %v10247_v47 }
0x14e8   :  { %10248 = vrcp.f32 %v4906_v48 }
0x14f2   :  { %v10249_v49 = vpop.eup %10248 }
0x14f3   :  { %v4919_v55 = vsub.f32 1.0, %v10249_v49  ;;  %v4927_v57 = vmul.f32 %v10249_v49, %v4925_v54 }
0x1549   :  { %v4910_v50 = vpop.permute.xlu1 %4909 }
0x154a   :  { %v4912_v51 = vmul.f32 %v10249_v49, %v4910_v50 }
0x154c   :  { %4914 = vrot.lane.b32.xlu0 %v4912_v51, %s11113_s22 }
0x15be   :  { %v4915_v26 = vpop.permute.xlu0 %4914 }
0x15bf   :  { %v4917_v52 = vadd.f32 %v4915_v26, %v11822_v24 }
0x15c1   :  { %10250 = vtanh.f32 %v4917_v52 }
0x15cb   :  { %v10251_v53 = vpop.eup %10250 }
0x15cc   :  { %4921 = vrot.lane.b32.xlu1 %v10251_v53, %s11114_s8 }
0x163e   :  { %v4922_v56 = vpop.permute.xlu1 %4921 }
0x163f   :  { %v4924_v58 = vmul.f32 %v4922_v56, %v4919_v55 }
0x1641   :  { %v11847_v60 = vadd.f32 %v4927_v57, %v4924_v58 }
0x1643   :  { %v4935_v61 = vrot.slane %v11847_v60, 2  ;;  %v5036_v22 = vrot.slane %v11847_v60, 6 }
0x1645   :  { %4936 = vrot.lane.b32.xlu0 %v4935_v61, %s11114_s8 }
0x16b7   :  { %v4937_v62 = vpop.permute.xlu0 %4936 }
0x16b8   :  { %9029 = vmatmul.mubr.msk.f32.vlgmr.msra.gmra.mrb[36].mxu0 %vm4721_vm7, %v4937_v62 }
0x16b9   :  { %9551 = vmatpush3.bf16.msra.mxu0 %v11795_v9  ;;  %9050 = vmatprep.mubr.msk.f32.mxu0 %vm11111_vm5, %v11112_v8 }
0x16ba   :  { %9552 = vmatprep.subr.bf16.mxu0 %v11110_v13 }
0x16bd   :  { %9554 = vmatpush3.bf16.msra.mxu0 %v11799_v11 }
0x16be   :  { %9561 = vmatprep.subr.bf16.mxu0 %v11110_v13 }
0x178b   :  { %v5006_v63 = vpop.f32.mrb[36].mxu0 }
0x178c   :  { %v5007_v1 = vadd.f32 %v11824_v6, %v5006_v63  ;;  %v9030_v2 = vpop.f32.mrb[37].mxu0 }
0x178e   :  { %v5011_v3 = vrot.slane %v5007_v1, 4 }
0x1790   :  { %v5013_v4 = vadd.f32 %v5011_v3, %v11822_v24  ;;  %5020 = vrot.lane.b32.xlu1 %v5011_v3, %s11113_s22 }
0x1792   :  { %v8307_v5 = vmul.f32 -1.442695, %v5013_v4 }
0x1794   :  { %10252 = vpow2.f32 %v8307_v5 }
0x179e   :  { %v10253_v12 = vpop.eup %10252 }
0x179f   :  { %v5017_v59 = vadd.f32 1.0, %v10253_v12 }
0x17a1   :  { %10254 = vrcp.f32 %v5017_v59 }
0x17ab   :  { %v10255_v16 = vpop.eup %10254 }
0x17ac   :  { %v5030_v21 = vsub.f32 1.0, %v10255_v16  ;;  %v5038_v25 = vmul.f32 %v10255_v16, %v5036_v22 }
0x1802   :  { %v5021_v17 = vpop.permute.xlu1 %5020 }
0x1803   :  { %v5023_v18 = vmul.f32 %v10255_v16, %v5021_v17 }
0x1805   :  { %5025 = vrot.lane.b32.xlu0 %v5023_v18, %s11113_s22 }
0x1877   :  { %v5026_v19 = vpop.permute.xlu0 %5025 }
0x1878   :  { %v5028_v20 = vadd.f32 %v5026_v19, %v11822_v24 }
0x187a   :  { %10256 = vtanh.f32 %v5028_v20 }
0x1884   :  { %v10257_v14 = vpop.eup %10256 }
0x1885   :  { %5032 = vrot.lane.b32.xlu1 %v10257_v14, %s11114_s8 }
0x18f7   :  { %v5033_v30 = vpop.permute.xlu1 %5032 }
0x18f8   :  { %v5035_v7 = vmul.f32 %v5033_v30, %v5030_v21 }
0x18fa   :  { %v11865_v15 = vadd.f32 %v5038_v25, %v5035_v7 }
0x18fc   :  { %v5046_v27 = vrot.slane %v11865_v15, 4  ;;  %v5147_v43 = vrot.slane %v11865_v15, 6 }
0x18fe   :  { %5047 = vrot.lane.b32.xlu0 %v5046_v27, %s11114_s8 }
0x1970   :  { %v5048_v10 = vpop.permute.xlu0 %5047 }
0x1971   :  { %9040 = vmatmul.mubr.msk.f32.vlgmr.msra.gmra.mrb[26].mxu1 %vm4721_vm7, %v5048_v10 }
0x1972   :  { %9557 = vmatpush3.bf16.msra.mxu1 %v11795_v9  ;;  %9061 = vmatprep.mubr.msk.f32.mxu1 %vm11111_vm5, %v11112_v8 }
0x1973   :  { %9558 = vmatprep.subr.bf16.mxu1 %v11110_v13 }
0x1976   :  { %9560 = vmatpush3.bf16.msra.mxu1 %v11799_v11 }
0x1977   :  { %9567 = vmatprep.subr.bf16.mxu1 %v11110_v13 }
0x1a44   :  { %v5117_v28 = vpop.f32.mrb[26].mxu1 }
0x1a45   :  { %v5118_v32 = vadd.f32 %v11824_v6, %v5117_v28  ;;  %v9041_v29 = vpop.f32.mrb[27].mxu1 }
0x1a47   :  { %v5122_v31 = vrot.slane %v5118_v32, 2 }
0x1a49   :  { %v5124_v33 = vadd.f32 %v5122_v31, %v11822_v24  ;;  %5131 = vrot.lane.b32.xlu1 %v5122_v31, %s11113_s22 }
0x1a4b   :  { %v8309_v37 = vmul.f32 -1.442695, %v5124_v33 }
0x1a4d   :  { %10258 = vpow2.f32 %v8309_v37 }
0x1a57   :  { %v10259_v40 = vpop.eup %10258 }
0x1a58   :  { %v5128_v34 = vadd.f32 1.0, %v10259_v40 }
0x1a5a   :  { %10260 = vrcp.f32 %v5128_v34 }
0x1a64   :  { %v10261_v35 = vpop.eup %10260 }
0x1a65   :  { %v5141_v0 = vsub.f32 1.0, %v10261_v35  ;;  %v5149_v45 = vmul.f32 %v10261_v35, %v5147_v43 }
0x1abb   :  { %v5132_v36 = vpop.permute.xlu1 %5131 }
0x1abc   :  { %v5134_v38 = vmul.f32 %v10261_v35, %v5132_v36 }
0x1abe   :  { %5136 = vrot.lane.b32.xlu0 %v5134_v38, %s11113_s22 }
0x1b30   :  { %v5137_v39 = vpop.permute.xlu0 %5136 }
0x1b31   :  { %v5139_v41 = vadd.f32 %v5137_v39, %v11822_v24 }
0x1b33   :  { %10262 = vtanh.f32 %v5139_v41 }
0x1b3d   :  { %v10263_v42 = vpop.eup %10262 }
0x1b3e   :  { %5143 = vrot.lane.b32.xlu1 %v10263_v42, %s11114_s8 }
0x1bb0   :  { %v5144_v44 = vpop.permute.xlu1 %5143 }
0x1bb1   :  { %v5146_v46 = vmul.f32 %v5144_v44, %v5141_v0 }
0x1bb3   :  { %v11883_v47 = vadd.f32 %v5149_v45, %v5146_v46 }
0x1bb5   :  { %v5157_v48 = vrot.slane %v11883_v47, 6 }
0x1bb7   :  { %5158 = vrot.lane.b32.xlu0 %v5157_v48, %s11114_s8 }
0x1c29   :  { %v5159_v49 = vpop.permute.xlu0 %5158 }
0x1c2a   :  { %9051 = vmatmul.mubr.msk.f32.vlgmr.msra.gmra.mrb[38].mxu0 %vm4721_vm7, %v5159_v49 }
0x1c2b   :  { %9563 = vmatpush3.bf16.msra.mxu0 %v11795_v9  ;;  %9072 = vmatprep.mubr.msk.f32.mxu0 %vm11111_vm5, %v11112_v8 }
0x1c2c   :  { %9564 = vmatprep.subr.bf16.mxu0 %v11110_v13 }
0x1c2f   :  { %9566 = vmatpush3.bf16.msra.mxu0 %v11799_v11 }
0x1cfd   :  { %v5228_v24 = vpop.f32.mrb[38].mxu0 }
0x1cfe   :  { %v5229_v50 = vadd.f32 %v11824_v6, %v5228_v24  ;;  %v9052_v51 = vpop.f32.mrb[39].mxu0 }
0x1d00   :  { %v5232_v26 = vadd.f32 %v11820_v23, %v5229_v50  ;;  %5240 = vrot.lane.b32.xlu1 %v5229_v50, %s11113_s22 }
0x1d02   :  { %v8311_v52 = vmul.f32 -1.442695, %v5232_v26 }
0x1d04   :  { %10264 = vpow2.f32 %v8311_v52 }
0x1d0e   :  { %v10265_v53 = vpop.eup %10264 }
0x1d0f   :  { %v5236_v54 = vadd.f32 1.0, %v10265_v53 }
0x1d11   :  { %10266 = vrcp.f32 %v5236_v54 }
0x1d1b   :  { %v10267_v55 = vpop.eup %10266 }
0x1d1c   :  { %v5250_v63 = vsub.f32 1.0, %v10267_v55  ;;  %v5257_v2 = vmul.f32 %v10267_v55, %v5157_v48 }
0x1d72   :  { %v5241_v56 = vpop.permute.xlu1 %5240 }
0x1d73   :  { %v5243_v57 = vmul.f32 %v10267_v55, %v5241_v56 }
0x1d75   :  { %5245 = vrot.lane.b32.xlu0 %v5243_v57, %s11113_s22 }
0x1de7   :  { %v5246_v58 = vpop.permute.xlu0 %5245 }
0x1de8   :  { %v5248_v61 = vadd.f32 %v11820_v23, %v5246_v58 }
0x1dea   :  { %10268 = vtanh.f32 %v5248_v61 }
0x1df4   :  { %v10269_v62 = vpop.eup %10268 }
0x1df5   :  { %5252 = vrot.lane.b32.xlu1 %v10269_v62, %s11114_s8 }
0x1e67   :  { %v5253_v1 = vpop.permute.xlu1 %5252 }
0x1e68   :  { %v5255_v3 = vmul.f32 %v5253_v1, %v5250_v63 }
0x1e6a   :  { %v5258_v4 = vadd.f32 %v5257_v2, %v5255_v3 }
0x1e6c   :  { %5260 = vrot.lane.b32.xlu0 %v5258_v4, %s11114_s8  ;;  %v5362_v7 = vrot.slane %v5258_v4, 6 }
0x1ede   :  { %v5261_v5 = vpop.permute.xlu0 %5260 }
0x1edf   :  { %5263 = vst.msk [vmem:[#allocation2 + $0x8] sm:$0x3] %vm4825_vm6, %v5261_v5  ;;  %9062 = vmatmul.mubr.msk.f32.vlgmr.msra.gmra.mrb[28].mxu1 %vm4721_vm7, %v5261_v5  ;;  %vm6283_vm6 = vcmask 1044480  }
0x1ee0   :  { %9569 = vmatpush3.bf16.msra.mxu1 %v11795_v9  ;;  %9083 = vmatprep.mubr.msk.f32.mxu1 %vm11111_vm5, %v11112_v8 }
0x1ee1   :  { %9570 = vmatprep.subr.bf16.mxu1 %v11110_v13 }
0x1ee4   :  { %9572 = vmatpush3.bf16.msra.mxu1 %v11799_v11 }
0x1fb2   :  { %v5332_v12 = vpop.f32.mrb[28].mxu1 }
0x1fb3   :  { %v5333_v59 = vadd.f32 %v11824_v6, %v5332_v12  ;;  %v9063_v16 = vpop.f32.mrb[29].mxu1 }
0x1fb5   :  { %v5337_v17 = vrot.slane %v5333_v59, 6 }
0x1fb7   :  { %v5339_v18 = vadd.f32 %v11820_v23, %v5337_v17  ;;  %5346 = vrot.lane.b32.xlu1 %v5337_v17, %s11113_s22 }
0x1fb9   :  { %v8313_v19 = vmul.f32 -1.442695, %v5339_v18 }
0x1fbb   :  { %10270 = vpow2.f32 %v8313_v19 }
0x1fc5   :  { %v10271_v20 = vpop.eup %10270 }
0x1fc6   :  { %v5343_v9 = vadd.f32 1.0, %v10271_v20  ;;  %v5591_v20 = vld [vmem:[#allocation32] sm:$0xff] }
0x1fc8   :  { %10272 = vrcp.f32 %v5343_v9 }
0x1fd2   :  { %v10273_v14 = vpop.eup %10272 }
0x1fd3   :  { %v5356_v27 = vsub.f32 1.0, %v10273_v14  ;;  %v5364_v32 = vmul.f32 %v10273_v14, %v5362_v7 }
0x2029   :  { %v5347_v21 = vpop.permute.xlu1 %5346 }
0x202a   :  { %v5349_v22 = vmul.f32 %v10273_v14, %v5347_v21  ;;  %v5676_v14 = vld [vmem:[#allocation33] sm:$0xff]  ;;  %v5677_v21 = vld [vmem:[#allocation33 + $0x8] sm:$0xff] }
0x202c   :  { %5351 = vrot.lane.b32.xlu0 %v5349_v22, %s11113_s22  ;;  %v9577_v22 = vpack.c.bf16 %v5677_v21, %v5676_v14 }
0x202e   :  { %9578 = vmatprep.subr.bf16.mxu1 %v9577_v22 }
0x209e   :  { %v5352_v11 = vpop.permute.xlu0 %5351 }
0x209f   :  { %v5354_v30 = vadd.f32 %v11820_v23, %v5352_v11  ;;  %v5679_v11 = vld [vmem:[#allocation33 + $0x18] sm:$0xff] }
0x20a1   :  { %10274 = vtanh.f32 %v5354_v30 }
0x20ab   :  { %v10275_v25 = vpop.eup %10274 }
0x20ac   :  { %5358 = vrot.lane.b32.xlu1 %v10275_v25, %s11114_s8 }
0x211e   :  { %v5359_v10 = vpop.permute.xlu1 %5358 }
0x211f   :  { %v5361_v28 = vmul.f32 %v5359_v10, %v5356_v27 }
0x2121   :  { %v11913_v29 = vadd.f32 %v5364_v32, %v5361_v28  ;;  %v5592_v32 = vld [vmem:[#allocation32 + $0x8] sm:$0xff] }
0x2123   :  { %v5371_v31 = vrot.slane %v11913_v29, 2  ;;  %v5472_v49 = vrot.slane %v11913_v29, 6 }
0x2125   :  { %5372 = vrot.lane.b32.xlu0 %v5371_v31, %s11114_s8 }
0x2197   :  { %v5373_v33 = vpop.permute.xlu0 %5372 }
0x2198   :  { %9073 = vmatmul.mubr.msk.f32.vlgmr.msra.gmra.mrb[40].mxu0 %vm4721_vm7, %v5373_v33  ;;  %v8320_v33 = vld [vmem:[#allocation35] ss:$0 sm:$0xff] }
0x2199   :  { %9090 = vmatprep.mubr.msk.f32.mxu0 %vm4628_vm4, %v5591_v20 }
0x226b   :  { %v5442_v37 = vpop.f32.mrb[40].mxu0 }
0x226c   :  { %v5443_v40 = vadd.f32 %v11824_v6, %v5442_v37  ;;  %v9074_v34 = vpop.f32.mrb[41].mxu0 }
0x226e   :  { %v5447_v35 = vrot.slane %v5443_v40, 4 }
0x2270   :  { %v5449_v36 = vadd.f32 %v11820_v23, %v5447_v35  ;;  %5456 = vrot.lane.b32.xlu1 %v5447_v35, %s11113_s22 }
0x2272   :  { %v8315_v38 = vmul.f32 -1.442695, %v5449_v36 }
0x2274   :  { %10276 = vpow2.f32 %v8315_v38 }
0x227e   :  { %v10277_v39 = vpop.eup %10276 }
0x227f   :  { %v5453_v41 = vadd.f32 1.0, %v10277_v39 }
0x2281   :  { %10278 = vrcp.f32 %v5453_v41 }
0x228b   :  { %v10279_v42 = vpop.eup %10278 }
0x228c   :  { %v5466_v48 = vsub.f32 1.0, %v10279_v42  ;;  %v5474_v50 = vmul.f32 %v10279_v42, %v5472_v49 }
0x22e2   :  { %v5457_v0 = vpop.permute.xlu1 %5456 }
0x22e3   :  { %v5459_v43 = vmul.f32 %v10279_v42, %v5457_v0 }
0x22e5   :  { %5461 = vrot.lane.b32.xlu0 %v5459_v43, %s11113_s22 }
0x2357   :  { %v5462_v44 = vpop.permute.xlu0 %5461 }
0x2358   :  { %v5464_v45 = vadd.f32 %v11820_v23, %v5462_v44 }
0x235a   :  { %10280 = vtanh.f32 %v5464_v45 }
0x2364   :  { %v10281_v46 = vpop.eup %10280 }
0x2365   :  { %5468 = vrot.lane.b32.xlu1 %v10281_v46, %s11114_s8 }
0x23d7   :  { %v5469_v24 = vpop.permute.xlu1 %5468 }
0x23d8   :  { %v5471_v51 = vmul.f32 %v5469_v24, %v5466_v48  ;;  %v5816_v24 = vld [vmem:[#allocation33 + $0x20] sm:$0xff] }
0x23da   :  { %v5475_v26 = vadd.f32 %v5474_v50, %v5471_v51  ;;  %v5817_v50 = vld [vmem:[#allocation33 + $0x28] sm:$0xff] }
0x23db   :  { %v9585_v51 = vpack.c.bf16 %v5817_v50, %v5816_v24 }
0x23dc   :  { %v5481_v52 = vrot.slane %v5475_v26, 4 }
0x23de   :  { %5482 = vrot.lane.b32.xlu0 %v5481_v52, %s11114_s8  ;;  %v5819_v52 = vld [vmem:[#allocation33 + $0x38] sm:$0xff] }
0x2450   :  { %v5483_v53 = vpop.permute.xlu0 %5482 }
0x2451   :  { %9084 = vmatmul.mubr.msk.f32.vlgmr.msra.gmra.mrb[30].mxu1 %vm4721_vm7, %v5483_v53 }
0x2452   :  { %9580 = vmatpush3.bf16.msra.mxu1 %v9577_v22 }
0x2524   :  { %v5552_v54 = vpop.f32.mrb[30].mxu1 }
0x2525   :  { %v5553_v55 = vadd.f32 %v11824_v6, %v5552_v54  ;;  %v9085_v56 = vpop.f32.mrb[31].mxu1 }
0x2527   :  { %v5557_v57 = vrot.slane %v5553_v55, 2 }
0x2529   :  { %v5559_v58 = vadd.f32 %v11820_v23, %v5557_v57  ;;  %5566 = vrot.lane.b32.xlu1 %v5557_v57, %s11113_s22 }
0x252b   :  { %v8317_v61 = vmul.f32 -1.442695, %v5559_v58 }
0x252d   :  { %10282 = vpow2.f32 %v8317_v61 }
0x2537   :  { %v10283_v62 = vpop.eup %10282 }
0x2538   :  { %v5563_v63 = vadd.f32 1.0, %v10283_v62 }
0x253a   :  { %10284 = vrcp.f32 %v5563_v63  ;;  %v8323_v63 = vld [vmem:[#allocation36] ss:$0 sm:$0xff] }
0x2544   :  { %v10285_v1 = vpop.eup %10284 }
0x259b   :  { %v5567_v2 = vpop.permute.xlu1 %5566 }
0x259c   :  { %v5569_v3 = vmul.f32 %v10285_v1, %v5567_v2  ;;  %v8324_v2 = vld [vmem:[#allocation38] ss:$0 sm:$0xff] }
0x259e   :  { %5571 = vrot.lane.b32.xlu0 %v5569_v3, %s11113_s22 }
0x25a2   :  { %4930 = vrot.lane.b32.xlu0 %v11847_v60, %s11114_s8 }
0x25a6   :  { %5152 = vrot.lane.b32.xlu0 %v11883_v47, %s11114_s8  ;;  %v5582_v47 = vrot.slane %v5475_v26, 6 }
0x25a8   :  { %v5584_v17 = vmul.f32 %v10285_v1, %v5582_v47  ;;  %v8325_v47 = vld [vmem:[#allocation35 + $0x1] ss:$0 sm:$0xff] }
0x25aa   :  { %5477 = vrot.lane.b32.xlu0 %v5475_v26, %s11114_s8  ;;  %v5818_v26 = vld [vmem:[#allocation33 + $0x30] sm:$0xff] }
0x25ab   :  { %v9589_v53 = vpack.c.bf16 %v5819_v52, %v5818_v26  ;;  %v8330_v26 = vld [vmem:[#allocation35 + $0x2] ss:$0 sm:$0xff] }
0x2610   :  { %v5572_v6 = vpop.permute.xlu0 %5571 }
0x2611   :  { %v5574_v4 = vadd.f32 %v11820_v23, %v5572_v6  ;;  %v5576_v23 = vsub.f32 1.0, %v10285_v1 }
0x2613   :  { %10286 = vtanh.f32 %v5574_v4 }
0x2614   :  { %v4931_v5 = vpop.permute.xlu0 %4930 }
0x2615   :  { %4934 = vst.msk [vmem:[#allocation2] sm:$0xc] %vm4933_vm8, %v4931_v5 }
0x2618   :  { %v5153_v12 = vpop.permute.xlu0 %5152 }
0x2619   :  { %5156 = vst.msk [vmem:[#allocation2] sm:$0xc0] %vm5155_vm9, %v5153_v12 }
0x261c   :  { %v5478_v59 = vpop.permute.xlu0 %5477 }
0x261d   :  { %v10287_v60 = vpop.eup %10286  ;;  %5480 = vst.msk [vmem:[#allocation2 + $0x8] sm:$0x30] %vm5044_vm10, %v5478_v59 }
0x261e   :  { %5578 = vrot.lane.b32.xlu1 %v10287_v60, %s11114_s8 }
0x2622   :  { %5041 = vrot.lane.b32.xlu1 %v11865_v15, %s11114_s8  ;;  %v5678_v15 = vld [vmem:[#allocation33 + $0x10] sm:$0xff] }
0x2623   :  { %v9581_v25 = vpack.c.bf16 %v5679_v11, %v5678_v15 }
0x2625   :  { %9582 = vmatprep.subr.bf16.mxu1 %v9581_v25 }
0x2626   :  { %5367 = vrot.lane.b32.xlu1 %v11913_v29, %s11114_s8  ;;  %9584 = vmatpush3.bf16.msra.mxu1 %v9581_v25 }
0x2690   :  { %v5579_v16 = vpop.permute.xlu1 %5578 }
0x2691   :  { %v5581_v18 = vmul.f32 %v5579_v16, %v5576_v23 }
0x2693   :  { %v5585_v19 = vadd.f32 %v5584_v17, %v5581_v18 }
0x2694   :  { %v5042_v9 = vpop.permute.xlu1 %5041 }
0x2695   :  { %5045 = vst.msk [vmem:[#allocation2] sm:$0x30] %vm5044_vm10, %v5042_v9  ;;  %5587 = vrot.lane.b32.xlu1 %v5585_v19, %s11114_s8 }
0x2698   :  { %v5368_v30 = vpop.permute.xlu1 %5367 }
0x2699   :  { %5370 = vst.msk [vmem:[#allocation2 + $0x8] sm:$0xc] %vm4933_vm8, %v5368_v30  ;;  %vm6609_vm8 = vcmask 72704  }
0x269c   :  { %v5593_v27 = vld [vmem:[#allocation2] sm:$0xff] }
0x2707   :  { %v5588_v7 = vpop.permute.xlu1 %5587 }
0x2708   :  { %5590 = vst.msk [vmem:[#allocation2 + $0x8] sm:$0xc0] %vm5155_vm9, %v5588_v7 }
0x270f   :  { %v5594_v10 = vld [vmem:[#allocation2 + $0x8] sm:$0xff] }
0x2710   :  { %v9573_v28 = vpack.c.bf16 %v5594_v10, %v5593_v27 }
0x2712   :  { %9574 = vmatprep.subr.bf16.mxu0 %v9573_v28 }
0x2713   :  { %9576 = vmatpush3.bf16.msra.mxu0 %v9573_v28  ;;  %v5958_v28 = vld [vmem:[#allocation33 + $0x40] sm:$0xff] }
0x2714   :  { %9586 = vmatprep.subr.bf16.mxu0 %v9585_v51 }
0x2716   :  { %9091 = vmatmul.mubr.msk.f32.vlgmr.msra.gmra.mrb[42].mxu0 %vm4628_vm4, %v5592_v32  ;;  %v5959_v32 = vld [vmem:[#allocation33 + $0x48] sm:$0xff] }
0x2717   :  { %9588 = vmatpush3.bf16.msra.mxu0 %v9585_v51 }
0x2718   :  { %9590 = vmatprep.subr.bf16.mxu0 %v9589_v53 }
0x271b   :  { %9592 = vmatpush3.bf16.msra.mxu0 %v9589_v53 }
0x27e9   :  { %v9092_v29 = vpop.f32.mrb[42].mxu0 }
0x27ea   :  { %v5667_v31 = vpop.f32.mrb[43].mxu0 }
0x27eb   :  { %9101 = vmatprep.mubr.msk.f32.mxu1 %vm4721_vm7, %v5667_v31  ;;  %v5960_v31 = vld [vmem:[#allocation33 + $0x50] sm:$0xff] }
0x27ec   :  { %9102 = vmatmul.mubr.msk.f32.vlgmr.msra.gmra.mrb[32].mxu1 %vm4721_vm7, %v9092_v29  ;;  %v9593_v29 = vpack.c.bf16 %v5959_v32, %v5958_v28 }
0x27ee   :  { %9594 = vmatprep.subr.bf16.mxu1 %v9593_v29 }
0x27ef   :  { %9596 = vmatpush3.bf16.msra.mxu1 %v9593_v29 }
0x28bf   :  { %v9103_v37 = vpop.f32.mrb[32].mxu1 }
0x28c0   :  { %v5765_v40 = vadd.f32 %v9103_v37, %v8320_v33  ;;  %v5759_v34 = vpop.f32.mrb[33].mxu1 }
0x28c1   :  { %v5760_v35 = vadd.f32 %v8320_v33, %v5759_v34  ;;  %v5961_v33 = vld [vmem:[#allocation33 + $0x58] sm:$0xff] }
0x28c2   :  { %v5771_v36 = vsel %vm4721_vm7, %v5765_v40, 0.0  ;;  %v9597_v37 = vpack.c.bf16 %v5961_v33, %v5960_v31  ;;  %v8335_v31 = vld [vmem:[#allocation39] ss:$0 sm:$0xff] }
0x28c3   :  { %5772 = vadd.xlane.f32.xlu1 %v5771_v36  ;;  %v5768_v38 = vsel %vm4721_vm7, %v5760_v35, 0.0 }
0x28c4   :  { %5769 = vadd.xlane.f32.xlu0 %v5768_v38  ;;  %9598 = vmatprep.subr.bf16.mxu1 %v9597_v37 }
0x28c5   :  { %9600 = vmatpush3.bf16.msra.mxu1 %v9597_v37 }
0x2950   :  { %v5773_v39 = vpop.xlane.xlu1 %5772 }
0x2951   :  { %v5776_v41 = vmul.f32 0.03125, %v5773_v39  ;;  %v5770_v42 = vpop.xlane.xlu0 %5769 }
0x2952   :  { %v5775_v0 = vmul.f32 0.03125, %v5770_v42  ;;  %v8328_v42 = vld [vmem:[#allocation36 + $0x1] ss:$0 sm:$0xff] }
0x2953   :  { %v5778_v43 = vsub.f32 %v5765_v40, %v5776_v41 }
0x2954   :  { %v5777_v44 = vsub.f32 %v5760_v35, %v5775_v0 }
0x2955   :  { %v5780_v48 = vmul.f32 %v5778_v43, %v5778_v43 }
0x2956   :  { %v5779_v45 = vmul.f32 %v5777_v44, %v5777_v44 }
0x2957   :  { %v5784_v49 = vsel %vm4721_vm7, %v5780_v48, 0.0 }
0x2958   :  { %v5781_v46 = vsel %vm4721_vm7, %v5779_v45, 0.0  ;;  %v8329_v45 = vld [vmem:[#allocation38 + $0x1] ss:$0 sm:$0xff] }
0x2959   :  { %5782 = vadd.xlane.f32.xlu0 %v5781_v46 }
0x295d   :  { %5785 = vadd.xlane.f32.xlu0 %v5784_v49 }
0x29e6   :  { %v5783_v54 = vpop.xlane.xlu0 %5782 }
0x29e7   :  { %v5787_v55 = vmul.f32 0.03125, %v5783_v54 }
0x29e9   :  { %v5789_v56 = vadd.f32 1e-05, %v5787_v55 }
0x29ea   :  { %v5786_v57 = vpop.xlane.xlu0 %5785 }
0x29eb   :  { %10288 = vrsqrt.f32 %v5789_v56  ;;  %v5788_v58 = vmul.f32 0.03125, %v5786_v57 }
0x29ed   :  { %v5790_v61 = vadd.f32 1e-05, %v5788_v58 }
0x29ef   :  { %10290 = vrsqrt.f32 %v5790_v61 }
0x29f5   :  { %v10289_v62 = vpop.eup %10288 }
0x29f6   :  { %v5793_v1 = vmul.f32 %v10289_v62, %v5777_v44 }
0x29f8   :  { %v5802_v3 = vmul.f32 %v8323_v63, %v5793_v1 }
0x29f9   :  { %v10291_v6 = vpop.eup %10290 }
0x29fa   :  { %v5794_v4 = vmul.f32 %v10291_v6, %v5778_v43  ;;  %v5811_v5 = vadd.f32 %v8324_v2, %v5802_v3 }
0x29fc   :  { %v5803_v12 = vmul.f32 %v8323_v63, %v5794_v4  ;;  %v5813_v59 = vmax.f32 %v5811_v5, 0.0 }
0x29fe   :  { %v5812_v60 = vadd.f32 %v8324_v2, %v5803_v12  ;;  %9112 = vmatprep.mubr.msk.f32.mxu0 %vm4721_vm7, %v5813_v59  ;;  %v6099_v12 = vld [vmem:[%s12279_s17] sm:$0xff]  ;;  %v6100_v59 = vld [vmem:[%s12279_s17 + $0x8] sm:$0xff] }
0x2a00   :  { %v5814_v23 = vmax.f32 %v5812_v60, 0.0  ;;  %v9601_v60 = vpack.c.bf16 %v6100_v59, %v6099_v12 }
0x2a02   :  { %9113 = vmatmul.mubr.msk.f32.vlgmr.msra.gmra.mrb[44].mxu0 %vm4721_vm7, %v5814_v23  ;;  %v6101_v23 = vld [vmem:[%s12279_s17 + $0x10] sm:$0xff]  ;;  %9602 = vmatprep.subr.bf16.mxu0 %v9601_v60 }
0x2a03   :  { %9604 = vmatpush3.bf16.msra.mxu0 %v9601_v60 }
0x2ad5   :  { %v9114_v16 = vpop.f32.mrb[44].mxu0 }
0x2ad6   :  { %v5906_v17 = vadd.f32 %v9114_v16, %v8325_v47  ;;  %v5900_v18 = vpop.f32.mrb[45].mxu0 }
0x2ad7   :  { %v5901_v19 = vadd.f32 %v8325_v47, %v5900_v18  ;;  %v6102_v47 = vld [vmem:[%s12279_s17 + $0x18] sm:$0xff] }
0x2ad8   :  { %v5912_v20 = vsel %vm4721_vm7, %v5906_v17, 0.0  ;;  %v9605_v16 = vpack.c.bf16 %v6102_v47, %v6101_v23 }
0x2ad9   :  { %5913 = vadd.xlane.f32.xlu0 %v5912_v20  ;;  %v5909_v9 = vsel %vm4721_vm7, %v5901_v19, 0.0 }
0x2ada   :  { %5910 = vadd.xlane.f32.xlu1 %v5909_v9  ;;  %9606 = vmatprep.subr.bf16.mxu0 %v9605_v16 }
0x2adb   :  { %9608 = vmatpush3.bf16.msra.mxu0 %v9605_v16 }
0x2b66   :  { %v5914_v14 = vpop.xlane.xlu0 %5913 }
0x2b67   :  { %v5916_v21 = vmul.f32 0.03125, %v5914_v14  ;;  %v5911_v15 = vpop.xlane.xlu1 %5910 }
0x2b68   :  { %v5915_v22 = vmul.f32 0.03125, %v5911_v15  ;;  %v8333_v15 = vld [vmem:[#allocation36 + $0x2] ss:$0 sm:$0xff] }
0x2b69   :  { %v5918_v11 = vsub.f32 %v5906_v17, %v5916_v21 }
0x2b6a   :  { %v5917_v30 = vsub.f32 %v5901_v19, %v5915_v22 }
0x2b6b   :  { %v5920_v25 = vmul.f32 %v5918_v11, %v5918_v11 }
0x2b6c   :  { %v5919_v7 = vmul.f32 %v5917_v30, %v5917_v30 }
0x2b6d   :  { %v5924_v27 = vsel %vm4721_vm7, %v5920_v25, 0.0  ;;  %v8334_v25 = vld [vmem:[#allocation38 + $0x2] ss:$0 sm:$0xff] }
0x2b6e   :  { %5925 = vadd.xlane.f32.xlu0 %v5924_v27  ;;  %v5921_v10 = vsel %vm4721_vm7, %v5919_v7, 0.0 }
0x2b6f   :  { %5922 = vadd.xlane.f32.xlu1 %v5921_v10 }
0x2bfb   :  { %v5926_v40 = vpop.xlane.xlu0 %5925 }
0x2bfc   :  { %v5928_v34 = vmul.f32 0.03125, %v5926_v40  ;;  %v5923_v35 = vpop.xlane.xlu1 %5922 }
0x2bfd   :  { %v5927_v36 = vmul.f32 0.03125, %v5923_v35 }
0x2bfe   :  { %v5930_v38 = vadd.f32 1e-05, %v5928_v34 }
0x2bff   :  { %v5929_v39 = vadd.f32 1e-05, %v5927_v36 }
0x2c00   :  { %10292 = vrsqrt.f32 %v5930_v38 }
0x2c01   :  { %10294 = vrsqrt.f32 %v5929_v39 }
0x2c0a   :  { %v10293_v41 = vpop.eup %10292 }
0x2c0b   :  { %v10295_v0 = vpop.eup %10294  ;;  %v5934_v43 = vmul.f32 %v10293_v41, %v5918_v11 }
0x2c0c   :  { %v5933_v44 = vmul.f32 %v10295_v0, %v5917_v30 }
0x2c0d   :  { %v5944_v46 = vmul.f32 %v8328_v42, %v5934_v43 }
0x2c0e   :  { %v5943_v48 = vmul.f32 %v8328_v42, %v5933_v44 }
0x2c0f   :  { %v5954_v49 = vadd.f32 %v8329_v45, %v5944_v46 }
0x2c10   :  { %v5953_v24 = vadd.f32 %v8329_v45, %v5943_v48 }
0x2c11   :  { %v5956_v51 = vmax.f32 %v5954_v49, 0.0 }
0x2c12   :  { %v5955_v50 = vmax.f32 %v5953_v24, 0.0 }
0x2c14   :  { %9123 = vmatprep.mubr.msk.f32.mxu1 %vm4721_vm7, %v5955_v50 }
0x2c15   :  { %9124 = vmatmul.mubr.msk.f32.vlgmr.msra.gmra.mrb[34].mxu1 %vm4721_vm7, %v5956_v51 }
0x2ce8   :  { %v9125_v52 = vpop.f32.mrb[34].mxu1 }
0x2ce9   :  { %v6048_v53 = vadd.f32 %v9125_v52, %v8330_v26  ;;  %v6042_v54 = vpop.f32.mrb[35].mxu1 }
0x2cea   :  { %v6043_v55 = vadd.f32 %v8330_v26, %v6042_v54 }
0x2ceb   :  { %v6054_v56 = vsel %vm4721_vm7, %v6048_v53, 0.0 }
0x2cec   :  { %6055 = vadd.xlane.f32.xlu0 %v6054_v56  ;;  %v6051_v57 = vsel %vm4721_vm7, %v6043_v55, 0.0 }
0x2ced   :  { %6052 = vadd.xlane.f32.xlu1 %v6051_v57 }
0x2d79   :  { %v6056_v58 = vpop.xlane.xlu0 %6055 }
0x2d7a   :  { %v6058_v61 = vmul.f32 0.03125, %v6056_v58  ;;  %v6053_v62 = vpop.xlane.xlu1 %6052 }
0x2d7b   :  { %v6057_v63 = vmul.f32 0.03125, %v6053_v62 }
0x2d7c   :  { %v6060_v1 = vsub.f32 %v6048_v53, %v6058_v61 }
0x2d7d   :  { %v6059_v2 = vsub.f32 %v6043_v55, %v6057_v63 }
0x2d7e   :  { %v6062_v3 = vmul.f32 %v6060_v1, %v6060_v1 }
0x2d7f   :  { %v6061_v6 = vmul.f32 %v6059_v2, %v6059_v2 }
0x2d80   :  { %v6066_v4 = vsel %vm4721_vm7, %v6062_v3, 0.0 }
0x2d81   :  { %6067 = vadd.xlane.f32.xlu0 %v6066_v4  ;;  %v6063_v5 = vsel %vm4721_vm7, %v6061_v6, 0.0 }
0x2d82   :  { %6064 = vadd.xlane.f32.xlu1 %v6063_v5 }
0x2e0e   :  { %v6068_v17 = vpop.xlane.xlu0 %6067 }
0x2e0f   :  { %v6070_v18 = vmul.f32 0.03125, %v6068_v17  ;;  %v6065_v19 = vpop.xlane.xlu1 %6064 }
0x2e10   :  { %v6069_v20 = vmul.f32 0.03125, %v6065_v19 }
0x2e11   :  { %v6072_v9 = vadd.f32 1e-05, %v6070_v18 }
0x2e12   :  { %v6071_v14 = vadd.f32 1e-05, %v6069_v20 }
0x2e13   :  { %10296 = vrsqrt.f32 %v6072_v9 }
0x2e14   :  { %10298 = vrsqrt.f32 %v6071_v14 }
0x2e1d   :  { %v10297_v21 = vpop.eup %10296 }
0x2e1e   :  { %v10299_v22 = vpop.eup %10298  ;;  %v6076_v11 = vmul.f32 %v10297_v21, %v6060_v1 }
0x2e1f   :  { %v6075_v30 = vmul.f32 %v10299_v22, %v6059_v2 }
0x2e20   :  { %v6086_v7 = vmul.f32 %v8333_v15, %v6076_v11 }
0x2e21   :  { %v6085_v27 = vmul.f32 %v8333_v15, %v6075_v30 }
0x2e22   :  { %v6096_v10 = vadd.f32 %v8334_v25, %v6086_v7 }
0x2e23   :  { %v6095_v28 = vadd.f32 %v8334_v25, %v6085_v27  ;;  %v6273_v27 = vld [vmem:[#allocation41] sm:$0x1f] }
0x2e24   :  { %v6098_v29 = vmax.f32 %v6096_v10, 0.0  ;;  %v6362_v10 = vld [vmem:[#allocation42] sm:$0x1f]  ;;  %9137 = vmatprep.subr.msk.mxu1 %vm6283_vm6, %v6273_v27 }
0x2e25   :  { %v6097_v32 = vmax.f32 %v6095_v28, 0.0  ;;  %9142 = vmatprep.subr.msk.mxu0 %vm6283_vm6, %v6362_v10  ;;  %9138 = vmatpush3.msk.msra.mxu1 %vm6283_vm6, %v6273_v27  ;;  %v6443_v28 = vld [vmem:[%s12280_s23] sm:$0xff] }
0x2e27   :  { %9134 = vmatprep.mubr.msk.f32.mxu0 %vm4721_vm7, %v6097_v32  ;;  %v6444_v32 = vld [vmem:[%s12280_s23 + $0x8] sm:$0xff] }
0x2e28   :  { %9135 = vmatmul.mubr.msk.f32.vlgmr.msra.gmra.mrb[46].mxu0 %vm4721_vm7, %v6098_v29  ;;  %v6526_v29 = vld [vmem:[%s12281_s28] sm:$0xff]  ;;  %vm6278_vm7 = vcmask 39936  }
0x2e29   :  { %9143 = vmatpush3.msk.msra.mxu0 %vm6283_vm6, %v6362_v10 }
0x2efb   :  { %v9136_v33 = vpop.f32.mrb[46].mxu0 }
0x2efc   :  { %v11975_v37 = vadd.f32 %v9136_v33, %v8335_v31  ;;  %v6182_v40 = vpop.f32.mrb[47].mxu0  ;;  %v6527_v33 = vld [vmem:[%s12281_s28 + $0x8] sm:$0xff] }
0x2efd   :  { %v11977_v34 = vadd.f32 %v8335_v31, %v6182_v40  ;;  %v9609_v31 = vpack.c.bf16 %v6444_v32, %v6443_v28 }
0x2efe   :  { %v6194_v35 = vsub.f32 0.0, %v11975_v37  ;;  %v6221_v36 = vmul.f32 1.442695, %v11975_v37  ;;  %vm6192_vm15 = vcmp.ge.f32.partialorder %v11975_v37, 0.0 }
0x2eff   :  { %v6193_v38 = vsub.f32 0.0, %v11977_v34  ;;  %v6219_v39 = vmul.f32 1.442695, %v11977_v34  ;;  %vm6191_vm3 = vcmp.ge.f32.partialorder %v11977_v34, 0.0  ;;  %9610 = vmatprep.subr.bf16.mxu1 %v9609_v31 }
0x2f00   :  { %v6197_v41 = vmul.f32 1.442695, %v6194_v35  ;;  %10300 = vpow2.f32 %v6221_v36 }
0x2f01   :  { %v6195_v42 = vmul.f32 1.442695, %v6193_v38  ;;  %10302 = vpow2.f32 %v6219_v39 }
0x2f02   :  { %10304 = vpow2.f32 %v6197_v41 }
0x2f03   :  { %10306 = vpow2.f32 %v6195_v42 }
0x2f0a   :  { %v10301_v0 = vpop.eup %10300 }
0x2f0b   :  { %v10303_v43 = vpop.eup %10302  ;;  %v6232_v44 = vadd.f32 1.0, %v10301_v0  ;;  %v6235_v50 = vmul.f32 -0.5, %v10301_v0  ;;  %v6238_v54 = vand.u32 2147483647, %v10301_v0 }
0x2f0c   :  { %v10305_v45 = vpop.eup %10304  ;;  %v6223_v49 = vadd.f32 1.0, %v10303_v43  ;;  %v6226_v53 = vmul.f32 -0.5, %v10303_v43  ;;  %v6229_v3 = vand.u32 2147483647, %v10303_v43 }
0x2f0d   :  { %v10307_v46 = vpop.eup %10306  ;;  %v6208_v48 = vadd.f32 1.0, %v10305_v45  ;;  %10308 = vlog2.f32 %v6232_v44  ;;  %v6211_v51 = vmul.f32 -0.5, %v10305_v45  ;;  %v6236_v52 = vadd.f32 1.0, %v6235_v50  ;;  %v6696_v50 = vld [vmem:[%s12285_s7] sm:$0xff] }
0x2f0e   :  { %v6199_v24 = vadd.f32 1.0, %v10307_v46  ;;  %v6202_v26 = vmul.f32 -0.5, %v10307_v46  ;;  %v6214_v57 = vand.u32 2147483647, %v10305_v45  ;;  %v6205_v63 = vand.u32 2147483647, %v10307_v46 }
0x2f0f   :  { %10310 = vlog2.f32 %v6208_v48  ;;  %v6212_v55 = vadd.f32 1.0, %v6211_v51  ;;  %v6237_v62 = vmul.f32 %v10301_v0, %v6236_v52  ;;  %v6227_v1 = vadd.f32 1.0, %v6226_v53  ;;  %v6441_v0 = vld [vmem:[%s12282_s13] sm:$0xff]  ;;  %v6697_v51 = vld [vmem:[%s12285_s7 + $0x8] sm:$0xff]  ;;  %v6698_v52 = vld [vmem:[%s12285_s7 + $0x10] sm:$0xff] }
0x2f10   :  { %10312 = vlog2.f32 %v6199_v24  ;;  %v6203_v58 = vadd.f32 1.0, %v6202_v26  ;;  %vm6239_vm11 = vcmp.lt.f32.partialorder %v6238_v54, 0.0004427343  ;;  %vm6215_vm12 = vcmp.lt.f32.partialorder %v6214_v57, 0.0004427343  ;;  %v6699_v53 = vld [vmem:[%s12285_s7 + $0x18] sm:$0xff] }
0x2f11   :  { %10314 = vlog2.f32 %v6223_v49  ;;  %v6213_v5 = vmul.f32 %v10305_v45, %v6212_v55  ;;  %vm6206_vm13 = vcmp.lt.f32.partialorder %v6205_v63, 0.0004427343  ;;  %v6228_v17 = vmul.f32 %v10303_v43, %v6227_v1  ;;  %v6442_v43 = vld [vmem:[%s12282_s13 + $0x8] sm:$0xff]  ;;  %v12006_v45 = vld [vmem:[%s12283_s1] sm:$0xff] }
0x2f12   :  { %v6204_v23 = vmul.f32 %v10307_v46, %v6203_v58  ;;  %vm6230_vm14 = vcmp.lt.f32.partialorder %v6229_v3, 0.0004427343  ;;  %v6621_v48 = vld [vmem:[%s12284_s2] sm:$0x3]  ;;  %v9618_v26 = vpack.c.bf16 %v6697_v51, %v6696_v50  ;;  %v9621_v55 = vpack.c.bf16 %v6699_v53, %v6698_v52  ;;  %v6702_v58 = vld [vmem:[%s12285_s7 + $0x30] sm:$0xff]  ;;  %v6705_v1 = vld [vmem:[%s12285_s7 + $0x48] sm:$0xff] }
0x2f13   :  { %v6700_v54 = vld [vmem:[%s12285_s7 + $0x20] sm:$0xff]  ;;  %v6706_v3 = vld [vmem:[%s12285_s7 + $0x50] sm:$0xff]  ;;  %v7217_v51 = vld [vmem:[%s12287_s29 + $0x8] sm:$0xff] }
0x2f14   :  { %v6704_v63 = vld [vmem:[%s12285_s7 + $0x40] sm:$0xff] }
0x2f15   :  { %v7216_v50 = vld [vmem:[%s12287_s29] sm:$0xff] }
0x2f17   :  { %v10309_v56 = vpop.eup %10308 }
0x2f18   :  { %v6234_v61 = vmul.f32 0.6931472, %v10309_v56  ;;  %v6701_v56 = vld [vmem:[%s12285_s7 + $0x28] sm:$0xff] }
0x2f19   :  { %v10311_v2 = vpop.eup %10310  ;;  %v9624_v57 = vpack.c.bf16 %v6701_v56, %v6700_v54 }
0x2f1a   :  { %v10313_v6 = vpop.eup %10312  ;;  %v6210_v4 = vmul.f32 0.6931472, %v10311_v2  ;;  %v6240_v12 = vsel %vm6239_vm11, %v6237_v62, %v6234_v61  ;;  %v6703_v61 = vld [vmem:[%s12285_s7 + $0x38] sm:$0xff]  ;;  %v9630_v2 = vpack.c.bf16 %v6705_v1, %v6704_v63 }
0x2f1b   :  { %v10315_v59 = vpop.eup %10314  ;;  %v6201_v60 = vmul.f32 0.6931472, %v10313_v6  ;;  %v6242_v19 = vsub.f32 %v11975_v37, %v6240_v12  ;;  %v9613_v37 = vpack.c.bf16 %v6527_v33, %v6526_v29  ;;  %v9627_v62 = vpack.c.bf16 %v6703_v61, %v6702_v58  ;;  %v6707_v6 = vld [vmem:[%s12285_s7 + $0x58] sm:$0xff]  ;;  %v6709_v12 = vld [vmem:[%s12285_s7 + $0x68] sm:$0xff] }
0x2f1c   :  { %v6216_v47 = vsel %vm6215_vm12, %v6213_v5, %v6210_v4  ;;  %v6225_v16 = vmul.f32 0.6931472, %v10315_v59  ;;  %v9633_v4 = vpack.c.bf16 %v6707_v6, %v6706_v3  ;;  %v6708_v5 = vld [vmem:[%s12285_s7 + $0x60] sm:$0xff] }
0x2f1d   :  { %v6218_v18 = vsub.f32 0.0, %v6216_v47  ;;  %v6207_v20 = vsel %vm6206_vm13, %v6204_v23, %v6201_v60  ;;  %9614 = vmatprep.subr.bf16.mxu0 %v9613_v37  ;;  %v9636_v59 = vpack.c.bf16 %v6709_v12, %v6708_v5  ;;  %v6710_v60 = vld [vmem:[%s12285_s7 + $0x70] sm:$0xff]  ;;  %v6711_v23 = vld [vmem:[%s12285_s7 + $0x78] sm:$0xff] }
0x2f1e   :  { %v6217_v9 = vsub.f32 0.0, %v6207_v20  ;;  %v6231_v14 = vsel %vm6230_vm14, %v6228_v17, %v6225_v16  ;;  %v9639_v47 = vpack.c.bf16 %v6711_v23, %v6710_v60 }
0x2f1f   :  { %v6244_v21 = vsel %vm6192_vm15, %v6218_v18, %v6242_v19  ;;  %v6241_v15 = vsub.f32 %v11977_v34, %v6231_v14 }
0x2f20   :  { %v6246_v22 = vmul.f32 2.3025851, %v6244_v21 }
0x2f21   :  { %v6243_v11 = vsel %vm6191_vm3, %v6217_v9, %v6241_v15 }
0x2f22   :  { %v6245_v30 = vmul.f32 2.3025851, %v6243_v11  ;;  %v6249_v25 = vmul.f32 1.442695, %v6246_v22 }
0x2f24   :  { %10316 = vpow2.f32 %v6249_v25  ;;  %v6247_v7 = vmul.f32 1.442695, %v6245_v30 }
0x2f26   :  { %10318 = vpow2.f32 %v6247_v7 }
0x2f2e   :  { %v10317_v40 = vpop.eup %10316 }
0x2f2f   :  { %v6252_v34 = vmul.f32 2.0, %v10317_v40 }
0x2f30   :  { %v10319_v35 = vpop.eup %10318 }
0x2f31   :  { %v11991_v36 = vadd.f32 1e-07, %v6252_v34  ;;  %v6251_v38 = vmul.f32 2.0, %v10319_v35 }
0x2f33   :  { %6276 = vrot.lane.b32.xlu0 %v11991_v36, %s11115_s24  ;;  %v11994_v39 = vadd.f32 1e-07, %v6251_v38 }
0x2f35   :  { %6274 = vrot.lane.b32.xlu1 %v11994_v39, %s11115_s24 }
0x2f39   :  { %6257 = vrot.lane.b32.xlu1 %v11994_v39, %s11116_s25 }
0x2f3d   :  { %6259 = vrot.lane.b32.xlu1 %v11991_v36, %s11116_s25 }
0x2fa5   :  { %v6277_v42 = vpop.permute.xlu0 %6276 }
0x2fa7   :  { %v6275_v41 = vpop.permute.xlu1 %6274 }
0x2fa8   :  { %9139 = vmatprep.mubr.msk.f32.mxu1 %vm6278_vm7, %v6275_v41  ;;  %9144 = vmatprep.mubr.msk.f32.mxu0 %vm6278_vm7, %v6275_v41 }
0x2fa9   :  { %9140 = vmatmul.mubr.msk.f32.vlgmr.msra.gmra.mrb[36].mxu1 %vm6278_vm7, %v6277_v42  ;;  %9145 = vmatmul.mubr.msk.f32.vlgmr.msra.gmra.mrb[48].mxu0 %vm6278_vm7, %v6277_v42 }
0x2faa   :  { %9612 = vmatpush3.bf16.msra.mxu1 %v9609_v31  ;;  %9616 = vmatpush3.bf16.msra.mxu0 %v9613_v37 }
0x2fab   :  { %v6258_v44 = vpop.permute.xlu1 %6257  ;;  %9151 = vmatprep.mubr.msk.f32.mxu1 %vm4628_vm4, %v6441_v0  ;;  %9158 = vmatprep.mubr.msk.f32.mxu0 %vm4628_vm4, %v6441_v0 }
0x2fac   :  { %v6263_v46 = vsel %vm3636_vm2, %v6258_v44, 0.0  ;;  %9161 = vmatprep.subr.mxu1 %v11112_v8  ;;  %9617 = vmatprep.subr.bf16.mxu0 %v11110_v13  ;;  %v7380_v44 = vld [vmem:[%s12286_s30] sm:$0xff] }
0x2fad   :  { %9152 = vmatmul.mubr.msk.f32.vlgmr.msra.gmra.mrb[38].mxu1 %vm4628_vm4, %v6442_v43  ;;  %9159 = vmatmul.mubr.msk.f32.vlgmr.msra.gmra.mrb[50].mxu0 %vm4628_vm4, %v6442_v43  ;;  %v7381_v43 = vld [vmem:[%s12286_s30 + $0x8] sm:$0xff] }
0x2fae   :  { %6264 = vadd.xlane.f32.xlu0 %v6263_v46  ;;  %9162 = vmatpush3.msra.mxu1 %v12006_v45 }
0x2faf   :  { %v6260_v49 = vpop.permute.xlu1 %6259  ;;  %9163 = vmatprep.mubr.msk.f32.mxu1 %vm11111_vm5, %v11112_v8  ;;  %9198 = vmatprep.mubr.msk.f32.mxu0 %vm11111_vm5, %v11112_v8 }
0x2fb0   :  { %v6266_v24 = vsel %vm3636_vm2, %v6260_v49, 0.0  ;;  %9201 = vmatprep.subr.mxu1 %v11112_v8  ;;  %9619 = vmatpush3.bf16.msra.mxu0 %v9618_v26 }
0x2fb1   :  { %9164 = vmatmul.mubr.msk.f32.vlgmr.msra.gmra.mrb[40].mxu1 %vm3636_vm2, %v6621_v48  ;;  %6267 = vadd.xlane.f32.xlu1 %v6266_v24 }
0x2fb2   :  { %9202 = vmatpush3.msra.mxu1 %v12006_v45  ;;  %9203 = vmatprep.mubr.msk.f32.mxu1 %vm11111_vm5, %v11112_v8 }
0x2fb3   :  { %9206 = vmatprep.subr.mxu1 %v11112_v8  ;;  %9620 = vmatprep.subr.bf16.mxu0 %v11110_v13 }
0x2fb4   :  { %9622 = vmatpush3.bf16.msra.mxu0 %v9621_v55 }
0x2fb5   :  { %9623 = vmatprep.subr.bf16.mxu0 %v11110_v13 }
0x2fb8   :  { %9625 = vmatpush3.bf16.msra.mxu0 %v9624_v57 }
0x2fb9   :  { %9626 = vmatprep.subr.bf16.mxu0 %v11110_v13 }
0x2fbc   :  { %9628 = vmatpush3.bf16.msra.mxu0 %v9627_v62 }
0x2fbd   :  { %9629 = vmatprep.subr.bf16.mxu0 %v11110_v13 }
0x2fc0   :  { %9631 = vmatpush3.bf16.msra.mxu0 %v9630_v2 }
0x2fc1   :  { %9632 = vmatprep.subr.bf16.mxu0 %v11110_v13 }
0x2fc4   :  { %9634 = vmatpush3.bf16.msra.mxu0 %v9633_v4 }
0x2fc5   :  { %9635 = vmatprep.subr.bf16.mxu0 %v11110_v13 }
0x2fc8   :  { %9637 = vmatpush3.bf16.msra.mxu0 %v9636_v59 }
0x2fc9   :  { %9638 = vmatprep.subr.bf16.mxu0 %v11110_v13 }
0x2fcc   :  { %9640 = vmatpush3.bf16.msra.mxu0 %v9639_v47 }
0x303b   :  { %v6265_v16 = vpop.xlane.xlu0 %6264 }
0x303c   :  { %10320 = vrcp.f32 %v6265_v16 }
0x303e   :  { %v6268_v17 = vpop.xlane.xlu1 %6267 }
0x303f   :  { %10322 = vrcp.f32 %v6268_v17 }
0x3046   :  { %v10321_v18 = vpop.eup %10320 }
0x3047   :  { %v6270_v19 = vmul.f32 %v10321_v18, %v11994_v39 }
0x3049   :  { %v10323_v20 = vpop.eup %10322  ;;  %6889 = vrot.lane.b32.xlu0 %v6270_v19, %s11116_s25 }
0x304a   :  { %v6272_v9 = vmul.f32 %v10323_v20, %v11991_v36 }
0x304c   :  { %7103 = vrot.lane.b32.xlu1 %v6272_v9, %s11116_s25 }
0x3067   :  { %6783 = vxpose.xlu0.b32.start.end [1/1] (short) (narrow) %v11994_v39, 8 }
0x306b   :  { %6997 = vxpose.xlu0.b32.start.end [1/1] (short) (narrow) %v11991_v36, 8 }
0x307c   :  { %v9141_v14 = vpop.f32.mrb[36].mxu1  ;;  %v9146_v21 = vpop.f32.mrb[48].mxu0 }
0x307d   :  { %v6353_v15 = vpop.f32.mrb[37].mxu1  ;;  %v6432_v22 = vpop.f32.mrb[49].mxu0 }
0x3080   :  { %v9153_v11 = vpop.f32.mrb[38].mxu1  ;;  %v9160_v30 = vpop.f32.mrb[50].mxu0 }
0x3081   :  { %v6604_v25 = vmul.f32 %v9153_v11, %v9141_v14  ;;  %v6615_v7 = vmul.f32 %v9153_v11, %v9146_v21  ;;  %v6606_v27 = vmul.f32 %v9160_v30, %v9146_v21  ;;  %v6613_v10 = vmul.f32 %v9160_v30, %v9141_v14  ;;  %v6517_v28 = vpop.f32.mrb[39].mxu1  ;;  %v6594_v32 = vpop.f32.mrb[51].mxu0 }
0x3082   :  { %v6603_v29 = vmul.f32 %v6517_v28, %v6353_v15  ;;  %v6614_v31 = vmul.f32 %v6517_v28, %v6432_v22  ;;  %v6605_v33 = vmul.f32 %v6594_v32, %v6432_v22  ;;  %v6612_v37 = vmul.f32 %v6594_v32, %v6353_v15 }
0x3083   :  { %v6608_v40 = vsub.f32 %v6604_v25, %v6606_v27  ;;  %v6617_v34 = vadd.f32 %v6615_v7, %v6613_v10 }
0x3084   :  { %v6607_v35 = vsub.f32 %v6603_v29, %v6605_v33  ;;  %v6616_v36 = vadd.f32 %v6614_v31, %v6612_v37  ;;  %v6691_v38 = vpop.f32.mrb[40].mxu1 }
0x3085   :  { %6611 = vst.msk [vmem:[%s11379_s27 + $0x8] sm:$0xff] %vm6609_vm8, %v6608_v40  ;;  %6619 = vst.msk [vmem:[%s11384_s14 + $0x8] sm:$0xff] %vm6609_vm8, %v6617_v34  ;;  %v6695_v39 = vmul.f32 6.25e-05, %v6691_v38  ;;  %v9165_v41 = vpop.f32.mrb[41].mxu1 }
0x3086   :  { %6610 = vst.msk [vmem:[%s11379_s27] sm:$0xff] %vm6609_vm8, %v6607_v35  ;;  %6618 = vst.msk [vmem:[%s11384_s14] sm:$0xff] %vm6609_vm8, %v6616_v36  ;;  %v11117_v35 = vmov 683565275   ;;  %v11118_v41 = vmov 2475754826  }
0x3087   :  { %9199 = vmatmul.mubr.f32.vlgmr.msra.gmra.mrb[52].mxu0 %v6695_v39  ;;  %s12288_s14 = sld [smem:[#allocation94_spill]]  ;;  %s11123_s27 = smov [#allocation46]  }
0x3088   :  { %s7797_s15 = sshll.u32 %s11123_s27, 4  ;;  %s7798_s15 = int_to_ptr.vmem [resolvable:$true] %s7797_s15 }
0x3089   :  { %s10926_s10 = scalar_lea.vmem %s7798_s15, 32  ;;  %p10931_p7 = scmp.lt.s32.totalorder %s7798_s15, %s7798_s15 }
0x308a   :  { %p10927_p6 = scmp.ne.s32.totalorder %s7798_s15, %s10926_s10  ;;  %p10932_p8 = scmp.lt.s32.totalorder %s10926_s10, %s10926_s10 }
0x308c   :  { %p10933_p9 = por %p10932_p8, %p10931_p7 }
0x308e   :  { %p10934_p10 = pnand %p10933_p9, %p10927_p6 }
0x30bb   :  { %v6890_v42 = vpop.permute.xlu0 %6889 }
0x30bc   :  { %6892 = vxpose.xlu1.b32.start.end [1/1] (short) (narrow) %v6890_v42, 8 }
0x30be   :  { %v7104_v0 = vpop.permute.xlu1 %7103 }
0x30bf   :  { %7106 = vxpose.xlu0.b32.start.end [1/1] (short) (narrow) %v7104_v0, 8  ;;  %v11119_v0 = vmov 2131351028  }
0x30da   :  { %7389 = vperm.xlu1 %9807, %v7381_v43  }
0x30e7   :  { %v6799_v46 = vpop.trf.xlu0 }
0x30e8   :  { %7384 = vperm.xlu0 %9806, %v7380_v44   ;;  %9204 = vmatmul.mubr.msk.f32.vlgmr.msra.gmra.mrb[42].mxu1 %vm3636_vm2, %v6799_v46  ;;  %v11120_v44 = vmov 2102212464  }
0x30e9   :  { %9207 = vmatpush3.msra.mxu1 %v12006_v45  ;;  %9208 = vmatprep.mubr.msk.f32.mxu1 %vm11111_vm5, %v11112_v8 }
0x30ea   :  { %9211 = vmatprep.subr.mxu1 %v11112_v8 }
0x30eb   :  { %v7013_v49 = vpop.trf.xlu0 }
0x313c   :  { %v6908_v48 = vpop.trf.xlu1 }
0x313d   :  { %9209 = vmatmul.mubr.msk.f32.vlgmr.msra.gmra.mrb[44].mxu1 %vm3636_vm2, %v6908_v48  ;;  %v11121_v48 = vmov 920167782  }
0x313e   :  { %9212 = vmatpush3.msra.mxu1 %v12006_v45  ;;  %9213 = vmatprep.mubr.msk.f32.mxu1 %vm11111_vm5, %v11112_v8 }
0x313f   :  { %9216 = vmatprep.subr.mxu1 %v11112_v8  ;;  %v7122_v24 = vpop.trf.xlu0 }
0x3141   :  { %9214 = vmatmul.mubr.msk.f32.vlgmr.msra.gmra.mrb[46].mxu1 %vm3636_vm2, %v7013_v49 }
0x3142   :  { %9217 = vmatpush3.msra.mxu1 %v12006_v45  ;;  %9218 = vmatprep.mubr.msk.f32.mxu1 %vm11111_vm5, %v11112_v8 }
0x3143   :  { %9221 = vmatprep.subr.msk.mxu1 %vm3396_vm1, %v6695_v39 }
0x3145   :  { %9219 = vmatmul.mubr.msk.f32.vlgmr.msra.gmra.mrb[48].mxu1 %vm3636_vm2, %v7122_v24  ;;  %vm7214_vm2 = vcmask 1040384  }
0x3146   :  { %9222 = vmatpush3.msk.msra.mxu1 %vm3396_vm1, %v6695_v39  ;;  %9223 = vmatprep.mubr.msk.f32.mxu1 %vm3389_vm0, %v7216_v50 }
0x3149   :  { %9224 = vmatmul.mubr.msk.f32.vlgmr.msra.gmra.mrb[50].mxu1 %vm3389_vm0, %v7217_v51 }
0x314a   :  { %9228 = vmatprep.mubr.msk.f32.mxu1 %vm3389_vm0, %v7216_v50 }
0x3159   :  { %v7390_v2 = vpop.permute.xlu1 %7389 }
0x315a   :  { %v6778_v26 = vpop.f32.mrb[52].mxu0 }
0x315b   :  { %v6782_v45 = vmul.f32 6.2831855, %v6778_v26  ;;  %v9200_v52 = vpop.f32.mrb[53].mxu0 }
0x315c   :  { %v11122_v52 = vmov 1326507024  }
0x315d   :  { %9226 = vmatprep.subr.msk.mxu1 %vm3396_vm1, %v6782_v45 }
0x315e   :  { %9227 = vmatpush3.msk.msra.mxu1 %vm3396_vm1, %v6782_v45 }
0x315f   :  { %9229 = vmatmul.mubr.msk.f32.vlgmr.msra.gmra.mrb[52].mxu1 %vm3389_vm0, %v7217_v51  ;;  %9641 = vmatprep.subr.bf16.mxu1 %v11110_v13 }
0x3160   :  { %9235 = vmatprep.mubr.msk.f32.mxu1 %vm11111_vm5, %v11112_v8 }
0x3167   :  { %v7385_v6 = vpop.permute.xlu0 %7384 }
0x31bb   :  { %v6884_v53 = vpop.f32.mrb[42].mxu1 }
0x31bc   :  { %v9205_v54 = vpop.f32.mrb[43].mxu1 }
0x3210   :  { %v6993_v55 = vpop.f32.mrb[44].mxu1 }
0x3211   :  { %7777 = vst [vmem:[#allocation48] sm:$0xff] %v6993_v55  ;;  %v9210_v56 = vpop.f32.mrb[45].mxu1 }
0x3214   :  { %v7098_v57 = vpop.f32.mrb[46].mxu1 }
0x3215   :  { %v7212_v58 = vrot.slane %v7098_v57, 7  ;;  %v9215_v61 = vpop.f32.mrb[47].mxu1 }
0x3217   :  { %v12093_v62 = vsel %vm7214_vm2, %v6884_v53, %v7212_v58 }
0x3218   :  { %v7207_v63 = vpop.f32.mrb[48].mxu1  ;;  %7776 = vst [vmem:[#allocation46] sm:$0x3] %v12093_v62 }
0x3219   :  { %7778 = vst [vmem:[#allocation48 + $0x8] sm:$0xff] %v7207_v63  ;;  %v9220_v1 = vpop.f32.mrb[49].mxu1 }
0x321c   :  { %v9225_v3 = vpop.f32.mrb[50].mxu1 }
0x321d   :  { %v7393_v4 = vmul.f32 %v9225_v3, %v7390_v2  ;;  %v7293_v5 = vpop.f32.mrb[51].mxu1 }
0x321e   :  { %v7392_v12 = vmul.f32 %v7385_v6, %v7293_v5 }
0x321f   :  { %vm7395_vm0 = vcmp.lt.f32.partialorder %v7393_v4, 0.5 }
0x3220   :  { %v8360_v59 = vsel %vm7395_vm0, 1.0, %v11112_v8  ;;  %vm7394_vm1 = vcmp.lt.f32.partialorder %v7392_v12, 0.5 }
0x3221   :  { %v12097_v60 = vmul.f32 %v8360_v59, %v7207_v63  ;;  %v8359_v23 = vsel %vm7394_vm1, 1.0, %v11112_v8 }
0x3222   :  { %v12100_v47 = vmul.f32 %v8359_v23, %v6993_v55 }
0x3232   :  { %v9230_v16 = vpop.f32.mrb[52].mxu1 }
0x3233   :  { %v12102_v17 = vmul.f32 %v9230_v16, %v7390_v2  ;;  %v7371_v18 = vpop.f32.mrb[53].mxu1 }
0x3234   :  { %v12104_v19 = vmul.f32 %v7385_v6, %v7371_v18 }
0x3235   :  { %v7508_v20 = vand.u32 2147483647, %v12102_v17  ;;  %v7511_v9 = vand.u32 2139095040, %v12102_v17 }
0x3236   :  { %v7407_v14 = vand.u32 2139095040, %v12104_v19  ;;  %v7404_v22 = vand.u32 2147483647, %v12104_v19 }
0x3237   :  { %v7512_v21 = vshrl.u32 %v7511_v9, 23  ;;  %v7515_v15 = vand.u32 8388607, %v7508_v20 }
0x3238   :  { %v7408_v11 = vshrl.u32 %v7407_v14, 23  ;;  %v12114_v10 = vand.u32 8388607, %v7404_v22 }
0x3239   :  { %v8365_v30 = vadd.s32 4294967169, %v7512_v21  ;;  %v7516_v27 = vor.u32 8388608, %v7515_v15 }
0x323a   :  { %v8361_v25 = vadd.s32 4294967169, %v7408_v11  ;;  %v7412_v40 = vor.u32 8388608, %v12114_v10 }
0x323b   :  { %v7518_v7 = vadd.s32 1, %v8365_v30  ;;  %v12116_v37 = vshll.u32 %v7516_v27, 8 }
0x323c   :  { %v7414_v28 = vadd.s32 1, %v8361_v25 }
0x323d   :  { %vm7519_vm9 = vcmp.gt.s32.totalorder %v7518_v7, 0 }
0x323e   :  { %v7520_v32 = vsel %vm7519_vm9, %v7518_v7, 0  ;;  %vm7415_vm10 = vcmp.gt.s32.totalorder %v7414_v28, 0  ;;  %vm7510_vm9 = vcmp.lt.s32.totalorder %v12102_v17, 0 }
0x323f   :  { %v7521_v29 = vshrl.u32 %v7520_v32, 5  ;;  %v7522_v31 = vand.u32 31, %v7520_v32  ;;  %v7416_v33 = vsel %vm7415_vm10, %v7414_v28, 0  ;;  %vm7509_vm10 = vcmp.le.f32.partialorder %v7508_v20, 0.7853982 }
0x3240   :  { %v12119_v38 = vshrl.u32 %v7416_v33, 5  ;;  %v7418_v39 = vand.u32 31, %v7416_v33 }
0x3241   :  { %v7523_v34 = vsub.s32 32, %v7522_v31  ;;  %v7525_v36 = vshll.u32 %v11117_v35, %v7522_v31  ;;  %v7528_v42 = vshll.u32 %v11118_v41, %v7522_v31  ;;  %v7531_v43 = vshll.u32 %v11119_v0, %v7522_v31 }
0x3242   :  { %v7534_v46 = vshll.u32 %v11120_v44, %v7522_v31  ;;  %v7537_v49 = vshll.u32 %v11121_v48, %v7522_v31  ;;  %vm7540_vm11 = vcmp.lt.s32.totalorder %v7521_v29, 1  ;;  %vm7541_vm12 = vcmp.lt.s32.totalorder %v7521_v29, 2 }
0x3243   :  { %v7526_v24 = vshrl.u32 %v11118_v41, %v7523_v34  ;;  %v7529_v50 = vshrl.u32 %v11119_v0, %v7523_v34  ;;  %v7532_v51 = vshrl.u32 %v11120_v44, %v7523_v34  ;;  %v7524_v26 = vshrl.u32 %v11117_v35, %v7523_v34 }
0x3244   :  { %v7535_v45 = vshrl.u32 %v11121_v48, %v7523_v34  ;;  %v7538_v53 = vshrl.u32 %v11122_v52, %v7523_v34  ;;  %v7419_v57 = vsub.s32 32, %v7418_v39  ;;  %vm7542_vm13 = vcmp.lt.s32.totalorder %v7521_v29, 3 }
0x3245   :  { %v7527_v54 = vor.u32 %v7526_v24, %v7525_v36  ;;  %v7530_v55 = vor.u32 %v7529_v50, %v7528_v42  ;;  %v7533_v56 = vor.u32 %v7532_v51, %v7531_v43  ;;  %vm7543_vm14 = vcmp.lt.s32.totalorder %v7521_v29, 4 }
0x3246   :  { %v7536_v58 = vor.u32 %v7535_v45, %v7534_v46  ;;  %v7539_v61 = vor.u32 %v7538_v53, %v7537_v49  ;;  %v7421_v12 = vshll.u32 %v11117_v35, %v7418_v39  ;;  %v7422_v16 = vshrl.u32 %v11118_v41, %v7419_v57 }
0x3247   :  { %v7544_v63 = vsel %vm7540_vm11, %v7524_v26, %v7527_v54  ;;  %v7545_v1 = vsel %vm7543_vm14, %v7533_v56, 2102212464  ;;  %v7548_v2 = vsel %vm7540_vm11, %v7527_v54, %v7530_v55  ;;  %v7552_v3 = vsel %vm7540_vm11, %v7530_v55, %v7533_v56 }
0x3248   :  { %v7546_v6 = vsel %vm7542_vm13, %v7530_v55, %v7545_v1  ;;  %v7549_v4 = vsel %vm7543_vm14, %v7536_v58, 920167782  ;;  %v7553_v5 = vsel %vm7543_vm14, %v7539_v61, 1326507024  ;;  %v7424_v18 = vshll.u32 %v11118_v41, %v7418_v39 }
0x3249   :  { %v7550_v59 = vsel %vm7542_vm13, %v7533_v56, %v7549_v4  ;;  %v7554_v23 = vsel %vm7542_vm13, %v7536_v58, %v7553_v5  ;;  %v7547_v9 = vsel %vm7541_vm12, %v7544_v63, %v7546_v6  ;;  %v7425_v15 = vshrl.u32 %v11119_v0, %v7419_v57 }
0x324a   :  { %v7551_v14 = vsel %vm7541_vm12, %v7548_v2, %v7550_v59  ;;  %v7555_v21 = vsel %vm7541_vm12, %v7552_v3, %v7554_v23  ;;  %v7423_v27 = vor.u32 %v7422_v16, %v7421_v12  ;;  %v7427_v28 = vshll.u32 %v11119_v0, %v7418_v39 }
0x324b   :  { %v12128_v11 = vmul.u32.u64.low %v12116_v37, %v7555_v21  ;;  %v12129_v30 = vmul.u32.u64.high %v12116_v37, %v7555_v21, %v12128_v11  ;;  %v12132_v25 = vmul.u32.u64.low %v12116_v37, %v7551_v14  ;;  %v12133_v7 = vmul.u32.u64.high %v12116_v37, %v7551_v14, %v12132_v25 }
0x324c   :  { %v7426_v10 = vor.u32 %v7425_v15, %v7424_v18  ;;  %v7428_v32 = vshrl.u32 %v11120_v44, %v7419_v57  ;;  %v7430_v31 = vshll.u32 %v11120_v44, %v7418_v39  ;;  %v7431_v33 = vshrl.u32 %v11121_v48, %v7419_v57 }
0x324d   :  { %v7434_v34 = vshrl.u32 %v11122_v52, %v7419_v57  ;;  %v7452_v36 = vshll.u32 %v7412_v40, 8  ;;  %v7563_v29 = vmul.u32 %v12116_v37, %v7547_v9  ;;  %v7420_v41 = vshrl.u32 %v11117_v35, %v7419_v57 }
0x324e   :  { %v7429_v42 = vor.u32 %v7428_v32, %v7427_v28  ;;  %v7433_v43 = vshll.u32 %v11121_v48, %v7418_v39  ;;  %vm7565_vm15 = vc.u32 %v12129_v30, %v12132_v25  ;;  %v7566_v46 = vadd.s32 1, %v12133_v7 }
0x324f   :  { %v7432_v49 = vor.u32 %v7431_v33, %v7430_v31  ;;  %vm7436_vm3 = vcmp.lt.s32.totalorder %v12119_v38, 1  ;;  %vm7438_vm6 = vcmp.lt.s32.totalorder %v12119_v38, 3  ;;  %vm7439_vm7 = vcmp.lt.s32.totalorder %v12119_v38, 4 }
0x3250   :  { %v7435_v24 = vor.u32 %v7434_v34, %v7433_v43  ;;  %v7444_v0 = vsel %vm7436_vm3, %v7423_v27, %v7426_v10  ;;  %v7567_v40 = vsel %vm7565_vm15, %v7566_v46, %v12133_v7  ;;  %v7441_v44 = vsel %vm7439_vm7, %v7429_v42, 2102212464 }
0x3251   :  { %v7445_v37 = vsel %vm7439_vm7, %v7432_v49, 920167782  ;;  %v7448_v35 = vsel %vm7436_vm3, %v7426_v10, %v7429_v42  ;;  %v7568_v50 = vadd.s32 %v7567_v40, %v7563_v29  ;;  %vm7437_vm8 = vcmp.lt.s32.totalorder %v12119_v38, 2 }
0x3252   :  { %v7446_v39 = vsel %vm7438_vm6, %v7429_v42, %v7445_v37  ;;  %v7449_v48 = vsel %vm7439_vm7, %v7435_v24, 1326507024  ;;  %v7440_v51 = vsel %vm7436_vm3, %v7420_v41, %v7423_v27  ;;  %v7442_v26 = vsel %vm7438_vm6, %v7426_v10, %v7441_v44 }
0x3253   :  { %v7447_v45 = vsel %vm7437_vm8, %v7444_v0, %v7446_v39  ;;  %v7450_v52 = vsel %vm7438_vm6, %v7432_v49, %v7449_v48  ;;  %v7569_v53 = vadd.s32 536870912, %v7568_v50  ;;  %v7443_v63 = vsel %vm7437_vm8, %v7440_v51, %v7442_v26 }
0x3254   :  { %v7451_v54 = vsel %vm7437_vm8, %v7448_v35, %v7450_v52  ;;  %v12143_v55 = vmul.u32.u64.low %v7452_v36, %v7447_v45  ;;  %v12144_v56 = vmul.u32.u64.high %v7452_v36, %v7447_v45, %v12143_v55  ;;  %v7459_v38 = vmul.u32 %v7452_v36, %v7443_v63 }
0x3255   :  { %v12146_v57 = vmul.u32.u64.low %v7452_v36, %v7451_v54  ;;  %v12147_v58 = vmul.u32.u64.high %v7452_v36, %v7451_v54, %v12146_v57  ;;  %v7570_v61 = vshrl.u32 %v7569_v53, 30  ;;  %v7564_v11 = vadd.s32 %v12132_v25, %v12129_v30 }
0x3256   :  { %v7462_v2 = vadd.s32 1, %v12144_v56  ;;  %vm7406_vm11 = vcmp.lt.s32.totalorder %v12104_v19, 0  ;;  %vm7405_vm12 = vcmp.le.f32.partialorder %v7404_v22, 0.7853982  ;;  %vm7600_vm3 = vweird.f32 %v12102_v17 }
0x3257   :  { %v7571_v1 = vshll.u32 %v7570_v61, 30  ;;  %vm7461_vm2 = vc.u32 %v12147_v58, %v12143_v55  ;;  %v7460_v49 = vadd.s32 %v12143_v55, %v12147_v58  ;;  %v7594_v25 = vsub.s32 4, %v7570_v61 }
0x3258   :  { %v7463_v6 = vsel %vm7461_vm2, %v7462_v2, %v12144_v56  ;;  %vm7496_vm2 = vweird.f32 %v12104_v19 }
0x3259   :  { %v7572_v3 = vsub.s32 %v7568_v50, %v7571_v1  ;;  %v7464_v4 = vadd.s32 %v7463_v6, %v7459_v38  ;;  %v7595_v51 = vsel %vm7510_vm9, %v7594_v25, %v7570_v61 }
0x325a   :  { %v7597_v52 = vsel %vm7509_vm10, 0, %v7595_v51 }
0x325b   :  { %v7574_v5 = vsub.s32 0, %v7572_v3  ;;  %v7465_v12 = vadd.s32 536870912, %v7464_v4  ;;  %v7601_v57 = vadd.s32 3, %v7597_v52 }
0x325d   :  { %v8366_v59 = vmin.u32 %v7574_v5, %v7572_v3  ;;  %v7466_v23 = vshrl.u32 %v7465_v12, 30  ;;  %v7602_v61 = vand.u32 3, %v7601_v57 }
0x325f   :  { %v7576_v16 = vclz %v8366_v59  ;;  %v7467_v18 = vshll.u32 %v7466_v23, 30  ;;  %v7490_v56 = vsub.s32 4, %v7466_v23  ;;  %vm7607_vm13 = vcmp.eq.s32.totalorder %v7602_v61, 2 }
0x3260   :  { %vm7604_vm14 = vcmp.eq.s32.totalorder %v7602_v61, 0  ;;  %vm7603_vm15 = vcmp.lt.s32.totalorder %v7602_v61, 2 }
0x3261   :  { %v8367_v9 = vadd.s32 4294967294, %v7576_v16  ;;  %v7468_v14 = vsub.s32 %v7464_v4, %v7467_v18  ;;  %v7491_v63 = vsel %vm7406_vm11, %v7490_v56, %v7466_v23 }
0x3262   :  { %v7493_v38 = vsel %vm7405_vm12, 0, %v7491_v63 }
0x3263   :  { %vm8368_vm0 = vcmp.lt.s32.totalorder %v8367_v9, 0  ;;  %v7470_v15 = vsub.s32 0, %v7468_v14  ;;  %v7497_v5 = vadd.s32 3, %v7493_v38 }
0x3264   :  { %v7579_v21 = vsel %vm8368_vm0, 0, %v8367_v9 }
0x3265   :  { %v7580_v7 = vsub.s32 32, %v7579_v21  ;;  %v7584_v27 = vsub.s32 4294967266, %v7579_v21  ;;  %v8362_v10 = vmin.u32 %v7470_v15, %v7468_v14  ;;  %v7581_v28 = vshll.u32 %v7572_v3, %v7579_v21 }
0x3266   :  { %v7498_v16 = vand.u32 3, %v7497_v5 }
0x3267   :  { %v7582_v32 = vshrl.u32 %v7564_v11, %v7580_v7  ;;  %v7585_v31 = vadd.s32 127, %v7584_v27  ;;  %v7472_v33 = vclz %v8362_v10 }
0x3268   :  { %vm7503_vm6 = vcmp.eq.s32.totalorder %v7498_v16, 2  ;;  %vm7500_vm7 = vcmp.eq.s32.totalorder %v7498_v16, 0  ;;  %vm7499_vm8 = vcmp.lt.s32.totalorder %v7498_v16, 2 }
0x3269   :  { %v7583_v34 = vor.u32 %v7582_v32, %v7581_v28  ;;  %v7586_v36 = vshll.u32 %v7585_v31, 23  ;;  %v8363_v29 = vadd.s32 4294967294, %v7472_v33  ;;  %v7689_v28 = vld [vmem:[#allocation44] sm:$0xff]  ;;  %v7690_v32 = vld [vmem:[#allocation44 + $0x8] sm:$0xff] }
0x326a   :  { %v9645_v33 = vpack.c.bf16 %v7690_v32, %v7689_v28 }
0x326b   :  { %v7587_v41 = vor.u32 4788187, %v7586_v36  ;;  %vm8364_vm1 = vcmp.lt.s32.totalorder %v8363_v29, 0  ;;  %v7590_v43 = vcvt.s32.f32 %v7583_v34  ;;  %v7691_v34 = vld [vmem:[#allocation44 + $0x10] sm:$0xff]  ;;  %v7692_v36 = vld [vmem:[#allocation44 + $0x18] sm:$0xff] }
0x326c   :  { %v7475_v46 = vsel %vm8364_vm1, 0, %v8363_v29  ;;  %v9648_v29 = vpack.c.bf16 %v7692_v36, %v7691_v34 }
0x326d   :  { %v7588_v42 = vand.u32 2147483647, %v7587_v41  ;;  %v7476_v24 = vsub.s32 32, %v7475_v46  ;;  %v7480_v0 = vsub.s32 4294967266, %v7475_v46  ;;  %v7477_v40 = vshll.u32 %v7468_v14, %v7475_v46 }
0x326f   :  { %v7591_v30 = vmul.f32 %v7590_v43, %v7588_v42  ;;  %v7478_v44 = vshrl.u32 %v7460_v49, %v7476_v24  ;;  %v7481_v37 = vadd.s32 127, %v7480_v0  ;;  %v7695_v42 = vld [vmem:[#allocation44 + $0x30] sm:$0xff]  ;;  %v7696_v43 = vld [vmem:[#allocation44 + $0x38] sm:$0xff]  ;;  %v7697_v49 = vld [vmem:[#allocation44 + $0x40] sm:$0xff] }
0x3270   :  { %v9654_v46 = vpack.c.bf16 %v7696_v43, %v7695_v42  ;;  %v7698_v24 = vld [vmem:[#allocation44 + $0x48] sm:$0xff] }
0x3271   :  { %v7592_v35 = vxor.u32 2147483648, %v7591_v30  ;;  %v7479_v50 = vor.u32 %v7478_v44, %v7477_v40  ;;  %v7482_v39 = vshll.u32 %v7481_v37, 23  ;;  %v9657_v0 = vpack.c.bf16 %v7698_v24, %v7697_v49  ;;  %v7701_v40 = vld [vmem:[#allocation44 + $0x60] sm:$0xff]  ;;  %v7702_v44 = vld [vmem:[#allocation44 + $0x68] sm:$0xff] }
0x3272   :  { %v9663_v37 = vpack.c.bf16 %v7702_v44, %v7701_v40 }
0x3273   :  { %v7593_v48 = vsel %vm7510_vm9, %v7592_v35, %v7591_v30  ;;  %v7483_v45 = vor.u32 4788187, %v7482_v39  ;;  %v7486_v54 = vcvt.s32.f32 %v7479_v50  ;;  %v7700_v30 = vld [vmem:[#allocation44 + $0x58] sm:$0xff]  ;;  %v7703_v35 = vld [vmem:[#allocation44 + $0x70] sm:$0xff] }
0x3274   :  { %v7596_v26 = vsel %vm7509_vm10, %v12102_v17, %v7593_v48  ;;  %v7704_v50 = vld [vmem:[#allocation44 + $0x78] sm:$0xff] }
0x3275   :  { %10324 = vcosq.f32 %v7596_v26  ;;  %v7484_v53 = vand.u32 2147483647, %v7483_v45  ;;  %v9666_v39 = vpack.c.bf16 %v7704_v50, %v7703_v35 }
0x3276   :  { %10326 = vsinq.f32 %v7596_v26 }
0x3277   :  { %v7487_v55 = vmul.f32 %v7486_v54, %v7484_v53 }
0x3279   :  { %v7488_v58 = vxor.u32 2147483648, %v7487_v55 }
0x327b   :  { %v7489_v20 = vsel %vm7406_vm11, %v7488_v58, %v7487_v55 }
0x327c   :  { %v7492_v1 = vsel %vm7405_vm12, %v12104_v19, %v7489_v20  ;;  %v7694_v19 = vld [vmem:[#allocation44 + $0x28] sm:$0xff] }
0x327d   :  { %10328 = vcosq.f32 %v7492_v1 }
0x327e   :  { %10330 = vsinq.f32 %v7492_v1 }
0x327f   :  { %v10325_v2 = vpop.eup %10324 }
0x3280   :  { %v10327_v3 = vpop.eup %10326  ;;  %v7608_v6 = vxor.u32 2147483648, %v10325_v2 }
0x3281   :  { %v7605_v4 = vxor.u32 2147483648, %v10327_v3 }
0x3282   :  { %v7609_v12 = vsel %vm7607_vm13, %v7608_v6, %v10327_v3 }
0x3283   :  { %v7606_v59 = vsel %vm7604_vm14, %v10325_v2, %v7605_v4 }
0x3284   :  { %v7610_v22 = vsel %vm7603_vm15, %v7606_v59, %v7609_v12 }
0x3285   :  { %v7611_v23 = vsel %vm7600_vm3, nan, %v7610_v22 }
0x3286   :  { %v7613_v18 = vmul.f32 %v7611_v23, %v12097_v60  ;;  %v7614_v60 = vld [vmem:[%s12288_s14] sm:$0x3] }
0x3287   :  { %v10329_v9 = vpop.eup %10328 }
0x3288   :  { %v10331_v14 = vpop.eup %10330  ;;  %v7504_v21 = vxor.u32 2147483648, %v10329_v9 }
0x3289   :  { %v7501_v15 = vxor.u32 2147483648, %v10331_v14 }
0x328a   :  { %v7505_v11 = vsel %vm7503_vm6, %v7504_v21, %v10331_v14 }
0x328b   :  { %v7502_v7 = vsel %vm7500_vm7, %v10329_v9, %v7501_v15 }
0x328c   :  { %v7506_v27 = vsel %vm7499_vm8, %v7502_v7, %v7505_v11 }
0x328d   :  { %v7507_v10 = vsel %vm7496_vm2, nan, %v7506_v27 }
0x328e   :  { %v7612_v17 = vmul.f32 %v7507_v10, %v12100_v47  ;;  %v7693_v47 = vld [vmem:[#allocation44 + $0x20] sm:$0xff] }
0x328f   :  { %v9651_v41 = vpack.c.bf16 %v7694_v19, %v7693_v47 }
0x3290   :  { %v9642_v31 = vpack.c.bf16 %v7613_v18, %v7612_v17 }
0x3292   :  { %9643 = vmatpush3.bf16.msra.mxu1 %v9642_v31 }
0x3293   :  { %9644 = vmatprep.subr.bf16.mxu1 %v11110_v13 }
0x3295   :  { %9236 = vmatmul.mubr.msk.f32.vlgmr.msra.gmra.mrb[54].mxu1 %vm4628_vm4, %v7614_v60 }
0x3296   :  { %9646 = vmatpush3.bf16.msra.mxu1 %v9645_v33  ;;  %9270 = vmatprep.mubr.msk.f32.mxu1 %vm11111_vm5, %v11112_v8  ;;  %v7699_v8 = vld [vmem:[#allocation44 + $0x50] sm:$0xff] }
0x3297   :  { %9647 = vmatprep.subr.bf16.mxu1 %v11110_v13  ;;  %v9660_v25 = vpack.c.bf16 %v7700_v30, %v7699_v8 }
0x329a   :  { %9649 = vmatpush3.bf16.msra.mxu1 %v9648_v29 }
0x329b   :  { %9650 = vmatprep.subr.bf16.mxu1 %v11110_v13 }
0x329e   :  { %9652 = vmatpush3.bf16.msra.mxu1 %v9651_v41 }
0x329f   :  { %9653 = vmatprep.subr.bf16.mxu1 %v11110_v13 }
0x32a2   :  { %9655 = vmatpush3.bf16.msra.mxu1 %v9654_v46 }
0x32a3   :  { %9656 = vmatprep.subr.bf16.mxu1 %v11110_v13 }
0x32a6   :  { %9658 = vmatpush3.bf16.msra.mxu1 %v9657_v0 }
0x32a7   :  { %9659 = vmatprep.subr.bf16.mxu1 %v11110_v13 }
0x32aa   :  { %9661 = vmatpush3.bf16.msra.mxu1 %v9660_v25 }
0x32ab   :  { %9662 = vmatprep.subr.bf16.mxu1 %v11110_v13 }
0x32ae   :  { %9664 = vmatpush3.bf16.msra.mxu1 %v9663_v37 }
0x32af   :  { %9665 = vmatprep.subr.bf16.mxu1 %v11110_v13 }
0x32b2   :  { %9667 = vmatpush3.bf16.msra.mxu1 %v9666_v39 }
0x3368   :  { %v7684_v48 = vpop.f32.mrb[54].mxu1 }
0x3369   :  { %v7688_v51 = vmul.f32 %v7684_v48, %v12093_v62  ;;  %v9237_v26 = vpop.f32.mrb[55].mxu1 }
0x336b   :  { %9271 = vmatmul.mubr.f32.vlgmr.msra.gmra.mrb[56].mxu1 %v7688_v51 }
0x336c   :  { %10937 = shalt.err (!%p10934_p10)
}
0x336d   :  { %s10938_s20 = scalar_lea.hbm %s11369_s6, 32 }
0x336e   :  { %p10939_p11 = scmp.ne.s32.totalorder %s11369_s6, %s10938_s20  ;;  %p10942_p12 = scmp.lt.u32.totalorder %s10938_s20, %s11369_s6 }
0x3370   :  { %p10944_p13 = pnand %p10942_p12, %p10939_p11 }
0x3372   :  { %10947 = shalt.err (!%p10944_p13)
}
0x3373   :  { %7800 = dma.vmem_to_hbm [thread:$0]  %s7798_s15, 32, %s11369_s6, [#allocation47]  }
0x3374   :  { %s11124_s12 = smov [#allocation48]  }
0x3375   :  { %s7806_s21 = sshll.u32 %s11124_s12, 4  ;;  %s7807_s21 = int_to_ptr.vmem [resolvable:$true] %s7806_s21 }
0x3376   :  { %s10948_s11 = scalar_lea.vmem %s7807_s21, 256  ;;  %p10953_p1 = scmp.lt.s32.totalorder %s7807_s21, %s7807_s21 }
0x3377   :  { %p10949_p0 = scmp.ne.s32.totalorder %s7807_s21, %s10948_s11  ;;  %p10954_p2 = scmp.lt.s32.totalorder %s10948_s11, %s10948_s11 }
0x3379   :  { %p10955_p3 = por %p10954_p2, %p10953_p1 }
0x337b   :  { %p10956_p4 = pnand %p10955_p3, %p10949_p0 }
0x337d   :  { %10959 = shalt.err (!%p10956_p4)
}
0x337e   :  { %s10960_s19 = scalar_lea.hbm %s11374_s3, 256 }
0x337f   :  { %p10961_p5 = scmp.ne.s32.totalorder %s11374_s3, %s10960_s19  ;;  %p10964_p6 = scmp.lt.u32.totalorder %s10960_s19, %s11374_s3 }
0x3381   :  { %p10966_p7 = pnand %p10964_p6, %p10961_p5 }
0x3383   :  { %10969 = shalt.err (!%p10966_p7)
}
0x3384   :  { %7812 = dma.vmem_to_hbm [thread:$0]  %s7807_s21, 256, %s11374_s3, [#allocation47], %s11087_s26, %s11087_s26, %s11088_s9  }
0x3385   :  { %s11125_s6 = smov [#allocation45]  }
0x3386   :  { %s7787_s0 = sshll.u32 %s11125_s6, 4  ;;  %s7788_s0 = int_to_ptr.vmem [resolvable:$true] %s7787_s0 }
0x3387   :  { %s10970_s4 = scalar_lea.vmem %s7788_s0, 32  ;;  %p10975_p9 = scmp.lt.s32.totalorder %s7788_s0, %s7788_s0 }
0x3388   :  { %p10971_p8 = scmp.ne.s32.totalorder %s7788_s0, %s10970_s4  ;;  %p10976_p10 = scmp.lt.s32.totalorder %s10970_s4, %s10970_s4 }
0x338a   :  { %p10977_p11 = por %p10976_p10, %p10975_p9 }
0x338c   :  { %p10978_p12 = pnand %p10977_p11, %p10971_p8 }
0x343e   :  { %v7771_v13 = vpop.f32.mrb[56].mxu1 }
0x343f   :  { %7775 = vst [vmem:[#allocation45] sm:$0x3] %v7771_v13  ;;  %v9272_v62 = vpop.f32.mrb[57].mxu1 }
0x3440   :  { %10981 = shalt.err (!%p10978_p12)
}
0x3441   :  { %s12289_s16 = sld [smem:[#allocation97_spill]] }
0x3447   :  { %s10982_s5 = scalar_lea.hbm %s12289_s16, 32 }
0x3448   :  { %p10983_p13 = scmp.ne.s32.totalorder %s12289_s16, %s10982_s5  ;;  %p10986_p0 = scmp.lt.u32.totalorder %s10982_s5, %s12289_s16 }
0x344a   :  { %p10988_p1 = pnand %p10986_p0, %p10983_p13 }
0x344c   :  { %10991 = shalt.err (!%p10988_p1)
}
0x344d   :  { %7790 = dma.vmem_to_hbm [thread:$0]  %s7788_s0, 32, %s12289_s16, [#allocation5]  }
0x344e   :  { %11020 = dma.done.wait [#allocation5], 32  }
0x344f   :  { %11021 = vsyncadd [#allocation5], 4294967264 }
0x3450   :  { %11022 = dma.done.wait [#allocation47], 288  }
0x3451   :  { %11023 = vsyncadd [#allocation47], 4294967008 }
0x3452   :  { %7832 = vsyncpa [#allocation4], 1 }
0x3453   :  { %7833 = vsyncpa [#allocation7], 1 }
0x3454   :  { %7834 = vsyncpa [#allocation10], 1 }
0x3455   :  { %7835 = vsyncpa [#allocation13], 1 }
0x3456   :  { %7836 = vsyncpa [#allocation16], 1 }
0x3457   :  { %7837 = vsyncpa [#allocation19], 1 }
0x3458   :  { %7838 = vsyncpa [#allocation22], 1 }
0x3459   :  { %7839 = vsyncpa [#allocation25], 1 }
0x345a   :  { %7840 = vsyncpa [#allocation28], 1 }
0x345b   :  { %7841 = vsyncpa [#allocation31], 1 }
0x345c   :  { %7842 = vsyncpa [#allocation34], 1 }
0x345d   :  { %7843 = vsyncpa [#allocation37], 1 }
0x345e   :  { %7844 = vsyncpa [#allocation40], 1 }
0x345f   :  { %7845 = vsyncpa [#allocation43], 1 }
0x3460   :  { %7846 = vsyncpa [#allocation5], 1 }
0x3461   :  { %7847 = vsyncpa [#allocation47], 1 }

</bundles_post_ra>
